<compile_context>
chip_gen: v7x
topology: tpu7x:2x2x1
jax: 0.10.0
libtpu: 0.0.40
codegen_flags: <defaults>
</compile_context>

<pallas_src>
import functools

import jax
import jax.numpy as jnp
from jax.experimental import pallas as pl
from jax.experimental.pallas import tpu as pltpu


# ----------------------------- device heuristics -----------------------------

_MIB = 1024 * 1024


def _device_kind():
    try:
        return jax.devices()[0].device_kind.lower()
    except Exception:
        return ""


def _elementwise_dtype(kind):
    """bf16 elementwise math only on chips with a bf16 VPU/EUP (v6e / v7x)."""
    return jnp.bfloat16 if ("v6" in kind or "v7" in kind) else jnp.float32


def _num_tensorcores(kind):
    """Sharding width of dimension_semantics=('parallel',): 2 TensorCores on
    v7x and on v4/v5p megacore, 1 on v5e/v6e."""
    return 2 if ("v7" in kind or "v5p" in kind or "v4" in kind) else 1


def _vmem_plan(kind):
    """(VMEM budget for the hot per-step temporaries, explicit scoped-VMEM limit)."""
    if "v7" in kind:                      # 64 MiB physical per TensorCore
        return 20 * _MIB, 48 * _MIB
    if "v6" in kind or "v5" in kind:      # 128 MiB physical, 16/32 MiB scoped default
        return 40 * _MIB, 96 * _MIB
    return 8 * _MIB, None                 # v2-v4 / unknown: stay under scoped default


def _pick_images_per_step(batch, hw, c_hidden, elem_bytes, n_cores, vmem_budget_bytes):
    """Images per grid step: amortize the ~0.35-0.6us per-step pipeline overhead
    while keeping the live (Bt*HW, 1280) temporaries inside the VMEM budget.
    Bt must divide B.  On 2-core chips prefer divisors that give an even (>=2)
    step count so both TensorCores get equal work; on 1-core chips no step floor."""
    per_image = (8 + 2 * elem_bytes) * hw * c_hidden   # f32 conv acc + elem temps
    cap = max(1, vmem_budget_bytes // per_image)
    divisors = [d for d in range(1, batch + 1) if batch % d == 0 and d <= cap]
    if not divisors:
        return 1
    if n_cores > 1:
        balanced = [d for d in divisors if (batch // d) % n_cores == 0]
        if balanced:
            return max(balanced)
    return max(divisors)


# --------------------------------- kernel ------------------------------------

def _classify_kernel(x_ref, cw_ref, bias_ref, lw_ref, lb_ref, out_ref, *,
                     elem_dtype, inv_hw, hw, bt):
    c1 = x_ref.shape[1]
    # x block: (Bt, C1, HW) f32 straight from the NCHW input (HW already on the
    # lane axis of the DMA'd block).  Channels-last relayout + bf16 cast are
    # VMEM-local -- no extra HBM pass.
    x = jnp.transpose(x_ref[...], (0, 2, 1))                 # (Bt, HW, C1)
    x = x.reshape(bt * hw, c1).astype(jnp.bfloat16)          # (Bt*HW, C1)
    # 1x1 conv with the BN scale pre-folded into the weight; f32 MXU accumulate.
    h = jnp.dot(x, cw_ref[...], preferred_element_type=jnp.float32)   # (Bt*HW, C_)
    # Folded BN bias + SiLU in elem_dtype (bf16 on v6e/v7x, f32 on v5e and older).
    h = h.astype(elem_dtype) + bias_ref[...]
    # SiLU(h) = h * sigmoid(h) = 0.5*h*(1 + tanh(h/2))  ->  one EUP push / element.
    act = (0.5 * h) * (1.0 + jnp.tanh(0.5 * h))              # (Bt*HW, C_)
    # AdaptiveAvgPool2d(1): per-image mean over HW via an XLU cross-sublane
    # reduce, f32 accumulation, exact 1/HW scale.  No pooling constant / matmul.
    pooled = jnp.sum(act.reshape(bt, hw, -1).astype(jnp.float32),
                     axis=1) * inv_hw                        # (Bt, C_) f32
    # Dropout(p=0.0) is the identity.  Classifier (bf16 MXU operands, f32 acc)
    # followed by an exact f32 softmax.
    logits = jnp.dot(pooled.astype(jnp.bfloat16), lw_ref[...],
                     preferred_element_type=jnp.float32) + lb_ref[...]   # (Bt, C2)
    m = jnp.max(logits, axis=-1, keepdims=True)
    ex = jnp.exp(logits - m)
    probs = ex / jnp.sum(ex, axis=-1, keepdims=True)
    # TODO(synk): at realistic B/C2 pad or batch the C2(=8)-lane store so the
    # output write is lane-dense; masked vst is noise at this size.
    out_ref[0] = probs.astype(out_ref.dtype)


# -------------------------------- wrapper -------------------------------------

def classify_forward(x_nchw, params):
    B, C1, H, W = x_nchw.shape
    HW = H * W
    cw = params["conv_w"]          # (C1, C_) f32
    bn_scale = params["bn_scale"]  # (1, C_)  f32
    bn_bias = params["bn_bias"]    # (1, C_)  f32
    lw = params["lin_w"]           # (C_, C2) f32
    lb = params["lin_b"]           # (1, C2)  f32
    C_ = cw.shape[1]
    C2 = lw.shape[1]

    kind = _device_kind()
    elem_dtype = _elementwise_dtype(kind)
    n_cores = _num_tensorcores(kind)
    temp_budget, vmem_limit = _vmem_plan(kind)
    bt = _pick_images_per_step(B, HW, C_, jnp.dtype(elem_dtype).itemsize,
                               n_cores, temp_budget)
    steps = B // bt

    # Free reshape of the contiguous NCHW input: no host-side transpose or cast
    # (that was a full extra HBM read+write of x); relayout happens in-kernel.
    x = x_nchw.reshape(B, C1, HW)
    cw_folded = (cw * bn_scale).astype(jnp.bfloat16)   # BN scale folded into conv w
    bias = bn_bias.astype(elem_dtype)                  # (1, C_)
    lw_bf16 = lw.astype(jnp.bfloat16)                  # classifier weight (MXU operand)

    kernel = functools.partial(_classify_kernel, elem_dtype=elem_dtype,
                               inv_hw=1.0 / HW, hw=HW, bt=bt)

    cp = dict(dimension_semantics=("parallel",))
    if vmem_limit is not None:
        cp["vmem_limit_bytes"] = int(vmem_limit)

    def build(single_buffer_weights):
        def const_spec(shape):
            # Grid-invariant blocks: request a single VMEM buffer instead of the
            # default double-buffering (matters under v7x's 64 MiB VMEM once c1
            # is realistic; zero cost at c1=4).
            if single_buffer_weights:
                return pl.BlockSpec(shape, lambda s: (0, 0),
                                    pipeline_mode=pl.Buffered(1))
            return pl.BlockSpec(shape, lambda s: (0, 0))

        return pl.pallas_call(
            kernel,
            out_shape=jax.ShapeDtypeStruct((steps, bt, C2), jnp.float32),
            grid_spec=pltpu.PrefetchScalarGridSpec(
                num_scalar_prefetch=0,
                grid=(steps,),
                in_specs=[
                    pl.BlockSpec((bt, C1, HW), lambda s: (s, 0, 0)),  # x slab (f32)
                    const_spec((C1, C_)),    # folded conv weight (bf16)
                    const_spec((1, C_)),     # folded BN bias
                    const_spec((C_, C2)),    # linear weight (bf16)
                    const_spec((1, C2)),     # linear bias (f32)
                ],
                out_specs=pl.BlockSpec((1, bt, C2), lambda s: (s, 0, 0)),
            ),
            compiler_params=pltpu.CompilerParams(**cp),
        )

    args = (x, cw_folded, bias, lw_bf16, lb)
    try:
        out = jax.block_until_ready(build(True)(*args))
    except Exception:
        # Narrow portability guard: if this Pallas/Mosaic version rejects
        # pipeline_mode on the top-level TPU grid, fall back to the default
        # double-buffered (tiny at c1=4) weight blocks.
        out = build(False)(*args)
    return out.reshape(B, C2)


# ------------------------------ reference / data ------------------------------

def classify_ref(x_nchw, params):
    """Pure-JAX f32 reference of the same eval-mode forward."""
    B, C1, H, W = x_nchw.shape
    x = jnp.transpose(x_nchw, (0, 2, 3, 1)).reshape(B, H * W, C1)
    h = x @ params["conv_w"]
    h = h * params["bn_scale"] + params["bn_bias"]
    h = h * jax.nn.sigmoid(h)
    pooled = h.mean(axis=1)
    logits = pooled @ params["lin_w"] + params["lin_b"][0]
    return jax.nn.softmax(logits, axis=-1)


def make_params(key, c1, c_, c2):
    k = jax.random.split(key, 7)
    conv_w = jax.random.normal(k[0], (c1, c_), jnp.float32) * (1.0 / jnp.sqrt(c1))
    # BatchNorm2d(c_) eval-mode parameters, folded into per-channel scale/bias.
    gamma = 1.0 + 0.1 * jax.random.normal(k[1], (c_,), jnp.float32)
    beta = 0.1 * jax.random.normal(k[2], (c_,), jnp.float32)
    running_mean = 0.1 * jax.random.normal(k[3], (c_,), jnp.float32)
    running_var = jnp.abs(1.0 + 0.1 * jax.random.normal(k[4], (c_,), jnp.float32))
    eps = 1e-5
    bn_scale = gamma / jnp.sqrt(running_var + eps)
    bn_bias = beta - running_mean * bn_scale
    lin_w = jax.random.normal(k[5], (c_, c2), jnp.float32) * (1.0 / jnp.sqrt(c_))
    lin_b = 0.01 * jax.random.normal(k[6], (1, c2), jnp.float32)
    return {
        "conv_w": conv_w,
        "bn_scale": bn_scale.reshape(1, c_),
        "bn_bias": bn_bias.reshape(1, c_),
        "lin_w": lin_w,
        "lin_b": lin_b,
    }


if __name__ == "__main__":
    B, C1, H, W = 2, 4, 16, 16      # x(b, c1, 16, 16)
    C_ = 1280                       # fixed hidden width of the Classify head
    C2 = 8                          # number of classes

    key = jax.random.PRNGKey(0)
    kx, kp = jax.random.split(key)
    x = jax.random.normal(kx, (B, C1, H, W), jnp.float32)   # NCHW, like PyTorch
    params = make_params(kp, C1, C_, C2)

    out = jax.block_until_ready(classify_forward(x, params))
    ref = classify_ref(x, params)

    assert out.shape == (B, C2)
    # bf16 MXU operands (+ bf16 elementwise/tanh on v6e/v7x) vs. an f32 reference:
    # allow a few-1e-3 absolute deviation on the softmax probabilities.
    assert jnp.allclose(out, ref, atol=3e-3, rtol=3e-2)
    # Final softmax normalization is exact f32, so probabilities sum to 1 tightly.
    assert jnp.allclose(out.sum(axis=1), jnp.ones((B,)), atol=1e-5)

    print("KERNEL_OK")
</pallas_src>

<mosaic_0001>
module attributes {stable_mosaic.version = 11 : i64} {
  func.func @_classify_kernel(%arg0: i32, %arg1: memref<1x4x256xf32, #tpu.memory_space<vmem>>, %arg2: memref<4x1280xbf16, #tpu.memory_space<vmem>>, %arg3: memref<1x1280xf32, #tpu.memory_space<vmem>>, %arg4: memref<1280x8xbf16, #tpu.memory_space<vmem>>, %arg5: memref<1x8xf32, #tpu.memory_space<vmem>>, %arg6: memref<1x1x8xf32, #tpu.memory_space<vmem>>) attributes {dimension_semantics = [#tpu.dimension_semantics<parallel>], iteration_bounds = array<i64: 2>, scalar_prefetch = 0 : i64, scratch_operands = 0 : i64, tpu.core_type = #tpu.core_type<tc>, window_params = [{transform_indices = @transform_0, window_bounds = array<i64: 1, 4, 256>}, {pipeline_mode = #tpu.pipeline_mode<synchronous>, transform_indices = @transform_1, window_bounds = array<i64: 4, 1280>}, {pipeline_mode = #tpu.pipeline_mode<synchronous>, transform_indices = @transform_2, window_bounds = array<i64: 1, 1280>}, {pipeline_mode = #tpu.pipeline_mode<synchronous>, transform_indices = @transform_3, window_bounds = array<i64: 1280, 8>}, {pipeline_mode = #tpu.pipeline_mode<synchronous>, transform_indices = @transform_4, window_bounds = array<i64: 1, 8>}, {transform_indices = @transform_5, window_bounds = array<i64: 1, 1, 8>}]} {
    %c0 = arith.constant 0 : index
    %c0_0 = arith.constant 0 : index
    %c0_1 = arith.constant 0 : index
    %0 = vector.load %arg1[%c0, %c0_0, %c0_1] : memref<1x4x256xf32, #tpu.memory_space<vmem>>, vector<1x4x256xf32>
    %1 = tpu.transpose %0, [0, 2, 1] : vector<1x4x256xf32> -> vector<1x256x4xf32>
    %2 = vector.shape_cast %1 : vector<1x256x4xf32> to vector<256x4xf32>
    %3 = arith.truncf %2 : vector<256x4xf32> to vector<256x4xbf16>
    %c0_2 = arith.constant 0 : index
    %c0_3 = arith.constant 0 : index
    %4 = vector.load %arg2[%c0_2, %c0_3] : memref<4x1280xbf16, #tpu.memory_space<vmem>>, vector<4x1280xbf16>
    %cst = arith.constant dense<0.000000e+00> : vector<256x1280xf32>
    %5 = tpu.matmul %3, %4, %cst {dimension_numbers = #tpu.dot_dimension_numbers<[1], [0], [0], [1], [0, 0, 1, 1], [], []>} : vector<256x4xbf16>, vector<4x1280xbf16>, vector<256x1280xf32> -> vector<256x1280xf32>
    %c0_4 = arith.constant 0 : index
    %c0_5 = arith.constant 0 : index
    %6 = vector.load %arg3[%c0_4, %c0_5] : memref<1x1280xf32, #tpu.memory_space<vmem>>, vector<1x1280xf32>
    %7 = vector.broadcast %6 : vector<1x1280xf32> to vector<256x1280xf32>
    %8 = arith.addf %5, %7 : vector<256x1280xf32>
    %cst_6 = arith.constant 5.000000e-01 : f32
    %9 = vector.broadcast %cst_6 : f32 to vector<256x1280xf32>
    %10 = arith.mulf %9, %8 : vector<256x1280xf32>
    %cst_7 = arith.constant 5.000000e-01 : f32
    %11 = vector.broadcast %cst_7 : f32 to vector<256x1280xf32>
    %12 = arith.mulf %11, %8 : vector<256x1280xf32>
    %13 = math.tanh %12 : vector<256x1280xf32>
    %cst_8 = arith.constant 1.000000e+00 : f32
    %14 = vector.broadcast %cst_8 : f32 to vector<256x1280xf32>
    %15 = arith.addf %14, %13 : vector<256x1280xf32>
    %16 = arith.mulf %10, %15 : vector<256x1280xf32>
    %17 = vector.shape_cast %16 : vector<256x1280xf32> to vector<1x256x1280xf32>
    %cst_9 = arith.constant dense<0.000000e+00> : vector<1x1280xf32>
    %18 = vector.multi_reduction <add>, %17, %cst_9 [1] : vector<1x256x1280xf32> to vector<1x1280xf32>
    %cst_10 = arith.constant 3.906250e-03 : f32
    %19 = vector.broadcast %cst_10 : f32 to vector<1x1280xf32>
    %20 = arith.mulf %18, %19 : vector<1x1280xf32>
    %21 = arith.truncf %20 : vector<1x1280xf32> to vector<1x1280xbf16>
    %c0_11 = arith.constant 0 : index
    %c0_12 = arith.constant 0 : index
    %22 = vector.load %arg4[%c0_11, %c0_12] : memref<1280x8xbf16, #tpu.memory_space<vmem>>, vector<1280x8xbf16>
    %cst_13 = arith.constant dense<0.000000e+00> : vector<1x8xf32>
    %23 = tpu.matmul %21, %22, %cst_13 {dimension_numbers = #tpu.dot_dimension_numbers<[1], [0], [0], [1], [0, 0, 1, 1], [], []>} : vector<1x1280xbf16>, vector<1280x8xbf16>, vector<1x8xf32> -> vector<1x8xf32>
    %c0_14 = arith.constant 0 : index
    %c0_15 = arith.constant 0 : index
    %24 = vector.load %arg5[%c0_14, %c0_15] : memref<1x8xf32, #tpu.memory_space<vmem>>, vector<1x8xf32>
    %25 = arith.addf %23, %24 : vector<1x8xf32>
    %cst_16 = arith.constant dense<0xFF800000> : vector<1xf32>
    %26 = vector.multi_reduction <maximumf>, %25, %cst_16 [1] : vector<1x8xf32> to vector<1xf32>
    %27 = vector.shape_cast %26 : vector<1xf32> to vector<1x1xf32>
    %28 = vector.broadcast %27 : vector<1x1xf32> to vector<1x8xf32>
    %29 = arith.subf %25, %28 : vector<1x8xf32>
    %30 = math.exp %29 : vector<1x8xf32>
    %cst_17 = arith.constant dense<0.000000e+00> : vector<1xf32>
    %31 = vector.multi_reduction <add>, %30, %cst_17 [1] : vector<1x8xf32> to vector<1xf32>
    %32 = vector.shape_cast %31 : vector<1xf32> to vector<1x1xf32>
    %33 = vector.broadcast %32 : vector<1x1xf32> to vector<1x8xf32>
    %34 = arith.divf %30, %33 : vector<1x8xf32>
    %c0_18 = arith.constant 0 : index
    %c0_19 = arith.constant 0 : index
    %c0_20 = arith.constant 0 : index
    %35 = vector.load %arg6[%c0_18, %c0_19, %c0_20] : memref<1x1x8xf32, #tpu.memory_space<vmem>>, vector<1x1x8xf32>
    %36 = vector.shape_cast %35 : vector<1x1x8xf32> to vector<1x8xf32>
    %37 = vector.shape_cast %34 : vector<1x8xf32> to vector<1x1x8xf32>
    tpu.vector_store %arg6[%c0_18, %c0_19, %c0_20], %37 {strides = array<i32>} : memref<1x1x8xf32, #tpu.memory_space<vmem>>, vector<1x1x8xf32>,
    return
  }
  func.func @transform_0(%arg0: i32) -> (i32, i32, i32) {
    %c0_i32 = arith.constant 0 : i32
    %c0_i32_0 = arith.constant 0 : i32
    %c0_i32_1 = arith.constant 0 : i32
    return %arg0, %c0_i32, %c0_i32_0 : i32, i32, i32
  }
  func.func @transform_1(%arg0: i32) -> (i32, i32) {
    %c0_i32 = arith.constant 0 : i32
    %c0_i32_0 = arith.constant 0 : i32
    %c0_i32_1 = arith.constant 0 : i32
    return %c0_i32, %c0_i32_0 : i32, i32
  }
  func.func @transform_2(%arg0: i32) -> (i32, i32) {
    %c0_i32 = arith.constant 0 : i32
    %c0_i32_0 = arith.constant 0 : i32
    %c0_i32_1 = arith.constant 0 : i32
    return %c0_i32, %c0_i32_0 : i32, i32
  }
  func.func @transform_3(%arg0: i32) -> (i32, i32) {
    %c0_i32 = arith.constant 0 : i32
    %c0_i32_0 = arith.constant 0 : i32
    %c0_i32_1 = arith.constant 0 : i32
    return %c0_i32, %c0_i32_0 : i32, i32
  }
  func.func @transform_4(%arg0: i32) -> (i32, i32) {
    %c0_i32 = arith.constant 0 : i32
    %c0_i32_0 = arith.constant 0 : i32
    %c0_i32_1 = arith.constant 0 : i32
    return %c0_i32, %c0_i32_0 : i32, i32
  }
  func.func @transform_5(%arg0: i32) -> (i32, i32, i32) {
    %c0_i32 = arith.constant 0 : i32
    %c0_i32_0 = arith.constant 0 : i32
    %c0_i32_1 = arith.constant 0 : i32
    return %arg0, %c0_i32, %c0_i32_0 : i32, i32, i32
  }
}

module attributes {stable_mosaic.version = 11 : i64} {
  func.func @_classify_kernel(%arg0: i32, %arg1: memref<1x4x256xf32, #tpu.memory_space<vmem>>, %arg2: memref<4x1280xbf16, #tpu.memory_space<vmem>>, %arg3: memref<1x1280xf32, #tpu.memory_space<vmem>>, %arg4: memref<1280x8xbf16, #tpu.memory_space<vmem>>, %arg5: memref<1x8xf32, #tpu.memory_space<vmem>>, %arg6: memref<1x1x8xf32, #tpu.memory_space<vmem>>) attributes {dimension_semantics = [#tpu.dimension_semantics<parallel>], iteration_bounds = array<i64: 2>, scalar_prefetch = 0 : i64, scratch_operands = 0 : i64, tpu.core_type = #tpu.core_type<tc>, window_params = [{transform_indices = @transform_0, window_bounds = array<i64: 1, 4, 256>}, {pipeline_mode = #tpu.pipeline_mode<synchronous>, transform_indices = @transform_1, window_bounds = array<i64: 4, 1280>}, {pipeline_mode = #tpu.pipeline_mode<synchronous>, transform_indices = @transform_2, window_bounds = array<i64: 1, 1280>}, {pipeline_mode = #tpu.pipeline_mode<synchronous>, transform_indices = @transform_3, window_bounds = array<i64: 1280, 8>}, {pipeline_mode = #tpu.pipeline_mode<synchronous>, transform_indices = @transform_4, window_bounds = array<i64: 1, 8>}, {transform_indices = @transform_5, window_bounds = array<i64: 1, 1, 8>}]} {
    %c0 = arith.constant 0 : index
    %c0_0 = arith.constant 0 : index
    %c0_1 = arith.constant 0 : index
    %0 = vector.load %arg1[%c0, %c0_0, %c0_1] : memref<1x4x256xf32, #tpu.memory_space<vmem>>, vector<1x4x256xf32>
    %1 = tpu.transpose %0, [0, 2, 1] : vector<1x4x256xf32> -> vector<1x256x4xf32>
    %2 = vector.shape_cast %1 : vector<1x256x4xf32> to vector<256x4xf32>
    %3 = arith.truncf %2 : vector<256x4xf32> to vector<256x4xbf16>
    %c0_2 = arith.constant 0 : index
    %c0_3 = arith.constant 0 : index
    %4 = vector.load %arg2[%c0_2, %c0_3] : memref<4x1280xbf16, #tpu.memory_space<vmem>>, vector<4x1280xbf16>
    %cst = arith.constant dense<0.000000e+00> : vector<256x1280xf32>
    %5 = tpu.matmul %3, %4, %cst {dimension_numbers = #tpu.dot_dimension_numbers<[1], [0], [0], [1], [0, 0, 1, 1], [], []>} : vector<256x4xbf16>, vector<4x1280xbf16>, vector<256x1280xf32> -> vector<256x1280xf32>
    %c0_4 = arith.constant 0 : index
    %c0_5 = arith.constant 0 : index
    %6 = vector.load %arg3[%c0_4, %c0_5] : memref<1x1280xf32, #tpu.memory_space<vmem>>, vector<1x1280xf32>
    %7 = vector.broadcast %6 : vector<1x1280xf32> to vector<256x1280xf32>
    %8 = arith.addf %5, %7 : vector<256x1280xf32>
    %cst_6 = arith.constant 5.000000e-01 : f32
    %9 = vector.broadcast %cst_6 : f32 to vector<256x1280xf32>
    %10 = arith.mulf %9, %8 : vector<256x1280xf32>
    %cst_7 = arith.constant 5.000000e-01 : f32
    %11 = vector.broadcast %cst_7 : f32 to vector<256x1280xf32>
    %12 = arith.mulf %11, %8 : vector<256x1280xf32>
    %13 = math.tanh %12 : vector<256x1280xf32>
    %cst_8 = arith.constant 1.000000e+00 : f32
    %14 = vector.broadcast %cst_8 : f32 to vector<256x1280xf32>
    %15 = arith.addf %14, %13 : vector<256x1280xf32>
    %16 = arith.mulf %10, %15 : vector<256x1280xf32>
    %17 = vector.shape_cast %16 : vector<256x1280xf32> to vector<1x256x1280xf32>
    %cst_9 = arith.constant dense<0.000000e+00> : vector<1x1280xf32>
    %18 = vector.multi_reduction <add>, %17, %cst_9 [1] : vector<1x256x1280xf32> to vector<1x1280xf32>
    %cst_10 = arith.constant 3.906250e-03 : f32
    %19 = vector.broadcast %cst_10 : f32 to vector<1x1280xf32>
    %20 = arith.mulf %18, %19 : vector<1x1280xf32>
    %21 = arith.truncf %20 : vector<1x1280xf32> to vector<1x1280xbf16>
    %c0_11 = arith.constant 0 : index
    %c0_12 = arith.constant 0 : index
    %22 = vector.load %arg4[%c0_11, %c0_12] : memref<1280x8xbf16, #tpu.memory_space<vmem>>, vector<1280x8xbf16>
    %cst_13 = arith.constant dense<0.000000e+00> : vector<1x8xf32>
    %23 = tpu.matmul %21, %22, %cst_13 {dimension_numbers = #tpu.dot_dimension_numbers<[1], [0], [0], [1], [0, 0, 1, 1], [], []>} : vector<1x1280xbf16>, vector<1280x8xbf16>, vector<1x8xf32> -> vector<1x8xf32>
    %c0_14 = arith.constant 0 : index
    %c0_15 = arith.constant 0 : index
    %24 = vector.load %arg5[%c0_14, %c0_15] : memref<1x8xf32, #tpu.memory_space<vmem>>, vector<1x8xf32>
    %25 = arith.addf %23, %24 : vector<1x8xf32>
    %cst_16 = arith.constant dense<0xFF800000> : vector<1xf32>
    %26 = vector.multi_reduction <maximumf>, %25, %cst_16 [1] : vector<1x8xf32> to vector<1xf32>
    %27 = vector.shape_cast %26 : vector<1xf32> to vector<1x1xf32>
    %28 = vector.broadcast %27 : vector<1x1xf32> to vector<1x8xf32>
    %29 = arith.subf %25, %28 : vector<1x8xf32>
    %30 = math.exp %29 : vector<1x8xf32>
    %cst_17 = arith.constant dense<0.000000e+00> : vector<1xf32>
    %31 = vector.multi_reduction <add>, %30, %cst_17 [1] : vector<1x8xf32> to vector<1xf32>
    %32 = vector.shape_cast %31 : vector<1xf32> to vector<1x1xf32>
    %33 = vector.broadcast %32 : vector<1x1xf32> to vector<1x8xf32>
    %34 = arith.divf %30, %33 : vector<1x8xf32>
    %c0_18 = arith.constant 0 : index
    %c0_19 = arith.constant 0 : index
    %c0_20 = arith.constant 0 : index
    %35 = vector.load %arg6[%c0_18, %c0_19, %c0_20] : memref<1x1x8xf32, #tpu.memory_space<vmem>>, vector<1x1x8xf32>
    %36 = vector.shape_cast %35 : vector<1x1x8xf32> to vector<1x8xf32>
    %37 = vector.shape_cast %34 : vector<1x8xf32> to vector<1x1x8xf32>
    tpu.vector_store %arg6[%c0_18, %c0_19, %c0_20], %37 {strides = array<i32>} : memref<1x1x8xf32, #tpu.memory_space<vmem>>, vector<1x1x8xf32>,
    return
  }
  func.func @transform_0(%arg0: i32) -> (i32, i32, i32) {
    %c0_i32 = arith.constant 0 : i32
    %c0_i32_0 = arith.constant 0 : i32
    %c0_i32_1 = arith.constant 0 : i32
    return %arg0, %c0_i32, %c0_i32_0 : i32, i32, i32
  }
  func.func @transform_1(%arg0: i32) -> (i32, i32) {
    %c0_i32 = arith.constant 0 : i32
    %c0_i32_0 = arith.constant 0 : i32
    %c0_i32_1 = arith.constant 0 : i32
    return %c0_i32, %c0_i32_0 : i32, i32
  }
  func.func @transform_2(%arg0: i32) -> (i32, i32) {
    %c0_i32 = arith.constant 0 : i32
    %c0_i32_0 = arith.constant 0 : i32
    %c0_i32_1 = arith.constant 0 : i32
    return %c0_i32, %c0_i32_0 : i32, i32
  }
  func.func @transform_3(%arg0: i32) -> (i32, i32) {
    %c0_i32 = arith.constant 0 : i32
    %c0_i32_0 = arith.constant 0 : i32
    %c0_i32_1 = arith.constant 0 : i32
    return %c0_i32, %c0_i32_0 : i32, i32
  }
  func.func @transform_4(%arg0: i32) -> (i32, i32) {
    %c0_i32 = arith.constant 0 : i32
    %c0_i32_0 = arith.constant 0 : i32
    %c0_i32_1 = arith.constant 0 : i32
    return %c0_i32, %c0_i32_0 : i32, i32
  }
  func.func @transform_5(%arg0: i32) -> (i32, i32, i32) {
    %c0_i32 = arith.constant 0 : i32
    %c0_i32_0 = arith.constant 0 : i32
    %c0_i32_1 = arith.constant 0 : i32
    return %arg0, %c0_i32, %c0_i32_0 : i32, i32, i32
  }
}

</mosaic_0001>

<bundles_post_ra>
// kernel: tpu_custom_call.1
= control target key start
LH: loop header
LB: loop body
LE: loop exit
PB: predicated region body
PF: predicated region fallthrough
CT: control target
= control target key end

     0   :  { %10 = vsyncpa [#allocation3], 0  ;;  %s8244_s0 = inlined_call_operand.vmem [shape: f32[2,4,256], index: 0, kind: input, shape index: {}]   ;;  %s8245_s1 = inlined_call_operand.vmem [shape: bf16[4,1280], index: 1, kind: input, shape index: {}]   ;;  %s8246_s2 = inlined_call_operand.vmem [shape: f32[1,1280], index: 2, kind: input, shape index: {}]   ;;  %s8247_s3 = inlined_call_operand.vmem [shape: bf16[1280,8], index: 3, kind: input, shape index: {}]   ;;  %s8248_s4 = inlined_call_operand.vmem [shape: f32[1,8], index: 4, kind: input, shape index: {}]   ;;  %s8249_s5 = inlined_call_operand.hbm [shape: f32[2,1,8], index: 5, kind: output, shape index: {}]  }
   0x1   :  { %12 = vsyncpa [#allocation3 + $0x1], 0  ;;  %s5200_s18 = smov 0   ;;  %s5202_s19 = smov 0  }
   0x2   :  { %s5204_s20 = smov 0   ;;  %s5206_s21 = smov 0  }
   0x3 LB: > { %s5221_s22 = sadd.s32 4294967295, %s5165_s21   ;;  %s4046_s23 = sadd.s32 4294967294, %s5165_s21   ;;  %s5165_s21 = sphi %s5206_s21, %s8476_s21   ;;  %s5161_s20 = sphi %s5204_s20, %s8475_s20   ;;  %s5157_s19 = sphi %s5202_s19, %s8474_s19   ;;  %s5153_s18 = sphi %s5200_s18, %s8473_s18  }
   0x4   : > { %s5225_s24 = sadd.s32 1, %s5165_s21   ;;  %s135_s25 = sadd.s32 1, %s5161_s20 }
   0x5   : > { %s132_s26 = ssub.s32 %s5165_s21, %s5225_s24  ;;  %p145_p0 = scmp.ne.s32.totalorder %s5161_s20, %s5157_s19 }
   0x6   : > { %p133_p1 = scmp.eq.s32.totalorder %s132_s26, 0  ;;  %p146_p2 = scmp.eq.s32.totalorder %s5221_s22, 1 }
   0x7   : > { %p151_p3 = scmp.ne.s32.totalorder %s5157_s19, %s5153_s18  ;;  %p152_p4 = scmp.eq.s32.totalorder %s4046_s23, 1 }
   0x8   : > { %s5236_s27 = scalar_select %p133_p1, %s5161_s20, %s135_s25  }
   0x9   : > { %p5238_p5 = por %p146_p2, %p145_p0  ;;  %p5242_p6 = por %p152_p4, %p151_p3 }
   0xa   : > { %p4049_p7 = scmp.ge.s32.totalorder %s5165_s21, 1  ;;  %p190_p8 = scmp.lt.s32.totalorder %s5165_s21, 3 }
   0xc   : > { %p191_p9 = pnand %p4049_p7, %p190_p8 }
   0xe   : > { %194 = sbr.rel (%p191_p9) target bundleno = 1477 (0x5c5), region = 40 }
  0x15   : > { %p217_p10 = scmp.lt.s32.totalorder %s5221_s22, 1  ;;  %v314_v0 = vlaneseq  ;;  %v5167_v1 = vmov 1983009808   ;;  %v5258_v6 = vld [vmem:[%s8246_s2] sm:$0xff]  ;;  %vm458_vm0 = vcmask 1041408   ;;  %v5168_v22 = vmov 0  }
  0x16   : > { %v369_v2 = vunpack.c.l.s4 %v5167_v1  ;;  %v307_v13 = vld [vmem:[%s8245_s1] sm:$0xff]  ;;  %521 = vmatprep.mubr.bf16.mxu0 %v5168_v22  ;;  %661 = vmatprep.mubr.bf16.mxu1 %v5168_v22  ;;  %v5299_v25 = vld [vmem:[%s8245_s1 + $0x8] sm:$0xff]  ;;  %vm409_vm1 = vcmask 31744   ;;  %vm3965_vm2 = vcmask 57344   ;;  %s4218_s7 = sshll.u32 %s5221_s22, 4 }
  0x17   : > { %s218_s30 = scalar_select %p217_p10, %s5221_s22, 1  ;;  %v5250_v3 = vshrl.u32 %v314_v0, 7  ;;  %v367_v29 = vcombine.high %v307_v13, %v307_v13  ;;  %v5319_v37 = vld.sshfl [vmem:[%s8245_s1 + $0x10] sm:$0x33 pattern:$0x76325410] }
  0x18   : > { %v370_v4 = vunpack.c.0.s8 %v369_v2  ;;  %v408_v38 = vcombine.high %v5319_v37, %v5319_v37  ;;  %s8201_s12 = scalar_lea.hbm %s8249_s5, %s4218_s7  ;;  %s5169_s22 = smov [#allocation2]  }
  0x19   : > { %s4221_s6 = sshll.u32 %s218_s30, 3  ;;  %v324_v7 = vsub.s32 2, %v5250_v3  ;;  %v328_v9 = vsub.s32 3, %v5250_v3  ;;  %v332_v10 = vsub.s32 4, %v5250_v3  ;;  %v336_v11 = vsub.s32 5, %v5250_v3  ;;  %s5107_s15 = sshll.u32 %s5169_s22, 4  ;;  %s5108_s15 = int_to_ptr.vmem [resolvable:$false] %s5107_s15 }
  0x1a   : > { %s221_s9 = scalar_lea.vmem %s8244_s0, %s4221_s6  ;;  %v5262_v8 = vsub.s32 %v370_v4, %v5250_v3  ;;  %v340_v12 = vsub.s32 6, %v5250_v3  ;;  %v344_v15 = vsub.s32 7, %v5250_v3  ;;  %s215_s6 = sand.u32 1, %s5157_s19  }
  0x1b   : > { %v223_v5 = vld [vmem:[%s221_s9] sm:$0xff]  ;;  %v5272_v14 = vrot.slane %v5258_v6, %v324_v7  ;;  %v5276_v16 = vrot.slane %v5258_v6, %v328_v9  ;;  %v5279_v17 = vrot.slane %v5258_v6, %v332_v10  ;;  %v5282_v18 = vrot.slane %v5258_v6, %v336_v11  ;;  %s216_s8 = scalar_lea.vmem [#allocation2], %s215_s6  ;;  %s3979_s13 = scalar_lea.sflag [#allocation3], %s215_s6 }
  0x1c   : > { %227 = vxpose.xlu0.b32.start.end [1/1] (short) %v223_v5, 128  ;;  %v5285_v19 = vrot.slane %v5258_v6, %v340_v12  ;;  %v5288_v20 = vrot.slane %v5258_v6, %v344_v15  ;;  %v374_v21 = vrot.slane %v307_v13, %v5262_v8  ;;  %v391_v26 = vrot.slane %v5299_v25, %v5262_v8  ;;  %s3991_s9 = sshll.u32 %s216_s8, 4  ;;  %s5109_s16 = scalar_lea.vmem %s5108_s15, 32  ;;  %s8203_s9 = int_to_ptr.vmem [resolvable:$true] %s3991_s9 }
  0x1d   : > { %v225_v28 = vcombine.high %v223_v5, %v223_v5  ;;  %v5305_v30 = vrot.slane %v367_v29, %v5262_v8  ;;  %s5103_s14 = scalar_lea.vmem %s8203_s9, 16  ;;  %p5110_p0 = scmp.lt.s32.totalorder %s8203_s9, %s5108_s15 }
  0x1e   : > { %8257 = vst [vmem:[#allocation5_spill] sm:$0xff] %v5285_v19  ;;  %8258 = vst [vmem:[#allocation6_spill] sm:$0xff] %v5288_v20  ;;  %v382_v23 = vcombine.high %v374_v21, %v374_v21  ;;  %v460_v24 = vsel %vm458_vm0, %v374_v21, 0  ;;  %v399_v27 = vcombine.high %v391_v26, %v391_v26  ;;  %v472_v35 = vsel %vm458_vm0, %v391_v26, 0  ;;  %p5104_p11 = scmp.ne.s32.totalorder %s8203_s9, %s5103_s14  ;;  %p5111_p1 = scmp.lt.s32.totalorder %s5109_s16, %s5103_s14 }
  0x1f   : > { %v383_v31 = vcombine.high %v5305_v30, %v5305_v30  ;;  %v466_v29 = vsel %vm458_vm0, %v5305_v30, 0 }
  0x20   : > { %4053 = vmatprep.subr.msk.bf16.mxu0 %vm458_vm0, %v382_v23  ;;  %4332 = vmatprep.subr.msk.bf16.mxu1 %vm458_vm0, %v382_v23  ;;  %v384_v23 = vcombine.high %v5299_v25, %v5299_v25  ;;  %v484_v25 = vsel %vm458_vm0, %v5319_v37, 0  ;;  %p5105_p12 = pnand %p5104_p11, %p5238_p5  ;;  %p5112_p2 = por %p5111_p1, %p5110_p0 }
  0x21   : > { %490 = vmatpush1.bf16.msra.mxu0 %v460_v24  ;;  %4333 = vmatpush1.bf16.msra.mxu1 %v460_v24 }
  0x22   : > { %4087 = vmatprep.subr.msk.bf16.mxu0 %vm458_vm0, %v399_v27  ;;  %4070 = vmatprep.subr.msk.bf16.mxu1 %vm458_vm0, %v383_v31  ;;  %v398_v26 = vrot.slane %v384_v23, %v5262_v8  ;;  %p5106_p13 = pneg %p5105_p12 }
  0x24   : > { %v400_v31 = vcombine.high %v398_v26, %v398_v26  ;;  %p5113_p3 = pnand %p5112_p2, %p5106_p13 }
  0x59   : > { %259 = vxpose.xlu0.b32.start.end [1/1] (short) %v225_v28, 128 }
  0x9c   : > { %v243_v32 = vpop.trf.xlu0 }
  0xa0   : > { %v244_v33 = vpop.trf.xlu0 }
  0xa1   : > { %v5310_v34 = vpack.c.bf16 %v244_v33, %v243_v32  ;;  %v478_v33 = vsel %vm458_vm0, %v398_v26, 0 }
  0xa3   : > { %4054 = vmatmul.mubr.msk.bf16.vlgmr.msra.gmra.mrb[0].mxu0 %vm409_vm1, %v5310_v34 }
  0xa4   : > { %v245_v36 = vpop.trf.xlu0  ;;  %531 = vmatprep.mubr.bf16.mxu0 %v5168_v22  ;;  %876 = vmatpush1.bf16.msra.mxu0 %v472_v35  ;;  %v316_v35 = vsub.s32 0, %v5250_v3 }
  0xa5   : > { %4121 = vmatprep.subr.msk.bf16.mxu0 %vm458_vm0, %v408_v38 }
  0xa6   : > { %v5479_v37 = vrot.slane %v5258_v6, %v316_v35 }
  0xa8   : > { %v246_v39 = vpop.trf.xlu0 }
  0xa9   : > { %v5324_v40 = vpack.c.bf16 %v246_v39, %v245_v36  ;;  %v320_v36 = vsub.s32 1, %v5250_v3 }
  0xab   : > { %4055 = vmatmul.mubr.msk.bf16.gmra.mrb[4].mxu0 %vm409_vm1, %v5324_v40  ;;  %v5488_v38 = vrot.slane %v5258_v6, %v320_v36 }
  0xac   : > { %v247_v41 = vpop.trf.xlu0  ;;  %541 = vmatprep.mubr.bf16.mxu0 %v5168_v22 }
  0xb0   : > { %v248_v42 = vpop.trf.xlu0 }
  0xb1   : > { %v5329_v43 = vpack.c.bf16 %v248_v42, %v247_v41 }
  0xb3   : > { %4056 = vmatmul.mubr.msk.bf16.gmra.mrb[8].mxu0 %vm409_vm1, %v5329_v43 }
  0xb4   : > { %v249_v44 = vpop.trf.xlu0  ;;  %551 = vmatprep.mubr.bf16.mxu0 %v5168_v22 }
  0xb8   : > { %v250_v45 = vpop.trf.xlu0 }
  0xb9   : > { %v5334_v46 = vpack.c.bf16 %v250_v45, %v249_v44 }
  0xbb   : > { %4057 = vmatmul.mubr.msk.bf16.gmra.mrb[12].mxu0 %vm409_vm1, %v5334_v46 }
  0xbc   : > { %v251_v47 = vpop.trf.xlu0  ;;  %561 = vmatprep.mubr.bf16.mxu0 %v5168_v22 }
  0xc0   : > { %v252_v48 = vpop.trf.xlu0 }
  0xc1   : > { %v5339_v49 = vpack.c.bf16 %v252_v48, %v251_v47 }
  0xc3   : > { %4058 = vmatmul.mubr.msk.bf16.gmra.mrb[16].mxu0 %vm409_vm1, %v5339_v49 }
  0xc4   : > { %v253_v50 = vpop.trf.xlu0  ;;  %571 = vmatprep.mubr.bf16.mxu0 %v5168_v22 }
  0xc8   : > { %v254_v51 = vpop.trf.xlu0 }
  0xc9   : > { %v5344_v52 = vpack.c.bf16 %v254_v51, %v253_v50 }
  0xcb   : > { %4059 = vmatmul.mubr.msk.bf16.gmra.mrb[20].mxu0 %vm409_vm1, %v5344_v52 }
  0xcc   : > { %v255_v53 = vpop.trf.xlu0  ;;  %581 = vmatprep.mubr.bf16.mxu0 %v5168_v22 }
  0xd0   : > { %v256_v54 = vpop.trf.xlu0 }
  0xd1   : > { %v5349_v55 = vpack.c.bf16 %v256_v54, %v255_v53 }
  0xd3   : > { %4060 = vmatmul.mubr.msk.bf16.gmra.mrb[24].mxu0 %vm409_vm1, %v5349_v55 }
  0xd4   : > { %v257_v56 = vpop.trf.xlu0  ;;  %591 = vmatprep.mubr.bf16.mxu0 %v5168_v22 }
  0xd8   : > { %v258_v57 = vpop.trf.xlu0 }
  0xd9   : > { %v5354_v58 = vpack.c.bf16 %v258_v57, %v257_v56 }
  0xdb   : > { %4061 = vmatmul.mubr.msk.bf16.gmra.mrb[28].mxu0 %vm409_vm1, %v5354_v58 }
  0xdc   : > { %v275_v59 = vpop.trf.xlu0  ;;  %601 = vmatprep.mubr.bf16.mxu0 %v5168_v22 }
  0xe0   : > { %v276_v60 = vpop.trf.xlu0 }
  0xe1   : > { %v5359_v61 = vpack.c.bf16 %v276_v60, %v275_v59 }
  0xe3   : > { %4062 = vmatmul.mubr.msk.bf16.gmra.mrb[32].mxu0 %vm409_vm1, %v5359_v61 }
  0xe4   : > { %v277_v62 = vpop.trf.xlu0  ;;  %611 = vmatprep.mubr.bf16.mxu0 %v5168_v22 }
  0xe8   : > { %v278_v63 = vpop.trf.xlu0 }
  0xe9   : > { %v5364_v0 = vpack.c.bf16 %v278_v63, %v277_v62 }
  0xeb   : > { %4063 = vmatmul.mubr.msk.bf16.gmra.mrb[36].mxu0 %vm409_vm1, %v5364_v0 }
  0xec   : > { %v279_v1 = vpop.trf.xlu0  ;;  %621 = vmatprep.mubr.bf16.mxu0 %v5168_v22 }
  0xf0   : > { %v280_v2 = vpop.trf.xlu0 }
  0xf1   : > { %v5369_v4 = vpack.c.bf16 %v280_v2, %v279_v1 }
  0xf3   : > { %4064 = vmatmul.mubr.msk.bf16.gmra.mrb[40].mxu0 %vm409_vm1, %v5369_v4 }
  0xf4   : > { %v281_v5 = vpop.trf.xlu0  ;;  %631 = vmatprep.mubr.bf16.mxu0 %v5168_v22 }
  0xf8   : > { %v282_v7 = vpop.trf.xlu0 }
  0xf9   : > { %v5374_v9 = vpack.c.bf16 %v282_v7, %v281_v5 }
  0xfb   : > { %4065 = vmatmul.mubr.msk.bf16.gmra.mrb[44].mxu0 %vm409_vm1, %v5374_v9 }
  0xfc   : > { %v283_v10 = vpop.trf.xlu0  ;;  %641 = vmatprep.mubr.bf16.mxu0 %v5168_v22 }
 0x100   : > { %v284_v11 = vpop.trf.xlu0 }
 0x101   : > { %v5379_v12 = vpack.c.bf16 %v284_v11, %v283_v10 }
 0x103   : > { %4066 = vmatmul.mubr.msk.bf16.gmra.mrb[48].mxu0 %vm409_vm1, %v5379_v12 }
 0x104   : > { %v285_v13 = vpop.trf.xlu0  ;;  %651 = vmatprep.mubr.bf16.mxu0 %v5168_v22 }
 0x108   : > { %v286_v15 = vpop.trf.xlu0 }
 0x109   : > { %v5384_v21 = vpack.c.bf16 %v286_v15, %v285_v13 }
 0x10b   : > { %4067 = vmatmul.mubr.msk.bf16.gmra.mrb[52].mxu0 %vm409_vm1, %v5384_v21 }
 0x10c   : > { %v287_v24 = vpop.trf.xlu0  ;;  %907 = vmatprep.mubr.bf16.mxu0 %v5168_v22 }
 0x110   : > { %v288_v27 = vpop.trf.xlu0 }
 0x111   : > { %v5392_v28 = vpack.c.bf16 %v288_v27, %v287_v24 }
 0x113   : > { %4068 = vmatmul.mubr.msk.bf16.vlgmr.msra.gmra.mrb[0].mxu1 %vm409_vm1, %v5392_v28  ;;  %4088 = vmatmul.mubr.msk.bf16.vlgmr.msra.gmra.mrb[56].mxu0 %vm409_vm1, %v5310_v34 }
 0x114   : > { %683 = vmatpush1.bf16.msra.mxu1 %v466_v29  ;;  %v289_v32 = vpop.trf.xlu0  ;;  %671 = vmatprep.mubr.bf16.mxu1 %v5168_v22 }
 0x115   : > { %917 = vmatprep.mubr.bf16.mxu0 %v5168_v22  ;;  %4104 = vmatprep.subr.msk.bf16.mxu1 %vm458_vm0, %v400_v31 }
 0x116   : > { %1262 = vmatpush1.bf16.msra.mxu0 %v484_v25 }
 0x118   : > { %v290_v8 = vpop.trf.xlu0 }
 0x119   : > { %v5405_v30 = vpack.c.bf16 %v290_v8, %v289_v32 }
 0x11b   : > { %4069 = vmatmul.mubr.msk.bf16.gmra.mrb[4].mxu1 %vm409_vm1, %v5405_v30  ;;  %4089 = vmatmul.mubr.msk.bf16.gmra.mrb[60].mxu0 %vm409_vm1, %v5324_v40 }
 0x11c   : > { %714 = vmatprep.mubr.bf16.mxu1 %v5168_v22  ;;  %927 = vmatprep.mubr.bf16.mxu0 %v5168_v22 }
 0x123   : > { %4071 = vmatmul.mubr.msk.bf16.vlgmr.msra.gmra.mrb[8].mxu1 %vm409_vm1, %v5310_v34  ;;  %4090 = vmatmul.mubr.msk.bf16.gmra.mrb[64].mxu0 %vm409_vm1, %v5329_v43 }
 0x124   : > { %1069 = vmatpush1.bf16.msra.mxu1 %v478_v33  ;;  %724 = vmatprep.mubr.bf16.mxu1 %v5168_v22 }
 0x125   : > { %937 = vmatprep.mubr.bf16.mxu0 %v5168_v22 }
 0x12b   : > { %4072 = vmatmul.mubr.msk.bf16.gmra.mrb[12].mxu1 %vm409_vm1, %v5324_v40  ;;  %4091 = vmatmul.mubr.msk.bf16.gmra.mrb[68].mxu0 %vm409_vm1, %v5334_v46 }
 0x12c   : > { %734 = vmatprep.mubr.bf16.mxu1 %v5168_v22  ;;  %947 = vmatprep.mubr.bf16.mxu0 %v5168_v22 }
 0x133   : > { %4073 = vmatmul.mubr.msk.bf16.gmra.mrb[16].mxu1 %vm409_vm1, %v5329_v43  ;;  %4092 = vmatmul.mubr.msk.bf16.gmra.mrb[72].mxu0 %vm409_vm1, %v5339_v49 }
 0x134   : > { %744 = vmatprep.mubr.bf16.mxu1 %v5168_v22  ;;  %957 = vmatprep.mubr.bf16.mxu0 %v5168_v22 }
 0x13b   : > { %4074 = vmatmul.mubr.msk.bf16.gmra.mrb[20].mxu1 %vm409_vm1, %v5334_v46  ;;  %4093 = vmatmul.mubr.msk.bf16.gmra.mrb[76].mxu0 %vm409_vm1, %v5344_v52 }
 0x13c   : > { %754 = vmatprep.mubr.bf16.mxu1 %v5168_v22  ;;  %967 = vmatprep.mubr.bf16.mxu0 %v5168_v22 }
 0x143   : > { %4075 = vmatmul.mubr.msk.bf16.gmra.mrb[24].mxu1 %vm409_vm1, %v5339_v49  ;;  %4094 = vmatmul.mubr.msk.bf16.gmra.mrb[80].mxu0 %vm409_vm1, %v5349_v55 }
 0x144   : > { %764 = vmatprep.mubr.bf16.mxu1 %v5168_v22  ;;  %977 = vmatprep.mubr.bf16.mxu0 %v5168_v22 }
 0x14b   : > { %4076 = vmatmul.mubr.msk.bf16.gmra.mrb[28].mxu1 %vm409_vm1, %v5344_v52  ;;  %4095 = vmatmul.mubr.msk.bf16.gmra.mrb[84].mxu0 %vm409_vm1, %v5354_v58 }
 0x14c   : > { %774 = vmatprep.mubr.bf16.mxu1 %v5168_v22  ;;  %987 = vmatprep.mubr.bf16.mxu0 %v5168_v22 }
 0x153   : > { %4077 = vmatmul.mubr.msk.bf16.gmra.mrb[32].mxu1 %vm409_vm1, %v5349_v55  ;;  %4096 = vmatmul.mubr.msk.bf16.gmra.mrb[88].mxu0 %vm409_vm1, %v5359_v61 }
 0x154   : > { %784 = vmatprep.mubr.bf16.mxu1 %v5168_v22  ;;  %997 = vmatprep.mubr.bf16.mxu0 %v5168_v22 }
 0x15b   : > { %4078 = vmatmul.mubr.msk.bf16.gmra.mrb[36].mxu1 %vm409_vm1, %v5354_v58  ;;  %4097 = vmatmul.mubr.msk.bf16.gmra.mrb[92].mxu0 %vm409_vm1, %v5364_v0 }
 0x15c   : > { %794 = vmatprep.mubr.bf16.mxu1 %v5168_v22  ;;  %1007 = vmatprep.mubr.bf16.mxu0 %v5168_v22 }
 0x163   : > { %4079 = vmatmul.mubr.msk.bf16.gmra.mrb[40].mxu1 %vm409_vm1, %v5359_v61  ;;  %4098 = vmatmul.mubr.msk.bf16.gmra.mrb[96].mxu0 %vm409_vm1, %v5369_v4 }
 0x164   : > { %804 = vmatprep.mubr.bf16.mxu1 %v5168_v22  ;;  %1017 = vmatprep.mubr.bf16.mxu0 %v5168_v22 }
 0x16b   : > { %4080 = vmatmul.mubr.msk.bf16.gmra.mrb[44].mxu1 %vm409_vm1, %v5364_v0  ;;  %4099 = vmatmul.mubr.msk.bf16.gmra.mrb[100].mxu0 %vm409_vm1, %v5374_v9 }
 0x16c   : > { %814 = vmatprep.mubr.bf16.mxu1 %v5168_v22  ;;  %1027 = vmatprep.mubr.bf16.mxu0 %v5168_v22 }
 0x173   : > { %4081 = vmatmul.mubr.msk.bf16.gmra.mrb[48].mxu1 %vm409_vm1, %v5369_v4  ;;  %4100 = vmatmul.mubr.msk.bf16.gmra.mrb[104].mxu0 %vm409_vm1, %v5379_v12 }
 0x174   : > { %824 = vmatprep.mubr.bf16.mxu1 %v5168_v22  ;;  %1037 = vmatprep.mubr.bf16.mxu0 %v5168_v22 }
 0x176   : > { %v523_v39 = vpop.f32.mrb[0].mxu0 }
 0x177   : > { %v524_v41 = vadd.f32 %v523_v39, %v5479_v37  ;;  %v525_v42 = vpop.f32.mrb[1].mxu0 }
 0x178   : > { %v526_v44 = vadd.f32 %v525_v42, %v5488_v38  ;;  %v527_v45 = vpop.f32.mrb[2].mxu0 }
 0x179   : > { %v1454_v47 = vmul.f32 0.5, %v524_v41  ;;  %v528_v48 = vadd.f32 %v527_v45, %v5479_v37  ;;  %v529_v50 = vpop.f32.mrb[3].mxu0 }
 0x17a   : > { %v1455_v51 = vmul.f32 0.5, %v526_v44  ;;  %v530_v53 = vadd.f32 %v529_v50, %v5488_v38 }
 0x17b   : > { %4459 = vtanh.f32 %v1454_v47  ;;  %v1464_v6 = vmul.f32 0.5, %v528_v48  ;;  %4082 = vmatmul.mubr.msk.bf16.gmra.mrb[52].mxu1 %vm409_vm1, %v5374_v9  ;;  %4101 = vmatmul.mubr.msk.bf16.gmra.mrb[108].mxu0 %vm409_vm1, %v5384_v21 }
 0x17c   : > { %4461 = vtanh.f32 %v1455_v51  ;;  %v1465_v54 = vmul.f32 0.5, %v530_v53  ;;  %834 = vmatprep.mubr.bf16.mxu1 %v5168_v22  ;;  %1047 = vmatprep.mubr.bf16.mxu0 %v5168_v22 }
 0x17d   : > { %4463 = vtanh.f32 %v1464_v6 }
 0x17e   : > { %4465 = vtanh.f32 %v1465_v54  ;;  %v533_v56 = vpop.f32.mrb[4].mxu0 }
 0x17f   : > { %v534_v57 = vadd.f32 %v533_v56, %v5479_v37  ;;  %v535_v59 = vpop.f32.mrb[5].mxu0 }
 0x180   : > { %v536_v60 = vadd.f32 %v535_v59, %v5488_v38  ;;  %v537_v62 = vpop.f32.mrb[6].mxu0 }
 0x181   : > { %v1474_v63 = vmul.f32 0.5, %v534_v57  ;;  %v538_v1 = vadd.f32 %v537_v62, %v5479_v37  ;;  %v539_v2 = vpop.f32.mrb[7].mxu0 }
 0x182   : > { %v1475_v5 = vmul.f32 0.5, %v536_v60  ;;  %v540_v7 = vadd.f32 %v539_v2, %v5488_v38 }
 0x183   : > { %4467 = vtanh.f32 %v1474_v63  ;;  %v1484_v10 = vmul.f32 0.5, %v538_v1  ;;  %4083 = vmatmul.mubr.msk.bf16.gmra.mrb[56].mxu1 %vm409_vm1, %v5379_v12  ;;  %4102 = vmatmul.mubr.msk.bf16.gmra.mrb[112].mxu0 %vm409_vm1, %v5392_v28 }
 0x184   : > { %4469 = vtanh.f32 %v1475_v5  ;;  %v1485_v11 = vmul.f32 0.5, %v540_v7  ;;  %844 = vmatprep.mubr.bf16.mxu1 %v5168_v22  ;;  %1057 = vmatprep.mubr.bf16.mxu0 %v5168_v22 }
 0x185   : > { %v4460_v13 = vpop.eup %4459  ;;  %4471 = vtanh.f32 %v1484_v10 }
 0x186   : > { %v4462_v15 = vpop.eup %4461  ;;  %v2094_v23 = vadd.f32 1.0, %v4460_v13  ;;  %4473 = vtanh.f32 %v1485_v11  ;;  %v543_v24 = vpop.f32.mrb[8].mxu0 }
 0x187   : > { %v4464_v26 = vpop.eup %4463  ;;  %v2095_v27 = vadd.f32 1.0, %v4462_v15  ;;  %v544_v29 = vadd.f32 %v543_v24, %v5479_v37  ;;  %v545_v31 = vpop.f32.mrb[9].mxu0 }
 0x188   : > { %v4466_v25 = vpop.eup %4465  ;;  %v2104_v32 = vadd.f32 1.0, %v4464_v26  ;;  %v546_v8 = vadd.f32 %v545_v31, %v5488_v38  ;;  %v547_v33 = vpop.f32.mrb[10].mxu0  ;;  %v2414_v45 = vmul.f32 %v2094_v23, %v1454_v47 }
 0x189   : > { %v2105_v39 = vadd.f32 1.0, %v4466_v25  ;;  %v5514_v41 = vmul.f32 0.5, %v544_v29  ;;  %v548_v42 = vadd.f32 %v547_v33, %v5479_v37  ;;  %v549_v44 = vpop.f32.mrb[11].mxu0  ;;  %v2415_v56 = vmul.f32 %v2095_v27, %v1455_v51 }
 0x18a   : > { %v2424_v48 = vmul.f32 %v2104_v32, %v1464_v6  ;;  %v5517_v50 = vmul.f32 0.5, %v546_v8  ;;  %v550_v53 = vadd.f32 %v549_v44, %v5488_v38 }
 0x18b   : > { %v2425_v57 = vmul.f32 %v2105_v39, %v1465_v54  ;;  %4475 = vtanh.f32 %v5514_v41  ;;  %v5521_v59 = vmul.f32 0.5, %v548_v42  ;;  %4084 = vmatmul.mubr.msk.bf16.gmra.mrb[60].mxu1 %vm409_vm1, %v5384_v21  ;;  %4103 = vmatmul.mubr.msk.bf16.gmra.mrb[116].mxu0 %vm409_vm1, %v5405_v30 }
 0x18c   : > { %v2734_v60 = vadd.f32 %v2424_v48, %v2414_v45  ;;  %4477 = vtanh.f32 %v5517_v50  ;;  %v5528_v47 = vmul.f32 0.5, %v550_v53  ;;  %854 = vmatprep.mubr.bf16.mxu1 %v5168_v22  ;;  %1293 = vmatprep.mubr.bf16.mxu0 %v5168_v22 }
 0x18d   : > { %v4468_v51 = vpop.eup %4467  ;;  %v2771_v6 = vadd.f32 %v2425_v57, %v2415_v56  ;;  %4479 = vtanh.f32 %v5521_v59 }
 0x18e   : > { %v4470_v54 = vpop.eup %4469  ;;  %v2114_v62 = vadd.f32 1.0, %v4468_v51  ;;  %4481 = vtanh.f32 %v5528_v47  ;;  %v553_v1 = vpop.f32.mrb[12].mxu0 }
 0x18f   : > { %v4472_v2 = vpop.eup %4471  ;;  %v2115_v7 = vadd.f32 1.0, %v4470_v54  ;;  %v554_v13 = vadd.f32 %v553_v1, %v5479_v37  ;;  %v555_v15 = vpop.f32.mrb[13].mxu0 }
 0x190   : > { %v4474_v23 = vpop.eup %4473  ;;  %v2434_v24 = vmul.f32 %v2114_v62, %v1474_v63  ;;  %v2124_v26 = vadd.f32 1.0, %v4472_v2  ;;  %v556_v27 = vadd.f32 %v555_v15, %v5488_v38  ;;  %v557_v29 = vpop.f32.mrb[14].mxu0 }
 0x191   : > { %v2435_v31 = vmul.f32 %v2115_v7, %v1475_v5  ;;  %v2125_v25 = vadd.f32 1.0, %v4474_v23  ;;  %v5536_v32 = vmul.f32 0.5, %v554_v13  ;;  %v558_v8 = vadd.f32 %v557_v29, %v5479_v37  ;;  %v559_v33 = vpop.f32.mrb[15].mxu0 }
 0x192   : > { %v2735_v39 = vadd.f32 %v2734_v60, %v2434_v24  ;;  %v2444_v42 = vmul.f32 %v2124_v26, %v1484_v10  ;;  %v5539_v44 = vmul.f32 0.5, %v556_v27  ;;  %v560_v45 = vadd.f32 %v559_v33, %v5488_v38 }
 0x193   : > { %v2772_v48 = vadd.f32 %v2771_v6, %v2435_v31  ;;  %v2445_v53 = vmul.f32 %v2125_v25, %v1485_v11  ;;  %4483 = vtanh.f32 %v5536_v32  ;;  %v5543_v63 = vmul.f32 0.5, %v558_v8  ;;  %4085 = vmatmul.mubr.msk.bf16.gmra.mrb[64].mxu1 %vm409_vm1, %v5392_v28  ;;  %4122 = vmatmul.mubr.msk.bf16.vlgmr.msra.gmra.mrb[120].mxu0 %vm409_vm1, %v5310_v34  ;;  %v4379_v11 = vld [vmem:[%s8247_s3 + $0x40] sm:$0xff]  }
 0x194   : > { %v2736_v5 = vadd.f32 %v2735_v39, %v2444_v42  ;;  %4485 = vtanh.f32 %v5539_v44  ;;  %v5550_v10 = vmul.f32 0.5, %v560_v45  ;;  %864 = vmatprep.mubr.bf16.mxu1 %v5168_v22  ;;  %1303 = vmatprep.mubr.bf16.mxu0 %v5168_v22 }
 0x195   : > { %v4476_v56 = vpop.eup %4475  ;;  %v2773_v57 = vadd.f32 %v2772_v48, %v2445_v53  ;;  %4487 = vtanh.f32 %v5543_v63  ;;  %4222 = vmatprep.subr.bf16.mxu1 %v4379_v11 }
 0x196   : > { %v4478_v60 = vpop.eup %4477  ;;  %v2134_v51 = vadd.f32 1.0, %v4476_v56  ;;  %4489 = vtanh.f32 %v5550_v10  ;;  %v563_v6 = vpop.f32.mrb[16].mxu0 }
 0x197   : > { %v4480_v54 = vpop.eup %4479  ;;  %v2135_v62 = vadd.f32 1.0, %v4478_v60  ;;  %v564_v1 = vadd.f32 %v563_v6, %v5479_v37  ;;  %v565_v2 = vpop.f32.mrb[17].mxu0 }
 0x198   : > { %v4482_v7 = vpop.eup %4481  ;;  %v2454_v13 = vmul.f32 %v2134_v51, %v5514_v41  ;;  %v2144_v15 = vadd.f32 1.0, %v4480_v54  ;;  %v566_v23 = vadd.f32 %v565_v2, %v5488_v38  ;;  %v567_v24 = vpop.f32.mrb[18].mxu0 }
 0x199   : > { %v2455_v26 = vmul.f32 %v2135_v62, %v5517_v50  ;;  %v2145_v27 = vadd.f32 1.0, %v4482_v7  ;;  %v5563_v29 = vmul.f32 0.5, %v564_v1  ;;  %v568_v31 = vadd.f32 %v567_v24, %v5479_v37  ;;  %v569_v25 = vpop.f32.mrb[19].mxu0 }
 0x19a   : > { %v2737_v8 = vadd.f32 %v2736_v5, %v2454_v13  ;;  %v2464_v33 = vmul.f32 %v2144_v15, %v5521_v59  ;;  %v5567_v39 = vmul.f32 0.5, %v566_v23  ;;  %v570_v42 = vadd.f32 %v569_v25, %v5488_v38 }
 0x19b   : > { %v2774_v41 = vadd.f32 %v2773_v57, %v2455_v26  ;;  %v2465_v45 = vmul.f32 %v2145_v27, %v5528_v47  ;;  %4491 = vtanh.f32 %v5563_v29  ;;  %v5572_v48 = vmul.f32 0.5, %v568_v31  ;;  %4086 = vmatmul.mubr.msk.bf16.gmra.mrb[68].mxu1 %vm409_vm1, %v5405_v30  ;;  %4123 = vmatmul.mubr.msk.bf16.gmra.mrb[124].mxu0 %vm409_vm1, %v5324_v40  ;;  %v4380_v27 = vld [vmem:[%s8247_s3] sm:$0xff]  }
 0x19c   : > { %v2738_v50 = vadd.f32 %v2737_v8, %v2464_v33  ;;  %4493 = vtanh.f32 %v5567_v39  ;;  %v5579_v59 = vmul.f32 0.5, %v570_v42  ;;  %1100 = vmatprep.mubr.bf16.mxu1 %v5168_v22  ;;  %1313 = vmatprep.mubr.bf16.mxu0 %v5168_v22 }
 0x19d   : > { %v4484_v47 = vpop.eup %4483  ;;  %v2775_v53 = vadd.f32 %v2774_v41, %v2465_v45  ;;  %4495 = vtanh.f32 %v5572_v48 }
 0x19e   : > { %v4486_v5 = vpop.eup %4485  ;;  %v2154_v11 = vadd.f32 1.0, %v4484_v47  ;;  %4497 = vtanh.f32 %v5579_v59  ;;  %v573_v56 = vpop.f32.mrb[20].mxu0 }
 0x19f   : > { %v4488_v57 = vpop.eup %4487  ;;  %v2155_v60 = vadd.f32 1.0, %v4486_v5  ;;  %v574_v51 = vadd.f32 %v573_v56, %v5479_v37  ;;  %v575_v6 = vpop.f32.mrb[21].mxu0 }
 0x1a0   : > { %v4490_v54 = vpop.eup %4489  ;;  %v2474_v62 = vmul.f32 %v2154_v11, %v5536_v32  ;;  %v2164_v1 = vadd.f32 1.0, %v4488_v57  ;;  %v576_v2 = vadd.f32 %v575_v6, %v5488_v38  ;;  %v577_v7 = vpop.f32.mrb[22].mxu0  ;;  %v4383_v11 = vld [vmem:[%s8247_s3 + $0x50] sm:$0xff]  }
 0x1a1   : > { %v2475_v13 = vmul.f32 %v2155_v60, %v5539_v44  ;;  %v2165_v15 = vadd.f32 1.0, %v4490_v54  ;;  %v5589_v23 = vmul.f32 0.5, %v574_v51  ;;  %v578_v24 = vadd.f32 %v577_v7, %v5479_v37  ;;  %v579_v26 = vpop.f32.mrb[23].mxu0  ;;  %v4381_v44 = vld [vmem:[%s8247_s3 + $0x48] sm:$0xff]  }
 0x1a2   : > { %v2739_v31 = vadd.f32 %v2738_v50, %v2474_v62  ;;  %v2484_v25 = vmul.f32 %v2164_v1, %v5543_v63  ;;  %v5596_v32 = vmul.f32 0.5, %v576_v2  ;;  %v580_v8 = vadd.f32 %v579_v26, %v5488_v38 }
 0x1a3   : > { %v2776_v33 = vadd.f32 %v2775_v53, %v2475_v13  ;;  %v2485_v42 = vmul.f32 %v2165_v15, %v5550_v10  ;;  %4499 = vtanh.f32 %v5589_v23  ;;  %v5604_v41 = vmul.f32 0.5, %v578_v24  ;;  %4105 = vmatmul.mubr.msk.bf16.vlgmr.msra.gmra.mrb[72].mxu1 %vm409_vm1, %v5310_v34  ;;  %4124 = vmatmul.mubr.msk.bf16.gmra.mrb[128].mxu0 %vm409_vm1, %v5329_v43  ;;  %v4382_v34 = vld [vmem:[%s8247_s3 + $0x8] sm:$0xff]  }
 0x1a4   : > { %v2740_v63 = vadd.f32 %v2739_v31, %v2484_v25  ;;  %4501 = vtanh.f32 %v5596_v32  ;;  %v5611_v45 = vmul.f32 0.5, %v580_v8  ;;  %1110 = vmatprep.mubr.bf16.mxu1 %v5168_v22  ;;  %1323 = vmatprep.mubr.bf16.mxu0 %v5168_v22 }
 0x1a5   : > { %v4492_v10 = vpop.eup %4491  ;;  %v2777_v50 = vadd.f32 %v2776_v33, %v2485_v42  ;;  %4503 = vtanh.f32 %v5604_v41  ;;  %4223 = vmatpush3.bf16.msra.mxu1 %v4380_v27  ;;  %v4384_v27 = vld [vmem:[%s8247_s3 + $0x10] sm:$0xff]  }
 0x1a6   : > { %v4494_v47 = vpop.eup %4493  ;;  %v2174_v53 = vadd.f32 1.0, %v4492_v10  ;;  %4505 = vtanh.f32 %v5611_v45  ;;  %v583_v5 = vpop.f32.mrb[24].mxu0  ;;  %4224 = vmatprep.subr.bf16.mxu1 %v4381_v44 }
 0x1a7   : > { %v4496_v56 = vpop.eup %4495  ;;  %v2175_v57 = vadd.f32 1.0, %v4494_v47  ;;  %v584_v60 = vadd.f32 %v583_v5, %v5479_v37  ;;  %v585_v51 = vpop.f32.mrb[25].mxu0 }
 0x1a8   : > { %v4498_v6 = vpop.eup %4497  ;;  %v2494_v54 = vmul.f32 %v2174_v53, %v5563_v29  ;;  %v2184_v62 = vadd.f32 1.0, %v4496_v56  ;;  %v586_v1 = vadd.f32 %v585_v51, %v5488_v38  ;;  %v587_v2 = vpop.f32.mrb[26].mxu0  ;;  %v4387_v53 = vld [vmem:[%s8247_s3 + $0x60] sm:$0xff]  }
 0x1a9   : > { %v2495_v7 = vmul.f32 %v2175_v57, %v5567_v39  ;;  %v2185_v13 = vadd.f32 1.0, %v4498_v6  ;;  %v5627_v15 = vmul.f32 0.5, %v584_v60  ;;  %v588_v24 = vadd.f32 %v587_v2, %v5479_v37  ;;  %v589_v26 = vpop.f32.mrb[27].mxu0  ;;  %4225 = vmatpush3.bf16.msra.mxu1 %v4382_v34  ;;  %v4385_v39 = vld [vmem:[%s8247_s3 + $0x58] sm:$0xff]  }
 0x1aa   : > { %v2741_v31 = vadd.f32 %v2740_v63, %v2494_v54  ;;  %v2504_v29 = vmul.f32 %v2184_v62, %v5572_v48  ;;  %v5634_v25 = vmul.f32 0.5, %v586_v1  ;;  %v590_v8 = vadd.f32 %v589_v26, %v5488_v38  ;;  %4226 = vmatprep.subr.bf16.mxu1 %v4383_v11  ;;  %v4388_v26 = vld [vmem:[%s8247_s3 + $0x20] sm:$0xff]  }
 0x1ab   : > { %v2778_v44 = vadd.f32 %v2777_v50, %v2495_v7  ;;  %v2505_v33 = vmul.f32 %v2185_v13, %v5579_v59  ;;  %4507 = vtanh.f32 %v5627_v15  ;;  %v5642_v42 = vmul.f32 0.5, %v588_v24  ;;  %4106 = vmatmul.mubr.msk.bf16.gmra.mrb[76].mxu1 %vm409_vm1, %v5324_v40  ;;  %4125 = vmatmul.mubr.msk.bf16.gmra.mrb[132].mxu0 %vm409_vm1, %v5334_v46  ;;  %v4386_v40 = vld [vmem:[%s8247_s3 + $0x18] sm:$0xff]  }
 0x1ac   : > { %v2742_v48 = vadd.f32 %v2741_v31, %v2504_v29  ;;  %4509 = vtanh.f32 %v5634_v25  ;;  %v5649_v63 = vmul.f32 0.5, %v590_v8  ;;  %1120 = vmatprep.mubr.bf16.mxu1 %v5168_v22  ;;  %1333 = vmatprep.mubr.bf16.mxu0 %v5168_v22 }
 0x1ad   : > { %v4500_v59 = vpop.eup %4499  ;;  %v2779_v10 = vadd.f32 %v2778_v44, %v2505_v33  ;;  %4511 = vtanh.f32 %v5642_v42  ;;  %4227 = vmatpush3.bf16.msra.mxu1 %v4384_v27 }
 0x1ae   : > { %v4502_v50 = vpop.eup %4501  ;;  %v2194_v34 = vadd.f32 1.0, %v4500_v59  ;;  %4513 = vtanh.f32 %v5649_v63  ;;  %v593_v47 = vpop.f32.mrb[28].mxu0  ;;  %4228 = vmatprep.subr.bf16.mxu1 %v4385_v39 }
 0x1af   : > { %v4504_v5 = vpop.eup %4503  ;;  %v2195_v11 = vadd.f32 1.0, %v4502_v50  ;;  %v594_v56 = vadd.f32 %v593_v47, %v5479_v37  ;;  %v595_v57 = vpop.f32.mrb[29].mxu0  ;;  %v4391_v50 = vld [vmem:[%s8247_s3 + $0x70] sm:$0xff]  }
 0x1b0   : > { %v4506_v60 = vpop.eup %4505  ;;  %v2514_v51 = vmul.f32 %v2194_v34, %v5589_v23  ;;  %v2204_v6 = vadd.f32 1.0, %v4504_v5  ;;  %v596_v54 = vadd.f32 %v595_v57, %v5488_v38  ;;  %v597_v62 = vpop.f32.mrb[30].mxu0 }
 0x1b1   : > { %v2515_v1 = vmul.f32 %v2195_v11, %v5596_v32  ;;  %v2205_v2 = vadd.f32 1.0, %v4506_v60  ;;  %v5665_v7 = vmul.f32 0.5, %v594_v56  ;;  %v598_v13 = vadd.f32 %v597_v62, %v5479_v37  ;;  %v599_v24 = vpop.f32.mrb[31].mxu0  ;;  %4229 = vmatpush3.bf16.msra.mxu1 %v4386_v40  ;;  %v4389_v32 = vld [vmem:[%s8247_s3 + $0x68] sm:$0xff]  }
 0x1b2   : > { %v2743_v27 = vadd.f32 %v2742_v48, %v2514_v51  ;;  %v2524_v23 = vmul.f32 %v2204_v6, %v5604_v41  ;;  %v5672_v31 = vmul.f32 0.5, %v596_v54  ;;  %v600_v29 = vadd.f32 %v599_v24, %v5488_v38  ;;  %4230 = vmatprep.subr.bf16.mxu1 %v4387_v53 }
 0x1b3   : > { %v2780_v8 = vadd.f32 %v2779_v10, %v2515_v1  ;;  %v2525_v39 = vmul.f32 %v2205_v2, %v5611_v45  ;;  %4515 = vtanh.f32 %v5665_v7  ;;  %v5680_v44 = vmul.f32 0.5, %v598_v13  ;;  %4107 = vmatmul.mubr.msk.bf16.gmra.mrb[80].mxu1 %vm409_vm1, %v5329_v43  ;;  %4126 = vmatmul.mubr.msk.bf16.gmra.mrb[136].mxu0 %vm409_vm1, %v5339_v49  ;;  %v4390_v43 = vld [vmem:[%s8247_s3 + $0x28] sm:$0xff]   ;;  %v4392_v13 = vld [vmem:[%s8247_s3 + $0x30] sm:$0xff]  }
 0x1b4   : > { %v2744_v41 = vadd.f32 %v2743_v27, %v2524_v23  ;;  %4517 = vtanh.f32 %v5672_v31  ;;  %v5687_v33 = vmul.f32 0.5, %v600_v29  ;;  %1130 = vmatprep.mubr.bf16.mxu1 %v5168_v22  ;;  %1343 = vmatprep.mubr.bf16.mxu0 %v5168_v22 }
 0x1b5   : > { %v4508_v45 = vpop.eup %4507  ;;  %v2781_v48 = vadd.f32 %v2780_v8, %v2525_v39  ;;  %4519 = vtanh.f32 %v5680_v44  ;;  %4231 = vmatpush3.bf16.msra.mxu1 %v4388_v26 }
 0x1b6   : > { %v4510_v59 = vpop.eup %4509  ;;  %v2214_v10 = vadd.f32 1.0, %v4508_v45  ;;  %4521 = vtanh.f32 %v5687_v33  ;;  %v603_v40 = vpop.f32.mrb[32].mxu0  ;;  %4232 = vmatprep.subr.bf16.mxu1 %v4389_v32 }
 0x1b7   : > { %v4512_v34 = vpop.eup %4511  ;;  %v2215_v47 = vadd.f32 1.0, %v4510_v59  ;;  %v604_v53 = vadd.f32 %v603_v40, %v5479_v37  ;;  %v605_v5 = vpop.f32.mrb[33].mxu0 }
 0x1b8   : > { %v4514_v11 = vpop.eup %4513  ;;  %v2534_v56 = vmul.f32 %v2214_v10, %v5627_v15  ;;  %v2224_v57 = vadd.f32 1.0, %v4512_v34  ;;  %v606_v60 = vadd.f32 %v605_v5, %v5488_v38  ;;  %v607_v51 = vpop.f32.mrb[34].mxu0 }
 0x1b9   : > { %v2535_v6 = vmul.f32 %v2215_v47, %v5634_v25  ;;  %v2225_v54 = vadd.f32 1.0, %v4514_v11  ;;  %v5703_v62 = vmul.f32 0.5, %v604_v53  ;;  %v608_v1 = vadd.f32 %v607_v51, %v5479_v37  ;;  %v609_v2 = vpop.f32.mrb[35].mxu0  ;;  %4233 = vmatpush3.bf16.msra.mxu1 %v4390_v43 }
 0x1ba   : > { %v2745_v24 = vadd.f32 %v2744_v41, %v2534_v56  ;;  %v2544_v15 = vmul.f32 %v2224_v57, %v5642_v42  ;;  %v5710_v26 = vmul.f32 0.5, %v606_v60  ;;  %v610_v27 = vadd.f32 %v609_v2, %v5488_v38  ;;  %4234 = vmatprep.subr.bf16.mxu1 %v4391_v50 }
 0x1bb   : > { %v2782_v25 = vadd.f32 %v2781_v48, %v2535_v6  ;;  %v2545_v23 = vmul.f32 %v2225_v54, %v5649_v63  ;;  %4523 = vtanh.f32 %v5703_v62  ;;  %v5715_v29 = vmul.f32 0.5, %v608_v1  ;;  %4108 = vmatmul.mubr.msk.bf16.gmra.mrb[84].mxu1 %vm409_vm1, %v5334_v46  ;;  %4127 = vmatmul.mubr.msk.bf16.gmra.mrb[140].mxu0 %vm409_vm1, %v5344_v52 }
 0x1bc   : > { %v2746_v32 = vadd.f32 %v2745_v24, %v2544_v15  ;;  %4525 = vtanh.f32 %v5710_v26  ;;  %v5722_v42 = vmul.f32 0.5, %v610_v27  ;;  %1140 = vmatprep.mubr.bf16.mxu1 %v5168_v22  ;;  %1353 = vmatprep.mubr.bf16.mxu0 %v5168_v22 }
 0x1bd   : > { %v4516_v63 = vpop.eup %4515  ;;  %v2783_v8 = vadd.f32 %v2782_v25, %v2545_v23  ;;  %4527 = vtanh.f32 %v5715_v29  ;;  %4235 = vmatpush3.bf16.msra.mxu1 %v4392_v13 }
 0x1be   : > { %v4518_v39 = vpop.eup %4517  ;;  %v2234_v41 = vadd.f32 1.0, %v4516_v63  ;;  %4529 = vtanh.f32 %v5722_v42  ;;  %v613_v46 = vpop.f32.mrb[36].mxu0 }
 0x1bf   : > { %v4520_v45 = vpop.eup %4519  ;;  %v2235_v48 = vadd.f32 1.0, %v4518_v39  ;;  %v614_v43 = vadd.f32 %v613_v46, %v5479_v37  ;;  %v615_v59 = vpop.f32.mrb[37].mxu0 }
 0x1c0   : > { %v4522_v10 = vpop.eup %4521  ;;  %v2554_v40 = vmul.f32 %v2234_v41, %v5665_v7  ;;  %v2244_v50 = vadd.f32 1.0, %v4520_v45  ;;  %v616_v34 = vadd.f32 %v615_v59, %v5488_v38  ;;  %v617_v47 = vpop.f32.mrb[38].mxu0 }
 0x1c1   : > { %v2555_v53 = vmul.f32 %v2235_v48, %v5672_v31  ;;  %v2245_v5 = vadd.f32 1.0, %v4522_v10  ;;  %v5732_v11 = vmul.f32 0.5, %v614_v43  ;;  %v618_v56 = vadd.f32 %v617_v47, %v5479_v37  ;;  %v619_v57 = vpop.f32.mrb[39].mxu0 }
 0x1c2   : > { %v2747_v60 = vadd.f32 %v2746_v32, %v2554_v40  ;;  %v2564_v51 = vmul.f32 %v2244_v50, %v5680_v44  ;;  %v5736_v6 = vmul.f32 0.5, %v616_v34  ;;  %v620_v54 = vadd.f32 %v619_v57, %v5488_v38 }
 0x1c3   : > { %v2784_v7 = vadd.f32 %v2783_v8, %v2555_v53  ;;  %v2565_v1 = vmul.f32 %v2245_v5, %v5687_v33  ;;  %4531 = vtanh.f32 %v5732_v11  ;;  %v5741_v2 = vmul.f32 0.5, %v618_v56  ;;  %4109 = vmatmul.mubr.msk.bf16.gmra.mrb[88].mxu1 %vm409_vm1, %v5339_v49  ;;  %4128 = vmatmul.mubr.msk.bf16.gmra.mrb[144].mxu0 %vm409_vm1, %v5349_v55 }
 0x1c4   : > { %v2748_v31 = vadd.f32 %v2747_v60, %v2564_v51  ;;  %4533 = vtanh.f32 %v5736_v6  ;;  %v5748_v44 = vmul.f32 0.5, %v620_v54  ;;  %1150 = vmatprep.mubr.bf16.mxu1 %v5168_v22  ;;  %1363 = vmatprep.mubr.bf16.mxu0 %v5168_v22 }
 0x1c5   : > { %v4524_v33 = vpop.eup %4523  ;;  %v2785_v13 = vadd.f32 %v2784_v7, %v2565_v1  ;;  %4535 = vtanh.f32 %v5741_v2 }
 0x1c6   : > { %v4526_v24 = vpop.eup %4525  ;;  %v2254_v15 = vadd.f32 1.0, %v4524_v33  ;;  %4537 = vtanh.f32 %v5748_v44  ;;  %v623_v49 = vpop.f32.mrb[40].mxu0 }
 0x1c7   : > { %v4528_v27 = vpop.eup %4527  ;;  %v2255_v25 = vadd.f32 1.0, %v4526_v24  ;;  %v624_v23 = vadd.f32 %v623_v49, %v5479_v37  ;;  %v625_v32 = vpop.f32.mrb[41].mxu0 }
 0x1c8   : > { %v4530_v63 = vpop.eup %4529  ;;  %v2574_v8 = vmul.f32 %v2254_v15, %v5703_v62  ;;  %v2264_v39 = vadd.f32 1.0, %v4528_v27  ;;  %v626_v41 = vadd.f32 %v625_v32, %v5488_v38  ;;  %v627_v46 = vpop.f32.mrb[42].mxu0 }
 0x1c9   : > { %v2575_v45 = vmul.f32 %v2255_v25, %v5710_v26  ;;  %v2265_v48 = vadd.f32 1.0, %v4530_v63  ;;  %v5758_v43 = vmul.f32 0.5, %v624_v23  ;;  %v628_v59 = vadd.f32 %v627_v46, %v5479_v37  ;;  %v629_v10 = vpop.f32.mrb[43].mxu0  ;;  %v4393_v26 = vld [vmem:[%s8247_s3 + $0x78] sm:$0xff]  }
 0x1ca   : > { %v2749_v40 = vadd.f32 %v2748_v31, %v2574_v8  ;;  %v2584_v50 = vmul.f32 %v2264_v39, %v5715_v29  ;;  %v5762_v34 = vmul.f32 0.5, %v626_v41  ;;  %v630_v47 = vadd.f32 %v629_v10, %v5488_v38  ;;  %4236 = vmatprep.subr.bf16.mxu1 %v4393_v26 }
 0x1cb   : > { %v2786_v62 = vadd.f32 %v2785_v13, %v2575_v45  ;;  %v2585_v53 = vmul.f32 %v2265_v48, %v5722_v42  ;;  %4539 = vtanh.f32 %v5758_v43  ;;  %v5767_v5 = vmul.f32 0.5, %v628_v59  ;;  %4110 = vmatmul.mubr.msk.bf16.gmra.mrb[92].mxu1 %vm409_vm1, %v5344_v52  ;;  %4129 = vmatmul.mubr.msk.bf16.gmra.mrb[148].mxu0 %vm409_vm1, %v5354_v58  ;;  %v4394_v52 = vld [vmem:[%s8247_s3 + $0x38] sm:$0xff]  }
 0x1cc   : > { %v2750_v29 = vadd.f32 %v2749_v40, %v2584_v50  ;;  %4541 = vtanh.f32 %v5762_v34  ;;  %v5777_v56 = vmul.f32 0.5, %v630_v47  ;;  %1160 = vmatprep.mubr.bf16.mxu1 %v5168_v22  ;;  %1373 = vmatprep.mubr.bf16.mxu0 %v5168_v22 }
 0x1cd   : > { %v4532_v42 = vpop.eup %4531  ;;  %v2787_v57 = vadd.f32 %v2786_v62, %v2585_v53  ;;  %4543 = vtanh.f32 %v5767_v5  ;;  %4237 = vmatpush3.bf16.msra.mxu1 %v4394_v52 }
 0x1ce   : > { %v4534_v60 = vpop.eup %4533  ;;  %v2274_v51 = vadd.f32 1.0, %v4532_v42  ;;  %4545 = vtanh.f32 %v5777_v56  ;;  %v633_v54 = vpop.f32.mrb[44].mxu0 }
 0x1cf   : > { %v4536_v7 = vpop.eup %4535  ;;  %v2275_v1 = vadd.f32 1.0, %v4534_v60  ;;  %v634_v31 = vadd.f32 %v633_v54, %v5479_v37  ;;  %v635_v33 = vpop.f32.mrb[45].mxu0 }
 0x1d0   : > { %v4538_v13 = vpop.eup %4537  ;;  %v2594_v24 = vmul.f32 %v2274_v51, %v5732_v11  ;;  %v2284_v15 = vadd.f32 1.0, %v4536_v7  ;;  %v636_v49 = vadd.f32 %v635_v33, %v5488_v38  ;;  %v637_v27 = vpop.f32.mrb[46].mxu0 }
 0x1d1   : > { %v2595_v25 = vmul.f32 %v2275_v1, %v5736_v6  ;;  %v2285_v23 = vadd.f32 1.0, %v4538_v13  ;;  %v5790_v32 = vmul.f32 0.5, %v634_v31  ;;  %v638_v63 = vadd.f32 %v637_v27, %v5479_v37  ;;  %v639_v8 = vpop.f32.mrb[47].mxu0 }
 0x1d2   : > { %v2751_v39 = vadd.f32 %v2750_v29, %v2594_v24  ;;  %v2604_v41 = vmul.f32 %v2284_v15, %v5741_v2  ;;  %v5794_v46 = vmul.f32 0.5, %v636_v49  ;;  %v640_v45 = vadd.f32 %v639_v8, %v5488_v38 }
 0x1d3   : > { %v2788_v11 = vadd.f32 %v2787_v57, %v2595_v25  ;;  %v2605_v48 = vmul.f32 %v2285_v23, %v5748_v44  ;;  %4547 = vtanh.f32 %v5790_v32  ;;  %v5799_v59 = vmul.f32 0.5, %v638_v63  ;;  %4111 = vmatmul.mubr.msk.bf16.gmra.mrb[96].mxu1 %vm409_vm1, %v5349_v55  ;;  %4130 = vmatmul.mubr.msk.bf16.gmra.mrb[152].mxu0 %vm409_vm1, %v5359_v61 }
 0x1d4   : > { %v2752_v6 = vadd.f32 %v2751_v39, %v2604_v41  ;;  %4549 = vtanh.f32 %v5794_v46  ;;  %v5806_v2 = vmul.f32 0.5, %v640_v45  ;;  %1170 = vmatprep.mubr.bf16.mxu1 %v5168_v22  ;;  %1383 = vmatprep.mubr.bf16.mxu0 %v5168_v22 }
 0x1d5   : > { %v4540_v44 = vpop.eup %4539  ;;  %v2789_v10 = vadd.f32 %v2788_v11, %v2605_v48  ;;  %4551 = vtanh.f32 %v5799_v59 }
 0x1d6   : > { %v4542_v40 = vpop.eup %4541  ;;  %v2294_v50 = vadd.f32 1.0, %v4540_v44  ;;  %4553 = vtanh.f32 %v5806_v2  ;;  %v643_v55 = vpop.f32.mrb[48].mxu0 }
 0x1d7   : > { %v4544_v47 = vpop.eup %4543  ;;  %v2295_v62 = vadd.f32 1.0, %v4542_v40  ;;  %v644_v53 = vadd.f32 %v643_v55, %v5479_v37  ;;  %v645_v26 = vpop.f32.mrb[49].mxu0 }
 0x1d8   : > { %v4546_v29 = vpop.eup %4545  ;;  %v2614_v52 = vmul.f32 %v2294_v50, %v5758_v43  ;;  %v2304_v42 = vadd.f32 1.0, %v4544_v47  ;;  %v646_v57 = vadd.f32 %v645_v26, %v5488_v38  ;;  %v647_v60 = vpop.f32.mrb[50].mxu0 }
 0x1d9   : > { %v2615_v51 = vmul.f32 %v2295_v62, %v5762_v34  ;;  %v2305_v54 = vadd.f32 1.0, %v4546_v29  ;;  %v5816_v7 = vmul.f32 0.5, %v644_v53  ;;  %v648_v1 = vadd.f32 %v647_v60, %v5479_v37  ;;  %v649_v31 = vpop.f32.mrb[51].mxu0 }
 0x1da   : > { %v2753_v33 = vadd.f32 %v2752_v6, %v2614_v52  ;;  %v2624_v13 = vmul.f32 %v2304_v42, %v5767_v5  ;;  %v5820_v24 = vmul.f32 0.5, %v646_v57  ;;  %v650_v15 = vadd.f32 %v649_v31, %v5488_v38 }
 0x1db   : > { %v2790_v43 = vadd.f32 %v2789_v10, %v2615_v51  ;;  %v2625_v49 = vmul.f32 %v2305_v54, %v5777_v56  ;;  %4555 = vtanh.f32 %v5816_v7  ;;  %v5825_v27 = vmul.f32 0.5, %v648_v1  ;;  %4112 = vmatmul.mubr.msk.bf16.gmra.mrb[100].mxu1 %vm409_vm1, %v5354_v58  ;;  %4131 = vmatmul.mubr.msk.bf16.gmra.mrb[156].mxu0 %vm409_vm1, %v5364_v0 }
 0x1dc   : > { %v2754_v34 = vadd.f32 %v2753_v33, %v2624_v13  ;;  %4557 = vtanh.f32 %v5820_v24  ;;  %v5832_v5 = vmul.f32 0.5, %v650_v15  ;;  %1180 = vmatprep.mubr.bf16.mxu1 %v5168_v22  ;;  %1393 = vmatprep.mubr.bf16.mxu0 %v5168_v22 }
 0x1dd   : > { %v4548_v56 = vpop.eup %4547  ;;  %v2791_v25 = vadd.f32 %v2790_v43, %v2625_v49  ;;  %4559 = vtanh.f32 %v5825_v27 }
 0x1de   : > { %v4550_v23 = vpop.eup %4549  ;;  %v2314_v63 = vadd.f32 1.0, %v4548_v56  ;;  %4561 = vtanh.f32 %v5832_v5  ;;  %v653_v58 = vpop.f32.mrb[52].mxu0 }
 0x1df   : > { %v4552_v8 = vpop.eup %4551  ;;  %v2315_v39 = vadd.f32 1.0, %v4550_v23  ;;  %v654_v41 = vadd.f32 %v653_v58, %v5479_v37  ;;  %v655_v45 = vpop.f32.mrb[53].mxu0 }
 0x1e0   : > { %v4554_v11 = vpop.eup %4553  ;;  %v2634_v48 = vmul.f32 %v2314_v63, %v5790_v32  ;;  %v2324_v6 = vadd.f32 1.0, %v4552_v8  ;;  %v656_v44 = vadd.f32 %v655_v45, %v5488_v38  ;;  %v657_v10 = vpop.f32.mrb[54].mxu0  ;;  %v311_v32 = vld [vmem:[%s8246_s2 + $0x8] sm:$0x3] }
 0x1e1   : > { %v2635_v40 = vmul.f32 %v2315_v39, %v5794_v46  ;;  %v2325_v50 = vadd.f32 1.0, %v4554_v11  ;;  %v5842_v55 = vmul.f32 0.5, %v654_v41  ;;  %v658_v47 = vadd.f32 %v657_v10, %v5479_v37  ;;  %v659_v62 = vpop.f32.mrb[55].mxu0 }
 0x1e2   : > { %v2755_v53 = vadd.f32 %v2754_v34, %v2634_v48  ;;  %v2644_v26 = vmul.f32 %v2324_v6, %v5799_v59  ;;  %v5846_v29 = vmul.f32 0.5, %v656_v44  ;;  %v660_v52 = vadd.f32 %v659_v62, %v5488_v38 }
 0x1e3   : > { %v2792_v42 = vadd.f32 %v2791_v25, %v2635_v40  ;;  %v2645_v46 = vmul.f32 %v2325_v50, %v5806_v2  ;;  %4563 = vtanh.f32 %v5842_v55  ;;  %v5854_v57 = vmul.f32 0.5, %v658_v47  ;;  %4113 = vmatmul.mubr.msk.bf16.gmra.mrb[104].mxu1 %vm409_vm1, %v5359_v61  ;;  %4132 = vmatmul.mubr.msk.bf16.gmra.mrb[160].mxu0 %vm409_vm1, %v5369_v4 }
 0x1e4   : > { %v2756_v59 = vadd.f32 %v2755_v53, %v2644_v26  ;;  %4565 = vtanh.f32 %v5846_v29  ;;  %v5861_v60 = vmul.f32 0.5, %v660_v52  ;;  %1190 = vmatprep.mubr.bf16.mxu1 %v5168_v22  ;;  %1403 = vmatprep.mubr.bf16.mxu0 %v5168_v22  ;;  %v5868_v61 = vrot.slane %v311_v32, %v316_v35 }
 0x1e5   : > { %v4556_v2 = vpop.eup %4555  ;;  %v2793_v51 = vadd.f32 %v2792_v42, %v2645_v46  ;;  %4567 = vtanh.f32 %v5854_v57  ;;  %v5873_v15 = vrot.slane %v311_v32, %v320_v36 }
 0x1e6   : > { %v4558_v54 = vpop.eup %4557  ;;  %8259 = vst [vmem:[#allocation7_spill] sm:$0xff] %v5868_v61  ;;  %v2334_v1 = vadd.f32 1.0, %v4556_v2  ;;  %4569 = vtanh.f32 %v5861_v60  ;;  %v663_v31 = vpop.f32.mrb[0].mxu1 }
 0x1e7   : > { %v909_v33 = vpop.f32.mrb[56].mxu0  ;;  %v4560_v13 = vpop.eup %4559  ;;  %8260 = vst [vmem:[#allocation8_spill] sm:$0xff] %v5873_v15  ;;  %v2335_v43 = vadd.f32 1.0, %v4558_v54  ;;  %v664_v49 = vadd.f32 %v663_v31, %v5479_v37 }
 0x1e8   : > { %v910_v34 = vadd.f32 %v909_v33, %v5279_v17  ;;  %v665_v56 = vpop.f32.mrb[1].mxu1  ;;  %v911_v25 = vpop.f32.mrb[57].mxu0  ;;  %v2654_v35 = vmul.f32 %v2334_v1, %v5816_v7  ;;  %v2344_v63 = vadd.f32 1.0, %v4560_v13 }
 0x1e9   : > { %v4562_v23 = vpop.eup %4561  ;;  %v666_v58 = vadd.f32 %v665_v56, %v5488_v38  ;;  %v912_v8 = vadd.f32 %v911_v25, %v5282_v18  ;;  %v667_v39 = vpop.f32.mrb[2].mxu1  ;;  %v2655_v3 = vmul.f32 %v2335_v43, %v5820_v24  ;;  %v5881_v45 = vmul.f32 0.5, %v664_v49 }
 0x1ea   : > { %v913_v41 = vpop.f32.mrb[58].mxu0  ;;  %v2345_v36 = vadd.f32 1.0, %v4562_v23  ;;  %v5883_v11 = vmul.f32 0.5, %v910_v34  ;;  %v669_v48 = vpop.f32.mrb[3].mxu1  ;;  %v2757_v44 = vadd.f32 %v2756_v59, %v2654_v35  ;;  %v2664_v10 = vmul.f32 %v2344_v63, %v5825_v27 }
 0x1eb   : > { %v915_v6 = vpop.f32.mrb[59].mxu0  ;;  %v5886_v7 = vmul.f32 0.5, %v666_v58  ;;  %v5888_v40 = vmul.f32 0.5, %v912_v8  ;;  %v2794_v50 = vadd.f32 %v2793_v51, %v2655_v3  ;;  %4571 = vtanh.f32 %v5881_v45  ;;  %4114 = vmatmul.mubr.msk.bf16.gmra.mrb[108].mxu1 %vm409_vm1, %v5364_v0  ;;  %4133 = vmatmul.mubr.msk.bf16.gmra.mrb[164].mxu0 %vm409_vm1, %v5374_v9 }
 0x1ec   : > { %v2665_v47 = vmul.f32 %v2345_v36, %v5832_v5  ;;  %v668_v24 = vadd.f32 %v667_v39, %v5479_v37  ;;  %v2758_v62 = vadd.f32 %v2757_v44, %v2664_v10  ;;  %4573 = vtanh.f32 %v5883_v11  ;;  %1200 = vmatprep.mubr.bf16.mxu1 %v5168_v22  ;;  %1413 = vmatprep.mubr.bf16.mxu0 %v5168_v22 }
 0x1ed   : > { %v914_v27 = vadd.f32 %v913_v41, %v5279_v17  ;;  %v670_v53 = vadd.f32 %v669_v48, %v5488_v38  ;;  %v4564_v5 = vpop.eup %4563  ;;  %4575 = vtanh.f32 %v5886_v7  ;;  %v916_v0 = vadd.f32 %v915_v6, %v5282_v18 }
 0x1ee   : > { %v2795_v26 = vadd.f32 %v2794_v50, %v2665_v47  ;;  %v5903_v52 = vmul.f32 0.5, %v668_v24  ;;  %v4566_v32 = vpop.eup %4565  ;;  %v2354_v42 = vadd.f32 1.0, %v4564_v5  ;;  %4577 = vtanh.f32 %v5888_v40  ;;  %v673_v2 = vpop.f32.mrb[4].mxu1 }
 0x1ef   : > { %v5907_v46 = vmul.f32 0.5, %v914_v27  ;;  %v5909_v59 = vmul.f32 0.5, %v670_v53  ;;  %v919_v51 = vpop.f32.mrb[60].mxu0  ;;  %v4568_v54 = vpop.eup %4567  ;;  %v2355_v1 = vadd.f32 1.0, %v4566_v32  ;;  %v5912_v31 = vmul.f32 0.5, %v916_v0 }
 0x1f0   : > { %4579 = vtanh.f32 %v5903_v52  ;;  %v674_v33 = vadd.f32 %v673_v2, %v5479_v37  ;;  %v675_v13 = vpop.f32.mrb[5].mxu1  ;;  %v921_v43 = vpop.f32.mrb[61].mxu0  ;;  %v2674_v34 = vmul.f32 %v2354_v42, %v5842_v55  ;;  %v2364_v56 = vadd.f32 1.0, %v4568_v54 }
 0x1f1   : > { %v4570_v49 = vpop.eup %4569  ;;  %4581 = vtanh.f32 %v5907_v46  ;;  %v920_v25 = vadd.f32 %v919_v51, %v5279_v17  ;;  %v677_v23 = vpop.f32.mrb[6].mxu1  ;;  %v2675_v63 = vmul.f32 %v2355_v1, %v5846_v29  ;;  %v676_v29 = vadd.f32 %v675_v13, %v5488_v38 }
 0x1f2   : > { %v923_v35 = vpop.f32.mrb[62].mxu0  ;;  %v2365_v58 = vadd.f32 1.0, %v4570_v49  ;;  %4583 = vtanh.f32 %v5909_v59  ;;  %v5920_v8 = vmul.f32 0.5, %v674_v33  ;;  %v679_v39 = vpop.f32.mrb[7].mxu1  ;;  %v2759_v3 = vadd.f32 %v2758_v62, %v2674_v34 }
 0x1f3   : > { %v925_v41 = vpop.f32.mrb[63].mxu0  ;;  %v2684_v36 = vmul.f32 %v2364_v56, %v5854_v57  ;;  %4585 = vtanh.f32 %v5912_v31  ;;  %v5924_v55 = vmul.f32 0.5, %v920_v25  ;;  %v2796_v48 = vadd.f32 %v2795_v26, %v2675_v63  ;;  %4115 = vmatmul.mubr.msk.bf16.gmra.mrb[112].mxu1 %vm409_vm1, %v5369_v4  ;;  %4134 = vmatmul.mubr.msk.bf16.gmra.mrb[168].mxu0 %vm409_vm1, %v5379_v12 }
 0x1f4   : > { %v2685_v6 = vmul.f32 %v2365_v58, %v5861_v60  ;;  %4587 = vtanh.f32 %v5920_v8  ;;  %v922_v57 = vadd.f32 %v921_v43, %v5282_v18  ;;  %v678_v10 = vadd.f32 %v677_v23, %v5479_v37  ;;  %1210 = vmatprep.mubr.bf16.mxu1 %v5168_v22  ;;  %1423 = vmatprep.mubr.bf16.mxu0 %v5168_v22 }
 0x1f5   : > { %v2760_v44 = vadd.f32 %v2759_v3, %v2684_v36  ;;  %4589 = vtanh.f32 %v5924_v55  ;;  %v4572_v60 = vpop.eup %4571  ;;  %v5938_v47 = vmul.f32 0.5, %v676_v29  ;;  %v924_v4 = vadd.f32 %v923_v35, %v5279_v17 }
 0x1f6   : > { %v2797_v50 = vadd.f32 %v2796_v48, %v2685_v6  ;;  %v680_v24 = vadd.f32 %v679_v39, %v5488_v38  ;;  %v4574_v62 = vpop.eup %4573  ;;  %v2374_v27 = vadd.f32 1.0, %v4572_v60  ;;  %v5942_v53 = vmul.f32 0.5, %v922_v57  ;;  %v716_v26 = vpop.f32.mrb[8].mxu1 }
 0x1f7   : > { %v5944_v5 = vmul.f32 0.5, %v678_v10  ;;  %v926_v37 = vadd.f32 %v925_v41, %v5282_v18  ;;  %v929_v0 = vpop.f32.mrb[64].mxu0  ;;  %v4576_v32 = vpop.eup %4575  ;;  %v2098_v42 = vadd.f32 1.0, %v4574_v62  ;;  %4591 = vtanh.f32 %v5938_v47 }
 0x1f8   : > { %v5948_v2 = vmul.f32 0.5, %v924_v4  ;;  %v5950_v51 = vmul.f32 0.5, %v680_v24  ;;  %v718_v54 = vpop.f32.mrb[9].mxu1  ;;  %v931_v38 = vpop.f32.mrb[65].mxu0  ;;  %v2694_v33 = vmul.f32 %v2374_v27, %v5881_v45  ;;  %v2375_v13 = vadd.f32 1.0, %v4576_v32 }
 0x1f9   : > { %v4578_v1 = vpop.eup %4577  ;;  %4593 = vtanh.f32 %v5942_v53  ;;  %v5954_v43 = vmul.f32 0.5, %v926_v37  ;;  %v720_v49 = vpop.f32.mrb[10].mxu1  ;;  %v2418_v25 = vmul.f32 %v2098_v42, %v5883_v11  ;;  %v717_v35 = vadd.f32 %v716_v26, %v5272_v14 }
 0x1fa   : > { %v5956_v34 = vpop.f32.mrb[66].mxu0  ;;  %v4580_v56 = vpop.eup %4579  ;;  %v2099_v23 = vadd.f32 1.0, %v4578_v1  ;;  %4595 = vtanh.f32 %v5944_v5  ;;  %v2761_v39 = vadd.f32 %v2760_v44, %v2694_v33  ;;  %v2695_v41 = vmul.f32 %v2375_v13, %v5886_v7 }
 0x1fb   : > { %v5961_v63 = vpop.f32.mrb[11].mxu1  ;;  %v5963_v58 = vpop.f32.mrb[67].mxu0  ;;  %v2384_v3 = vadd.f32 1.0, %v4580_v56  ;;  %4597 = vtanh.f32 %v5948_v2  ;;  %v5969_v6 = vmul.f32 0.5, %v717_v35  ;;  %4116 = vmatmul.mubr.msk.bf16.gmra.mrb[116].mxu1 %vm409_vm1, %v5374_v9  ;;  %4135 = vmatmul.mubr.msk.bf16.gmra.mrb[172].mxu0 %vm409_vm1, %v5384_v21  ;;  %v930_v9 = vadd.f32 %v929_v0, %v5279_v17 }
 0x1fc   : > { %v4582_v45 = vpop.eup %4581  ;;  %v2419_v48 = vmul.f32 %v2099_v23, %v5888_v40  ;;  %4599 = vtanh.f32 %v5950_v51  ;;  %v2798_v44 = vadd.f32 %v2797_v50, %v2695_v41  ;;  %1220 = vmatprep.mubr.bf16.mxu1 %v5168_v22  ;;  %1433 = vmatprep.mubr.bf16.mxu0 %v5168_v22  ;;  %v719_v62 = vadd.f32 %v718_v54, %v5276_v16 }
 0x1fd   : > { %v4584_v36 = vpop.eup %4583  ;;  %v2108_v11 = vadd.f32 1.0, %v4582_v45  ;;  %v2704_v7 = vmul.f32 %v2384_v3, %v5903_v52  ;;  %4601 = vtanh.f32 %v5954_v43  ;;  %v5989_v42 = vmul.f32 0.5, %v930_v9 }
 0x1fe   : > { %v4586_v29 = vpop.eup %4585  ;;  %v2385_v57 = vadd.f32 1.0, %v4584_v36  ;;  %4603 = vtanh.f32 %v5969_v6  ;;  %v5984_v27 = vpop.f32.mrb[12].mxu1  ;;  %v5996_v13 = vmul.f32 0.5, %v719_v62  ;;  %v932_v54 = vadd.f32 %v931_v38, %v5282_v18 }
 0x1ff   : > { %v4588_v40 = vpop.eup %4587  ;;  %v2428_v10 = vmul.f32 %v2108_v11, %v5907_v46  ;;  %v2109_v60 = vadd.f32 1.0, %v4586_v29  ;;  %v2762_v24 = vadd.f32 %v2761_v39, %v2704_v7  ;;  %v5986_v37 = vpop.f32.mrb[68].mxu0  ;;  %4605 = vtanh.f32 %v5989_v42 }
 0x200   : > { %v4590_v4 = vpop.eup %4589  ;;  %v2705_v50 = vmul.f32 %v2385_v57, %v5909_v59  ;;  %v2394_v52 = vadd.f32 1.0, %v4588_v40  ;;  %v5991_v1 = vpop.f32.mrb[13].mxu1  ;;  %v721_v45 = vadd.f32 %v720_v49, %v5272_v14  ;;  %4607 = vtanh.f32 %v5996_v13 }
 0x201   : > { %v2882_v26 = vadd.f32 %v2428_v10, %v2418_v25  ;;  %v2429_v32 = vmul.f32 %v2109_v60, %v5912_v31  ;;  %v2118_v46 = vadd.f32 1.0, %v4590_v4  ;;  %v5993_v0 = vpop.f32.mrb[69].mxu0  ;;  %v5999_v56 = vpop.f32.mrb[14].mxu1  ;;  %v6011_v38 = vmul.f32 0.5, %v932_v54 }
 0x202   : > { %v2799_v33 = vadd.f32 %v2798_v44, %v2705_v50  ;;  %v2714_v59 = vmul.f32 %v2394_v52, %v5920_v8  ;;  %v6001_v23 = vpop.f32.mrb[70].mxu0  ;;  %v4592_v25 = vpop.eup %4591  ;;  %v6013_v44 = vmul.f32 0.5, %v721_v45  ;;  %v723_v40 = vadd.f32 %v5961_v63, %v5276_v16 }
 0x203   : > { %v2919_v31 = vadd.f32 %v2429_v32, %v2419_v48  ;;  %v2438_v35 = vmul.f32 %v2118_v46, %v5924_v55  ;;  %v6006_v39 = vpop.f32.mrb[15].mxu1  ;;  %v6008_v41 = vpop.f32.mrb[71].mxu0  ;;  %v2395_v36 = vadd.f32 1.0, %v4592_v25  ;;  %v934_v55 = vadd.f32 %v5956_v34, %v5279_v17  ;;  %4117 = vmatmul.mubr.msk.bf16.gmra.mrb[120].mxu1 %vm409_vm1, %v5379_v12  ;;  %4136 = vmatmul.mubr.msk.bf16.gmra.mrb[176].mxu0 %vm409_vm1, %v5392_v28 }
 0x204   : > { %v4594_v8 = vpop.eup %4593  ;;  %v2763_v3 = vadd.f32 %v2762_v24, %v2714_v59  ;;  %4609 = vtanh.f32 %v6011_v38  ;;  %1230 = vmatprep.mubr.bf16.mxu1 %v5168_v22  ;;  %1443 = vmatprep.mubr.bf16.mxu0 %v5168_v22  ;;  %v6032_v50 = vmul.f32 0.5, %v723_v40  ;;  %v936_v45 = vadd.f32 %v5963_v58, %v5282_v18 }
 0x205   : > { %v4596_v11 = vpop.eup %4595  ;;  %v2883_v29 = vadd.f32 %v2882_v26, %v2438_v35  ;;  %v2119_v48 = vadd.f32 1.0, %v4594_v8  ;;  %v2715_v7 = vmul.f32 %v2395_v36, %v5938_v47  ;;  %4611 = vtanh.f32 %v6013_v44 }
 0x206   : > { %v4598_v49 = vpop.eup %4597  ;;  %v2404_v57 = vadd.f32 1.0, %v4596_v11  ;;  %v6029_v60 = vmul.f32 0.5, %v934_v55  ;;  %v6034_v63 = vpop.f32.mrb[16].mxu1  ;;  %v727_v8 = vadd.f32 %v5984_v27, %v5272_v14  ;;  %v940_v55 = vadd.f32 %v5986_v37, %v5279_v17 }
 0x207   : > { %v4600_v34 = vpop.eup %4599  ;;  %v2439_v10 = vmul.f32 %v2119_v48, %v5942_v53  ;;  %v2128_v12 = vadd.f32 1.0, %v4598_v49  ;;  %v2800_v47 = vadd.f32 %v2799_v33, %v2715_v7  ;;  %v6036_v52 = vpop.f32.mrb[72].mxu0  ;;  %v729_v58 = vadd.f32 %v5991_v1, %v5276_v16 }
 0x208   : > { %v4602_v9 = vpop.eup %4601  ;;  %v2724_v4 = vmul.f32 %v2404_v57, %v5944_v5  ;;  %v2405_v24 = vadd.f32 1.0, %v4600_v34  ;;  %4613 = vtanh.f32 %v6029_v60  ;;  %v6040_v46 = vpop.f32.mrb[17].mxu1  ;;  %v6064_v7 = vmul.f32 0.5, %v727_v8 }
 0x209   : > { %v4604_v62 = vpop.eup %4603  ;;  %v2920_v26 = vadd.f32 %v2919_v31, %v2439_v10  ;;  %v2448_v53 = vmul.f32 %v2128_v12, %v5948_v2  ;;  %v2129_v32 = vadd.f32 1.0, %v4602_v9  ;;  %v6042_v59 = vpop.f32.mrb[73].mxu0  ;;  %4615 = vtanh.f32 %v6032_v50 }
 0x20a   : > { %v2764_v33 = vadd.f32 %v2763_v3, %v2724_v4  ;;  %v2725_v5 = vmul.f32 %v2405_v24, %v5950_v51  ;;  %v2096_v54 = vadd.f32 1.0, %v4604_v62  ;;  %v6046_v25 = vpop.f32.mrb[18].mxu1  ;;  %v6048_v35 = vpop.f32.mrb[74].mxu0  ;;  %v6072_v37 = vmul.f32 0.5, %v940_v55 }
 0x20b   : > { %v2884_v31 = vadd.f32 %v2883_v29, %v2448_v53  ;;  %v2449_v2 = vmul.f32 %v2129_v32, %v5954_v43  ;;  %v6055_v36 = vpop.f32.mrb[19].mxu1  ;;  %v6057_v3 = vpop.f32.mrb[75].mxu0  ;;  %v6062_v43 = vmul.f32 0.5, %v936_v45  ;;  %4118 = vmatmul.mubr.msk.bf16.gmra.mrb[124].mxu1 %vm409_vm1, %v5384_v21  ;;  %4137 = vmatmul.mubr.msk.bf16.gmra.mrb[180].mxu0 %vm409_vm1, %v5405_v30  ;;  %v6076_v10 = vmul.f32 0.5, %v729_v58 }
 0x20c   : > { %v2765_v51 = vrot.slane %v2764_v33, 4  ;;  %v2801_v11 = vadd.f32 %v2800_v47, %v2725_v5  ;;  %v2416_v48 = vmul.f32 %v2096_v54, %v5969_v6  ;;  %v4606_v29 = vpop.eup %4605  ;;  %1240 = vmatprep.mubr.bf16.mxu1 %v5168_v22  ;;  %v942_v1 = vadd.f32 %v5993_v0, %v5282_v18 }
 0x20d   : > { %v2921_v49 = vadd.f32 %v2920_v26, %v2449_v2  ;;  %v4608_v27 = vpop.eup %4607  ;;  %v2138_v40 = vadd.f32 1.0, %v4606_v29  ;;  %4617 = vtanh.f32 %v6062_v43 }
 0x20e   : > { %v2766_v6 = vadd.f32 %v2765_v51, %v2764_v33  ;;  %v2802_v57 = vrot.slane %v2801_v11, 4  ;;  %v2097_v34 = vadd.f32 1.0, %v4608_v27  ;;  %v4610_v21 = vpop.eup %4609  ;;  %4619 = vtanh.f32 %v6064_v7  ;;  %v6084_v4 = vpop.f32.mrb[20].mxu1 }
 0x20f   : > { %v2458_v47 = vmul.f32 %v2138_v40, %v5989_v42  ;;  %v6086_v24 = vpop.f32.mrb[76].mxu0  ;;  %v4612_v62 = vpop.eup %4611  ;;  %v2139_v53 = vadd.f32 1.0, %v4610_v21  ;;  %4621 = vtanh.f32 %v6072_v37  ;;  %v6090_v32 = vmul.f32 0.5, %v942_v1 }
 0x210   : > { %v2767_v12 = vrot.slane %v2766_v6, 2  ;;  %v6080_v9 = vadd.f32 %v2802_v57, %v2801_v11  ;;  %v2417_v26 = vmul.f32 %v2097_v34, %v5996_v13  ;;  %v6092_v0 = vpop.f32.mrb[21].mxu1  ;;  %v6094_v33 = vpop.f32.mrb[77].mxu0  ;;  %v2106_v54 = vadd.f32 1.0, %v4612_v62 }
 0x211   : > { %v2885_v42 = vadd.f32 %v2884_v31, %v2458_v47  ;;  %4623 = vtanh.f32 %v6076_v10  ;;  %v6097_v2 = vpop.f32.mrb[22].mxu1  ;;  %v6099_v45 = vpop.f32.mrb[78].mxu0  ;;  %v2459_v13 = vmul.f32 %v2139_v53, %v6011_v38  ;;  %v731_v51 = vadd.f32 %v5999_v56, %v5272_v14 }
 0x212   : > { %v2768_v5 = vadd.f32 %v2767_v12, %v2766_v6  ;;  %v4614_v8 = vpop.eup %4613  ;;  %4625 = vtanh.f32 %v6090_v32  ;;  %v944_v11 = vadd.f32 %v6001_v23, %v5279_v17  ;;  %v6107_v55 = vpop.f32.mrb[23].mxu1  ;;  %v2426_v27 = vmul.f32 %v2106_v54, %v6013_v44 }
 0x213   : > { %v6109_v31 = vpop.f32.mrb[79].mxu0  ;;  %v4616_v29 = vpop.eup %4615  ;;  %v2148_v6 = vadd.f32 1.0, %v4614_v8  ;;  %v733_v38 = vadd.f32 %v6006_v39, %v5276_v16  ;;  %v2922_v57 = vadd.f32 %v2921_v49, %v2459_v13  ;;  %v6114_v34 = vmul.f32 0.5, %v731_v51  ;;  %4119 = vmatmul.mubr.msk.bf16.gmra.mrb[128].mxu1 %vm409_vm1, %v5392_v28 }
 0x214   : > { %v2769_v58 = vrot.slane %v2768_v5, 1  ;;  %v2107_v40 = vadd.f32 1.0, %v4616_v29  ;;  %v6116_v56 = vmul.f32 0.5, %v944_v11  ;;  %v2808_v1 = vadd.f32 %v2426_v27, %v2416_v48  ;;  %1250 = vmatprep.mubr.bf16.mxu1 %v5168_v22 }
 0x215   : > { %v2468_v21 = vmul.f32 %v2148_v6, %v6029_v60  ;;  %v6121_v12 = vmul.f32 0.5, %v733_v38  ;;  %4627 = vtanh.f32 %v6114_v34  ;;  %v946_v39 = vadd.f32 %v6008_v41, %v5282_v18 }
 0x216   : > { %v2770_v23 = vadd.f32 %v2769_v58, %v2768_v5  ;;  %v2427_v44 = vmul.f32 %v2107_v40, %v6032_v50  ;;  %v737_v49 = vadd.f32 %v6034_v63, %v5272_v14  ;;  %4629 = vtanh.f32 %v6116_v56  ;;  %v6135_v48 = vpop.f32.mrb[24].mxu1  ;;  %v6137_v22 = vpop.f32.mrb[80].mxu0 }
 0x217   : > { %v2886_v28 = vadd.f32 %v2885_v42, %v2468_v21  ;;  %v950_v60 = vadd.f32 %v6036_v52, %v5279_v17  ;;  %v4618_v50 = vpop.eup %4617  ;;  %4631 = vtanh.f32 %v6121_v12  ;;  %v6140_v41 = vmul.f32 0.5, %v946_v39  ;;  %v6144_v63 = vpop.f32.mrb[25].mxu1 }
 0x218   : > { %v6130_v47 = vmul.f32 0.00390625, %v2770_v23  ;;  %v2845_v62 = vadd.f32 %v2427_v44, %v2417_v26  ;;  %v6142_v53 = vmul.f32 0.5, %v737_v49  ;;  %v6146_v5 = vpop.f32.mrb[81].mxu0  ;;  %v4620_v42 = vpop.eup %4619  ;;  %v2149_v54 = vadd.f32 1.0, %v4618_v50 }
 0x219   : > { %v6148_v8 = vmul.f32 0.5, %v950_v60  ;;  %v739_v52 = vadd.f32 %v6040_v46, %v5276_v16  ;;  %v952_v26 = vadd.f32 %v6042_v59, %v5282_v18  ;;  %v6154_v13 = vpop.f32.mrb[26].mxu1  ;;  %v6156_v51 = vpop.f32.mrb[82].mxu0  ;;  %v2116_v29 = vadd.f32 1.0, %v4620_v42 }
 0x21a   : > { %v4622_v11 = vpop.eup %4621  ;;  %4633 = vtanh.f32 %v6140_v41  ;;  %v741_v58 = vadd.f32 %v6046_v25, %v5272_v14  ;;  %v954_v27 = vadd.f32 %v6048_v35, %v5279_v17  ;;  %v6163_v6 = vpop.f32.mrb[27].mxu1  ;;  %v2469_v59 = vmul.f32 %v2149_v54, %v6062_v43 }
 0x21b   : > { %v6165_v46 = vpop.f32.mrb[83].mxu0  ;;  %v4624_v38 = vpop.eup %4623  ;;  %v2158_v40 = vadd.f32 1.0, %v4622_v11  ;;  %4635 = vtanh.f32 %v6142_v53  ;;  %v6169_v23 = vmul.f32 0.5, %v739_v52  ;;  %v2436_v44 = vmul.f32 %v2116_v29, %v6064_v7  ;;  %4120 = vmatmul.mubr.msk.bf16.gmra.mrb[132].mxu1 %vm409_vm1, %v5405_v30 }
 0x21c   : > { %v4626_v21 = vpop.eup %4625  ;;  %v2117_v39 = vadd.f32 1.0, %v4624_v38  ;;  %4637 = vtanh.f32 %v6148_v8  ;;  %v6173_v25 = vmul.f32 0.5, %v952_v26  ;;  %v2923_v35 = vadd.f32 %v2922_v57, %v2469_v59 }
 0x21d   : > { %v2478_v49 = vmul.f32 %v2158_v40, %v6072_v37  ;;  %v2159_v43 = vadd.f32 1.0, %v4626_v21  ;;  %4639 = vtanh.f32 %v6169_v23  ;;  %v2809_v60 = vadd.f32 %v2808_v1, %v2436_v44 }
 0x21e   : > { %v2437_v50 = vmul.f32 %v2117_v39, %v6076_v10  ;;  %4641 = vtanh.f32 %v6173_v25  ;;  %v6181_v7 = vmul.f32 0.5, %v741_v58  ;;  %v6184_v52 = vmul.f32 0.5, %v954_v27  ;;  %v6188_v57 = vpop.f32.mrb[28].mxu1  ;;  %v6190_v37 = vpop.f32.mrb[84].mxu0 }
 0x21f   : > { %v2887_v42 = vadd.f32 %v2886_v28, %v2478_v49  ;;  %v2479_v54 = vmul.f32 %v2159_v43, %v6090_v32  ;;  %v743_v30 = vadd.f32 %v6055_v36, %v5276_v16  ;;  %v4628_v26 = vpop.eup %4627  ;;  %v956_v10 = vadd.f32 %v6057_v3, %v5282_v18  ;;  %v6197_v32 = vpop.f32.mrb[29].mxu1 }
 0x220   : > { %v2846_v1 = vadd.f32 %v2845_v62, %v2437_v50  ;;  %4643 = vtanh.f32 %v6181_v7  ;;  %v747_v28 = vadd.f32 %v6084_v4, %v5272_v14  ;;  %v6199_v11 = vpop.f32.mrb[85].mxu0  ;;  %v4630_v29 = vpop.eup %4629  ;;  %v2126_v58 = vadd.f32 1.0, %v4628_v26 }
 0x221   : > { %v2924_v36 = vadd.f32 %v2923_v35, %v2479_v54  ;;  %4645 = vtanh.f32 %v6184_v52  ;;  %v6202_v27 = vmul.f32 0.5, %v743_v30  ;;  %v6204_v62 = vpop.f32.mrb[30].mxu1  ;;  %v6206_v38 = vpop.f32.mrb[86].mxu0  ;;  %v2168_v3 = vadd.f32 1.0, %v4630_v29 }
 0x222   : > { %v4632_v59 = vpop.eup %4631  ;;  %v6208_v40 = vmul.f32 0.5, %v956_v10  ;;  %v6210_v4 = vmul.f32 0.5, %v747_v28  ;;  %v960_v21 = vadd.f32 %v6086_v24, %v5279_v17  ;;  %v6214_v44 = vpop.f32.mrb[31].mxu1  ;;  %v2446_v35 = vmul.f32 %v2126_v58, %v6114_v34 }
 0x223   : > { %v6216_v39 = vpop.f32.mrb[87].mxu0  ;;  %v2127_v49 = vadd.f32 1.0, %v4632_v59  ;;  %4647 = vtanh.f32 %v6202_v27  ;;  %v749_v43 = vadd.f32 %v6092_v0, %v5276_v16  ;;  %v2488_v54 = vmul.f32 %v2168_v3, %v6116_v56 }
 0x224   : > { %v4634_v50 = vpop.eup %4633  ;;  %4649 = vtanh.f32 %v6208_v40  ;;  %v6224_v30 = vmul.f32 0.5, %v960_v21  ;;  %v962_v24 = vadd.f32 %v6094_v33, %v5282_v18  ;;  %v2810_v10 = vadd.f32 %v2809_v60, %v2446_v35 }
 0x225   : > { %v4636_v26 = vpop.eup %4635  ;;  %v2447_v34 = vmul.f32 %v2127_v49, %v6121_v12  ;;  %v2169_v28 = vadd.f32 1.0, %v4634_v50  ;;  %4651 = vtanh.f32 %v6210_v4  ;;  %v2888_v58 = vadd.f32 %v2887_v42, %v2488_v54 }
 0x226   : > { %v4638_v29 = vpop.eup %4637  ;;  %v2136_v0 = vadd.f32 1.0, %v4636_v26  ;;  %4653 = vtanh.f32 %v6224_v30  ;;  %v6231_v56 = vmul.f32 0.5, %v749_v43  ;;  %v6234_v33 = vmul.f32 0.5, %v962_v24  ;;  %v6236_v60 = vpop.f32.mrb[32].mxu1 }
 0x227   : > { %v4640_v59 = vpop.eup %4639  ;;  %v2847_v3 = vadd.f32 %v2846_v1, %v2447_v34  ;;  %v2489_v21 = vmul.f32 %v2169_v28, %v6140_v41  ;;  %v2178_v20 = vadd.f32 1.0, %v4638_v29  ;;  %v6238_v12 = vpop.f32.mrb[88].mxu0  ;;  %v751_v43 = vadd.f32 %v6097_v2, %v5272_v14 }
 0x228   : > { %v4642_v35 = vpop.eup %4641  ;;  %v2456_v49 = vmul.f32 %v2136_v0, %v6142_v53  ;;  %v2137_v42 = vadd.f32 1.0, %v4640_v59  ;;  %4655 = vtanh.f32 %v6231_v56  ;;  %v6244_v50 = vpop.f32.mrb[33].mxu1  ;;  %v964_v2 = vadd.f32 %v6099_v45, %v5279_v17 }
 0x229   : > { %v6246_v1 = vpop.f32.mrb[89].mxu0  ;;  %v2925_v41 = vadd.f32 %v2924_v36, %v2489_v21  ;;  %v2498_v54 = vmul.f32 %v2178_v20, %v6148_v8  ;;  %v2179_v24 = vadd.f32 1.0, %v4642_v35  ;;  %4657 = vtanh.f32 %v6234_v33  ;;  %v6250_v26 = vpop.f32.mrb[34].mxu1 }
 0x22a   : > { %v6252_v34 = vpop.f32.mrb[90].mxu0  ;;  %v4644_v53 = vpop.eup %4643  ;;  %v2811_v28 = vadd.f32 %v2810_v10, %v2456_v49  ;;  %v2457_v29 = vmul.f32 %v2137_v42, %v6169_v23  ;;  %v6255_v0 = vmul.f32 0.5, %v751_v43  ;;  %v753_v19 = vadd.f32 %v6107_v55, %v5276_v16 }
 0x22b   : > { %v6259_v59 = vpop.f32.mrb[35].mxu1  ;;  %v6261_v36 = vpop.f32.mrb[91].mxu0  ;;  %v2889_v8 = vadd.f32 %v2888_v58, %v2498_v54  ;;  %v2499_v21 = vmul.f32 %v2179_v24, %v6173_v25  ;;  %v2146_v35 = vadd.f32 1.0, %v4644_v53  ;;  %v6267_v23 = vmul.f32 0.5, %v964_v2 }
 0x22c   : > { %v4646_v20 = vpop.eup %4645  ;;  %v2848_v10 = vadd.f32 %v2847_v3, %v2457_v29  ;;  %4659 = vtanh.f32 %v6255_v0  ;;  %v6270_v15 = vmul.f32 0.5, %v753_v19  ;;  %v966_v58 = vadd.f32 %v6109_v31, %v5282_v18 }
 0x22d   : > { %v2188_v49 = vadd.f32 1.0, %v4646_v20  ;;  %v4648_v42 = vpop.eup %4647  ;;  %v2926_v45 = vadd.f32 %v2925_v41, %v2499_v21  ;;  %v2466_v43 = vmul.f32 %v2146_v35, %v6181_v7  ;;  %4661 = vtanh.f32 %v6267_v23 }
 0x22e   : > { %v4650_v25 = vpop.eup %4649  ;;  %v2147_v24 = vadd.f32 1.0, %v4648_v42  ;;  %v757_v55 = vadd.f32 %v6135_v48, %v5272_v14  ;;  %4663 = vtanh.f32 %v6270_v15  ;;  %v6279_v7 = vmul.f32 0.5, %v966_v58  ;;  %v6281_v19 = vpop.f32.mrb[36].mxu1 }
 0x22f   : > { %v2508_v54 = vmul.f32 %v2188_v49, %v6184_v52  ;;  %v4652_v3 = vpop.eup %4651  ;;  %v2812_v53 = vadd.f32 %v2811_v28, %v2466_v43  ;;  %v2189_v29 = vadd.f32 1.0, %v4650_v25  ;;  %v6283_v41 = vpop.f32.mrb[92].mxu0  ;;  %v970_v42 = vadd.f32 %v6137_v22, %v5279_v17 }
 0x230   : > { %v4654_v31 = vpop.eup %4653  ;;  %v2467_v52 = vmul.f32 %v2147_v24, %v6202_v27  ;;  %v2156_v20 = vadd.f32 1.0, %v4652_v3  ;;  %v6286_v21 = vmul.f32 0.5, %v757_v55  ;;  %v6288_v35 = vpop.f32.mrb[37].mxu1  ;;  %4665 = vtanh.f32 %v6279_v7 }
 0x231   : > { %v2890_v2 = vadd.f32 %v2889_v8, %v2508_v54  ;;  %v6290_v48 = vpop.f32.mrb[93].mxu0  ;;  %v2509_v28 = vmul.f32 %v2189_v29, %v6208_v40  ;;  %v2198_v49 = vadd.f32 1.0, %v4654_v31  ;;  %v6296_v43 = vpop.f32.mrb[38].mxu1  ;;  %v759_v54 = vadd.f32 %v6144_v63, %v5276_v16 }
 0x232   : > { %v6298_v8 = vpop.f32.mrb[94].mxu0  ;;  %v4656_v27 = vpop.eup %4655  ;;  %v2849_v58 = vadd.f32 %v2848_v10, %v2467_v52  ;;  %v2476_v25 = vmul.f32 %v2156_v20, %v6210_v4  ;;  %4667 = vtanh.f32 %v6286_v21  ;;  %v6309_v31 = vmul.f32 0.5, %v970_v42 }
 0x233   : > { %v6304_v40 = vpop.f32.mrb[39].mxu1  ;;  %v6306_v24 = vpop.f32.mrb[95].mxu0  ;;  %v2927_v3 = vadd.f32 %v2926_v45, %v2509_v28  ;;  %v2518_v22 = vmul.f32 %v2198_v49, %v6224_v30  ;;  %v2157_v29 = vadd.f32 1.0, %v4656_v27  ;;  %v6311_v52 = vmul.f32 0.5, %v759_v54 }
 0x234   : > { %v4658_v55 = vpop.eup %4657  ;;  %v2813_v61 = vadd.f32 %v2812_v53, %v2476_v25  ;;  %v972_v4 = vadd.f32 %v6146_v5, %v5282_v18  ;;  %4669 = vtanh.f32 %v6309_v31  ;;  %v761_v45 = vadd.f32 %v6154_v13, %v5272_v14 }
 0x235   : > { %v2199_v10 = vadd.f32 1.0, %v4658_v55  ;;  %v2891_v20 = vadd.f32 %v2890_v2, %v2518_v22  ;;  %v2477_v63 = vmul.f32 %v2157_v29, %v6231_v56  ;;  %4671 = vtanh.f32 %v6311_v52 }
 0x236   : > { %v4660_v28 = vpop.eup %4659  ;;  %v6321_v53 = vmul.f32 0.5, %v972_v4  ;;  %v974_v49 = vadd.f32 %v6156_v51, %v5279_v17  ;;  %v6325_v2 = vmul.f32 0.5, %v761_v45  ;;  %v763_v56 = vadd.f32 %v6163_v6, %v5276_v16  ;;  %v6329_v27 = vpop.f32.mrb[40].mxu1 }
 0x237   : > { %v2519_v30 = vmul.f32 %v2199_v10, %v6234_v33  ;;  %v2850_v42 = vadd.f32 %v2849_v58, %v2477_v63  ;;  %v2166_v5 = vadd.f32 1.0, %v4660_v28  ;;  %v6331_v13 = vpop.f32.mrb[96].mxu0  ;;  %v4662_v25 = vpop.eup %4661  ;;  %v976_v51 = vadd.f32 %v6165_v46, %v5282_v18 }
 0x238   : > { %4673 = vtanh.f32 %v6321_v53  ;;  %v6334_v54 = vmul.f32 0.5, %v974_v49  ;;  %v6338_v58 = vpop.f32.mrb[41].mxu1  ;;  %v6340_v55 = vpop.f32.mrb[97].mxu0  ;;  %v2208_v29 = vadd.f32 1.0, %v4662_v25  ;;  %v6344_v10 = vmul.f32 0.5, %v763_v56 }
 0x239   : > { %v2928_v33 = vadd.f32 %v2927_v3, %v2519_v30  ;;  %v4664_v22 = vpop.eup %4663  ;;  %v2486_v6 = vmul.f32 %v2166_v5, %v6255_v0  ;;  %4675 = vtanh.f32 %v6325_v2  ;;  %v6346_v3 = vpop.f32.mrb[42].mxu1  ;;  %v6351_v46 = vmul.f32 0.5, %v976_v51 }
 0x23a   : > { %8261 = vst [vmem:[#allocation9_spill] sm:$0xff] %v6346_v3  ;;  %v6348_v4 = vpop.f32.mrb[98].mxu0  ;;  %v2167_v63 = vadd.f32 1.0, %v4664_v22  ;;  %4677 = vtanh.f32 %v6334_v54  ;;  %v2804_v45 = vrot.slane %v6080_v9, 2  ;;  %v6354_v28 = vpop.f32.mrb[43].mxu1  ;;  %v2528_v5 = vmul.f32 %v2208_v29, %v6267_v23 }
 0x23b   : > { %8262 = vst [vmem:[#allocation10_spill] sm:$0xff] %v6348_v4  ;;  %8263 = vst [vmem:[#allocation11_spill] sm:$0xff] %v6354_v28  ;;  %v6356_v30 = vpop.f32.mrb[99].mxu0  ;;  %v4666_v0 = vpop.eup %4665  ;;  %v2814_v49 = vadd.f32 %v2813_v61, %v2486_v6  ;;  %4679 = vtanh.f32 %v6344_v10  ;;  %v767_v56 = vadd.f32 %v6188_v57, %v5272_v14  ;;  %v980_v61 = vadd.f32 %v6190_v37, %v5279_v17 }
 0x23c   : > { %8264 = vst [vmem:[#allocation12_spill] sm:$0xff] %v6356_v30  ;;  %v4668_v25 = vpop.eup %4667  ;;  %v2487_v22 = vmul.f32 %v2167_v63, %v6270_v15  ;;  %v2209_v51 = vadd.f32 1.0, %v4666_v0  ;;  %4681 = vtanh.f32 %v6351_v46  ;;  %v2805_v4 = vadd.f32 %v2804_v45, %v6080_v9 }
 0x23d   : > { %v2892_v28 = vadd.f32 %v2891_v20, %v2528_v5  ;;  %v2176_v3 = vadd.f32 1.0, %v4668_v25  ;;  %v6365_v30 = vmul.f32 0.5, %v767_v56  ;;  %v769_v57 = vadd.f32 %v6197_v32, %v5276_v16 }
 0x23e   : > { %v2851_v23 = vadd.f32 %v2850_v42, %v2487_v22  ;;  %v2529_v6 = vmul.f32 %v2209_v51, %v6279_v7  ;;  %v2806_v29 = vrot.slane %v2805_v4, 1  ;;  %v4670_v15 = vpop.eup %4669  ;;  %v6374_v9 = vmul.f32 0.5, %v980_v61  ;;  %v6378_v45 = vpop.f32.mrb[44].mxu1 }
 0x23f   : > { %v2496_v63 = vmul.f32 %v2176_v3, %v6286_v21  ;;  %4683 = vtanh.f32 %v6365_v30  ;;  %v982_v20 = vadd.f32 %v6199_v11, %v5282_v18  ;;  %v6380_v37 = vpop.f32.mrb[100].mxu0  ;;  %v4672_v42 = vpop.eup %4671  ;;  %v2218_v0 = vadd.f32 1.0, %v4670_v15 }
 0x240   : > { %v2929_v7 = vadd.f32 %v2928_v33, %v2529_v6  ;;  %v2807_v5 = vadd.f32 %v2806_v29, %v2805_v4  ;;  %v6382_v56 = vmul.f32 0.5, %v769_v57  ;;  %v6384_v32 = vpop.f32.mrb[45].mxu1  ;;  %v6386_v21 = vpop.f32.mrb[101].mxu0  ;;  %v2177_v25 = vadd.f32 1.0, %v4672_v42 }
 0x241   : > { %8265 = vst [vmem:[#allocation13_spill] sm:$0xff] %v6386_v21  ;;  %v2815_v3 = vadd.f32 %v2814_v49, %v2496_v63  ;;  %4685 = vtanh.f32 %v6374_v9  ;;  %v6389_v22 = vmul.f32 0.5, %v982_v20  ;;  %v6391_v11 = vpop.f32.mrb[46].mxu1  ;;  %v6393_v51 = vpop.f32.mrb[102].mxu0  ;;  %v2538_v33 = vmul.f32 %v2218_v0, %v6309_v31 }
 0x242   : > { %8266 = vst [vmem:[#allocation14_spill] sm:$0xff] %v6391_v11  ;;  %8267 = vst [vmem:[#allocation15_spill] sm:$0xff] %v6393_v51  ;;  %v4674_v61 = vpop.eup %4673  ;;  %v3105_v4 = vmul.f32 0.00390625, %v2807_v5  ;;  %4687 = vtanh.f32 %v6382_v56  ;;  %v771_v6 = vadd.f32 %v6204_v62, %v5272_v14  ;;  %v6399_v29 = vpop.f32.mrb[47].mxu1  ;;  %v2497_v15 = vmul.f32 %v2177_v25, %v6311_v52  ;;  %v4395_v62 = vld [vmem:[%s8247_s3 + $0xc0] sm:$0xff]  }
 0x243   : > { %8268 = vst [vmem:[#allocation16_spill] sm:$0xff] %v6399_v29  ;;  %v6401_v49 = vpop.f32.mrb[103].mxu0  ;;  %v4676_v57 = vpop.eup %4675  ;;  %v2219_v63 = vadd.f32 1.0, %v4674_v61  ;;  %4689 = vtanh.f32 %v6389_v22  ;;  %v984_v20 = vadd.f32 %v6206_v38, %v5279_v17  ;;  %v2893_v42 = vadd.f32 %v2892_v28, %v2538_v33  ;;  %4244 = vmatprep.subr.bf16.mxu1 %v4395_v62 }
 0x244   : > { %8269 = vst [vmem:[#allocation17_spill] sm:$0xff] %v6401_v49  ;;  %v4678_v31 = vpop.eup %4677  ;;  %v2186_v0 = vadd.f32 1.0, %v4676_v57  ;;  %v3115_v5 = vpack.c.bf16 %v3105_v4, %v3105_v4  ;;  %v6407_v51 = vmul.f32 0.5, %v771_v6  ;;  %v2852_v29 = vadd.f32 %v2851_v23, %v2497_v15 }
 0x245   : > { %v4680_v49 = vpop.eup %4679  ;;  %v2539_v52 = vmul.f32 %v2219_v63, %v6321_v53  ;;  %v2228_v25 = vadd.f32 1.0, %v4678_v31  ;;  %v6413_v61 = vmul.f32 0.5, %v984_v20  ;;  %v773_v28 = vadd.f32 %v6214_v44, %v5276_v16 }
 0x246   : > { %v4682_v11 = vpop.eup %4681  ;;  %v2506_v38 = vmul.f32 %v2186_v0, %v6325_v2  ;;  %v2187_v21 = vadd.f32 1.0, %v4680_v49  ;;  %3797 = vmatprep.mubr.bf16.mxu1 %v3115_v5  ;;  %4691 = vtanh.f32 %v6407_v51  ;;  %v6421_v53 = vpop.f32.mrb[48].mxu1  ;;  %v986_v15 = vadd.f32 %v6216_v39, %v5282_v18 }
 0x247   : > { %v2930_v33 = vadd.f32 %v2929_v7, %v2539_v52  ;;  %v2548_v4 = vmul.f32 %v2228_v25, %v6334_v54  ;;  %v2229_v23 = vadd.f32 1.0, %v4682_v11  ;;  %4693 = vtanh.f32 %v6413_v61  ;;  %v6423_v6 = vpop.f32.mrb[104].mxu0  ;;  %v6430_v44 = vpop.f32.mrb[49].mxu1  ;;  %v4396_v54 = vld [vmem:[%s8247_s3 + $0x80] sm:$0xff]  }
 0x248   : > { %v2816_v57 = vadd.f32 %v2815_v3, %v2506_v38  ;;  %v2507_v2 = vmul.f32 %v2187_v21, %v6344_v10  ;;  %v6426_v49 = vmul.f32 0.5, %v773_v28  ;;  %v6432_v7 = vpop.f32.mrb[105].mxu0  ;;  %v3114_v10 = vpack.c.bf16 %v6130_v47, %v6130_v47  ;;  %v6442_v3 = vpop.f32.mrb[50].mxu1 }
 0x249   : > { %v4684_v11 = vpop.eup %4683  ;;  %v2894_v63 = vadd.f32 %v2893_v42, %v2548_v4  ;;  %v2549_v20 = vmul.f32 %v2229_v23, %v6351_v46  ;;  %v777_v21 = vadd.f32 %v6236_v60, %v5272_v14  ;;  %v6444_v39 = vpop.f32.mrb[106].mxu0  ;;  %v6447_v5 = vmul.f32 0.5, %v986_v15 }
 0x24a   : > { %v2853_v31 = vadd.f32 %v2852_v29, %v2507_v2  ;;  %v2196_v0 = vadd.f32 1.0, %v4684_v11  ;;  %4695 = vtanh.f32 %v6426_v49  ;;  %v6449_v62 = vpop.f32.mrb[51].mxu1  ;;  %v6451_v42 = vpop.f32.mrb[107].mxu0  ;;  %3798 = vmatmul.mubr.bf16.vlgmr.msra.gmra.mrb[136].mxu1 %v3114_v10  ;;  %v990_v60 = vadd.f32 %v6238_v12, %v5279_v17 }
 0x24b   : > { %v4686_v46 = vpop.eup %4685  ;;  %v2931_v52 = vadd.f32 %v2930_v33, %v2549_v20  ;;  %v6453_v47 = vmul.f32 0.5, %v777_v21  ;;  %v779_v29 = vadd.f32 %v6244_v50, %v5276_v16  ;;  %4697 = vtanh.f32 %v6447_v5  ;;  %4245 = vmatpush3.bf16.msra.mxu1 %v4396_v54  ;;  %v4397_v33 = vld [vmem:[%s8247_s3 + $0xc8] sm:$0xff]  }
 0x24c   : > { %v4688_v25 = vpop.eup %4687  ;;  %v2516_v38 = vmul.f32 %v2196_v0, %v6365_v30  ;;  %v2238_v28 = vadd.f32 1.0, %v4686_v46  ;;  %v992_v4 = vadd.f32 %v6246_v1, %v5282_v18  ;;  %v6467_v12 = vmul.f32 0.5, %v990_v60  ;;  %v4398_v30 = vld [vmem:[%s8247_s3 + $0x88] sm:$0xff]   ;;  %4246 = vmatprep.subr.bf16.mxu1 %v4397_v33 }
 0x24d   : > { %v4690_v23 = vpop.eup %4689  ;;  %v2197_v2 = vadd.f32 1.0, %v4688_v25  ;;  %4699 = vtanh.f32 %v6453_v47  ;;  %v6469_v50 = vmul.f32 0.5, %v779_v29  ;;  %v781_v10 = vadd.f32 %v6250_v26, %v5272_v14  ;;  %v4399_v26 = vld [vmem:[%s8247_s3 + $0xd0] sm:$0xff]  }
 0x24e   : > { %v2817_v15 = vadd.f32 %v2816_v57, %v2516_v38  ;;  %v2558_v1 = vmul.f32 %v2238_v28, %v6374_v9  ;;  %v2239_v54 = vadd.f32 1.0, %v4690_v23  ;;  %v6475_v11 = vmul.f32 0.5, %v992_v4  ;;  %v6483_v0 = vpop.f32.mrb[52].mxu1  ;;  %v6485_v46 = vpop.f32.mrb[108].mxu0 }
 0x24f   : > { %v2517_v20 = vmul.f32 %v2197_v2, %v6382_v56  ;;  %4701 = vtanh.f32 %v6467_v12  ;;  %v994_v21 = vadd.f32 %v6252_v34, %v5279_v17  ;;  %v783_v56 = vadd.f32 %v6259_v59, %v5276_v16  ;;  %v6491_v29 = vpop.f32.mrb[53].mxu1  ;;  %v6493_v25 = vpop.f32.mrb[109].mxu0  ;;  %4247 = vmatpush3.bf16.msra.mxu1 %v4398_v30 }
 0x250   : > { %v4692_v57 = vpop.eup %4691  ;;  %v2895_v9 = vadd.f32 %v2894_v63, %v2558_v1  ;;  %v2559_v60 = vmul.f32 %v2239_v54, %v6389_v22  ;;  %4703 = vtanh.f32 %v6469_v50  ;;  %v6499_v22 = vmul.f32 0.5, %v781_v10  ;;  %v6501_v63 = vpop.f32.mrb[54].mxu1  ;;  %4248 = vmatprep.subr.bf16.mxu1 %v4399_v26 }
 0x251   : > { %v4694_v34 = vpop.eup %4693  ;;  %v2854_v38 = vadd.f32 %v2853_v31, %v2517_v20  ;;  %v2206_v28 = vadd.f32 1.0, %v4692_v57  ;;  %4705 = vtanh.f32 %v6475_v11  ;;  %v6503_v4 = vpop.f32.mrb[110].mxu0  ;;  %v6505_v23 = vmul.f32 0.5, %v994_v21  ;;  %v4400_v20 = vld [vmem:[%s8247_s3 + $0x90] sm:$0xff]  }
 0x252   : > { %v2932_v59 = vadd.f32 %v2931_v52, %v2559_v60  ;;  %v2248_v33 = vadd.f32 1.0, %v4694_v34  ;;  %v6507_v2 = vmul.f32 0.5, %v783_v56  ;;  %v6509_v30 = vpop.f32.mrb[55].mxu1  ;;  %v6511_v1 = vpop.f32.mrb[111].mxu0  ;;  %4707 = vtanh.f32 %v6499_v22 }
 0x253   : > { %8270 = vst [vmem:[#allocation18_spill] sm:$0xff] %v6511_v1  ;;  %v2526_v31 = vmul.f32 %v2206_v28, %v6407_v51  ;;  %v996_v54 = vadd.f32 %v6261_v36, %v5282_v18  ;;  %v787_v52 = vadd.f32 %v6281_v19, %v5272_v14  ;;  %4709 = vtanh.f32 %v6505_v23  ;;  %4249 = vmatpush3.bf16.msra.mxu1 %v4400_v20 }
 0x254   : > { %v4696_v10 = vpop.eup %4695  ;;  %v2568_v21 = vmul.f32 %v2248_v33, %v6413_v61  ;;  %v1000_v51 = vadd.f32 %v6283_v41, %v5279_v17  ;;  %v789_v57 = vadd.f32 %v6288_v35, %v5276_v16  ;;  %4711 = vtanh.f32 %v6507_v2 }
 0x255   : > { %v2818_v60 = vadd.f32 %v2817_v15, %v2526_v31  ;;  %v2207_v36 = vadd.f32 1.0, %v4696_v10  ;;  %v6529_v19 = vmul.f32 0.5, %v996_v54  ;;  %v4698_v56 = vpop.eup %4697  ;;  %v6531_v34 = vmul.f32 0.5, %v787_v52  ;;  %v4402_v10 = vld [vmem:[%s8247_s3 + $0x98] sm:$0xff]  }
 0x256   : > { %v2896_v26 = vadd.f32 %v2895_v9, %v2568_v21  ;;  %v6533_v61 = vmul.f32 0.5, %v1000_v51  ;;  %v6535_v28 = vmul.f32 0.5, %v789_v57  ;;  %v2249_v1 = vadd.f32 1.0, %v4698_v56  ;;  %v6541_v15 = vpop.f32.mrb[56].mxu1  ;;  %v6543_v31 = vpop.f32.mrb[112].mxu0  ;;  %v4401_v9 = vld [vmem:[%s8247_s3 + $0xd8] sm:$0xff]  }
 0x257   : > { %v4700_v33 = vpop.eup %4699  ;;  %v2527_v41 = vmul.f32 %v2207_v36, %v6426_v49  ;;  %4713 = vtanh.f32 %v6529_v19  ;;  %v1002_v35 = vadd.f32 %v6290_v48, %v5282_v18  ;;  %v791_v49 = vadd.f32 %v6296_v43, %v5272_v14  ;;  %v6553_v20 = vpop.f32.mrb[57].mxu1  ;;  %4250 = vmatprep.subr.bf16.mxu1 %v4401_v9 }
 0x258   : > { %v2216_v54 = vadd.f32 1.0, %v4700_v33  ;;  %4715 = vtanh.f32 %v6531_v34  ;;  %v1004_v52 = vadd.f32 %v6298_v8, %v5279_v17  ;;  %8271 = vst [vmem:[#allocation19_spill] sm:$0xff] %v6553_v20  ;;  %v6555_v48 = vpop.f32.mrb[113].mxu0  ;;  %v2569_v57 = vmul.f32 %v2249_v1, %v6447_v5  ;;  %v6564_v43 = vpop.f32.mrb[58].mxu1  ;;  %4251 = vmatpush3.bf16.msra.mxu1 %v4402_v10 }
 0x259   : > { %8272 = vst [vmem:[#allocation20_spill] sm:$0xff] %v6555_v48  ;;  %v4702_v21 = vpop.eup %4701  ;;  %v2855_v51 = vadd.f32 %v2854_v38, %v2527_v41  ;;  %4717 = vtanh.f32 %v6533_v61  ;;  %v6562_v36 = vmul.f32 0.5, %v1002_v35  ;;  %v6566_v56 = vpop.f32.mrb[114].mxu0  ;;  %v6570_v20 = vmul.f32 0.5, %v791_v49 }
 0x25a   : > { %8273 = vst [vmem:[#allocation21_spill] sm:$0xff] %v6566_v56  ;;  %v4704_v8 = vpop.eup %4703  ;;  %v2536_v33 = vmul.f32 %v2216_v54, %v6453_v47  ;;  %v2258_v48 = vadd.f32 1.0, %v4702_v21  ;;  %4719 = vtanh.f32 %v6535_v28  ;;  %v6572_v38 = vpop.f32.mrb[59].mxu1  ;;  %v2933_v41 = vadd.f32 %v2932_v59, %v2569_v57  ;;  %v4403_v47 = vld [vmem:[%s8247_s3 + $0xe0] sm:$0xff]  }
 0x25b   : > { %8274 = vst [vmem:[#allocation22_spill] sm:$0xff] %v6572_v38  ;;  %v6574_v5 = vpop.f32.mrb[115].mxu0  ;;  %v4706_v1 = vpop.eup %4705  ;;  %v2217_v35 = vadd.f32 1.0, %v4704_v8  ;;  %4721 = vtanh.f32 %v6562_v36  ;;  %v6577_v56 = vmul.f32 0.5, %v1004_v52  ;;  %v793_v59 = vadd.f32 %v6304_v40, %v5276_v16  ;;  %4252 = vmatprep.subr.bf16.mxu1 %v4403_v47 }
 0x25c   : > { %8275 = vst [vmem:[#allocation23_spill] sm:$0xff] %v6574_v5  ;;  %v2819_v9 = vadd.f32 %v2818_v60, %v2536_v33  ;;  %v2578_v54 = vmul.f32 %v2258_v48, %v6467_v12  ;;  %v2259_v49 = vadd.f32 1.0, %v4706_v1  ;;  %4723 = vtanh.f32 %v6570_v20  ;;  %v4708_v21 = vpop.eup %4707 }
 0x25d   : > { %v2537_v10 = vmul.f32 %v2217_v35, %v6469_v50  ;;  %4725 = vtanh.f32 %v6577_v56  ;;  %v1006_v52 = vadd.f32 %v6306_v24, %v5282_v18  ;;  %v4710_v57 = vpop.eup %4709  ;;  %v2226_v12 = vadd.f32 1.0, %v4708_v21 }
 0x25e   : > { %v2897_v8 = vadd.f32 %v2896_v26, %v2578_v54  ;;  %v2579_v60 = vmul.f32 %v2259_v49, %v6475_v11  ;;  %v797_v48 = vadd.f32 %v6329_v27, %v5272_v14  ;;  %v4712_v33 = vpop.eup %4711  ;;  %v2268_v50 = vadd.f32 1.0, %v4710_v57  ;;  %v6597_v40 = vpop.f32.mrb[60].mxu1 }
 0x25f   : > { %v2856_v1 = vadd.f32 %v2855_v51, %v2537_v10  ;;  %v6593_v35 = vmul.f32 0.5, %v793_v59  ;;  %v6595_v5 = vmul.f32 0.5, %v1006_v52  ;;  %v6599_v38 = vpop.f32.mrb[116].mxu0  ;;  %v2546_v26 = vmul.f32 %v2226_v12, %v6499_v22  ;;  %v6604_v54 = vpop.f32.mrb[61].mxu1  ;;  %v4404_v51 = vld [vmem:[%s8247_s3 + $0xa0] sm:$0xff]  }
 0x260   : > { %v2934_v24 = vadd.f32 %v2933_v41, %v2579_v60  ;;  %v2227_v47 = vadd.f32 1.0, %v4712_v33  ;;  %v6602_v11 = vmul.f32 0.5, %v797_v48  ;;  %v6606_v27 = vpop.f32.mrb[117].mxu0  ;;  %v2588_v21 = vmul.f32 %v2268_v50, %v6505_v23  ;;  %v6617_v10 = vpop.f32.mrb[62].mxu1  ;;  %4253 = vmatpush3.bf16.msra.mxu1 %v4404_v51 }
 0x261   : > { %v4714_v49 = vpop.eup %4713  ;;  %4727 = vtanh.f32 %v6593_v35  ;;  %v1010_v41 = vadd.f32 %v6331_v13, %v5279_v17  ;;  %v799_v22 = vadd.f32 %v6338_v58, %v5276_v16  ;;  %8276 = vst [vmem:[#allocation24_spill] sm:$0xff] %v6617_v10  ;;  %v6619_v59 = vpop.f32.mrb[118].mxu0  ;;  %v2820_v57 = vadd.f32 %v2819_v9, %v2546_v26 }
 0x262   : > { %8277 = vst [vmem:[#allocation25_spill] sm:$0xff] %v6619_v59  ;;  %v4716_v52 = vpop.eup %4715  ;;  %v2547_v60 = vmul.f32 %v2227_v47, %v6507_v2  ;;  %v2269_v12 = vadd.f32 1.0, %v4714_v49  ;;  %4729 = vtanh.f32 %v6595_v5  ;;  %v6623_v23 = vpop.f32.mrb[63].mxu1  ;;  %v2898_v33 = vadd.f32 %v2897_v8, %v2588_v21  ;;  %v4405_v47 = vld [vmem:[%s8247_s3 + $0xe8] sm:$0xff]  }
 0x263   : > { %v6625_v48 = vpop.f32.mrb[119].mxu0  ;;  %v4718_v13 = vpop.eup %4717  ;;  %v2236_v50 = vadd.f32 1.0, %v4716_v52  ;;  %4731 = vtanh.f32 %v6602_v11  ;;  %v6628_v58 = vmul.f32 0.5, %v1010_v41  ;;  %v6631_v26 = vmul.f32 0.5, %v799_v22  ;;  %4254 = vmatprep.subr.bf16.mxu1 %v4405_v47 }
 0x264   : > { %8278 = vst [vmem:[#allocation26_spill] sm:$0xff] %v6625_v48  ;;  %v4720_v59 = vpop.eup %4719  ;;  %v2857_v10 = vadd.f32 %v2856_v1, %v2547_v60  ;;  %v2589_v9 = vmul.f32 %v2269_v12, %v6529_v19  ;;  %v2278_v2 = vadd.f32 1.0, %v4718_v13  ;;  %v1012_v21 = vadd.f32 %v6340_v55, %v5282_v18  ;;  %v4406_v19 = vld [vmem:[%s8247_s3 + $0xa8] sm:$0xff]  }
 0x265   : > { %v4722_v49 = vpop.eup %4721  ;;  %v2556_v51 = vmul.f32 %v2236_v50, %v6531_v34  ;;  %v2237_v8 = vadd.f32 1.0, %v4720_v59  ;;  %4733 = vtanh.f32 %v6628_v58  ;;  %4255 = vmatpush3.bf16.msra.mxu1 %v4406_v19 }
 0x266   : > { %v4724_v1 = vpop.eup %4723  ;;  %v2935_v41 = vadd.f32 %v2934_v24, %v2589_v9  ;;  %v2598_v22 = vmul.f32 %v2278_v2, %v6533_v61  ;;  %v2279_v52 = vadd.f32 1.0, %v4722_v49  ;;  %4735 = vtanh.f32 %v6631_v26  ;;  %v6648_v55 = vpop.f32.mrb[64].mxu1  ;;  %v8279_v9 = vld [vmem:[#allocation9_spill] sm:$0xff] }
 0x267   : > { %v4726_v60 = vpop.eup %4725  ;;  %v2821_v34 = vadd.f32 %v2820_v57, %v2556_v51  ;;  %v2557_v59 = vmul.f32 %v2237_v8, %v6535_v28  ;;  %v2246_v12 = vadd.f32 1.0, %v4724_v1  ;;  %v6646_v13 = vmul.f32 0.5, %v1012_v21  ;;  %v6650_v50 = vpop.f32.mrb[120].mxu0  ;;  %v4407_v28 = vld [vmem:[%s8247_s3 + $0xf0] sm:$0xff]  }
 0x268   : > { %v2899_v48 = vadd.f32 %v2898_v33, %v2598_v22  ;;  %v2599_v24 = vmul.f32 %v2279_v52, %v6562_v36  ;;  %v2288_v61 = vadd.f32 1.0, %v4726_v60  ;;  %v801_v2 = vadd.f32 %v8279_v9, %v5272_v14  ;;  %v6655_v47 = vpop.f32.mrb[65].mxu1  ;;  %v6657_v57 = vpop.f32.mrb[121].mxu0  ;;  %v8280_v33 = vld [vmem:[#allocation10_spill] sm:$0xff]  ;;  %v8283_v52 = vld [vmem:[#allocation11_spill] sm:$0xff]  ;;  %4256 = vmatprep.subr.bf16.mxu1 %v4407_v28 }
 0x269   : > { %v2858_v49 = vadd.f32 %v2857_v10, %v2557_v59  ;;  %v2566_v51 = vmul.f32 %v2246_v12, %v6570_v20  ;;  %4737 = vtanh.f32 %v6646_v13  ;;  %v1014_v36 = vadd.f32 %v8280_v33, %v5279_v17  ;;  %v6666_v8 = vpop.f32.mrb[66].mxu1  ;;  %v6668_v21 = vpop.f32.mrb[122].mxu0  ;;  %v8286_v33 = vld [vmem:[#allocation12_spill] sm:$0xff] }
 0x26a   : > { %8281 = vst [vmem:[#allocation9_spill] sm:$0xff] %v6666_v8  ;;  %8282 = vst [vmem:[#allocation10_spill] sm:$0xff] %v6668_v21  ;;  %v2936_v19 = vadd.f32 %v2935_v41, %v2599_v24  ;;  %v2608_v1 = vmul.f32 %v2288_v61, %v6577_v56  ;;  %v6671_v22 = vmul.f32 0.5, %v801_v2  ;;  %v803_v60 = vadd.f32 %v8283_v52, %v5276_v16  ;;  %v6675_v10 = vpop.f32.mrb[67].mxu1  ;;  %v6677_v20 = vpop.f32.mrb[123].mxu0  ;;  %v4408_v41 = vld [vmem:[%s8247_s3 + $0xb0] sm:$0xff]  }
 0x26b   : > { %8284 = vst [vmem:[#allocation11_spill] sm:$0xff] %v6675_v10  ;;  %8285 = vst [vmem:[#allocation27_spill] sm:$0xff] %v6677_v20  ;;  %v4728_v59 = vpop.eup %4727  ;;  %v2822_v12 = vadd.f32 %v2821_v34, %v2566_v51  ;;  %v6679_v9 = vmul.f32 0.5, %v1014_v36  ;;  %v1016_v21 = vadd.f32 %v8286_v33, %v5282_v18  ;;  %v807_v56 = vadd.f32 %v6378_v45, %v5272_v14 }
 0x26c   : > { %v4730_v24 = vpop.eup %4729  ;;  %v2900_v61 = vadd.f32 %v2899_v48, %v2608_v1  ;;  %v2247_v2 = vadd.f32 1.0, %v4728_v59  ;;  %4739 = vtanh.f32 %v6671_v22  ;;  %v6689_v28 = vmul.f32 0.5, %v803_v60  ;;  %4257 = vmatpush3.bf16.msra.mxu1 %v4408_v41  ;;  %v8287_v59 = vld [vmem:[#allocation13_spill] sm:$0xff] }
 0x26d   : > { %v4732_v34 = vpop.eup %4731  ;;  %v2289_v51 = vadd.f32 1.0, %v4730_v24  ;;  %4741 = vtanh.f32 %v6679_v9  ;;  %v6692_v36 = vmul.f32 0.5, %v1016_v21  ;;  %v6694_v52 = vmul.f32 0.5, %v807_v56  ;;  %v4409_v24 = vld [vmem:[%s8247_s3 + $0xf8] sm:$0xff]  }
 0x26e   : > { %v2567_v45 = vmul.f32 %v2247_v2, %v6593_v35  ;;  %v2256_v33 = vadd.f32 1.0, %v4732_v34  ;;  %4743 = vtanh.f32 %v6689_v28  ;;  %v1020_v48 = vadd.f32 %v6380_v37, %v5279_v17  ;;  %v6706_v41 = vpop.f32.mrb[68].mxu1  ;;  %v6708_v35 = vpop.f32.mrb[124].mxu0  ;;  %4258 = vmatprep.subr.bf16.mxu1 %v4409_v24 }
 0x26f   : > { %v4734_v1 = vpop.eup %4733  ;;  %v2609_v60 = vmul.f32 %v2289_v51, %v6595_v5  ;;  %4745 = vtanh.f32 %v6692_v36  ;;  %v809_v21 = vadd.f32 %v6384_v32, %v5276_v16  ;;  %v1022_v56 = vadd.f32 %v8287_v59, %v5282_v18  ;;  %8288 = vst [vmem:[#allocation12_spill] sm:$0xff] %v6706_v41  ;;  %8289 = vst [vmem:[#allocation13_spill] sm:$0xff] %v6708_v35  ;;  %v6715_v51 = vpop.f32.mrb[69].mxu1  ;;  %v4410_v59 = vld [vmem:[%s8247_s3 + $0xb8] sm:$0xff]  }
 0x270   : > { %v4736_v37 = vpop.eup %4735  ;;  %v2859_v2 = vadd.f32 %v2858_v49, %v2567_v45  ;;  %v2576_v5 = vmul.f32 %v2256_v33, %v6602_v11  ;;  %v2298_v34 = vadd.f32 1.0, %v4734_v1  ;;  %4747 = vtanh.f32 %v6694_v52  ;;  %8290 = vst [vmem:[#allocation28_spill] sm:$0xff] %v6715_v51  ;;  %v6717_v32 = vpop.f32.mrb[125].mxu0  ;;  %4259 = vmatpush3.bf16.msra.mxu1 %v4410_v59 }
 0x271   : > { %8291 = vst [vmem:[#allocation29_spill] sm:$0xff] %v6717_v32  ;;  %v2937_v35 = vadd.f32 %v2936_v19, %v2609_v60  ;;  %v2257_v41 = vadd.f32 1.0, %v4736_v37  ;;  %v6722_v20 = vmul.f32 0.5, %v1020_v48  ;;  %v6724_v10 = vmul.f32 0.5, %v809_v21  ;;  %v6726_v49 = vpop.f32.mrb[70].mxu1  ;;  %v6728_v11 = vpop.f32.mrb[126].mxu0 }
 0x272   : > { %v2823_v45 = vadd.f32 %v2822_v12, %v2576_v5  ;;  %v2618_v33 = vmul.f32 %v2298_v34, %v6628_v58  ;;  %v6731_v1 = vmul.f32 0.5, %v1022_v56  ;;  %v8292_v32 = vld [vmem:[#allocation14_spill] sm:$0xff]  ;;  %v6735_v8 = vpop.f32.mrb[71].mxu1  ;;  %v6737_v19 = vpop.f32.mrb[127].mxu0  ;;  %v8295_v21 = vld [vmem:[#allocation15_spill] sm:$0xff]  ;;  %v8296_v58 = vld [vmem:[#allocation16_spill] sm:$0xff] }
 0x273   : > { %v811_v51 = vadd.f32 %v8292_v32, %v5272_v14  ;;  %8293 = vst [vmem:[#allocation14_spill] sm:$0xff] %v6735_v8  ;;  %8294 = vst [vmem:[#allocation30_spill] sm:$0xff] %v6737_v19  ;;  %v4738_v48 = vpop.eup %4737  ;;  %v2577_v60 = vmul.f32 %v2257_v41, %v6631_v26  ;;  %4749 = vtanh.f32 %v6722_v20  ;;  %v1024_v12 = vadd.f32 %v8295_v21, %v5279_v17  ;;  %v8297_v21 = vld [vmem:[#allocation17_spill] sm:$0xff] }
 0x274   : > { %v813_v56 = vadd.f32 %v8296_v58, %v5276_v16  ;;  %v2901_v24 = vadd.f32 %v2900_v61, %v2618_v33  ;;  %v2299_v37 = vadd.f32 1.0, %v4738_v48  ;;  %4751 = vtanh.f32 %v6724_v10 }
 0x275   : > { %v6746_v5 = vmul.f32 0.5, %v811_v51  ;;  %v2860_v34 = vadd.f32 %v2859_v2, %v2577_v60  ;;  %4753 = vtanh.f32 %v6731_v1  ;;  %v6749_v32 = vmul.f32 0.5, %v1024_v12 }
 0x276   : > { %v6751_v26 = vmul.f32 0.5, %v813_v56  ;;  %v4740_v41 = vpop.eup %4739  ;;  %v2619_v59 = vmul.f32 %v2299_v37, %v6646_v13  ;;  %v1026_v61 = vadd.f32 %v8297_v21, %v5282_v18  ;;  %v817_v33 = vadd.f32 %v6421_v53, %v5272_v14  ;;  %v6764_v12 = vpop.f32.mrb[72].mxu1 }
 0x277   : > { %4755 = vtanh.f32 %v6746_v5  ;;  %v4742_v51 = vpop.eup %4741  ;;  %v2266_v48 = vadd.f32 1.0, %v4740_v41  ;;  %v1030_v2 = vadd.f32 %v6423_v6, %v5279_v17  ;;  %v819_v60 = vadd.f32 %v6430_v44, %v5276_v16  ;;  %8298 = vst [vmem:[#allocation15_spill] sm:$0xff] %v6764_v12  ;;  %v6766_v13 = vpop.f32.mrb[128].mxu0 }
 0x278   : > { %4757 = vtanh.f32 %v6749_v32  ;;  %8299 = vst [vmem:[#allocation16_spill] sm:$0xff] %v6766_v13  ;;  %v4744_v58 = vpop.eup %4743  ;;  %v2938_v56 = vadd.f32 %v2937_v35, %v2619_v59  ;;  %v2308_v37 = vadd.f32 1.0, %v4742_v51  ;;  %v6769_v53 = vmul.f32 0.5, %v1026_v61  ;;  %v6771_v41 = vpop.f32.mrb[73].mxu1 }
 0x279   : > { %4759 = vtanh.f32 %v6751_v26  ;;  %8300 = vst [vmem:[#allocation17_spill] sm:$0xff] %v6771_v41  ;;  %v6773_v21 = vpop.f32.mrb[129].mxu0  ;;  %v4746_v19 = vpop.eup %4745  ;;  %v2586_v6 = vmul.f32 %v2266_v48, %v6671_v22  ;;  %v2267_v8 = vadd.f32 1.0, %v4744_v58  ;;  %v6776_v44 = vmul.f32 0.5, %v817_v33 }
 0x27a   : > { %8301 = vst [vmem:[#allocation31_spill] sm:$0xff] %v6773_v21  ;;  %v6778_v12 = vmul.f32 0.5, %v1030_v2  ;;  %v6780_v13 = vpop.f32.mrb[74].mxu1  ;;  %v6782_v35 = vpop.f32.mrb[130].mxu0  ;;  %v2628_v61 = vmul.f32 %v2308_v37, %v6679_v9  ;;  %v2309_v51 = vadd.f32 1.0, %v4746_v19  ;;  %4761 = vtanh.f32 %v6769_v53 }
 0x27b   : > { %8302 = vst [vmem:[#allocation32_spill] sm:$0xff] %v6782_v35  ;;  %v4748_v59 = vpop.eup %4747  ;;  %v6786_v41 = vmul.f32 0.5, %v819_v60  ;;  %v6788_v21 = vpop.f32.mrb[75].mxu1  ;;  %v2824_v33 = vadd.f32 %v2823_v45, %v2586_v6  ;;  %v2587_v48 = vmul.f32 %v2267_v8, %v6689_v28  ;;  %4763 = vtanh.f32 %v6776_v44 }
 0x27c   : > { %v6790_v22 = vpop.f32.mrb[131].mxu0  ;;  %v2276_v2 = vadd.f32 1.0, %v4748_v59  ;;  %v2902_v58 = vadd.f32 %v2901_v24, %v2628_v61  ;;  %v2629_v35 = vmul.f32 %v2309_v51, %v6692_v36  ;;  %4765 = vtanh.f32 %v6778_v12 }
 0x27d   : > { %v1032_v9 = vadd.f32 %v6432_v7, %v5282_v18  ;;  %v4750_v19 = vpop.eup %4749  ;;  %v2861_v60 = vadd.f32 %v2860_v34, %v2587_v48  ;;  %4767 = vtanh.f32 %v6786_v41  ;;  %v821_v8 = vadd.f32 %v6442_v3, %v5272_v14 }
 0x27e   : > { %v2596_v37 = vmul.f32 %v2276_v2, %v6694_v52  ;;  %v4752_v28 = vpop.eup %4751  ;;  %v2939_v45 = vadd.f32 %v2938_v56, %v2629_v35  ;;  %v2318_v6 = vadd.f32 1.0, %v4750_v19  ;;  %v1034_v36 = vadd.f32 %v6444_v39, %v5279_v17  ;;  %v6810_v34 = vpop.f32.mrb[76].mxu1 }
 0x27f   : > { %v6802_v24 = vmul.f32 0.5, %v1032_v9  ;;  %v4754_v59 = vpop.eup %4753  ;;  %v2277_v7 = vadd.f32 1.0, %v4752_v28  ;;  %v6806_v51 = vmul.f32 0.5, %v821_v8  ;;  %v823_v52 = vadd.f32 %v6449_v62, %v5276_v16  ;;  %v6812_v48 = vpop.f32.mrb[132].mxu0 }
 0x280   : > { %v2825_v61 = vadd.f32 %v2824_v33, %v2596_v37  ;;  %v2638_v56 = vmul.f32 %v2318_v6, %v6722_v20  ;;  %v2319_v35 = vadd.f32 1.0, %v4754_v59  ;;  %v6816_v2 = vmul.f32 0.5, %v1034_v36  ;;  %v6818_v39 = vpop.f32.mrb[77].mxu1  ;;  %v6820_v33 = vpop.f32.mrb[133].mxu0 }
 0x281   : > { %v4756_v3 = vpop.eup %4755  ;;  %4769 = vtanh.f32 %v6802_v24  ;;  %8303 = vst [vmem:[#allocation33_spill] sm:$0xff] %v6818_v39  ;;  %8304 = vst [vmem:[#allocation34_spill] sm:$0xff] %v6820_v33  ;;  %v2597_v19 = vmul.f32 %v2277_v7, %v6724_v10  ;;  %v6824_v37 = vmul.f32 0.5, %v823_v52  ;;  %v6826_v8 = vpop.f32.mrb[78].mxu1  ;;  %v4411_v10 = vld [vmem:[%s8247_s3 + $0x140] sm:$0xff]  }
 0x282   : > { %v4758_v9 = vpop.eup %4757  ;;  %v2286_v62 = vadd.f32 1.0, %v4756_v3  ;;  %4771 = vtanh.f32 %v6806_v51  ;;  %v6828_v20 = vpop.f32.mrb[134].mxu0  ;;  %v2903_v6 = vadd.f32 %v2902_v58, %v2638_v56  ;;  %v2639_v36 = vmul.f32 %v2319_v35, %v6731_v1  ;;  %4266 = vmatprep.subr.bf16.mxu1 %v4411_v10 }
 0x283   : > { %8305 = vst [vmem:[#allocation35_spill] sm:$0xff] %v6828_v20  ;;  %v4760_v28 = vpop.eup %4759  ;;  %v2328_v59 = vadd.f32 1.0, %v4758_v9  ;;  %4773 = vtanh.f32 %v6816_v2  ;;  %v6832_v33 = vpop.f32.mrb[79].mxu1  ;;  %v2862_v7 = vadd.f32 %v2861_v60, %v2597_v19  ;;  %v1036_v35 = vadd.f32 %v6451_v42, %v5282_v18 }
 0x284   : > { %8306 = vst [vmem:[#allocation36_spill] sm:$0xff] %v6832_v33  ;;  %v6834_v39 = vpop.f32.mrb[135].mxu0  ;;  %v2606_v52 = vmul.f32 %v2286_v62, %v6746_v5  ;;  %v2287_v3 = vadd.f32 1.0, %v4760_v28  ;;  %4775 = vtanh.f32 %v6824_v37  ;;  %v4762_v58 = vpop.eup %4761  ;;  %v2940_v56 = vadd.f32 %v2939_v45, %v2639_v36 }
 0x285   : > { %8307 = vst [vmem:[#allocation37_spill] sm:$0xff] %v6834_v39  ;;  %v2648_v1 = vmul.f32 %v2328_v59, %v6749_v32  ;;  %v827_v9 = vadd.f32 %v6483_v0, %v5272_v14  ;;  %v4764_v39 = vpop.eup %4763  ;;  %v2329_v19 = vadd.f32 1.0, %v4762_v58  ;;  %v1040_v5 = vadd.f32 %v6485_v46, %v5279_v17 }
 0x286   : > { %v2826_v33 = vadd.f32 %v2825_v61, %v2606_v52  ;;  %v2607_v60 = vmul.f32 %v2287_v3, %v6751_v26  ;;  %v4766_v62 = vpop.eup %4765  ;;  %v2296_v45 = vadd.f32 1.0, %v4764_v39  ;;  %v6849_v36 = vmul.f32 0.5, %v1036_v35  ;;  %v6856_v61 = vpop.f32.mrb[80].mxu1 }
 0x287   : > { %v2904_v28 = vadd.f32 %v2903_v6, %v2648_v1  ;;  %v6851_v32 = vmul.f32 0.5, %v827_v9  ;;  %v4768_v42 = vpop.eup %4767  ;;  %v2649_v0 = vmul.f32 %v2329_v19, %v6769_v53  ;;  %v2338_v10 = vadd.f32 1.0, %v4766_v62  ;;  %v6858_v26 = vpop.f32.mrb[136].mxu0 }
 0x288   : > { %v2863_v59 = vadd.f32 %v2862_v7, %v2607_v60  ;;  %v6854_v20 = vmul.f32 0.5, %v1040_v5  ;;  %v2616_v46 = vmul.f32 %v2296_v45, %v6776_v44  ;;  %v2297_v52 = vadd.f32 1.0, %v4768_v42  ;;  %v6864_v6 = vpop.f32.mrb[81].mxu1  ;;  %v6866_v7 = vpop.f32.mrb[137].mxu0 }
 0x289   : > { %4777 = vtanh.f32 %v6849_v36  ;;  %v829_v39 = vadd.f32 %v6491_v29, %v5276_v16  ;;  %v2941_v53 = vadd.f32 %v2940_v56, %v2649_v0  ;;  %v2658_v3 = vmul.f32 %v2338_v10, %v6778_v12  ;;  %v6872_v1 = vpop.f32.mrb[82].mxu1  ;;  %v6874_v44 = vpop.f32.mrb[138].mxu0 }
 0x28a   : > { %4779 = vtanh.f32 %v6851_v32  ;;  %v1042_v58 = vadd.f32 %v6493_v25, %v5282_v18  ;;  %v2827_v9 = vadd.f32 %v2826_v33, %v2616_v46  ;;  %v2617_v29 = vmul.f32 %v2297_v52, %v6786_v41  ;;  %v6880_v56 = vpop.f32.mrb[83].mxu1  ;;  %v6882_v12 = vpop.f32.mrb[139].mxu0 }
 0x28b   : > { %v4770_v35 = vpop.eup %4769  ;;  %4781 = vtanh.f32 %v6854_v20  ;;  %v6878_v60 = vmul.f32 0.5, %v829_v39  ;;  %v2905_v5 = vadd.f32 %v2904_v28, %v2658_v3  ;;  %v831_v45 = vadd.f32 %v6501_v63, %v5272_v14 }
 0x28c   : > { %v4772_v19 = vpop.eup %4771  ;;  %v2339_v62 = vadd.f32 1.0, %v4770_v35  ;;  %v6884_v25 = vmul.f32 0.5, %v1042_v58  ;;  %v2864_v33 = vadd.f32 %v2863_v59, %v2617_v29  ;;  %v1044_v41 = vadd.f32 %v6503_v4, %v5279_v17  ;;  %v8308_v4 = vld [vmem:[#allocation18_spill] sm:$0xff] }
 0x28d   : > { %v4774_v42 = vpop.eup %4773  ;;  %v2306_v0 = vadd.f32 1.0, %v4772_v19  ;;  %4783 = vtanh.f32 %v6878_v60  ;;  %v6893_v28 = vmul.f32 0.5, %v831_v45  ;;  %v833_v59 = vadd.f32 %v6509_v30, %v5276_v16 }
 0x28e   : > { %v4776_v10 = vpop.eup %4775  ;;  %v2659_v46 = vmul.f32 %v2339_v62, %v6802_v24  ;;  %v2348_v52 = vadd.f32 1.0, %v4774_v42  ;;  %4785 = vtanh.f32 %v6884_v25  ;;  %v6896_v63 = vmul.f32 0.5, %v1044_v41  ;;  %v6904_v29 = vpop.f32.mrb[84].mxu1 }
 0x28f   : > { %v2626_v39 = vmul.f32 %v2306_v0, %v6806_v51  ;;  %v2307_v3 = vadd.f32 1.0, %v4776_v10  ;;  %4787 = vtanh.f32 %v6893_v28  ;;  %v1046_v24 = vadd.f32 %v8308_v4, %v5282_v18  ;;  %8309 = vst [vmem:[#allocation18_spill] sm:$0xff] %v6904_v29  ;;  %v6906_v19 = vpop.f32.mrb[140].mxu0  ;;  %v6912_v30 = vpop.f32.mrb[85].mxu1 }
 0x290   : > { %v2942_v58 = vadd.f32 %v2941_v53, %v2659_v46  ;;  %v2668_v35 = vmul.f32 %v2348_v52, %v6816_v2  ;;  %8310 = vst [vmem:[#allocation38_spill] sm:$0xff] %v6906_v19  ;;  %4789 = vtanh.f32 %v6896_v63  ;;  %v6910_v45 = vmul.f32 0.5, %v833_v59  ;;  %8311 = vst [vmem:[#allocation39_spill] sm:$0xff] %v6912_v30  ;;  %v6914_v53 = vpop.f32.mrb[141].mxu0  ;;  %v8315_v52 = vld [vmem:[#allocation19_spill] sm:$0xff] }
 0x291   : > { %v2828_v62 = vadd.f32 %v2827_v9, %v2626_v39  ;;  %v2627_v51 = vmul.f32 %v2307_v3, %v6824_v37  ;;  %8312 = vst [vmem:[#allocation40_spill] sm:$0xff] %v6914_v53  ;;  %v6916_v42 = vmul.f32 0.5, %v1046_v24  ;;  %v837_v0 = vadd.f32 %v6541_v15, %v5272_v14  ;;  %v6922_v9 = vpop.f32.mrb[86].mxu1  ;;  %v6924_v37 = vpop.f32.mrb[142].mxu0 }
 0x292   : > { %v2906_v2 = vadd.f32 %v2905_v5, %v2668_v35  ;;  %v1050_v41 = vadd.f32 %v6543_v31, %v5279_v17  ;;  %8313 = vst [vmem:[#allocation41_spill] sm:$0xff] %v6922_v9  ;;  %8314 = vst [vmem:[#allocation42_spill] sm:$0xff] %v6924_v37  ;;  %4791 = vtanh.f32 %v6910_v45  ;;  %v839_v39 = vadd.f32 %v8315_v52, %v5276_v16  ;;  %v8316_v5 = vld [vmem:[#allocation20_spill] sm:$0xff]  ;;  %v6931_v59 = vpop.f32.mrb[87].mxu1  ;;  %v6933_v15 = vpop.f32.mrb[143].mxu0 }
 0x293   : > { %v4778_v10 = vpop.eup %4777  ;;  %v2865_v46 = vadd.f32 %v2864_v33, %v2627_v51  ;;  %v1052_v3 = vadd.f32 %v8316_v5, %v5282_v18  ;;  %8317 = vst [vmem:[#allocation19_spill] sm:$0xff] %v6931_v59  ;;  %8318 = vst [vmem:[#allocation20_spill] sm:$0xff] %v6933_v15  ;;  %4793 = vtanh.f32 %v6916_v42  ;;  %v6936_v4 = vmul.f32 0.5, %v837_v0 }
 0x294   : > { %v4780_v35 = vpop.eup %4779  ;;  %v2349_v31 = vadd.f32 1.0, %v4778_v10  ;;  %v6938_v24 = vmul.f32 0.5, %v1050_v41  ;;  %v6940_v37 = vmul.f32 0.5, %v839_v39  ;;  %v841_v5 = vadd.f32 %v6564_v43, %v5272_v14  ;;  %v8319_v10 = vld [vmem:[#allocation21_spill] sm:$0xff] }
 0x295   : > { %v4782_v33 = vpop.eup %4781  ;;  %v2316_v51 = vadd.f32 1.0, %v4780_v35  ;;  %v6942_v52 = vmul.f32 0.5, %v1052_v3  ;;  %4795 = vtanh.f32 %v6936_v4  ;;  %v1054_v0 = vadd.f32 %v8319_v10, %v5279_v17  ;;  %v8320_v3 = vld [vmem:[#allocation22_spill] sm:$0xff]  ;;  %v4413_v43 = vld [vmem:[%s8247_s3 + $0x240] sm:$0xff]  }
 0x296   : > { %v2669_v59 = vmul.f32 %v2349_v31, %v6849_v36  ;;  %v2358_v15 = vadd.f32 1.0, %v4782_v33  ;;  %4797 = vtanh.f32 %v6938_v24  ;;  %v6952_v39 = vmul.f32 0.5, %v841_v5  ;;  %v4414_v36 = vld [vmem:[%s8247_s3 + $0x200] sm:$0xff]   ;;  %v6966_v5 = vpop.f32.mrb[144].mxu0  ;;  %4310 = vmatprep.subr.bf16.mxu0 %v4413_v43  ;;  %v8323_v43 = vld [vmem:[#allocation23_spill] sm:$0xff] }
 0x297   : > { %v4784_v9 = vpop.eup %4783  ;;  %v2636_v41 = vmul.f32 %v2316_v51, %v6851_v32  ;;  %v843_v35 = vadd.f32 %v8320_v3, %v5276_v16  ;;  %4799 = vtanh.f32 %v6940_v37  ;;  %v6964_v51 = vpop.f32.mrb[88].mxu1  ;;  %v6969_v30 = vmul.f32 0.5, %v1054_v0  ;;  %4311 = vmatpush3.bf16.msra.mxu0 %v4414_v36 }
 0x298   : > { %v4786_v31 = vpop.eup %4785  ;;  %v2943_v33 = vadd.f32 %v2942_v58, %v2669_v59  ;;  %v2678_v10 = vmul.f32 %v2358_v15, %v6854_v20  ;;  %v2317_v32 = vadd.f32 1.0, %v4784_v9  ;;  %4801 = vtanh.f32 %v6942_v52  ;;  %v6971_v19 = vpop.f32.mrb[89].mxu1 }
 0x299   : > { %v2829_v3 = vadd.f32 %v2828_v62, %v2636_v41  ;;  %v2359_v53 = vadd.f32 1.0, %v4786_v31  ;;  %v6973_v29 = vpop.f32.mrb[145].mxu0  ;;  %v4788_v58 = vpop.eup %4787  ;;  %4803 = vtanh.f32 %v6952_v39  ;;  %v6977_v59 = vmul.f32 0.5, %v843_v35 }
 0x29a   : > { %v2907_v20 = vadd.f32 %v2906_v2, %v2678_v10  ;;  %v2637_v9 = vmul.f32 %v2317_v32, %v6878_v60  ;;  %v6979_v15 = vpop.f32.mrb[90].mxu1  ;;  %v6981_v62 = vpop.f32.mrb[146].mxu0  ;;  %v2326_v31 = vadd.f32 1.0, %v4788_v58  ;;  %4805 = vtanh.f32 %v6969_v30 }
 0x29b   : > { %8321 = vst [vmem:[#allocation21_spill] sm:$0xff] %v6979_v15  ;;  %8322 = vst [vmem:[#allocation22_spill] sm:$0xff] %v6981_v62  ;;  %v4790_v0 = vpop.eup %4789  ;;  %v2679_v41 = vmul.f32 %v2359_v53, %v6884_v25  ;;  %v1056_v2 = vadd.f32 %v8323_v43, %v5282_v18  ;;  %v6987_v10 = vpop.f32.mrb[91].mxu1  ;;  %4807 = vtanh.f32 %v6977_v59  ;;  %v847_v36 = vadd.f32 %v6597_v40, %v5272_v14 }
 0x29c   : > { %8324 = vst [vmem:[#allocation23_spill] sm:$0xff] %v6987_v10  ;;  %v6989_v60 = vpop.f32.mrb[147].mxu0  ;;  %v2866_v35 = vadd.f32 %v2865_v46, %v2637_v9  ;;  %v2368_v32 = vadd.f32 1.0, %v4790_v0  ;;  %v4792_v62 = vpop.eup %4791  ;;  %v2646_v25 = vmul.f32 %v2326_v31, %v6893_v28  ;;  %v1060_v58 = vadd.f32 %v6599_v38, %v5279_v17 }
 0x29d   : > { %8325 = vst [vmem:[#allocation43_spill] sm:$0xff] %v6989_v60  ;;  %v2944_v15 = vadd.f32 %v2943_v33, %v2679_v41  ;;  %v6995_v53 = vmul.f32 0.5, %v1056_v2  ;;  %v4794_v43 = vpop.eup %4793  ;;  %v2327_v60 = vadd.f32 1.0, %v4792_v62  ;;  %v7000_v46 = vmul.f32 0.5, %v847_v36 }
 0x29e   : > { %v2688_v10 = vmul.f32 %v2368_v32, %v6896_v63  ;;  %v849_v9 = vadd.f32 %v6604_v54, %v5276_v16  ;;  %v2830_v0 = vadd.f32 %v2829_v3, %v2646_v25  ;;  %v2369_v40 = vadd.f32 1.0, %v4794_v43  ;;  %v7011_v63 = vpop.f32.mrb[92].mxu1  ;;  %v7013_v62 = vpop.f32.mrb[148].mxu0  ;;  %v8330_v25 = vld [vmem:[#allocation24_spill] sm:$0xff] }
 0x29f   : > { %4809 = vtanh.f32 %v6995_v53  ;;  %v7005_v33 = vmul.f32 0.5, %v1060_v58  ;;  %v4796_v28 = vpop.eup %4795  ;;  %v2647_v31 = vmul.f32 %v2327_v60, %v6910_v45  ;;  %8326 = vst [vmem:[#allocation44_spill] sm:$0xff] %v7011_v63  ;;  %8327 = vst [vmem:[#allocation45_spill] sm:$0xff] %v7013_v62  ;;  %v1062_v32 = vadd.f32 %v6606_v27, %v5282_v18  ;;  %v7021_v45 = vpop.f32.mrb[149].mxu0 }
 0x2a0   : > { %v2908_v41 = vadd.f32 %v2907_v20, %v2688_v10  ;;  %4811 = vtanh.f32 %v7000_v46  ;;  %v7009_v38 = vmul.f32 0.5, %v849_v9  ;;  %v4798_v2 = vpop.eup %4797  ;;  %v2689_v54 = vmul.f32 %v2369_v40, %v6916_v42  ;;  %v7019_v20 = vpop.f32.mrb[93].mxu1  ;;  %8329 = vst [vmem:[#allocation47_spill] sm:$0xff] %v7021_v45 }
 0x2a1   : > { %v2336_v3 = vadd.f32 1.0, %v4796_v28  ;;  %4813 = vtanh.f32 %v7005_v33  ;;  %8328 = vst [vmem:[#allocation46_spill] sm:$0xff] %v7019_v20  ;;  %v4800_v10 = vpop.eup %4799  ;;  %v2867_v60 = vadd.f32 %v2866_v35, %v2647_v31  ;;  %v2378_v36 = vadd.f32 1.0, %v4798_v2  ;;  %v7026_v43 = vpop.f32.mrb[94].mxu1 }
 0x2a2   : > { %4815 = vtanh.f32 %v7009_v38  ;;  %v851_v58 = vadd.f32 %v8330_v25, %v5272_v14  ;;  %8331 = vst [vmem:[#allocation24_spill] sm:$0xff] %v7026_v43  ;;  %v7028_v42 = vpop.f32.mrb[150].mxu0  ;;  %v4802_v9 = vpop.eup %4801  ;;  %v2945_v40 = vadd.f32 %v2944_v15, %v2689_v54  ;;  %v2337_v28 = vadd.f32 1.0, %v4800_v10  ;;  %v8334_v43 = vld [vmem:[#allocation25_spill] sm:$0xff] }
 0x2a3   : > { %8332 = vst [vmem:[#allocation48_spill] sm:$0xff] %v7028_v42  ;;  %v2656_v27 = vmul.f32 %v2336_v3, %v6936_v4  ;;  %v7031_v20 = vmul.f32 0.5, %v1062_v32  ;;  %v7033_v45 = vpop.f32.mrb[95].mxu1  ;;  %v7035_v35 = vpop.f32.mrb[151].mxu0  ;;  %v2698_v2 = vmul.f32 %v2378_v36, %v6938_v24  ;;  %v2379_v62 = vadd.f32 1.0, %v4802_v9 }
 0x2a4   : > { %8333 = vst [vmem:[#allocation49_spill] sm:$0xff] %v7035_v35  ;;  %v4804_v31 = vpop.eup %4803  ;;  %v7038_v25 = vmul.f32 0.5, %v851_v58  ;;  %v1064_v42 = vadd.f32 %v8334_v43, %v5279_v17  ;;  %v2657_v4 = vmul.f32 %v2337_v28, %v6940_v37  ;;  %v853_v37 = vadd.f32 %v6623_v23, %v5276_v16  ;;  %v8335_v43 = vld [vmem:[#allocation26_spill] sm:$0xff] }
 0x2a5   : > { %v4806_v63 = vpop.eup %4805  ;;  %v2831_v15 = vadd.f32 %v2830_v0, %v2656_v27  ;;  %v2346_v54 = vadd.f32 1.0, %v4804_v31  ;;  %4817 = vtanh.f32 %v7031_v20  ;;  %v2909_v32 = vadd.f32 %v2908_v41, %v2698_v2  ;;  %v4424_v23 = vld [vmem:[%s8247_s3 + $0x208] sm:$0xff]  }
 0x2a6   : > { %v4808_v3 = vpop.eup %4807  ;;  %v2699_v10 = vmul.f32 %v2379_v62, %v6942_v52  ;;  %v2388_v35 = vadd.f32 1.0, %v4806_v63  ;;  %4819 = vtanh.f32 %v7038_v25  ;;  %v2868_v24 = vadd.f32 %v2867_v60, %v2657_v4  ;;  %v7054_v27 = vpop.f32.mrb[96].mxu1 }
 0x2a7   : > { %v2666_v36 = vmul.f32 %v2346_v54, %v6952_v39  ;;  %v2347_v58 = vadd.f32 1.0, %v4808_v3  ;;  %v7047_v9 = vmul.f32 0.5, %v1064_v42  ;;  %v1066_v41 = vadd.f32 %v8335_v43, %v5282_v18  ;;  %v7056_v52 = vpop.f32.mrb[152].mxu0  ;;  %v4423_v18 = vld [vmem:[%s8247_s3 + $0x248] sm:$0xff]  }
 0x2a8   : > { %v2946_v17 = vadd.f32 %v2945_v40, %v2699_v10  ;;  %v2708_v0 = vmul.f32 %v2388_v35, %v6969_v30  ;;  %v857_v60 = vadd.f32 %v6648_v55, %v5272_v14  ;;  %v7062_v30 = vpop.f32.mrb[97].mxu1  ;;  %v7064_v42 = vpop.f32.mrb[153].mxu0  ;;  %v7072_v35 = vmul.f32 0.5, %v853_v37  ;;  %v8337_v10 = vld [vmem:[#allocation7_spill] sm:$0xff]  ;;  %4312 = vmatprep.subr.bf16.mxu0 %v4423_v18 }
 0x2a9   : > { %v4810_v63 = vpop.eup %4809  ;;  %v2832_v62 = vadd.f32 %v2831_v15, %v2666_v36  ;;  %v2667_v39 = vmul.f32 %v2347_v58, %v6977_v59  ;;  %4821 = vtanh.f32 %v7047_v9  ;;  %v7074_v31 = vmul.f32 0.5, %v1066_v41  ;;  %v7076_v55 = vpop.f32.mrb[98].mxu1  ;;  %4313 = vmatpush3.bf16.msra.mxu0 %v4424_v23 }
 0x2aa   : > { %v4812_v40 = vpop.eup %4811  ;;  %v2910_v28 = vadd.f32 %v2909_v32, %v2708_v0  ;;  %v2389_v59 = vadd.f32 1.0, %v4810_v63  ;;  %v7078_v2 = vpop.f32.mrb[154].mxu0  ;;  %v7080_v3 = vmul.f32 0.5, %v857_v60  ;;  %v1296_v36 = vadd.f32 %v6650_v50, %v8337_v10 }
 0x2ab   : > { %8336 = vst [vmem:[#allocation25_spill] sm:$0xff] %v7078_v2  ;;  %v4814_v15 = vpop.eup %4813  ;;  %v2869_v4 = vadd.f32 %v2868_v24, %v2667_v39  ;;  %v2356_v54 = vadd.f32 1.0, %v4812_v40  ;;  %v7084_v58 = vpop.f32.mrb[99].mxu1  ;;  %4823 = vtanh.f32 %v7072_v35  ;;  %v859_v24 = vadd.f32 %v6655_v47, %v5276_v16  ;;  %v8340_v47 = vld [vmem:[#allocation8_spill] sm:$0xff] }
 0x2ac   : > { %8338 = vst [vmem:[#allocation26_spill] sm:$0xff] %v7084_v58  ;;  %v7086_v32 = vpop.f32.mrb[155].mxu0  ;;  %v4816_v0 = vpop.eup %4815  ;;  %v2709_v37 = vmul.f32 %v2389_v59, %v6995_v53  ;;  %v2398_v43 = vadd.f32 1.0, %v4814_v15  ;;  %4825 = vtanh.f32 %v7074_v31  ;;  %v7094_v50 = vmul.f32 0.5, %v1296_v36 }
 0x2ad   : > { %8339 = vst [vmem:[#allocation7_spill] sm:$0xff] %v7086_v32  ;;  %v2676_v41 = vmul.f32 %v2356_v54, %v7000_v46  ;;  %v2357_v63 = vadd.f32 1.0, %v4816_v0  ;;  %4827 = vtanh.f32 %v7080_v3  ;;  %v7098_v53 = vmul.f32 0.5, %v859_v24 }
 0x2ae   : > { %v2947_v39 = vadd.f32 %v2946_v17, %v2709_v37  ;;  %v2718_v60 = vmul.f32 %v2398_v43, %v7005_v33  ;;  %4829 = vtanh.f32 %v7094_v50  ;;  %v1298_v46 = vadd.f32 %v6657_v57, %v8340_v47  ;;  %v8341_v33 = vld [vmem:[#allocation9_spill] sm:$0xff]  ;;  %v7107_v36 = vpop.f32.mrb[100].mxu1  ;;  %v7109_v0 = vpop.f32.mrb[156].mxu0  ;;  %v8344_v43 = vld [vmem:[#allocation10_spill] sm:$0xff] }
 0x2af   : > { %v4818_v18 = vpop.eup %4817  ;;  %v2833_v40 = vadd.f32 %v2832_v62, %v2676_v41  ;;  %v2677_v59 = vmul.f32 %v2357_v63, %v7009_v38  ;;  %4831 = vtanh.f32 %v7098_v53  ;;  %v861_v17 = vadd.f32 %v8341_v33, %v5272_v14  ;;  %8342 = vst [vmem:[#allocation8_spill] sm:$0xff] %v7107_v36  ;;  %8343 = vst [vmem:[#allocation9_spill] sm:$0xff] %v7109_v0  ;;  %v7115_v57 = vpop.f32.mrb[101].mxu1  ;;  %v8348_v33 = vld [vmem:[#allocation27_spill] sm:$0xff] }
 0x2b0   : > { %v4820_v23 = vpop.eup %4819  ;;  %v2911_v15 = vadd.f32 %v2910_v28, %v2718_v60  ;;  %v2399_v54 = vadd.f32 1.0, %v4818_v18  ;;  %v7111_v38 = vmul.f32 0.5, %v1298_v46  ;;  %v1300_v24 = vadd.f32 %v8344_v43, %v8337_v10  ;;  %8345 = vst [vmem:[#allocation10_spill] sm:$0xff] %v7115_v57  ;;  %v7117_v28 = vpop.f32.mrb[157].mxu0  ;;  %v8347_v60 = vld [vmem:[#allocation11_spill] sm:$0xff]  ;;  %v8349_v43 = vld [vmem:[#allocation12_spill] sm:$0xff] }
 0x2b1   : > { %v2870_v62 = vadd.f32 %v2869_v4, %v2677_v59  ;;  %v2366_v37 = vadd.f32 1.0, %v4820_v23  ;;  %8346 = vst [vmem:[#allocation50_spill] sm:$0xff] %v7117_v28  ;;  %v7120_v63 = vmul.f32 0.5, %v861_v17  ;;  %v863_v18 = vadd.f32 %v8347_v60, %v5276_v16  ;;  %v7135_v17 = vpop.f32.mrb[102].mxu1 }
 0x2b2   : > { %v2719_v41 = vmul.f32 %v2399_v54, %v7031_v20  ;;  %v1302_v4 = vadd.f32 %v8348_v33, %v8340_v47  ;;  %4833 = vtanh.f32 %v7111_v38  ;;  %v7128_v23 = vmul.f32 0.5, %v1300_v24  ;;  %8350 = vst [vmem:[#allocation11_spill] sm:$0xff] %v7135_v17  ;;  %v7163_v58 = vpop.f32.mrb[103].mxu1 }
 0x2b3   : > { %v4822_v59 = vpop.eup %4821  ;;  %v2686_v46 = vmul.f32 %v2366_v37, %v7038_v25  ;;  %v867_v28 = vadd.f32 %v8349_v43, %v5272_v14  ;;  %4835 = vtanh.f32 %v7120_v63  ;;  %v7133_v54 = vmul.f32 0.5, %v863_v18  ;;  %v7142_v37 = vpop.f32.mrb[158].mxu0  ;;  %v8353_v18 = vld [vmem:[#allocation28_spill] sm:$0xff] }
 0x2b4   : > { %v2948_v57 = vadd.f32 %v2947_v39, %v2719_v41  ;;  %v2408_v20 = vadd.f32 1.0, %v4822_v59  ;;  %4837 = vtanh.f32 %v7128_v23  ;;  %v7138_v33 = vmul.f32 0.5, %v1302_v4  ;;  %8351 = vst [vmem:[#allocation27_spill] sm:$0xff] %v7142_v37  ;;  %v8352_v39 = vld [vmem:[#allocation13_spill] sm:$0xff] }
 0x2b5   : > { %v2834_v60 = vadd.f32 %v2833_v40, %v2686_v46  ;;  %v7140_v25 = vmul.f32 0.5, %v867_v28  ;;  %v4824_v24 = vpop.eup %4823  ;;  %4839 = vtanh.f32 %v7133_v54  ;;  %v1306_v41 = vadd.f32 %v8352_v39, %v8337_v10  ;;  %v8354_v28 = vld [vmem:[#allocation29_spill] sm:$0xff] }
 0x2b6   : > { %v2728_v43 = vmul.f32 %v2408_v20, %v7047_v9  ;;  %v869_v59 = vadd.f32 %v8353_v18, %v5276_v16  ;;  %v4826_v40 = vpop.eup %4825  ;;  %v2367_v46 = vadd.f32 1.0, %v4824_v24  ;;  %4841 = vtanh.f32 %v7138_v33 }
 0x2b7   : > { %v1308_v4 = vadd.f32 %v8354_v28, %v8340_v47  ;;  %v871_v37 = vadd.f32 %v6726_v49, %v5272_v14  ;;  %v4828_v17 = vpop.eup %4827  ;;  %v2409_v20 = vadd.f32 1.0, %v4826_v40  ;;  %4843 = vtanh.f32 %v7140_v25 }
 0x2b8   : > { %v2912_v9 = vadd.f32 %v2911_v15, %v2728_v43  ;;  %v7156_v0 = vmul.f32 0.5, %v1306_v41  ;;  %v4830_v39 = vpop.eup %4829  ;;  %v2687_v18 = vmul.f32 %v2367_v46, %v7072_v35  ;;  %v2376_v36 = vadd.f32 1.0, %v4828_v17  ;;  %v7167_v15 = vpop.f32.mrb[159].mxu0 }
 0x2b9   : > { %v7159_v24 = vmul.f32 0.5, %v869_v59  ;;  %v7161_v32 = vmul.f32 0.5, %v1308_v4  ;;  %v4832_v28 = vpop.eup %4831  ;;  %v2729_v14 = vmul.f32 %v2409_v20, %v7074_v31  ;;  %v2102_v49 = vadd.f32 1.0, %v4830_v39  ;;  %v7171_v17 = vpop.f32.mrb[104].mxu1 }
 0x2ba   : > { %v2913_v2 = vrot.slane %v2912_v9, 4  ;;  %4845 = vtanh.f32 %v7156_v0  ;;  %v2871_v43 = vadd.f32 %v2870_v62, %v2687_v18  ;;  %v2696_v41 = vmul.f32 %v2376_v36, %v7080_v3  ;;  %v7175_v31 = vpop.f32.mrb[160].mxu0  ;;  %v7182_v36 = vpop.f32.mrb[105].mxu1 }
 0x2bb   : > { %v2377_v35 = vadd.f32 1.0, %v4832_v28  ;;  %4847 = vtanh.f32 %v7159_v24  ;;  %v2949_v40 = vadd.f32 %v2948_v57, %v2729_v14  ;;  %v2422_v46 = vmul.f32 %v2102_v49, %v7094_v50  ;;  %8355 = vst [vmem:[#allocation12_spill] sm:$0xff] %v7175_v31  ;;  %8356 = vst [vmem:[#allocation13_spill] sm:$0xff] %v7182_v36  ;;  %v8357_v50 = vld [vmem:[#allocation14_spill] sm:$0xff]  ;;  %v7186_v14 = vpop.f32.mrb[161].mxu0 }
 0x2bc   : > { %v2914_v59 = vadd.f32 %v2913_v2, %v2912_v9  ;;  %4849 = vtanh.f32 %v7161_v32  ;;  %v4834_v4 = vpop.eup %4833  ;;  %v2835_v20 = vadd.f32 %v2834_v60, %v2696_v41  ;;  %v7178_v62 = vmul.f32 0.5, %v871_v37  ;;  %8358 = vst [vmem:[#allocation28_spill] sm:$0xff] %v7186_v14  ;;  %v7191_v37 = vpop.f32.mrb[106].mxu1 }
 0x2bd   : > { %v2697_v39 = vmul.f32 %v2377_v35, %v7098_v53  ;;  %v1310_v3 = vadd.f32 %v6728_v11, %v8337_v10  ;;  %v4836_v18 = vpop.eup %4835  ;;  %v2950_v57 = vrot.slane %v2949_v40, 4  ;;  %v2103_v9 = vadd.f32 1.0, %v4834_v4  ;;  %8359 = vst [vmem:[#allocation29_spill] sm:$0xff] %v7191_v37 }
 0x2be   : > { %v2915_v2 = vrot.slane %v2914_v59, 2  ;;  %v873_v28 = vadd.f32 %v8357_v50, %v5276_v16  ;;  %v4838_v49 = vpop.eup %4837  ;;  %v2386_v41 = vadd.f32 1.0, %v4836_v18  ;;  %4851 = vtanh.f32 %v7178_v62 }
 0x2bf   : > { %v2872_v60 = vadd.f32 %v2871_v43, %v2697_v39  ;;  %v7189_v53 = vmul.f32 0.5, %v1310_v3  ;;  %v4840_v11 = vpop.eup %4839  ;;  %v7195_v36 = vadd.f32 %v2950_v57, %v2949_v40  ;;  %v2423_v4 = vmul.f32 %v2103_v9, %v7111_v38  ;;  %v7202_v39 = vpop.f32.mrb[162].mxu0  ;;  %v8362_v40 = vld [vmem:[#allocation30_spill] sm:$0xff]  ;;  %v8363_v57 = vld [vmem:[#allocation5_spill] sm:$0xff]  ;;  %v8364_v38 = vld [vmem:[#allocation15_spill] sm:$0xff] }
 0x2c0   : > { %v7193_v35 = vadd.f32 %v2915_v2, %v2914_v59  ;;  %v2112_v31 = vadd.f32 1.0, %v4838_v49  ;;  %v4842_v16 = vpop.eup %4841  ;;  %v2706_v50 = vmul.f32 %v2386_v41, %v7120_v63  ;;  %v2387_v14 = vadd.f32 1.0, %v4840_v11  ;;  %8361 = vst [vmem:[#allocation51_spill] sm:$0xff] %v7202_v39  ;;  %v7209_v49 = vpop.f32.mrb[107].mxu1 }
 0x2c1   : > { %4853 = vtanh.f32 %v7189_v53  ;;  %v7200_v43 = vmul.f32 0.5, %v873_v28  ;;  %v4844_v3 = vpop.eup %4843  ;;  %v2113_v59 = vadd.f32 1.0, %v4842_v16  ;;  %v1312_v2 = vadd.f32 %v8362_v40, %v8340_v47  ;;  %8365 = vst [vmem:[#allocation30_spill] sm:$0xff] %v7209_v49  ;;  %v7213_v28 = vpop.f32.mrb[163].mxu0  ;;  %v4431_v40 = vld [vmem:[%s8247_s3 + $0x250] sm:$0xff]   ;;  %v8370_v49 = vld [vmem:[#allocation17_spill] sm:$0xff] }
 0x2c2   : > { %8360 = vst [vmem:[#allocation14_spill] sm:$0xff] %v7193_v35  ;;  %v2432_v18 = vmul.f32 %v2112_v31, %v7128_v23  ;;  %v1103_v9 = vadd.f32 %v8364_v38, %v8363_v57  ;;  %v2836_v63 = vadd.f32 %v2835_v20, %v2706_v50  ;;  %v2707_v41 = vmul.f32 %v2387_v14, %v7133_v54  ;;  %v4432_v54 = vld [vmem:[%s8247_s3 + $0x210] sm:$0xff]   ;;  %v7226_v20 = vpop.f32.mrb[108].mxu1 }
 0x2c3   : > { %v2396_v11 = vadd.f32 1.0, %v4844_v3  ;;  %4855 = vtanh.f32 %v7200_v43  ;;  %8366 = vst [vmem:[#allocation5_spill] sm:$0xff] %v7213_v28  ;;  %v2433_v23 = vmul.f32 %v2113_v59, %v7138_v33  ;;  %v7216_v31 = vmul.f32 0.5, %v1312_v2  ;;  %8367 = vst [vmem:[#allocation15_spill] sm:$0xff] %v7226_v20  ;;  %v8368_v33 = vld [vmem:[#allocation16_spill] sm:$0xff]  ;;  %v7231_v59 = vpop.f32.mrb[164].mxu0  ;;  %4314 = vmatprep.subr.bf16.mxu0 %v4431_v40 }
 0x2c4   : > { %v4846_v39 = vpop.eup %4845  ;;  %v3030_v37 = vadd.f32 %v2432_v18, %v2422_v46  ;;  %v7218_v16 = vmul.f32 0.5, %v1103_v9  ;;  %v2873_v50 = vadd.f32 %v2872_v60, %v2707_v41  ;;  %v1316_v18 = vadd.f32 %v8368_v33, %v8337_v10  ;;  %v8369_v28 = vld [vmem:[#allocation6_spill] sm:$0xff]  ;;  %4315 = vmatpush3.bf16.msra.mxu0 %v4432_v54 }
 0x2c5   : > { %v4848_v14 = vpop.eup %4847  ;;  %v2716_v46 = vmul.f32 %v2396_v11, %v7140_v25  ;;  %v2122_v3 = vadd.f32 1.0, %v4846_v39  ;;  %v3067_v38 = vadd.f32 %v2433_v23, %v2423_v4  ;;  %4857 = vtanh.f32 %v7216_v31  ;;  %v7238_v25 = vpop.f32.mrb[109].mxu1  ;;  %v8371_v23 = vld [vmem:[#allocation31_spill] sm:$0xff] }
 0x2c6   : > { %v4850_v2 = vpop.eup %4849  ;;  %v2397_v9 = vadd.f32 1.0, %v4848_v14  ;;  %v1105_v35 = vadd.f32 %v8370_v49, %v8369_v28  ;;  %4859 = vtanh.f32 %v7218_v16  ;;  %v7241_v11 = vmul.f32 0.5, %v1316_v18  ;;  %v7247_v49 = vpop.f32.mrb[165].mxu0 }
 0x2c7   : > { %v2837_v20 = vadd.f32 %v2836_v63, %v2716_v46  ;;  %v2442_v60 = vmul.f32 %v2122_v3, %v7156_v0  ;;  %v2123_v41 = vadd.f32 1.0, %v4850_v2  ;;  %v1318_v14 = vadd.f32 %v8371_v23, %v8340_v47  ;;  %v8372_v46 = vld [vmem:[#allocation32_spill] sm:$0xff] }
 0x2c8   : > { %v2717_v39 = vmul.f32 %v2397_v9, %v7159_v24  ;;  %v7243_v4 = vmul.f32 0.5, %v1105_v35  ;;  %v4852_v63 = vpop.eup %4851  ;;  %v1107_v54 = vadd.f32 %v6780_v13, %v8363_v57  ;;  %v1320_v3 = vadd.f32 %v8372_v46, %v8337_v10  ;;  %v7254_v24 = vpop.f32.mrb[110].mxu1 }
 0x2c9   : > { %v3031_v40 = vadd.f32 %v3030_v37, %v2442_v60  ;;  %v2443_v0 = vmul.f32 %v2123_v41, %v7161_v32  ;;  %8373 = vst [vmem:[#allocation16_spill] sm:$0xff] %v7254_v24  ;;  %v2406_v35 = vadd.f32 1.0, %v4852_v63  ;;  %4861 = vtanh.f32 %v7241_v11  ;;  %v7268_v41 = vpop.f32.mrb[166].mxu0 }
 0x2ca   : > { %v2874_v33 = vadd.f32 %v2873_v50, %v2717_v39  ;;  %v7257_v18 = vmul.f32 0.5, %v1318_v14  ;;  %4863 = vtanh.f32 %v7243_v4  ;;  %v7260_v37 = vmul.f32 0.5, %v1107_v54  ;;  %8374 = vst [vmem:[#allocation6_spill] sm:$0xff] %v7268_v41 }
 0x2cb   : > { %v4854_v2 = vpop.eup %4853  ;;  %v3068_v9 = vadd.f32 %v3067_v38, %v2443_v0  ;;  %v7262_v32 = vmul.f32 0.5, %v1320_v3  ;;  %v2726_v13 = vmul.f32 %v2406_v35, %v7178_v62  ;;  %v1109_v50 = vadd.f32 %v6788_v21, %v8369_v28 }
 0x2cc   : > { %v2132_v60 = vadd.f32 1.0, %v4854_v2  ;;  %4865 = vtanh.f32 %v7257_v18  ;;  %v1322_v38 = vadd.f32 %v6790_v22, %v8340_v47  ;;  %v1113_v23 = vadd.f32 %v6810_v34, %v8363_v57  ;;  %v7287_v22 = vpop.f32.mrb[111].mxu1 }
 0x2cd   : > { %v4856_v39 = vpop.eup %4855  ;;  %4867 = vtanh.f32 %v7260_v37  ;;  %v1326_v62 = vadd.f32 %v6812_v48, %v8337_v10  ;;  %v2838_v14 = vadd.f32 %v2837_v20, %v2726_v13  ;;  %v7279_v21 = vmul.f32 0.5, %v1109_v50  ;;  %8375 = vst [vmem:[#allocation17_spill] sm:$0xff] %v7287_v22  ;;  %v7292_v13 = vpop.f32.mrb[167].mxu0 }
 0x2ce   : > { %v2452_v63 = vmul.f32 %v2132_v60, %v7189_v53  ;;  %v2407_v0 = vadd.f32 1.0, %v4856_v39  ;;  %4869 = vtanh.f32 %v7262_v32  ;;  %v7281_v54 = vmul.f32 0.5, %v1322_v38  ;;  %v8376_v53 = vld [vmem:[#allocation33_spill] sm:$0xff]  ;;  %8377 = vst [vmem:[#allocation31_spill] sm:$0xff] %v7292_v13  ;;  %v8378_v39 = vld [vmem:[#allocation34_spill] sm:$0xff] }
 0x2cf   : > { %v7283_v46 = vmul.f32 0.5, %v1113_v23  ;;  %v7285_v3 = vmul.f32 0.5, %v1326_v62  ;;  %v4858_v34 = vpop.eup %4857  ;;  %v2839_v35 = vrot.slane %v2838_v14, 4  ;;  %v1115_v20 = vadd.f32 %v8376_v53, %v8369_v28 }
 0x2d0   : > { %v3032_v2 = vadd.f32 %v3031_v40, %v2452_v63  ;;  %v2727_v48 = vmul.f32 %v2407_v0, %v7200_v43  ;;  %v4860_v60 = vpop.eup %4859  ;;  %v2133_v50 = vadd.f32 1.0, %v4858_v34  ;;  %4871 = vtanh.f32 %v7279_v21  ;;  %v7306_v34 = vpop.f32.mrb[112].mxu1 }
 0x2d1   : > { %v1328_v38 = vadd.f32 %v8378_v39, %v8340_v47  ;;  %v1117_v23 = vadd.f32 %v6826_v8, %v8363_v57  ;;  %v2840_v62 = vadd.f32 %v2839_v35, %v2838_v14  ;;  %v2100_v40 = vadd.f32 1.0, %v4860_v60  ;;  %8379 = vst [vmem:[#allocation32_spill] sm:$0xff] %v7306_v34 }
 0x2d2   : > { %v2875_v22 = vadd.f32 %v2874_v33, %v2727_v48  ;;  %4873 = vtanh.f32 %v7281_v54  ;;  %v2453_v43 = vmul.f32 %v2133_v50, %v7216_v31  ;;  %v7302_v63 = vmul.f32 0.5, %v1115_v20  ;;  %v7310_v33 = vpop.f32.mrb[168].mxu0 }
 0x2d3   : > { %4875 = vtanh.f32 %v7283_v46  ;;  %v7304_v0 = vmul.f32 0.5, %v1328_v38  ;;  %v4862_v53 = vpop.eup %4861  ;;  %v2841_v39 = vrot.slane %v2840_v62, 2  ;;  %v2420_v8 = vmul.f32 %v2100_v40, %v7218_v16  ;;  %8380 = vst [vmem:[#allocation33_spill] sm:$0xff] %v7310_v33  ;;  %v7331_v41 = vpop.f32.mrb[169].mxu0 }
 0x2d4   : > { %v2876_v13 = vrot.slane %v2875_v22, 4  ;;  %4877 = vtanh.f32 %v7285_v3  ;;  %v4864_v14 = vpop.eup %4863  ;;  %v3069_v35 = vadd.f32 %v3068_v9, %v2453_v43  ;;  %v2142_v31 = vadd.f32 1.0, %v4862_v53  ;;  %v8381_v9 = vld [vmem:[#allocation35_spill] sm:$0xff]  ;;  %v7324_v53 = vpop.f32.mrb[113].mxu1 }
 0x2d5   : > { %4879 = vtanh.f32 %v7302_v63  ;;  %v7313_v48 = vmul.f32 0.5, %v1117_v23  ;;  %v7315_v60 = vadd.f32 %v2841_v39, %v2840_v62  ;;  %v2101_v38 = vadd.f32 1.0, %v4864_v14  ;;  %8382 = vst [vmem:[#allocation34_spill] sm:$0xff] %v7324_v53  ;;  %v8384_v14 = vld [vmem:[#allocation37_spill] sm:$0xff] }
 0x2d6   : > { %v4866_v20 = vpop.eup %4865  ;;  %v7317_v50 = vadd.f32 %v2876_v13, %v2875_v22  ;;  %4881 = vtanh.f32 %v7304_v0  ;;  %v2462_v40 = vmul.f32 %v2142_v31, %v7241_v11  ;;  %v1330_v43 = vadd.f32 %v8381_v9, %v8337_v10  ;;  %v8383_v22 = vld [vmem:[#allocation36_spill] sm:$0xff]  ;;  %v7336_v9 = vpop.f32.mrb[114].mxu1 }
 0x2d7   : > { %v4868_v16 = vpop.eup %4867  ;;  %v2143_v34 = vadd.f32 1.0, %v4866_v20  ;;  %4883 = vtanh.f32 %v7313_v48  ;;  %v2421_v62 = vmul.f32 %v2101_v38, %v7243_v4  ;;  %v1119_v13 = vadd.f32 %v8383_v22, %v8369_v28  ;;  %8385 = vst [vmem:[#allocation35_spill] sm:$0xff] %v7336_v9  ;;  %v7345_v22 = vpop.f32.mrb[170].mxu0 }
 0x2d8   : > { %v4870_v23 = vpop.eup %4869  ;;  %v2110_v39 = vadd.f32 1.0, %v4868_v16  ;;  %v1332_v33 = vadd.f32 %v8384_v14, %v8340_v47  ;;  %v3033_v11 = vadd.f32 %v3032_v2, %v2462_v40  ;;  %v7334_v24 = vmul.f32 0.5, %v1330_v43  ;;  %8386 = vst [vmem:[#allocation36_spill] sm:$0xff] %v7345_v22  ;;  %v7351_v40 = vpop.f32.mrb[115].mxu1 }
 0x2d9   : > { %v2463_v31 = vmul.f32 %v2143_v34, %v7257_v18  ;;  %v2152_v20 = vadd.f32 1.0, %v4870_v23  ;;  %v7339_v4 = vmul.f32 0.5, %v1119_v13  ;;  %v1123_v16 = vadd.f32 %v6856_v61, %v8363_v57  ;;  %8387 = vst [vmem:[#allocation37_spill] sm:$0xff] %v7351_v40 }
 0x2da   : > { %v2430_v53 = vmul.f32 %v2110_v39, %v7260_v37  ;;  %v7341_v38 = vmul.f32 0.5, %v1332_v33  ;;  %v4872_v14 = vpop.eup %4871  ;;  %4885 = vtanh.f32 %v7334_v24  ;;  %v1336_v34 = vadd.f32 %v6858_v26, %v8337_v10 }
 0x2db   : > { %v3070_v2 = vadd.f32 %v3069_v35, %v2463_v31  ;;  %v2472_v18 = vmul.f32 %v2152_v20, %v7262_v32  ;;  %v2111_v33 = vadd.f32 1.0, %v4872_v14  ;;  %4887 = vtanh.f32 %v7339_v4  ;;  %v7359_v35 = vpop.f32.mrb[171].mxu0 }
 0x2dc   : > { %v4874_v37 = vpop.eup %4873  ;;  %v2956_v43 = vadd.f32 %v2430_v53, %v2420_v8  ;;  %v7354_v23 = vmul.f32 0.5, %v1123_v16  ;;  %4889 = vtanh.f32 %v7341_v38  ;;  %v7357_v32 = vmul.f32 0.5, %v1336_v34  ;;  %8388 = vst [vmem:[#allocation52_spill] sm:$0xff] %v7359_v35  ;;  %v4433_v53 = vld [vmem:[%s8247_s3 + $0x258] sm:$0xff]   ;;  %v7371_v16 = vpop.f32.mrb[116].mxu1 }
 0x2dd   : > { %v4876_v61 = vpop.eup %4875  ;;  %v3034_v39 = vadd.f32 %v3033_v11, %v2472_v18  ;;  %v2153_v13 = vadd.f32 1.0, %v4874_v37  ;;  %v2431_v26 = vmul.f32 %v2111_v33, %v7279_v21  ;;  %v1125_v8 = vadd.f32 %v6864_v6, %v8369_v28  ;;  %v4434_v11 = vld [vmem:[%s8247_s3 + $0x218] sm:$0xff]   ;;  %8389 = vst [vmem:[#allocation53_spill] sm:$0xff] %v7371_v16  ;;  %v7377_v6 = vpop.f32.mrb[172].mxu0  ;;  %4316 = vmatprep.subr.bf16.mxu0 %v4433_v53 }
 0x2de   : > { %v4878_v31 = vpop.eup %4877  ;;  %v2120_v20 = vadd.f32 1.0, %v4876_v61  ;;  %4891 = vtanh.f32 %v7354_v23  ;;  %v1338_v34 = vadd.f32 %v6866_v7, %v8340_v47  ;;  %8390 = vst [vmem:[#allocation54_spill] sm:$0xff] %v7377_v6  ;;  %v7382_v16 = vpop.f32.mrb[117].mxu1  ;;  %4317 = vmatpush3.bf16.msra.mxu0 %v4434_v11 }
 0x2df   : > { %v4880_v14 = vpop.eup %4879  ;;  %v2473_v18 = vmul.f32 %v2153_v13, %v7281_v54  ;;  %v2162_v21 = vadd.f32 1.0, %v4878_v31  ;;  %4893 = vtanh.f32 %v7357_v32  ;;  %v2993_v33 = vadd.f32 %v2431_v26, %v2421_v62  ;;  %v7387_v7 = vpop.f32.mrb[173].mxu0 }
 0x2e0   : > { %v4882_v37 = vpop.eup %4881  ;;  %v2440_v61 = vmul.f32 %v2120_v20, %v7283_v46  ;;  %v2121_v35 = vadd.f32 1.0, %v4880_v14  ;;  %v7380_v40 = vmul.f32 0.5, %v1125_v8  ;;  %v7385_v9 = vmul.f32 0.5, %v1338_v34  ;;  %v7391_v26 = vpop.f32.mrb[118].mxu1 }
 0x2e1   : > { %v4884_v22 = vpop.eup %4883  ;;  %v3071_v54 = vadd.f32 %v3070_v2, %v2473_v18  ;;  %v2482_v13 = vmul.f32 %v2162_v21, %v7285_v3  ;;  %v2163_v31 = vadd.f32 1.0, %v4882_v37  ;;  %v1127_v3 = vadd.f32 %v6872_v1, %v8363_v57  ;;  %v7397_v2 = vpop.f32.mrb[174].mxu0  ;;  %v8391_v1 = vld [vmem:[#allocation18_spill] sm:$0xff] }
 0x2e2   : > { %v2957_v6 = vadd.f32 %v2956_v43, %v2440_v61  ;;  %v2441_v62 = vmul.f32 %v2121_v35, %v7302_v63  ;;  %v2130_v46 = vadd.f32 1.0, %v4884_v22  ;;  %4895 = vtanh.f32 %v7380_v40  ;;  %v7410_v18 = vpop.f32.mrb[119].mxu1 }
 0x2e3   : > { %v3035_v20 = vadd.f32 %v3034_v39, %v2482_v13  ;;  %v2483_v8 = vmul.f32 %v2163_v31, %v7304_v0  ;;  %4897 = vtanh.f32 %v7385_v9  ;;  %v1340_v63 = vadd.f32 %v6874_v44, %v8337_v10  ;;  %v7423_v13 = vpop.f32.mrb[120].mxu1 }
 0x2e4   : > { %v2994_v53 = vadd.f32 %v2993_v33, %v2441_v62  ;;  %v2450_v43 = vmul.f32 %v2130_v46, %v7313_v48  ;;  %v1129_v22 = vadd.f32 %v6880_v56, %v8369_v28  ;;  %v4886_v35 = vpop.eup %4885  ;;  %v7404_v11 = vmul.f32 0.5, %v1127_v3  ;;  %v7416_v56 = vpop.f32.mrb[175].mxu0  ;;  %v8392_v46 = vld [vmem:[#allocation38_spill] sm:$0xff] }
 0x2e5   : > { %v3072_v39 = vadd.f32 %v3071_v54, %v2483_v8  ;;  %v1342_v0 = vadd.f32 %v6882_v12, %v8340_v47  ;;  %v1133_v14 = vadd.f32 %v8391_v1, %v8363_v57  ;;  %v4888_v21 = vpop.eup %4887  ;;  %v2172_v34 = vadd.f32 1.0, %v4886_v35 }
 0x2e6   : > { %v2958_v48 = vadd.f32 %v2957_v6, %v2450_v43  ;;  %v7412_v37 = vmul.f32 0.5, %v1340_v63  ;;  %v7414_v44 = vmul.f32 0.5, %v1129_v22  ;;  %v4890_v33 = vpop.eup %4889  ;;  %v2131_v61 = vadd.f32 1.0, %v4888_v21  ;;  %v8393_v22 = vld [vmem:[#allocation39_spill] sm:$0xff] }
 0x2e7   : > { %4899 = vtanh.f32 %v7404_v11  ;;  %v7419_v54 = vmul.f32 0.5, %v1342_v0  ;;  %v7421_v12 = vmul.f32 0.5, %v1133_v14  ;;  %v2492_v6 = vmul.f32 %v2172_v34, %v7334_v24  ;;  %v7433_v0 = vpop.f32.mrb[176].mxu0 }
 0x2e8   : > { %v4892_v31 = vpop.eup %4891  ;;  %v2173_v62 = vadd.f32 1.0, %v4890_v33  ;;  %4901 = vtanh.f32 %v7412_v37  ;;  %v1346_v8 = vadd.f32 %v8392_v46, %v8337_v10  ;;  %v2451_v43 = vmul.f32 %v2131_v61, %v7339_v4 }
 0x2e9   : > { %v4894_v3 = vpop.eup %4893  ;;  %v2140_v63 = vadd.f32 1.0, %v4892_v31  ;;  %4903 = vtanh.f32 %v7414_v44  ;;  %v1135_v35 = vadd.f32 %v8393_v22, %v8369_v28  ;;  %v3036_v1 = vadd.f32 %v3035_v20, %v2492_v6  ;;  %v8394_v20 = vld [vmem:[#allocation40_spill] sm:$0xff] }
 0x2ea   : > { %v2493_v24 = vmul.f32 %v2173_v62, %v7341_v38  ;;  %v2182_v14 = vadd.f32 1.0, %v4894_v3  ;;  %4905 = vtanh.f32 %v7419_v54  ;;  %v2995_v21 = vadd.f32 %v2994_v53, %v2451_v43  ;;  %v7446_v38 = vpop.f32.mrb[121].mxu1  ;;  %v7451_v43 = vpop.f32.mrb[177].mxu0 }
 0x2eb   : > { %v2460_v34 = vmul.f32 %v2140_v63, %v7354_v23  ;;  %4907 = vtanh.f32 %v7421_v12  ;;  %v7439_v4 = vmul.f32 0.5, %v1346_v8  ;;  %v7442_v46 = vmul.f32 0.5, %v1135_v35  ;;  %v8395_v23 = vld [vmem:[#allocation41_spill] sm:$0xff]  ;;  %8396 = vst [vmem:[#allocation18_spill] sm:$0xff] %v7451_v43 }
 0x2ec   : > { %v4896_v33 = vpop.eup %4895  ;;  %v3073_v61 = vadd.f32 %v3072_v39, %v2493_v24  ;;  %v2502_v31 = vmul.f32 %v2182_v14, %v7357_v32  ;;  %v1348_v6 = vadd.f32 %v8394_v20, %v8340_v47  ;;  %v1137_v8 = vadd.f32 %v8395_v23, %v8363_v57  ;;  %v8398_v14 = vld [vmem:[#allocation19_spill] sm:$0xff] }
 0x2ed   : > { %v4898_v62 = vpop.eup %4897  ;;  %v2959_v3 = vadd.f32 %v2958_v48, %v2460_v34  ;;  %v2141_v53 = vadd.f32 1.0, %v4896_v33  ;;  %4909 = vtanh.f32 %v7439_v4  ;;  %v8397_v48 = vld [vmem:[#allocation42_spill] sm:$0xff]  ;;  %v1139_v34 = vadd.f32 %v8398_v14, %v8369_v28 }
 0x2ee   : > { %v3037_v39 = vadd.f32 %v3036_v1, %v2502_v31  ;;  %v2183_v63 = vadd.f32 1.0, %v4898_v62  ;;  %4911 = vtanh.f32 %v7442_v46  ;;  %v7454_v32 = vmul.f32 0.5, %v1348_v6  ;;  %v8399_v1 = vld [vmem:[#allocation20_spill] sm:$0xff]  ;;  %v7469_v6 = vpop.f32.mrb[122].mxu1 }
 0x2ef   : > { %v2461_v22 = vmul.f32 %v2141_v53, %v7380_v40  ;;  %v7457_v35 = vmul.f32 0.5, %v1137_v8  ;;  %v1350_v24 = vadd.f32 %v8397_v48, %v8337_v10  ;;  %v1352_v31 = vadd.f32 %v8399_v1, %v8340_v47 }
 0x2f0   : > { %v2503_v33 = vmul.f32 %v2183_v63, %v7385_v9  ;;  %4913 = vtanh.f32 %v7454_v32  ;;  %v1143_v20 = vadd.f32 %v6964_v51, %v8363_v57  ;;  %v7474_v23 = vmul.f32 0.5, %v1139_v34 }
 0x2f1   : > { %v4900_v40 = vpop.eup %4899  ;;  %v2996_v62 = vadd.f32 %v2995_v21, %v2461_v22  ;;  %4915 = vtanh.f32 %v7457_v35  ;;  %v7472_v53 = vmul.f32 0.5, %v1350_v24  ;;  %v7476_v48 = vmul.f32 0.5, %v1352_v31  ;;  %v7485_v22 = vpop.f32.mrb[178].mxu0 }
 0x2f2   : > { %v4902_v8 = vpop.eup %4901  ;;  %v3074_v9 = vadd.f32 %v3073_v61, %v2503_v33  ;;  %v2150_v63 = vadd.f32 1.0, %v4900_v40  ;;  %v7478_v14 = vmul.f32 0.5, %v1143_v20  ;;  %v1356_v51 = vadd.f32 %v6966_v5, %v8337_v10  ;;  %8400 = vst [vmem:[#allocation38_spill] sm:$0xff] %v7485_v22  ;;  %v7491_v31 = vpop.f32.mrb[123].mxu1 }
 0x2f3   : > { %v4904_v1 = vpop.eup %4903  ;;  %v2192_v43 = vadd.f32 1.0, %v4902_v8  ;;  %4917 = vtanh.f32 %v7472_v53  ;;  %v1145_v21 = vadd.f32 %v6971_v19, %v8369_v28  ;;  %v1358_v33 = vadd.f32 %v6973_v29, %v8340_v47  ;;  %8401 = vst [vmem:[#allocation39_spill] sm:$0xff] %v7491_v31 }
 0x2f4   : > { %v4906_v24 = vpop.eup %4905  ;;  %v2470_v61 = vmul.f32 %v2150_v63, %v7404_v11  ;;  %v2151_v34 = vadd.f32 1.0, %v4904_v1  ;;  %4919 = vtanh.f32 %v7474_v23  ;;  %v7495_v19 = vmul.f32 0.5, %v1356_v51 }
 0x2f5   : > { %v4908_v20 = vpop.eup %4907  ;;  %v2512_v40 = vmul.f32 %v2192_v43, %v7412_v37  ;;  %v2193_v5 = vadd.f32 1.0, %v4906_v24  ;;  %4921 = vtanh.f32 %v7476_v48  ;;  %v7501_v31 = vmul.f32 0.5, %v1145_v21  ;;  %v7503_v37 = vpop.f32.mrb[179].mxu0 }
 0x2f6   : > { %v2960_v8 = vadd.f32 %v2959_v3, %v2470_v61  ;;  %v2471_v22 = vmul.f32 %v2151_v34, %v7414_v44  ;;  %v2160_v11 = vadd.f32 1.0, %v4908_v20  ;;  %4923 = vtanh.f32 %v7478_v14  ;;  %8402 = vst [vmem:[#allocation40_spill] sm:$0xff] %v7503_v37  ;;  %v4435_v44 = vld [vmem:[%s8247_s3 + $0x260] sm:$0xff]  }
 0x2f7   : > { %v4910_v63 = vpop.eup %4909  ;;  %v3038_v1 = vadd.f32 %v3037_v39, %v2512_v40  ;;  %v2513_v29 = vmul.f32 %v2193_v5, %v7419_v54  ;;  %4925 = vtanh.f32 %v7495_v19  ;;  %v7506_v61 = vmul.f32 0.5, %v1358_v33  ;;  %v4436_v54 = vld [vmem:[%s8247_s3 + $0x220] sm:$0xff]   ;;  %v7514_v39 = vpop.f32.mrb[124].mxu1  ;;  %4318 = vmatprep.subr.bf16.mxu0 %v4435_v44 }
 0x2f8   : > { %v4912_v43 = vpop.eup %4911  ;;  %v2997_v24 = vadd.f32 %v2996_v62, %v2471_v22  ;;  %v2480_v51 = vmul.f32 %v2160_v11, %v7421_v12  ;;  %v2202_v3 = vadd.f32 1.0, %v4910_v63  ;;  %8403 = vst [vmem:[#allocation41_spill] sm:$0xff] %v7514_v39  ;;  %4927 = vtanh.f32 %v7501_v31  ;;  %v7518_v12 = vpop.f32.mrb[180].mxu0  ;;  %v8405_v40 = vld [vmem:[#allocation21_spill] sm:$0xff]  ;;  %4319 = vmatpush3.bf16.msra.mxu0 %v4436_v54 }
 0x2f9   : > { %v3075_v21 = vadd.f32 %v3074_v9, %v2513_v29  ;;  %v2161_v34 = vadd.f32 1.0, %v4912_v43  ;;  %v2878_v62 = vrot.slane %v7317_v50, 2  ;;  %8404 = vst [vmem:[#allocation42_spill] sm:$0xff] %v7518_v12  ;;  %4929 = vtanh.f32 %v7506_v61  ;;  %v7524_v11 = vpop.f32.mrb[125].mxu1  ;;  %v8407_v12 = vld [vmem:[#allocation22_spill] sm:$0xff] }
 0x2fa   : > { %v4914_v22 = vpop.eup %4913  ;;  %v2961_v33 = vadd.f32 %v2960_v8, %v2480_v51  ;;  %v2522_v20 = vmul.f32 %v2202_v3, %v7439_v4  ;;  %v1147_v5 = vadd.f32 %v8405_v40, %v8363_v57  ;;  %8406 = vst [vmem:[#allocation19_spill] sm:$0xff] %v7524_v11  ;;  %v1360_v39 = vadd.f32 %v8407_v12, %v8337_v10  ;;  %v7530_v8 = vpop.f32.mrb[181].mxu0 }
 0x2fb   : > { %v4916_v9 = vpop.eup %4915  ;;  %v2481_v63 = vmul.f32 %v2161_v34, %v7442_v46  ;;  %v2203_v29 = vadd.f32 1.0, %v4914_v22  ;;  %v2879_v43 = vadd.f32 %v2878_v62, %v7317_v50  ;;  %8408 = vst [vmem:[#allocation20_spill] sm:$0xff] %v7530_v8  ;;  %v2843_v44 = vrot.slane %v7315_v60, 1  ;;  %v7535_v40 = vpop.f32.mrb[126].mxu1  ;;  %v8411_v8 = vld [vmem:[#allocation23_spill] sm:$0xff] }
 0x2fc   : > { %v3039_v4 = vadd.f32 %v3038_v1, %v2522_v20  ;;  %v2170_v51 = vadd.f32 1.0, %v4916_v9  ;;  %v7532_v3 = vmul.f32 0.5, %v1147_v5  ;;  %8409 = vst [vmem:[#allocation21_spill] sm:$0xff] %v7535_v40  ;;  %v7538_v50 = vmul.f32 0.5, %v1360_v39  ;;  %v7540_v62 = vpop.f32.mrb[182].mxu0 }
 0x2fd   : > { %v4918_v11 = vpop.eup %4917  ;;  %v2998_v37 = vadd.f32 %v2997_v24, %v2481_v63  ;;  %v2523_v46 = vmul.f32 %v2203_v29, %v7454_v32  ;;  %v2880_v34 = vrot.slane %v2879_v43, 1  ;;  %8410 = vst [vmem:[#allocation22_spill] sm:$0xff] %v7540_v62  ;;  %v2844_v22 = vadd.f32 %v2843_v44, %v7315_v60 }
 0x2fe   : > { %v4920_v54 = vpop.eup %4919  ;;  %v2490_v12 = vmul.f32 %v2170_v51, %v7457_v35  ;;  %v2212_v1 = vadd.f32 1.0, %v4918_v11  ;;  %4931 = vtanh.f32 %v7532_v3  ;;  %v1149_v60 = vadd.f32 %v8411_v8, %v8369_v28 }
 0x2ff   : > { %v4922_v20 = vpop.eup %4921  ;;  %v3076_v5 = vadd.f32 %v3075_v21, %v2523_v46  ;;  %v2171_v9 = vadd.f32 1.0, %v4920_v54  ;;  %v2881_v40 = vadd.f32 %v2880_v34, %v2879_v43  ;;  %4933 = vtanh.f32 %v7538_v50 }
 0x300   : > { %v4924_v32 = vpop.eup %4923  ;;  %v2962_v24 = vadd.f32 %v2961_v33, %v2490_v12  ;;  %v2532_v39 = vmul.f32 %v2212_v1, %v7472_v53  ;;  %v2213_v63 = vadd.f32 1.0, %v4922_v20  ;;  %v3106_v29 = vmul.f32 0.00390625, %v2844_v22  ;;  %v4412_v12 = vld [vmem:[%s8247_s3 + $0x100] sm:$0xff]  }
 0x301   : > { %v4926_v62 = vpop.eup %4925  ;;  %v2491_v35 = vmul.f32 %v2171_v9, %v7474_v23  ;;  %v2180_v11 = vadd.f32 1.0, %v4924_v32  ;;  %v3107_v51 = vmul.f32 0.00390625, %v2881_v40  ;;  %v7555_v23 = vmul.f32 0.5, %v1149_v60  ;;  %v8413_v32 = vld [vmem:[#allocation44_spill] sm:$0xff] }
 0x302   : > { %v3040_v44 = vadd.f32 %v3039_v4, %v2532_v39  ;;  %v2533_v21 = vmul.f32 %v2213_v63, %v7476_v48  ;;  %v2222_v43 = vadd.f32 1.0, %v4926_v62  ;;  %v3116_v46 = vpack.c.bf16 %v3106_v29, %v3106_v29  ;;  %v4928_v34 = vpop.eup %4927  ;;  %v8412_v48 = vld [vmem:[#allocation43_spill] sm:$0xff]  ;;  %v4416_v29 = vld [vmem:[%s8247_s3 + $0x108] sm:$0xff]  }
 0x303   : > { %v2999_v54 = vadd.f32 %v2998_v37, %v2491_v35  ;;  %v2500_v33 = vmul.f32 %v2180_v11, %v7478_v14  ;;  %v3117_v53 = vpack.c.bf16 %v3107_v51, %v3107_v51  ;;  %v4930_v40 = vpop.eup %4929  ;;  %v2181_v4 = vadd.f32 1.0, %v4928_v34  ;;  %v4415_v37 = vld [vmem:[%s8247_s3 + $0x148] sm:$0xff]  }
 0x304   : > { %v3077_v1 = vadd.f32 %v3076_v5, %v2533_v21  ;;  %v2542_v8 = vmul.f32 %v2222_v43, %v7495_v19  ;;  %v1362_v62 = vadd.f32 %v8412_v48, %v8340_v47  ;;  %v2223_v22 = vadd.f32 1.0, %v4930_v40  ;;  %v8414_v35 = vld [vmem:[#allocation45_spill] sm:$0xff]  ;;  %v4417_v43 = vld [vmem:[%s8247_s3 + $0x150] sm:$0xff]  }
 0x305   : > { %v2963_v14 = vadd.f32 %v2962_v24, %v2500_v33  ;;  %3837 = vmatprep.mubr.bf16.mxu1 %v3117_v53  ;;  %4935 = vtanh.f32 %v7555_v23  ;;  %v2952_v20 = vrot.slane %v7195_v36, 2  ;;  %v2501_v5 = vmul.f32 %v2181_v4, %v7501_v31  ;;  %v8415_v31 = vld [vmem:[#allocation46_spill] sm:$0xff] }
 0x306   : > { %v3041_v9 = vadd.f32 %v3040_v44, %v2542_v8  ;;  %3838 = vmatmul.mubr.bf16.vlgmr.msra.gmra.mrb[140].mxu1 %v3116_v46  ;;  %v7566_v19 = vmul.f32 0.5, %v1362_v62  ;;  %v1153_v39 = vadd.f32 %v8413_v32, %v8363_v57  ;;  %v2543_v63 = vmul.f32 %v2223_v22, %v7506_v61  ;;  %v4419_v32 = vld [vmem:[%s8247_s3 + $0x158] sm:$0xff]  }
 0x307   : > { %4267 = vmatpush3.bf16.msra.mxu1 %v4412_v12  ;;  %v2953_v24 = vadd.f32 %v2952_v20, %v7195_v36  ;;  %v1366_v11 = vadd.f32 %v8414_v35, %v8337_v10  ;;  %v1155_v51 = vadd.f32 %v8415_v31, %v8369_v28  ;;  %v7579_v44 = vadd.f32 %v2999_v54, %v2501_v5  ;;  %v8416_v36 = vld [vmem:[#allocation47_spill] sm:$0xff]  ;;  %v8418_v20 = vld [vmem:[#allocation48_spill] sm:$0xff] }
 0x308   : > { %v4932_v60 = vpop.eup %4931  ;;  %4937 = vtanh.f32 %v7566_v19  ;;  %4268 = vmatprep.subr.bf16.mxu1 %v4415_v37  ;;  %v7582_v61 = vmul.f32 0.5, %v1153_v39  ;;  %v1368_v21 = vadd.f32 %v8416_v36, %v8340_v47  ;;  %v7589_v34 = vadd.f32 %v3077_v1, %v2543_v63  ;;  %v8417_v1 = vld [vmem:[#allocation24_spill] sm:$0xff]  ;;  %v4418_v37 = vld [vmem:[%s8247_s3 + $0x110] sm:$0xff]   ;;  %v7614_v39 = vpop.f32.mrb[127].mxu1  ;;  %v8419_v36 = vld [vmem:[#allocation49_spill] sm:$0xff] }
 0x309   : > { %v4934_v46 = vpop.eup %4933  ;;  %v2190_v33 = vadd.f32 1.0, %v4932_v60  ;;  %v2954_v53 = vrot.slane %v2953_v24, 1  ;;  %v7591_v12 = vmul.f32 0.5, %v1366_v11  ;;  %v7594_v40 = vmul.f32 0.5, %v1155_v51  ;;  %v7616_v63 = vpop.f32.mrb[183].mxu0 }
 0x30a   : > { %v2232_v54 = vadd.f32 1.0, %v4934_v46  ;;  %4939 = vtanh.f32 %v7582_v61  ;;  %v7596_v8 = vmul.f32 0.5, %v1368_v21  ;;  %v1157_v62 = vadd.f32 %v8417_v1, %v8363_v57  ;;  %v7629_v11 = vpop.f32.mrb[128].mxu1 }
 0x30b   : > { %v2510_v4 = vmul.f32 %v2190_v33, %v7532_v3  ;;  %v2955_v48 = vadd.f32 %v2954_v53, %v2953_v24  ;;  %4269 = vmatpush3.bf16.msra.mxu1 %v4416_v29  ;;  %4941 = vtanh.f32 %v7591_v12  ;;  %v1370_v5 = vadd.f32 %v8418_v20, %v8337_v10  ;;  %v4438_v24 = vld [vmem:[%s8247_s3 + $0x228] sm:$0xff]  }
 0x30c   : > { %v2552_v22 = vmul.f32 %v2232_v54, %v7538_v50  ;;  %4943 = vtanh.f32 %v7594_v40  ;;  %4270 = vmatprep.subr.bf16.mxu1 %v4417_v43  ;;  %v1159_v3 = vadd.f32 %v7033_v45, %v8369_v28  ;;  %v4437_v50 = vld [vmem:[%s8247_s3 + $0x268] sm:$0xff]   ;;  %v7627_v45 = vmul.f32 0.5, %v1157_v62  ;;  %v7639_v43 = vpop.f32.mrb[129].mxu1  ;;  %v4421_v62 = vld [vmem:[%s8247_s3 + $0x160] sm:$0xff]  }
 0x30d   : > { %v7624_v29 = vadd.f32 %v2963_v14, %v2510_v4  ;;  %v3109_v35 = vmul.f32 0.00390625, %v2955_v48  ;;  %4945 = vtanh.f32 %v7596_v8  ;;  %v7633_v51 = vmul.f32 0.5, %v1370_v5  ;;  %4320 = vmatprep.subr.bf16.mxu0 %v4437_v50  ;;  %v7649_v54 = vpop.f32.mrb[130].mxu1 }
 0x30e   : > { %v7631_v31 = vadd.f32 %v3041_v9, %v2552_v22  ;;  %v7635_v60 = vmul.f32 0.5, %v1159_v3  ;;  %v1372_v21 = vadd.f32 %v8419_v36, %v8340_v47  ;;  %4947 = vtanh.f32 %v7627_v45  ;;  %v4420_v9 = vld [vmem:[%s8247_s3 + $0x118] sm:$0xff]   ;;  %4321 = vmatpush3.bf16.msra.mxu0 %v4438_v24 }
 0x30f   : > { %v4936_v14 = vpop.eup %4935  ;;  %v3119_v46 = vpack.c.bf16 %v3109_v35, %v3109_v35  ;;  %4271 = vmatpush3.bf16.msra.mxu1 %v4418_v37  ;;  %v1163_v33 = vadd.f32 %v7054_v27, %v8363_v57  ;;  %v1376_v53 = vadd.f32 %v7056_v52, %v8337_v10  ;;  %4949 = vtanh.f32 %v7633_v51  ;;  %v7659_v27 = vpop.f32.mrb[131].mxu1 }
 0x310   : > { %v2191_v4 = vadd.f32 1.0, %v4936_v14  ;;  %v7652_v48 = vmul.f32 0.5, %v1372_v21  ;;  %4272 = vmatprep.subr.bf16.mxu1 %v4419_v32  ;;  %v1165_v1 = vadd.f32 %v7062_v30, %v8369_v28  ;;  %8420 = vst [vmem:[#allocation23_spill] sm:$0xff] %v7659_v27  ;;  %4951 = vtanh.f32 %v7635_v60  ;;  %v7668_v20 = vpop.f32.mrb[132].mxu1 }
 0x311   : > { %3877 = vmatprep.mubr.bf16.mxu1 %v3119_v46  ;;  %v7662_v52 = vmul.f32 0.5, %v1163_v33  ;;  %v7664_v37 = vmul.f32 0.5, %v1376_v53  ;;  %v1378_v22 = vadd.f32 %v7064_v42, %v8340_v47  ;;  %8421 = vst [vmem:[#allocation43_spill] sm:$0xff] %v7668_v20  ;;  %v1167_v32 = vadd.f32 %v7076_v55, %v8363_v57  ;;  %v7676_v50 = vpop.f32.mrb[133].mxu1  ;;  %v8423_v42 = vld [vmem:[#allocation25_spill] sm:$0xff] }
 0x312   : > { %v4938_v5 = vpop.eup %4937  ;;  %v2511_v30 = vmul.f32 %v2191_v4, %v7555_v23  ;;  %4953 = vtanh.f32 %v7652_v48  ;;  %v7672_v3 = vmul.f32 0.5, %v1165_v1  ;;  %8422 = vst [vmem:[#allocation44_spill] sm:$0xff] %v7676_v50  ;;  %v1380_v36 = vadd.f32 %v8423_v42, %v8337_v10  ;;  %v4422_v23 = vld [vmem:[%s8247_s3 + $0x120] sm:$0xff]   ;;  %v7686_v21 = vpop.f32.mrb[134].mxu1  ;;  %v4425_v53 = vld [vmem:[%s8247_s3 + $0x168] sm:$0xff]  }
 0x313   : > { %v2233_v24 = vadd.f32 1.0, %v4938_v5  ;;  %4273 = vmatpush3.bf16.msra.mxu1 %v4420_v9  ;;  %4955 = vtanh.f32 %v7662_v52  ;;  %v7679_v35 = vmul.f32 0.5, %v1378_v22  ;;  %8424 = vst [vmem:[#allocation45_spill] sm:$0xff] %v7686_v21  ;;  %v7690_v46 = vmul.f32 0.5, %v1167_v32  ;;  %v8425_v9 = vld [vmem:[#allocation26_spill] sm:$0xff]  ;;  %v7697_v4 = vpop.f32.mrb[135].mxu1 }
 0x314   : > { %v4940_v14 = vpop.eup %4939  ;;  %v3001_v55 = vadd.f32 %v7579_v44, %v2511_v30  ;;  %4957 = vtanh.f32 %v7664_v37  ;;  %4274 = vmatprep.subr.bf16.mxu1 %v4421_v62  ;;  %v1169_v33 = vadd.f32 %v8425_v9, %v8369_v28  ;;  %8426 = vst [vmem:[#allocation46_spill] sm:$0xff] %v7697_v4  ;;  %v7701_v44 = vmul.f32 0.5, %v1380_v36  ;;  %v4441_v62 = vld [vmem:[%s8247_s3 + $0x270] sm:$0xff]  }
 0x315   : > { %v4942_v1 = vpop.eup %4941  ;;  %v2553_v22 = vmul.f32 %v2233_v24, %v7566_v19  ;;  %v2200_v5 = vadd.f32 1.0, %v4940_v14  ;;  %4959 = vtanh.f32 %v7672_v3  ;;  %v4442_v30 = vld [vmem:[%s8247_s3 + $0x230] sm:$0xff]   ;;  %4322 = vmatprep.subr.bf16.mxu0 %v4441_v62  ;;  %v8428_v62 = vld [vmem:[#allocation8_spill] sm:$0xff] }
 0x316   : > { %v4944_v32 = vpop.eup %4943  ;;  %v2242_v42 = vadd.f32 1.0, %v4942_v1  ;;  %4961 = vtanh.f32 %v7679_v35  ;;  %v7710_v9 = vmul.f32 0.5, %v1169_v33  ;;  %v8427_v19 = vld [vmem:[#allocation7_spill] sm:$0xff]  ;;  %v4426_v1 = vld [vmem:[%s8247_s3 + $0x128] sm:$0xff]   ;;  %4323 = vmatpush3.bf16.msra.mxu0 %v4442_v30 }
 0x317   : > { %v1382_v24 = vadd.f32 %v8427_v19, %v8340_v47  ;;  %v4946_v14 = vpop.eup %4945  ;;  %v3079_v36 = vadd.f32 %v7589_v34, %v2553_v22  ;;  %v2520_v4 = vmul.f32 %v2200_v5, %v7582_v61  ;;  %v2201_v21 = vadd.f32 1.0, %v4944_v32  ;;  %4275 = vmatpush3.bf16.msra.mxu1 %v4422_v23  ;;  %v4448_v33 = vld [vmem:[%s8247_s3 + $0x278] sm:$0xff]   ;;  %v4427_v61 = vld [vmem:[%s8247_s3 + $0x170] sm:$0xff]  }
 0x318   : > { %4963 = vtanh.f32 %v7690_v46  ;;  %v2562_v19 = vmul.f32 %v2242_v42, %v7591_v12  ;;  %v2243_v50 = vadd.f32 1.0, %v4946_v14  ;;  %4276 = vmatprep.subr.bf16.mxu1 %v4425_v53  ;;  %v4450_v23 = vld [vmem:[%s8247_s3 + $0x238] sm:$0xff]   ;;  %v4948_v22 = vpop.eup %4947  ;;  %v1173_v32 = vadd.f32 %v8428_v62, %v8363_v57  ;;  %4324 = vmatprep.subr.bf16.mxu0 %v4448_v33 }
 0x319   : > { %4965 = vtanh.f32 %v7701_v44  ;;  %v7725_v34 = vmul.f32 0.5, %v1382_v24  ;;  %v2965_v5 = vadd.f32 %v7624_v29, %v2520_v4  ;;  %v2521_v12 = vmul.f32 %v2201_v21, %v7594_v40  ;;  %v4950_v53 = vpop.eup %4949  ;;  %v8429_v40 = vld [vmem:[#allocation9_spill] sm:$0xff]  ;;  %v4428_v4 = vld [vmem:[%s8247_s3 + $0x130] sm:$0xff]  }
 0x31a   : > { %4967 = vtanh.f32 %v7710_v9  ;;  %v3043_v42 = vadd.f32 %v7631_v31, %v2562_v19  ;;  %v2563_v30 = vmul.f32 %v2243_v50, %v7596_v8  ;;  %v2210_v24 = vadd.f32 1.0, %v4948_v22  ;;  %v4952_v14 = vpop.eup %4951  ;;  %v8430_v19 = vld [vmem:[#allocation10_spill] sm:$0xff]  ;;  %4325 = vmatpush3.bf16.msra.mxu0 %v4450_v23 }
 0x31b   : > { %4969 = vtanh.f32 %v7725_v34  ;;  %v3002_v20 = vadd.f32 %v3001_v55, %v2521_v12  ;;  %v2252_v27 = vadd.f32 1.0, %v4950_v53  ;;  %4277 = vmatpush3.bf16.msra.mxu1 %v4426_v1  ;;  %v7741_v29 = vmul.f32 0.5, %v1173_v32  ;;  %v4429_v55 = vld [vmem:[%s8247_s3 + $0x178] sm:$0xff]  }
 0x31c   : > { %v1386_v21 = vadd.f32 %v8429_v40, %v8337_v10  ;;  %v4954_v33 = vpop.eup %4953  ;;  %v3080_v31 = vadd.f32 %v3079_v36, %v2563_v30  ;;  %v2530_v8 = vmul.f32 %v2210_v24, %v7627_v45  ;;  %v2211_v50 = vadd.f32 1.0, %v4952_v14  ;;  %4278 = vmatprep.subr.bf16.mxu1 %v4427_v61 }
 0x31d   : > { %v1175_v22 = vadd.f32 %v8430_v19, %v8369_v28  ;;  %v4956_v1 = vpop.eup %4955  ;;  %v2572_v12 = vmul.f32 %v2252_v27, %v7633_v51  ;;  %v2253_v62 = vadd.f32 1.0, %v4954_v33  ;;  %4971 = vtanh.f32 %v7741_v29  ;;  %v4430_v51 = vld [vmem:[%s8247_s3 + $0x138] sm:$0xff]   ;;  %v7766_v27 = vpop.f32.mrb[136].mxu1 }
 0x31e   : > { %v7756_v32 = vmul.f32 0.5, %v1386_v21  ;;  %v4958_v36 = vpop.eup %4957  ;;  %v2966_v45 = vadd.f32 %v2965_v5, %v2530_v8  ;;  %v2531_v53 = vmul.f32 %v2211_v50, %v7635_v60  ;;  %v2220_v30 = vadd.f32 1.0, %v4956_v1 }
 0x31f   : > { %v7759_v24 = vmul.f32 0.5, %v1175_v22  ;;  %v4960_v61 = vpop.eup %4959  ;;  %v3044_v14 = vadd.f32 %v3043_v42, %v2572_v12  ;;  %v2573_v40 = vmul.f32 %v2253_v62, %v7652_v48  ;;  %v2262_v23 = vadd.f32 1.0, %v4958_v36  ;;  %4279 = vmatpush3.bf16.msra.mxu1 %v4428_v4  ;;  %v7770_v42 = vpop.f32.mrb[137].mxu1  ;;  %v4439_v48 = vld [vmem:[%s8247_s3 + $0x1c0] sm:$0xff]   ;;  %v8432_v22 = vld [vmem:[#allocation50_spill] sm:$0xff]  ;;  %v8433_v36 = vld [vmem:[#allocation11_spill] sm:$0xff] }
 0x320   : > { %4973 = vtanh.f32 %v7756_v32  ;;  %v4962_v5 = vpop.eup %4961  ;;  %v3003_v21 = vadd.f32 %v3002_v20, %v2531_v53  ;;  %v2540_v60 = vmul.f32 %v2220_v30, %v7662_v52  ;;  %v2221_v33 = vadd.f32 1.0, %v4960_v61  ;;  %4280 = vmatprep.subr.bf16.mxu1 %v4429_v55  ;;  %8431 = vst [vmem:[#allocation47_spill] sm:$0xff] %v7770_v42  ;;  %v4241_v1 = vpop.f32.mrb[138].mxu1 }
 0x321   : > { %4975 = vtanh.f32 %v7759_v24  ;;  %v3081_v8 = vadd.f32 %v3080_v31, %v2573_v40  ;;  %v2582_v50 = vmul.f32 %v2262_v23, %v7664_v37  ;;  %v2263_v19 = vadd.f32 1.0, %v4962_v5  ;;  %v4242_v30 = vpop.f32.mrb[139].mxu1 }
 0x322   : > { %v4964_v4 = vpop.eup %4963  ;;  %v1388_v20 = vadd.f32 %v8432_v22, %v8340_v47  ;;  %v2967_v12 = vadd.f32 %v2966_v45, %v2540_v60  ;;  %v2541_v62 = vmul.f32 %v2221_v33, %v7672_v3  ;;  %v1177_v53 = vadd.f32 %v8433_v36, %v8363_v57 }
 0x323   : > { %v4966_v52 = vpop.eup %4965  ;;  %v2230_v55 = vadd.f32 1.0, %v4964_v4  ;;  %v3045_v42 = vadd.f32 %v3044_v14, %v2582_v50  ;;  %v2583_v31 = vmul.f32 %v2263_v19, %v7679_v35  ;;  %4281 = vmatpush3.bf16.msra.mxu1 %v4430_v51  ;;  %v8434_v51 = vld [vmem:[#allocation27_spill] sm:$0xff] }
 0x324   : > { %v4968_v61 = vpop.eup %4967  ;;  %v2272_v40 = vadd.f32 1.0, %v4966_v52  ;;  %v7782_v37 = vmul.f32 0.5, %v1388_v20  ;;  %v3004_v5 = vadd.f32 %v3003_v21, %v2541_v62  ;;  %v7785_v60 = vmul.f32 0.5, %v1177_v53  ;;  %4288 = vmatprep.subr.bf16.mxu1 %v4439_v48 }
 0x325   : > { %v4970_v23 = vpop.eup %4969  ;;  %v2550_v22 = vmul.f32 %v2230_v55, %v7690_v46  ;;  %v2231_v45 = vadd.f32 1.0, %v4968_v61  ;;  %v3082_v3 = vadd.f32 %v3081_v8, %v2583_v31  ;;  %v1390_v21 = vadd.f32 %v8434_v51, %v8337_v10  ;;  %v8436_v61 = vld [vmem:[#allocation13_spill] sm:$0xff] }
 0x326   : > { %v2592_v33 = vmul.f32 %v2272_v40, %v7701_v44  ;;  %v2273_v4 = vadd.f32 1.0, %v4970_v23  ;;  %4977 = vtanh.f32 %v7782_v37  ;;  %v1179_v48 = vadd.f32 %v7163_v58, %v8369_v28 }
 0x327   : > { %v2968_v14 = vadd.f32 %v2967_v12, %v2550_v22  ;;  %v2551_v35 = vmul.f32 %v2231_v45, %v7710_v9  ;;  %4979 = vtanh.f32 %v7785_v60  ;;  %v4972_v50 = vpop.eup %4971  ;;  %v1392_v44 = vadd.f32 %v7167_v15, %v8340_v47 }
 0x328   : > { %v3046_v46 = vadd.f32 %v3045_v42, %v2592_v33  ;;  %v2593_v19 = vmul.f32 %v2273_v4, %v7725_v34  ;;  %v2240_v20 = vadd.f32 1.0, %v4972_v50  ;;  %v7798_v1 = vmul.f32 0.5, %v1390_v21  ;;  %v8435_v34 = vld [vmem:[#allocation12_spill] sm:$0xff]  ;;  %v8440_v50 = vld [vmem:[#allocation51_spill] sm:$0xff] }
 0x329   : > { %v3005_v8 = vadd.f32 %v3004_v5, %v2551_v35  ;;  %v1183_v9 = vadd.f32 %v7171_v17, %v8363_v57  ;;  %v7802_v62 = vmul.f32 0.5, %v1179_v48  ;;  %v7804_v42 = vmul.f32 0.5, %v1392_v44 }
 0x32a   : > { %v4974_v52 = vpop.eup %4973  ;;  %v3083_v12 = vadd.f32 %v3082_v3, %v2593_v19  ;;  %v1396_v55 = vadd.f32 %v8435_v34, %v8337_v10  ;;  %v2560_v36 = vmul.f32 %v2240_v20, %v7741_v29  ;;  %4981 = vtanh.f32 %v7798_v1  ;;  %v8437_v29 = vld [vmem:[#allocation28_spill] sm:$0xff]  ;;  %v8438_v3 = vld [vmem:[#allocation14_spill] sm:$0xff] }
 0x32b   : > { %v4976_v58 = vpop.eup %4975  ;;  %v2282_v15 = vadd.f32 1.0, %v4974_v52  ;;  %v7810_v53 = vmul.f32 0.5, %v1183_v9  ;;  %4983 = vtanh.f32 %v7802_v62  ;;  %v1185_v31 = vadd.f32 %v8436_v61, %v8369_v28  ;;  %v8441_v20 = vld [vmem:[#allocation30_spill] sm:$0xff] }
 0x32c   : > { %v2241_v30 = vadd.f32 1.0, %v4976_v58  ;;  %v7813_v17 = vmul.f32 0.5, %v1396_v55  ;;  %v2969_v40 = vadd.f32 %v2968_v14, %v2560_v36  ;;  %4985 = vtanh.f32 %v7804_v42 }
 0x32d   : > { %v2602_v23 = vmul.f32 %v2282_v15, %v7756_v32  ;;  %v1398_v5 = vadd.f32 %v8437_v29, %v8340_v47  ;;  %4987 = vtanh.f32 %v7810_v53  ;;  %v7823_v45 = vmul.f32 0.5, %v1185_v31  ;;  %v8439_v32 = vld [vmem:[#allocation29_spill] sm:$0xff] }
 0x32e   : > { %v2561_v22 = vmul.f32 %v2241_v30, %v7759_v24  ;;  %v2917_v33 = vrot.slane %v8438_v3, 1  ;;  %4989 = vtanh.f32 %v7813_v17  ;;  %v1187_v14 = vadd.f32 %v8439_v32, %v8363_v57  ;;  %v8443_v30 = vld [vmem:[#allocation15_spill] sm:$0xff]  ;;  %v4440_v31 = vld [vmem:[%s8247_s3 + $0x180] sm:$0xff]  }
 0x32f   : > { %v3047_v4 = vadd.f32 %v3046_v46, %v2602_v23  ;;  %v7827_v35 = vmul.f32 0.5, %v1398_v5  ;;  %4991 = vtanh.f32 %v7823_v45  ;;  %v1400_v19 = vadd.f32 %v8440_v50, %v8337_v10 }
 0x330   : > { %v4978_v51 = vpop.eup %4977  ;;  %v3006_v21 = vadd.f32 %v3005_v8, %v2561_v22  ;;  %v2918_v24 = vadd.f32 %v2917_v33, %v8438_v3  ;;  %v7836_v46 = vmul.f32 0.5, %v1187_v14  ;;  %v1189_v9 = vadd.f32 %v8441_v20, %v8369_v28  ;;  %v8442_v8 = vld [vmem:[#allocation5_spill] sm:$0xff] }
 0x331   : > { %v4980_v48 = vpop.eup %4979  ;;  %v2283_v44 = vadd.f32 1.0, %v4978_v51  ;;  %4993 = vtanh.f32 %v7827_v35  ;;  %v7840_v55 = vmul.f32 0.5, %v1400_v19  ;;  %v1402_v58 = vadd.f32 %v8442_v8, %v8340_v47 }
 0x332   : > { %v2250_v52 = vadd.f32 1.0, %v4980_v48  ;;  %v3108_v34 = vmul.f32 0.00390625, %v2918_v24  ;;  %4995 = vtanh.f32 %v7836_v46  ;;  %v7846_v15 = vmul.f32 0.5, %v1189_v9 }
 0x333   : > { %v2603_v36 = vmul.f32 %v2283_v44, %v7782_v37  ;;  %v1193_v61 = vadd.f32 %v8443_v30, %v8363_v57  ;;  %4997 = vtanh.f32 %v7840_v55  ;;  %v7855_v5 = vmul.f32 0.5, %v1402_v58  ;;  %v4443_v37 = vld [vmem:[%s8247_s3 + $0x1c8] sm:$0xff]  }
 0x334   : > { %v2570_v23 = vmul.f32 %v2250_v52, %v7785_v60  ;;  %v3118_v29 = vpack.c.bf16 %v3108_v34, %v3108_v34  ;;  %v4982_v22 = vpop.eup %4981  ;;  %4999 = vtanh.f32 %v7846_v15  ;;  %v1406_v32 = vadd.f32 %v7231_v59, %v8337_v10  ;;  %v4444_v59 = vld [vmem:[%s8247_s3 + $0x188] sm:$0xff]   ;;  %v4445_v34 = vld [vmem:[%s8247_s3 + $0x1d0] sm:$0xff]  }
 0x335   : > { %v3084_v3 = vadd.f32 %v3083_v12, %v2603_v36  ;;  %v7861_v33 = vmul.f32 0.5, %v1193_v61  ;;  %v4984_v14 = vpop.eup %4983  ;;  %v2292_v51 = vadd.f32 1.0, %v4982_v22  ;;  %5001 = vtanh.f32 %v7855_v5 }
 0x336   : > { %v2970_v60 = vadd.f32 %v2969_v40, %v2570_v23  ;;  %3878 = vmatmul.mubr.bf16.vlgmr.msra.gmra.mrb[144].mxu1 %v3118_v29  ;;  %v1195_v24 = vadd.f32 %v7238_v25, %v8369_v28  ;;  %v4986_v50 = vpop.eup %4985  ;;  %v2251_v19 = vadd.f32 1.0, %v4984_v14  ;;  %v7869_v12 = vmul.f32 0.5, %v1406_v32  ;;  %v8444_v25 = vld [vmem:[#allocation16_spill] sm:$0xff] }
 0x337   : > { %5003 = vtanh.f32 %v7861_v33  ;;  %v1408_v48 = vadd.f32 %v7247_v49, %v8340_v47  ;;  %4289 = vmatpush3.bf16.msra.mxu1 %v4440_v31  ;;  %v4988_v40 = vpop.eup %4987  ;;  %v2612_v44 = vmul.f32 %v2292_v51, %v7798_v1  ;;  %v2293_v20 = vadd.f32 1.0, %v4986_v50  ;;  %v8445_v50 = vld [vmem:[#allocation6_spill] sm:$0xff] }
 0x338   : > { %v7877_v9 = vmul.f32 0.5, %v1195_v24  ;;  %v1197_v52 = vadd.f32 %v8444_v25, %v8363_v57  ;;  %4290 = vmatprep.subr.bf16.mxu1 %v4443_v37  ;;  %v4990_v49 = vpop.eup %4989  ;;  %v2571_v8 = vmul.f32 %v2251_v19, %v7802_v62  ;;  %v2260_v58 = vadd.f32 1.0, %v4988_v40  ;;  %v4446_v62 = vld [vmem:[%s8247_s3 + $0x190] sm:$0xff]  }
 0x339   : > { %5005 = vtanh.f32 %v7869_v12  ;;  %v7886_v36 = vmul.f32 0.5, %v1408_v48  ;;  %v4992_v1 = vpop.eup %4991  ;;  %v3048_v30 = vadd.f32 %v3047_v4, %v2612_v44  ;;  %v2613_v61 = vmul.f32 %v2293_v20, %v7804_v42  ;;  %v8446_v48 = vld [vmem:[#allocation17_spill] sm:$0xff] }
 0x33a   : > { %v2302_v31 = vadd.f32 1.0, %v4990_v49  ;;  %5007 = vtanh.f32 %v7877_v9  ;;  %v3007_v29 = vadd.f32 %v3006_v21, %v2571_v8  ;;  %v2580_v37 = vmul.f32 %v2260_v58, %v7810_v53  ;;  %v4447_v21 = vld [vmem:[%s8247_s3 + $0x1d8] sm:$0xff]  }
 0x33b   : > { %v4994_v23 = vpop.eup %4993  ;;  %v2261_v22 = vadd.f32 1.0, %v4992_v1  ;;  %5009 = vtanh.f32 %v7886_v36  ;;  %4291 = vmatpush3.bf16.msra.mxu1 %v4444_v59  ;;  %v3085_v32 = vadd.f32 %v3084_v3, %v2613_v61  ;;  %v7896_v42 = vmul.f32 0.5, %v1197_v52  ;;  %v8447_v1 = vld [vmem:[#allocation31_spill] sm:$0xff]  ;;  %v4451_v61 = vld [vmem:[%s8247_s3 + $0x1e0] sm:$0xff]  }
 0x33c   : > { %v2622_v4 = vmul.f32 %v2302_v31, %v7813_v17  ;;  %v2303_v14 = vadd.f32 1.0, %v4994_v23  ;;  %4292 = vmatprep.subr.bf16.mxu1 %v4445_v34  ;;  %v4996_v53 = vpop.eup %4995  ;;  %v2971_v51 = vadd.f32 %v2970_v60, %v2580_v37  ;;  %v1410_v19 = vadd.f32 %v8445_v50, %v8337_v10  ;;  %v8448_v37 = vld [vmem:[#allocation32_spill] sm:$0xff] }
 0x33d   : > { %v2581_v24 = vmul.f32 %v2261_v22, %v7823_v45  ;;  %v1199_v3 = vadd.f32 %v8446_v48, %v8369_v28  ;;  %v4998_v59 = vpop.eup %4997  ;;  %v2270_v44 = vadd.f32 1.0, %v4996_v53  ;;  %5011 = vtanh.f32 %v7896_v42  ;;  %v4449_v45 = vld [vmem:[%s8247_s3 + $0x198] sm:$0xff]   ;;  %v8449_v48 = vld [vmem:[#allocation33_spill] sm:$0xff] }
 0x33e   : > { %v3049_v17 = vadd.f32 %v3048_v30, %v2622_v4  ;;  %v2623_v40 = vmul.f32 %v2303_v14, %v7827_v35  ;;  %v5000_v20 = vpop.eup %4999  ;;  %v2312_v52 = vadd.f32 1.0, %v4998_v59  ;;  %v7908_v34 = vmul.f32 0.5, %v1410_v19 }
 0x33f   : > { %v3008_v25 = vadd.f32 %v3007_v29, %v2581_v24  ;;  %v7910_v60 = vmul.f32 0.5, %v1199_v3  ;;  %4293 = vmatpush3.bf16.msra.mxu1 %v4446_v62  ;;  %v5002_v49 = vpop.eup %5001  ;;  %v2590_v58 = vmul.f32 %v2270_v44, %v7836_v46  ;;  %v2271_v35 = vadd.f32 1.0, %v5000_v20  ;;  %v8450_v44 = vld [vmem:[#allocation34_spill] sm:$0xff] }
 0x340   : > { %v3086_v8 = vadd.f32 %v3085_v32, %v2623_v40  ;;  %v1412_v30 = vadd.f32 %v8447_v1, %v8340_v47  ;;  %4294 = vmatprep.subr.bf16.mxu1 %v4447_v21  ;;  %v2632_v23 = vmul.f32 %v2312_v52, %v7840_v55  ;;  %v2313_v29 = vadd.f32 1.0, %v5002_v49  ;;  %v4452_v55 = vld [vmem:[%s8247_s3 + $0x1a0] sm:$0xff]  }
 0x341   : > { %v5004_v31 = vpop.eup %5003  ;;  %5013 = vtanh.f32 %v7908_v34  ;;  %v1203_v22 = vadd.f32 %v8448_v37, %v8363_v57  ;;  %v2972_v62 = vadd.f32 %v2971_v51, %v2590_v58  ;;  %v2591_v46 = vmul.f32 %v2271_v35, %v7846_v15  ;;  %v4454_v35 = vld [vmem:[%s8247_s3 + $0x1a8] sm:$0xff]  }
 0x342   : > { %v2280_v32 = vadd.f32 1.0, %v5004_v31  ;;  %5015 = vtanh.f32 %v7910_v60  ;;  %v3050_v14 = vadd.f32 %v3049_v17, %v2632_v23  ;;  %v2633_v21 = vmul.f32 %v2313_v29, %v7855_v5  ;;  %v4453_v5 = vld [vmem:[%s8247_s3 + $0x1e8] sm:$0xff]  }
 0x343   : > { %v5006_v4 = vpop.eup %5005  ;;  %v7928_v53 = vmul.f32 0.5, %v1412_v30  ;;  %v7930_v24 = vmul.f32 0.5, %v1203_v22  ;;  %4295 = vmatpush3.bf16.msra.mxu1 %v4449_v45  ;;  %v3009_v51 = vadd.f32 %v3008_v25, %v2591_v46  ;;  %v1416_v3 = vadd.f32 %v8449_v48, %v8337_v10  ;;  %v8455_v48 = vld [vmem:[#allocation53_spill] sm:$0xff] }
 0x344   : > { %v5008_v50 = vpop.eup %5007  ;;  %v2600_v15 = vmul.f32 %v2280_v32, %v7861_v33  ;;  %v2322_v19 = vadd.f32 1.0, %v5006_v4  ;;  %4296 = vmatprep.subr.bf16.mxu1 %v4451_v61  ;;  %v3087_v17 = vadd.f32 %v3086_v8, %v2633_v21  ;;  %v1205_v20 = vadd.f32 %v8450_v44, %v8369_v28  ;;  %v8451_v61 = vld [vmem:[#allocation35_spill] sm:$0xff] }
 0x345   : > { %v5010_v59 = vpop.eup %5009  ;;  %v2281_v40 = vadd.f32 1.0, %v5008_v50  ;;  %5017 = vtanh.f32 %v7928_v53  ;;  %v7947_v49 = vmul.f32 0.5, %v1416_v3  ;;  %v1418_v8 = vadd.f32 %v7331_v41, %v8340_v47  ;;  %v4455_v41 = vld [vmem:[%s8247_s3 + $0x1f0] sm:$0xff]  }
 0x346   : > { %v2973_v25 = vadd.f32 %v2972_v62, %v2600_v15  ;;  %v2642_v33 = vmul.f32 %v2322_v19, %v7869_v12  ;;  %v2323_v52 = vadd.f32 1.0, %v5010_v59  ;;  %5019 = vtanh.f32 %v7930_v24  ;;  %v8456_v3 = vld [vmem:[#allocation54_spill] sm:$0xff]  ;;  %v4457_v59 = vld [vmem:[%s8247_s3 + $0x1f8] sm:$0xff]  }
 0x347   : > { %v2601_v45 = vmul.f32 %v2281_v40, %v7877_v9  ;;  %v7949_v58 = vmul.f32 0.5, %v1205_v20  ;;  %4297 = vmatpush3.bf16.msra.mxu1 %v4452_v55  ;;  %v5012_v1 = vpop.eup %5011  ;;  %v1207_v31 = vadd.f32 %v8451_v61, %v8363_v57  ;;  %v8452_v9 = vld [vmem:[#allocation36_spill] sm:$0xff]  ;;  %5021 = vtanh.f32 %v7947_v49 }
 0x348   : > { %v3051_v30 = vadd.f32 %v3050_v14, %v2642_v33  ;;  %v2643_v12 = vmul.f32 %v2323_v52, %v7886_v36  ;;  %v1420_v23 = vadd.f32 %v8452_v9, %v8337_v10  ;;  %4298 = vmatprep.subr.bf16.mxu1 %v4453_v5  ;;  %v2290_v37 = vadd.f32 1.0, %v5012_v1  ;;  %v8453_v14 = vld [vmem:[#allocation37_spill] sm:$0xff]  ;;  %v8454_v55 = vld [vmem:[#allocation52_spill] sm:$0xff] }
 0x349   : > { %v3010_v29 = vadd.f32 %v3009_v51, %v2601_v45  ;;  %v7965_v22 = vmul.f32 0.5, %v1418_v8  ;;  %5023 = vtanh.f32 %v7949_v58  ;;  %v7968_v36 = vmul.f32 0.5, %v1207_v31  ;;  %v4456_v51 = vld [vmem:[%s8247_s3 + $0x1b0] sm:$0xff]  }
 0x34a   : > { %v3088_v62 = vadd.f32 %v3087_v17, %v2643_v12  ;;  %v7970_v46 = vmul.f32 0.5, %v1420_v23  ;;  %v2610_v4 = vmul.f32 %v2290_v37, %v7896_v42  ;;  %v1209_v21 = vadd.f32 %v8453_v14, %v8369_v28 }
 0x34b   : > { %v5014_v32 = vpop.eup %5013  ;;  %5025 = vtanh.f32 %v7965_v22  ;;  %v1422_v50 = vadd.f32 %v8454_v55, %v8340_v47  ;;  %4299 = vmatpush3.bf16.msra.mxu1 %v4454_v35  ;;  %v1213_v42 = vadd.f32 %v8455_v48, %v8363_v57  ;;  %v1426_v5 = vadd.f32 %v8456_v3, %v8337_v10 }
 0x34c   : > { %v5016_v15 = vpop.eup %5015  ;;  %v2332_v19 = vadd.f32 1.0, %v5014_v32  ;;  %5027 = vtanh.f32 %v7968_v36  ;;  %4300 = vmatprep.subr.bf16.mxu1 %v4455_v41  ;;  %v2974_v17 = vadd.f32 %v2973_v25, %v2610_v4  ;;  %v7990_v44 = vmul.f32 0.5, %v1209_v21 }
 0x34d   : > { %v2291_v40 = vadd.f32 1.0, %v5016_v15  ;;  %5029 = vtanh.f32 %v7970_v46  ;;  %v7993_v33 = vmul.f32 0.5, %v1422_v50  ;;  %v7995_v52 = vmul.f32 0.5, %v1213_v42 }
 0x34e   : > { %v2652_v20 = vmul.f32 %v2332_v19, %v7908_v34  ;;  %v7997_v45 = vmul.f32 0.5, %v1426_v5  ;;  %5031 = vtanh.f32 %v7990_v44  ;;  %v1215_v25 = vadd.f32 %v7382_v16, %v8369_v28  ;;  %v4458_v34 = vld [vmem:[%s8247_s3 + $0x1b8] sm:$0xff]  }
 0x34f   : > { %v5018_v8 = vpop.eup %5017  ;;  %v2611_v35 = vmul.f32 %v2291_v40, %v7910_v60  ;;  %v1428_v1 = vadd.f32 %v7387_v7, %v8340_v47  ;;  %4301 = vmatpush3.bf16.msra.mxu1 %v4456_v51  ;;  %5033 = vtanh.f32 %v7993_v33  ;;  %v1217_v60 = vadd.f32 %v7391_v26, %v8363_v57 }
 0x350   : > { %v5020_v12 = vpop.eup %5019  ;;  %v3052_v61 = vadd.f32 %v3051_v30, %v2652_v20  ;;  %v2333_v31 = vadd.f32 1.0, %v5018_v8  ;;  %4302 = vmatprep.subr.bf16.mxu1 %v4457_v59  ;;  %5035 = vtanh.f32 %v7995_v52  ;;  %v8012_v16 = vmul.f32 0.5, %v1215_v25 }
 0x351   : > { %v3011_v9 = vadd.f32 %v3010_v29, %v2611_v35  ;;  %v2300_v23 = vadd.f32 1.0, %v5020_v12  ;;  %5037 = vtanh.f32 %v7997_v45  ;;  %v8016_v41 = vmul.f32 0.5, %v1428_v1  ;;  %v5022_v37 = vpop.eup %5021 }
 0x352   : > { %v2653_v7 = vmul.f32 %v2333_v31, %v7928_v53  ;;  %v8018_v30 = vmul.f32 0.5, %v1217_v60  ;;  %5039 = vtanh.f32 %v8012_v16  ;;  %v1430_v26 = vadd.f32 %v7397_v2, %v8337_v10 }
 0x353   : > { %v2620_v32 = vmul.f32 %v2300_v23, %v7930_v24  ;;  %v1219_v29 = vadd.f32 %v7410_v18, %v8369_v28  ;;  %4303 = vmatpush3.bf16.msra.mxu1 %v4458_v34  ;;  %v5024_v4 = vpop.eup %5023  ;;  %v2342_v14 = vadd.f32 1.0, %v5022_v37  ;;  %5041 = vtanh.f32 %v8016_v41 }
 0x354   : > { %v3089_v53 = vadd.f32 %v3088_v62, %v2653_v7  ;;  %v1432_v21 = vadd.f32 %v7416_v56, %v8340_v47  ;;  %v2301_v24 = vadd.f32 1.0, %v5024_v4  ;;  %5043 = vtanh.f32 %v8018_v30 }
 0x355   : > { %v5026_v55 = vpop.eup %5025  ;;  %v2975_v50 = vadd.f32 %v2974_v17, %v2620_v32  ;;  %v8030_v51 = vmul.f32 0.5, %v1430_v26  ;;  %v2662_v15 = vmul.f32 %v2342_v14, %v7947_v49  ;;  %v8033_v19 = vmul.f32 0.5, %v1219_v29  ;;  %v8457_v32 = vld [vmem:[#allocation18_spill] sm:$0xff] }
 0x356   : > { %v5028_v2 = vpop.eup %5027  ;;  %v2343_v18 = vadd.f32 1.0, %v5026_v55  ;;  %v8035_v62 = vmul.f32 0.5, %v1432_v21  ;;  %v2621_v42 = vmul.f32 %v2301_v24, %v7949_v58  ;;  %v1223_v56 = vadd.f32 %v7423_v13, %v8363_v57 }
 0x357   : > { %v5030_v48 = vpop.eup %5029  ;;  %v2310_v3 = vadd.f32 1.0, %v5028_v2  ;;  %5045 = vtanh.f32 %v8030_v51  ;;  %v3053_v5 = vadd.f32 %v3052_v61, %v2662_v15  ;;  %v1436_v13 = vadd.f32 %v7433_v0, %v8337_v10 }
 0x358   : > { %v2663_v59 = vmul.f32 %v2343_v18, %v7965_v22  ;;  %v2352_v17 = vadd.f32 1.0, %v5030_v48  ;;  %5047 = vtanh.f32 %v8033_v19  ;;  %v5032_v49 = vpop.eup %5031  ;;  %v3012_v40 = vadd.f32 %v3011_v9, %v2621_v42  ;;  %v8458_v42 = vld [vmem:[#allocation38_spill] sm:$0xff] }
 0x359   : > { %v2630_v20 = vmul.f32 %v2310_v3, %v7968_v36  ;;  %5049 = vtanh.f32 %v8035_v62  ;;  %v8045_v8 = vmul.f32 0.5, %v1223_v56  ;;  %v5034_v58 = vpop.eup %5033  ;;  %v2311_v1 = vadd.f32 1.0, %v5032_v49 }
 0x35a   : > { %v3090_v35 = vadd.f32 %v3089_v53, %v2663_v59  ;;  %v2672_v25 = vmul.f32 %v2352_v17, %v7970_v46  ;;  %v5036_v22 = vpop.eup %5035  ;;  %v2353_v12 = vadd.f32 1.0, %v5034_v58  ;;  %v1225_v36 = vadd.f32 %v7446_v38, %v8369_v28 }
 0x35b   : > { %v2976_v34 = vadd.f32 %v2975_v50, %v2630_v20  ;;  %5051 = vtanh.f32 %v8045_v8  ;;  %v5038_v61 = vpop.eup %5037  ;;  %v2631_v60 = vmul.f32 %v2311_v1, %v7990_v44  ;;  %v2320_v9 = vadd.f32 1.0, %v5036_v22 }
 0x35c   : > { %v3054_v31 = vadd.f32 %v3053_v5, %v2672_v25  ;;  %v8054_v23 = vmul.f32 0.5, %v1436_v13  ;;  %v5040_v46 = vpop.eup %5039  ;;  %v2673_v7 = vmul.f32 %v2353_v12, %v7993_v33  ;;  %v2362_v37 = vadd.f32 1.0, %v5038_v61  ;;  %v8460_v13 = vld [vmem:[#allocation40_spill] sm:$0xff] }
 0x35d   : > { %v8057_v0 = vmul.f32 0.5, %v1225_v36  ;;  %v1438_v26 = vadd.f32 %v8457_v32, %v8340_v47  ;;  %v5042_v29 = vpop.eup %5041  ;;  %v3013_v4 = vadd.f32 %v3012_v40, %v2631_v60  ;;  %v2640_v38 = vmul.f32 %v2320_v9, %v7995_v52  ;;  %v8462_v32 = vld [vmem:[#allocation42_spill] sm:$0xff] }
 0x35e   : > { %v2321_v53 = vadd.f32 1.0, %v5040_v46  ;;  %5053 = vtanh.f32 %v8054_v23  ;;  %v5044_v44 = vpop.eup %5043  ;;  %v3091_v14 = vadd.f32 %v3090_v35, %v2673_v7  ;;  %v2682_v21 = vmul.f32 %v2362_v37, %v7997_v45  ;;  %v8459_v35 = vld [vmem:[#allocation39_spill] sm:$0xff] }
 0x35f   : > { %v2363_v55 = vadd.f32 1.0, %v5042_v29  ;;  %5055 = vtanh.f32 %v8057_v0  ;;  %v2977_v33 = vadd.f32 %v2976_v34, %v2640_v38  ;;  %v2330_v24 = vadd.f32 1.0, %v5044_v44  ;;  %v8461_v34 = vld [vmem:[#allocation41_spill] sm:$0xff]  ;;  %v8463_v29 = vld [vmem:[#allocation19_spill] sm:$0xff] }
 0x360   : > { %v2641_v50 = vmul.f32 %v2321_v53, %v8012_v16  ;;  %v8066_v2 = vmul.f32 0.5, %v1438_v26  ;;  %v3055_v18 = vadd.f32 %v3054_v31, %v2682_v21  ;;  %v1227_v48 = vadd.f32 %v7469_v6, %v8363_v57  ;;  %v8464_v53 = vld [vmem:[#allocation20_spill] sm:$0xff] }
 0x361   : > { %v5046_v15 = vpop.eup %5045  ;;  %v2683_v52 = vmul.f32 %v2363_v55, %v8016_v41  ;;  %v1440_v3 = vadd.f32 %v8458_v42, %v8337_v10  ;;  %v2650_v5 = vmul.f32 %v2330_v24, %v8018_v30  ;;  %v1229_v25 = vadd.f32 %v8459_v35, %v8369_v28  ;;  %v8466_v42 = vld [vmem:[#allocation22_spill] sm:$0xff] }
 0x362   : > { %v5048_v45 = vpop.eup %5047  ;;  %v3014_v56 = vadd.f32 %v3013_v4, %v2641_v50  ;;  %v2372_v59 = vadd.f32 1.0, %v5046_v15  ;;  %5057 = vtanh.f32 %v8066_v2  ;;  %v8075_v40 = vmul.f32 0.5, %v1227_v48 }
 0x363   : > { %v5050_v16 = vpop.eup %5049  ;;  %v3092_v17 = vadd.f32 %v3091_v14, %v2683_v52  ;;  %v2331_v49 = vadd.f32 1.0, %v5048_v45  ;;  %v8077_v20 = vmul.f32 0.5, %v1440_v3  ;;  %v2978_v41 = vadd.f32 %v2977_v33, %v2650_v5  ;;  %v8465_v14 = vld [vmem:[#allocation21_spill] sm:$0xff] }
 0x364   : > { %v2692_v6 = vmul.f32 %v2372_v59, %v8030_v51  ;;  %v2373_v58 = vadd.f32 1.0, %v5050_v16  ;;  %5059 = vtanh.f32 %v8075_v40  ;;  %v1442_v22 = vadd.f32 %v8460_v13, %v8340_v47 }
 0x365   : > { %v5052_v1 = vpop.eup %5051  ;;  %v2651_v30 = vmul.f32 %v2331_v49, %v8033_v19  ;;  %v1233_v12 = vadd.f32 %v8461_v34, %v8363_v57  ;;  %5061 = vtanh.f32 %v8077_v20  ;;  %v8090_v60 = vmul.f32 0.5, %v1229_v25 }
 0x366   : > { %v3056_v36 = vadd.f32 %v3055_v18, %v2692_v6  ;;  %v2693_v61 = vmul.f32 %v2373_v58, %v8035_v62  ;;  %v2340_v31 = vadd.f32 1.0, %v5052_v1  ;;  %v8092_v9 = vmul.f32 0.5, %v1442_v22  ;;  %v8468_v22 = vld [vmem:[#allocation43_spill] sm:$0xff] }
 0x367   : > { %v3015_v51 = vadd.f32 %v3014_v56, %v2651_v30  ;;  %v8094_v19 = vmul.f32 0.5, %v1233_v12  ;;  %v1446_v26 = vadd.f32 %v8462_v32, %v8337_v10  ;;  %v1235_v62 = vadd.f32 %v8463_v29, %v8369_v28 }
 0x368   : > { %v5054_v46 = vpop.eup %5053  ;;  %v3093_v7 = vadd.f32 %v3092_v17, %v2693_v61  ;;  %v2660_v37 = vmul.f32 %v2340_v31, %v8045_v8  ;;  %5063 = vtanh.f32 %v8090_v60  ;;  %v1448_v44 = vadd.f32 %v8464_v53, %v8340_v47  ;;  %v8470_v53 = vld [vmem:[#allocation45_spill] sm:$0xff] }
 0x369   : > { %v5056_v4 = vpop.eup %5055  ;;  %v2382_v38 = vadd.f32 1.0, %v5054_v46  ;;  %v1237_v21 = vadd.f32 %v8465_v14, %v8363_v57  ;;  %5065 = vtanh.f32 %v8092_v9  ;;  %v8107_v8 = vmul.f32 0.5, %v1446_v26  ;;  %v8469_v26 = vld [vmem:[#allocation44_spill] sm:$0xff] }
 0x36a   : > { %v2979_v55 = vadd.f32 %v2978_v41, %v2660_v37  ;;  %v2341_v33 = vadd.f32 1.0, %v5056_v4  ;;  %5067 = vtanh.f32 %v8094_v19  ;;  %v8111_v24 = vmul.f32 0.5, %v1235_v62 }
 0x36b   : > { %v2702_v50 = vmul.f32 %v2382_v38, %v8054_v23  ;;  %v8113_v15 = vmul.f32 0.5, %v1448_v44  ;;  %5069 = vtanh.f32 %v8107_v8  ;;  %v8117_v48 = vmul.f32 0.5, %v1237_v21 }
 0x36c   : > { %v5058_v18 = vpop.eup %5057  ;;  %v2661_v52 = vmul.f32 %v2341_v33, %v8057_v0  ;;  %v1450_v3 = vadd.f32 %v8466_v42, %v8337_v10  ;;  %5071 = vtanh.f32 %v8111_v24  ;;  %v1239_v23 = vadd.f32 %v7614_v39, %v8369_v28 }
 0x36d   : > { %v3057_v45 = vadd.f32 %v3056_v36, %v2702_v50  ;;  %v2383_v56 = vadd.f32 1.0, %v5058_v18  ;;  %5073 = vtanh.f32 %v8113_v15  ;;  %v1452_v0 = vadd.f32 %v7616_v63, %v8340_v47 }
 0x36e   : > { %v3016_v5 = vadd.f32 %v3015_v51, %v2661_v52  ;;  %v8125_v59 = vmul.f32 0.5, %v1450_v3  ;;  %v5060_v16 = vpop.eup %5059  ;;  %5075 = vtanh.f32 %v8117_v48  ;;  %v8131_v10 = vmul.f32 0.5, %v1239_v23 }
 0x36f   : > { %v2703_v17 = vmul.f32 %v2383_v56, %v8066_v2  ;;  %v1243_v49 = vadd.f32 %v7629_v11, %v8363_v57  ;;  %v5062_v41 = vpop.eup %5061  ;;  %v2350_v39 = vadd.f32 1.0, %v5060_v16  ;;  %v8136_v6 = vmul.f32 0.5, %v1452_v0 }
 0x370   : > { %5077 = vtanh.f32 %v8125_v59  ;;  %v1245_v58 = vadd.f32 %v7639_v43, %v8369_v28  ;;  %v2392_v63 = vadd.f32 1.0, %v5062_v41  ;;  %v1247_v25 = vadd.f32 %v7649_v54, %v8363_v57  ;;  %v8467_v43 = vld [vmem:[#allocation23_spill] sm:$0xff] }
 0x371   : > { %v3094_v47 = vadd.f32 %v3093_v7, %v2703_v17  ;;  %5079 = vtanh.f32 %v8131_v10  ;;  %v8141_v2 = vmul.f32 0.5, %v1243_v49  ;;  %v2670_v35 = vmul.f32 %v2350_v39, %v8075_v40 }
 0x372   : > { %5081 = vtanh.f32 %v8136_v6  ;;  %v8145_v11 = vmul.f32 0.5, %v1245_v58  ;;  %v5064_v1 = vpop.eup %5063  ;;  %v2712_v30 = vmul.f32 %v2392_v63, %v8077_v20  ;;  %v1249_v13 = vadd.f32 %v8467_v43, %v8369_v28 }
 0x373   : > { %5083 = vtanh.f32 %v8141_v2  ;;  %v1253_v34 = vadd.f32 %v8468_v22, %v8363_v57  ;;  %v5066_v12 = vpop.eup %5065  ;;  %v2980_v40 = vadd.f32 %v2979_v55, %v2670_v35  ;;  %v2351_v36 = vadd.f32 1.0, %v5064_v1 }
 0x374   : > { %5085 = vtanh.f32 %v8145_v11  ;;  %v8156_v61 = vmul.f32 0.5, %v1247_v25  ;;  %v5068_v31 = vpop.eup %5067  ;;  %v3058_v54 = vadd.f32 %v3057_v45, %v2712_v30  ;;  %v2393_v51 = vadd.f32 1.0, %v5066_v12  ;;  %v8472_v30 = vld [vmem:[#allocation47_spill] sm:$0xff] }
 0x375   : > { %v8158_v46 = vmul.f32 0.5, %v1249_v13  ;;  %v8160_v20 = vmul.f32 0.5, %v1253_v34  ;;  %v5070_v7 = vpop.eup %5069  ;;  %v2671_v37 = vmul.f32 %v2351_v36, %v8090_v60  ;;  %v2360_v32 = vadd.f32 1.0, %v5068_v31 }
 0x376   : > { %5087 = vtanh.f32 %v8156_v61  ;;  %v1255_v29 = vadd.f32 %v8469_v26, %v8369_v28  ;;  %v5072_v62 = vpop.eup %5071  ;;  %v2713_v4 = vmul.f32 %v2393_v51, %v8092_v9  ;;  %v2402_v38 = vadd.f32 1.0, %v5070_v7 }
 0x377   : > { %5089 = vtanh.f32 %v8158_v46  ;;  %v1257_v44 = vadd.f32 %v8470_v53, %v8363_v57  ;;  %v5074_v14 = vpop.eup %5073  ;;  %v3017_v21 = vadd.f32 %v3016_v5, %v2671_v37  ;;  %v2680_v55 = vmul.f32 %v2360_v32, %v8094_v19 }
 0x378   : > { %v2361_v60 = vadd.f32 1.0, %v5072_v62  ;;  %5091 = vtanh.f32 %v8160_v20  ;;  %v5076_v33 = vpop.eup %5075  ;;  %v3095_v50 = vadd.f32 %v3094_v47, %v2713_v4  ;;  %v2722_v18 = vmul.f32 %v2402_v38, %v8107_v8 }
 0x379   : > { %v2403_v52 = vadd.f32 1.0, %v5074_v14  ;;  %v1761_v42 = vmul.f32 0.5, %v1255_v29  ;;  %v2981_v3 = vadd.f32 %v2980_v40, %v2680_v55  ;;  %v2370_v56 = vadd.f32 1.0, %v5076_v33 }
 0x37a   : > { %v5078_v9 = vpop.eup %5077  ;;  %v2681_v45 = vmul.f32 %v2361_v60, %v8111_v24  ;;  %v1770_v23 = vmul.f32 0.5, %v1257_v44  ;;  %v3059_v0 = vadd.f32 %v3058_v54, %v2722_v18  ;;  %v8471_v24 = vld [vmem:[#allocation46_spill] sm:$0xff]  ;;  %v8182_v43 = vadd.f32 %v8472_v30, %v7766_v27 }
 0x37b   : > { %v5080_v57 = vpop.eup %5079  ;;  %v2723_v5 = vmul.f32 %v2403_v52, %v8113_v15  ;;  %v2412_v19 = vadd.f32 1.0, %v5078_v9  ;;  %5093 = vtanh.f32 %v1761_v42  ;;  %v2690_v49 = vmul.f32 %v2370_v56, %v8117_v48 }
 0x37c   : > { %v5082_v16 = vpop.eup %5081  ;;  %v3018_v17 = vadd.f32 %v3017_v21, %v2681_v45  ;;  %v2371_v41 = vadd.f32 1.0, %v5080_v57  ;;  %5095 = vtanh.f32 %v1770_v23  ;;  %v1259_v63 = vadd.f32 %v8471_v24, %v8369_v28 }
 0x37d   : > { %v5084_v8 = vpop.eup %5083  ;;  %v3096_v39 = vadd.f32 %v3095_v50, %v2723_v5  ;;  %v2732_v58 = vmul.f32 %v2412_v19, %v8125_v59  ;;  %v2413_v47 = vadd.f32 1.0, %v5082_v16  ;;  %v2982_v25 = vadd.f32 %v2981_v3, %v2690_v49 }
 0x37e   : > { %v5086_v35 = vpop.eup %5085  ;;  %v2691_v15 = vmul.f32 %v2371_v41, %v8131_v10  ;;  %v2380_v1 = vadd.f32 1.0, %v5084_v8  ;;  %v1771_v34 = vmul.f32 0.5, %v1259_v63 }
 0x37f   : > { %v3060_v48 = vadd.f32 %v3059_v0, %v2732_v58  ;;  %v2733_v13 = vmul.f32 %v2413_v47, %v8136_v6  ;;  %v2381_v22 = vadd.f32 1.0, %v5086_v35 }
 0x380   : > { %v5088_v12 = vpop.eup %5087  ;;  %v3019_v59 = vadd.f32 %v3018_v17, %v2691_v15  ;;  %v2700_v40 = vmul.f32 %v2380_v1, %v8141_v2  ;;  %5097 = vtanh.f32 %v1771_v34 }
 0x381   : > { %v5090_v36 = vpop.eup %5089  ;;  %v3061_v28 = vrot.slane %v3060_v48, 4  ;;  %v3097_v31 = vadd.f32 %v3096_v39, %v2733_v13  ;;  %v2701_v54 = vmul.f32 %v2381_v22, %v8145_v11  ;;  %v2390_v10 = vadd.f32 1.0, %v5088_v12 }
 0x382   : > { %v5092_v51 = vpop.eup %5091  ;;  %v2983_v7 = vadd.f32 %v2982_v25, %v2700_v40  ;;  %v2391_v37 = vadd.f32 1.0, %v5090_v36 }
 0x383   : > { %v3062_v27 = vadd.f32 %v3061_v28, %v3060_v48  ;;  %v3098_v32 = vrot.slane %v3097_v31, 4  ;;  %v3020_v26 = vadd.f32 %v3019_v59, %v2701_v54  ;;  %v2710_v6 = vmul.f32 %v2390_v10, %v8156_v61 }
 0x384   : > { %v2711_v29 = vmul.f32 %v2391_v37, %v8158_v46  ;;  %v2400_v62 = vadd.f32 1.0, %v5092_v51 }
 0x385   : > { %v5094_v4 = vpop.eup %5093  ;;  %v3063_v2 = vrot.slane %v3062_v27, 2  ;;  %v3099_v38 = vadd.f32 %v3098_v32, %v3097_v31  ;;  %v2984_v53 = vadd.f32 %v2983_v7, %v2710_v6 }
 0x386   : > { %v5096_v44 = vpop.eup %5095  ;;  %v3021_v14 = vadd.f32 %v3020_v26, %v2711_v29  ;;  %v2720_v11 = vmul.f32 %v2400_v62, %v8160_v20  ;;  %v2401_v21 = vadd.f32 1.0, %v5094_v4 }
 0x387   : > { %v3064_v55 = vadd.f32 %v3063_v2, %v3062_v27  ;;  %v2410_v60 = vadd.f32 1.0, %v5096_v44  ;;  %v3100_v33 = vrot.slane %v3099_v38, 2 }
 0x388   : > { %v2985_v50 = vadd.f32 %v2984_v53, %v2720_v11  ;;  %v2721_v18 = vmul.f32 %v2401_v21, %v1761_v42 }
 0x389   : > { %v3065_v52 = vrot.slane %v3064_v55, 1  ;;  %v2730_v9 = vmul.f32 %v2410_v60, %v1770_v23  ;;  %v3101_v61 = vadd.f32 %v3100_v33, %v3099_v38 }
 0x38a   : > { %v3022_v3 = vadd.f32 %v3021_v14, %v2721_v18  ;;  %v5098_v57 = vpop.eup %5097 }
 0x38b   : > { %v3066_v46 = vadd.f32 %v3065_v52, %v3064_v55  ;;  %v2986_v45 = vadd.f32 %v2985_v50, %v2730_v9  ;;  %v3102_v56 = vrot.slane %v3101_v61, 1  ;;  %v2411_v5 = vadd.f32 1.0, %v5098_v57 }
 0x38d   : > { %v2987_v0 = vrot.slane %v2986_v45, 4  ;;  %v3103_v19 = vadd.f32 %v3102_v56, %v3101_v61  ;;  %v3112_v16 = vmul.f32 0.00390625, %v3066_v46  ;;  %v2731_v20 = vmul.f32 %v2411_v5, %v1771_v34  ;;  %v3284_v34 = vld [vmem:[%s8248_s4] sm:$0x1] }
 0x38e   : > { %v3800_v40 = vadd.f32 %v8182_v43, %v3284_v34 }
 0x38f   : > { %v2988_v17 = vadd.f32 %v2987_v0, %v2986_v45  ;;  %v3113_v49 = vmul.f32 0.00390625, %v3103_v19  ;;  %v3023_v8 = vadd.f32 %v3022_v3, %v2731_v20  ;;  %v3122_v58 = vpack.c.bf16 %v3112_v16, %v3112_v16 }
 0x391   : > { %v2989_v41 = vrot.slane %v2988_v17, 2  ;;  %v3123_v39 = vpack.c.bf16 %v3113_v49, %v3113_v49  ;;  %v3024_v47 = vrot.slane %v3023_v8, 4 }
 0x393   : > { %v2990_v42 = vadd.f32 %v2989_v41, %v2988_v17  ;;  %3957 = vmatprep.mubr.bf16.mxu0 %v3123_v39  ;;  %v3025_v23 = vadd.f32 %v3024_v47, %v3023_v8 }
 0x394   : > { %3958 = vmatmul.mubr.bf16.vlgmr.msra.gmra.mrb[184].mxu0 %v3122_v58 }
 0x395   : > { %v2991_v24 = vrot.slane %v2990_v42, 1  ;;  %v3026_v63 = vrot.slane %v3025_v23, 2 }
 0x397   : > { %v3027_v35 = vadd.f32 %v3026_v63, %v3025_v23  ;;  %v2992_v25 = vadd.f32 %v2991_v24, %v2990_v42 }
 0x399   : > { %v3028_v15 = vrot.slane %v3027_v35, 1  ;;  %v3110_v30 = vmul.f32 0.00390625, %v2992_v25 }
 0x39b   : > { %v3029_v1 = vadd.f32 %v3028_v15, %v3027_v35  ;;  %v3120_v22 = vpack.c.bf16 %v3110_v30, %v3110_v30 }
 0x39d   : > { %v3111_v48 = vmul.f32 0.00390625, %v3029_v1 }
 0x39f   : > { %v3121_v13 = vpack.c.bf16 %v3111_v48, %v3111_v48 }
 0x3a1   : > { %3917 = vmatprep.mubr.bf16.mxu1 %v3121_v13 }
 0x3a2   : > { %3918 = vmatmul.mubr.bf16.vlgmr.msra.gmra.mrb[148].mxu1 %v3120_v22 }
 0x3d9   : > { %v4260_v12 = vpop.f32.mrb[140].mxu1 }
 0x3da   : > { %v4261_v59 = vpop.f32.mrb[141].mxu1 }
 0x3db   : > { %v4262_v36 = vadd.f32 %v4261_v59, %v4260_v12  ;;  %v4263_v28 = vpop.f32.mrb[142].mxu1 }
 0x3dc   : > { %v4264_v31 = vpop.f32.mrb[143].mxu1 }
 0x3dd   : > { %v3840_v54 = vadd.f32 %v4262_v36, %v3800_v40 }
 0x409   : > { %v4282_v10 = vpop.f32.mrb[144].mxu1 }
 0x40a   : > { %v4283_v51 = vpop.f32.mrb[145].mxu1 }
 0x40b   : > { %v4284_v7 = vadd.f32 %v4283_v51, %v4282_v10  ;;  %v4285_v37 = vpop.f32.mrb[146].mxu1 }
 0x40c   : > { %v4286_v27 = vpop.f32.mrb[147].mxu1 }
 0x40d   : > { %v3880_v32 = vadd.f32 %v4284_v7, %v3840_v54 }
 0x467   : > { %v4326_v26 = vpop.f32.mrb[184].mxu0 }
 0x468   : > { %v4327_v6 = vpop.f32.mrb[185].mxu0 }
 0x469   : > { %v4328_v29 = vadd.f32 %v4327_v6, %v4326_v26  ;;  %v4329_v62 = vpop.f32.mrb[186].mxu0 }
 0x46a   : > { %v4330_v4 = vpop.f32.mrb[187].mxu0 }
 0x475   : > { %v4304_v2 = vpop.f32.mrb[148].mxu1 }
 0x476   : > { %v4305_v38 = vpop.f32.mrb[149].mxu1 }
 0x477   : > { %v4306_v53 = vadd.f32 %v4305_v38, %v4304_v2  ;;  %v4307_v44 = vpop.f32.mrb[150].mxu1 }
 0x478   : > { %v4308_v43 = vpop.f32.mrb[151].mxu1 }
 0x479   : > { %v3920_v14 = vadd.f32 %v4306_v53, %v3880_v32 }
 0x47b   : > { %v3960_v11 = vadd.f32 %v4328_v29, %v3920_v14 }
 0x47d   : > { %v3966_v21 = vsel %vm3965_vm2, %v3960_v11, -inf }
 0x47e   : > { %3967 = vmax.xlane.f32.xlu1 %v3966_v21 }
 0x50b   : > { %v3968_v55 = vpop.xlane.xlu1 %3967 }
 0x50c   : > { %v3969_v60 = vsub.f32 %v3960_v11, %v3968_v55 }
 0x50e   : > { %v3970_v33 = vmul.f32 1.442695, %v3969_v60 }
 0x510   : > { %5099 = vpow2.f32 %v3970_v33 }
 0x51a   : > { %v5100_v50 = vpop.eup %5099 }
 0x51b   : > { %v3972_v18 = vsel %vm3965_vm2, %v5100_v50, 0.0 }
 0x51c   : > { %3973 = vadd.xlane.f32.xlu1 %v3972_v18 }
 0x5a9   : > { %v3974_v52 = vpop.xlane.xlu1 %3973 }
 0x5aa   : > { %5101 = vrcp.f32 %v3974_v52 }
 0x5b4   : > { %v5102_v9 = vpop.eup %5101 }
 0x5b5   : > { %v3976_v61 = vmul.f32 %v5102_v9, %v5100_v50 }
 0x5b7   : > { %3977 = vst.msk [vmem:[%s216_s8] sm:$0x1] %vm3965_vm2, %v3976_v61 }
 0x5b8   : > { %5116 = shalt.err (!%p5113_p3)
}
 0x5b9   : > { %s5117_s17 = scalar_lea.hbm %s8201_s12, 16  ;;  %s5121_s26 = scalar_lea.hbm %s8249_s5, 32 }
 0x5ba   : > { %p5118_p4 = scmp.ne.s32.totalorder %s8201_s12, %s5117_s17  ;;  %p5122_p9 = scmp.lt.u32.totalorder %s8201_s12, %s8249_s5 }
 0x5bb   : > { %p5123_p10 = scmp.lt.u32.totalorder %s5121_s26, %s5117_s17  ;;  %p5125_p12 = scmp.lt.u32.totalorder %s5117_s17, %s8201_s12 }
 0x5bc   : > { %p5119_p7 = pnand %p5118_p4, %p5238_p5 }
 0x5bd   : > { %p5124_p11 = por %p5123_p10, %p5122_p9 }
 0x5be   : > { %p5120_p8 = pneg %p5119_p7 }
 0x5bf   : > { %p5126_p13 = por %p5125_p12, %p5124_p11 }
 0x5c1   : > { %p5127_p0 = pnand %p5126_p13, %p5120_p8 }
 0x5c3   : > { %5130 = shalt.err (!%p5127_p0)
}
 0x5c4   : > { %4334 = dma.vmem_to_hbm [thread:$0]  (%p5238_p5), %s8203_s9, 16, %s8201_s12, %s3979_s13  }
 0x5c5 PF: > { %p4340_p1 = scmp.ge.s32.totalorder %s5165_s21, 2  ;;  %s4003_s7 = sand.u32 1, %s5153_s18  }
 0x5c6   : > { %s4004_s8 = scalar_lea.sflag [#allocation3], %s4003_s7 }
 0x5c7   : > { %p4337_p2 = pnand %p4340_p1, %p5242_p6 }
 0x5c9   : > { %5148 = dma.done.wait (!%p4337_p2), %s4004_s8, 16  }
 0x5ca   : > { %5150 = vsyncadd (!%p4337_p2), %s4004_s8, 4294967280  ;;  %p15_p3 = scmp.ge.s32.totalorder %s5225_s24, 4   ;;  %s8473_s18 = smov %s5157_s19 }
 0x5cb   : > { %s8474_s19 = smov %s5161_s20  ;;  %s8475_s20 = smov %s5236_s27 }
 0x5cc   : > { %s8476_s21 = smov %s5225_s24  ;;  %17 = sbr.rel (!%p15_p3) target bundleno = 3 (0x3), region = 75 }
 0x5d3   :  { %4008 = vsyncpa [#allocation3], 1 }
 0x5d4   :  { %4010 = vsyncpa [#allocation3 + $0x1], 1 }

// kernel: tpu_custom_call.1
= control target key start
LH: loop header
LB: loop body
LE: loop exit
PB: predicated region body
PF: predicated region fallthrough
CT: control target
= control target key end

     0   :  { %10 = vsyncpa [#allocation3], 0  ;;  %s8244_s0 = inlined_call_operand.vmem [shape: f32[2,4,256], index: 0, kind: input, shape index: {}]   ;;  %s8245_s1 = inlined_call_operand.vmem [shape: bf16[4,1280], index: 1, kind: input, shape index: {}]   ;;  %s8246_s2 = inlined_call_operand.vmem [shape: f32[1,1280], index: 2, kind: input, shape index: {}]   ;;  %s8247_s3 = inlined_call_operand.vmem [shape: bf16[1280,8], index: 3, kind: input, shape index: {}]   ;;  %s8248_s4 = inlined_call_operand.vmem [shape: f32[1,8], index: 4, kind: input, shape index: {}]   ;;  %s8249_s5 = inlined_call_operand.hbm [shape: f32[2,1,8], index: 5, kind: output, shape index: {}]  }
   0x1   :  { %12 = vsyncpa [#allocation3 + $0x1], 0  ;;  %s5200_s18 = smov 0   ;;  %s5202_s19 = smov 0  }
   0x2   :  { %s5204_s20 = smov 0   ;;  %s5206_s21 = smov 0  }
   0x3 LB: > { %s5221_s22 = sadd.s32 4294967295, %s5165_s21   ;;  %s4046_s23 = sadd.s32 4294967294, %s5165_s21   ;;  %s5165_s21 = sphi %s5206_s21, %s8476_s21   ;;  %s5161_s20 = sphi %s5204_s20, %s8475_s20   ;;  %s5157_s19 = sphi %s5202_s19, %s8474_s19   ;;  %s5153_s18 = sphi %s5200_s18, %s8473_s18  }
   0x4   : > { %s5225_s24 = sadd.s32 1, %s5165_s21   ;;  %s135_s25 = sadd.s32 1, %s5161_s20 }
   0x5   : > { %s132_s26 = ssub.s32 %s5165_s21, %s5225_s24  ;;  %p145_p0 = scmp.ne.s32.totalorder %s5161_s20, %s5157_s19 }
   0x6   : > { %p133_p1 = scmp.eq.s32.totalorder %s132_s26, 0  ;;  %p146_p2 = scmp.eq.s32.totalorder %s5221_s22, 1 }
   0x7   : > { %p151_p3 = scmp.ne.s32.totalorder %s5157_s19, %s5153_s18  ;;  %p152_p4 = scmp.eq.s32.totalorder %s4046_s23, 1 }
   0x8   : > { %s5236_s27 = scalar_select %p133_p1, %s5161_s20, %s135_s25  }
   0x9   : > { %p5238_p5 = por %p146_p2, %p145_p0  ;;  %p5242_p6 = por %p152_p4, %p151_p3 }
   0xa   : > { %p4049_p7 = scmp.ge.s32.totalorder %s5165_s21, 1  ;;  %p190_p8 = scmp.lt.s32.totalorder %s5165_s21, 3 }
   0xc   : > { %p191_p9 = pnand %p4049_p7, %p190_p8 }
   0xe   : > { %194 = sbr.rel (%p191_p9) target bundleno = 1477 (0x5c5), region = 40 }
  0x15   : > { %p217_p10 = scmp.lt.s32.totalorder %s5221_s22, 1  ;;  %v314_v0 = vlaneseq  ;;  %v5167_v1 = vmov 1983009808   ;;  %v5258_v6 = vld [vmem:[%s8246_s2] sm:$0xff]  ;;  %vm458_vm0 = vcmask 1041408   ;;  %v5168_v22 = vmov 0  }
  0x16   : > { %v369_v2 = vunpack.c.l.s4 %v5167_v1  ;;  %v307_v13 = vld [vmem:[%s8245_s1] sm:$0xff]  ;;  %521 = vmatprep.mubr.bf16.mxu0 %v5168_v22  ;;  %661 = vmatprep.mubr.bf16.mxu1 %v5168_v22  ;;  %v5299_v25 = vld [vmem:[%s8245_s1 + $0x8] sm:$0xff]  ;;  %vm409_vm1 = vcmask 31744   ;;  %vm3965_vm2 = vcmask 57344   ;;  %s4218_s7 = sshll.u32 %s5221_s22, 4 }
  0x17   : > { %s218_s30 = scalar_select %p217_p10, %s5221_s22, 1  ;;  %v5250_v3 = vshrl.u32 %v314_v0, 7  ;;  %v367_v29 = vcombine.high %v307_v13, %v307_v13  ;;  %v5319_v37 = vld.sshfl [vmem:[%s8245_s1 + $0x10] sm:$0x33 pattern:$0x76325410] }
  0x18   : > { %v370_v4 = vunpack.c.0.s8 %v369_v2  ;;  %v408_v38 = vcombine.high %v5319_v37, %v5319_v37  ;;  %s8201_s12 = scalar_lea.hbm %s8249_s5, %s4218_s7  ;;  %s5169_s22 = smov [#allocation2]  }
  0x19   : > { %s4221_s6 = sshll.u32 %s218_s30, 3  ;;  %v324_v7 = vsub.s32 2, %v5250_v3  ;;  %v328_v9 = vsub.s32 3, %v5250_v3  ;;  %v332_v10 = vsub.s32 4, %v5250_v3  ;;  %v336_v11 = vsub.s32 5, %v5250_v3  ;;  %s5107_s15 = sshll.u32 %s5169_s22, 4  ;;  %s5108_s15 = int_to_ptr.vmem [resolvable:$false] %s5107_s15 }
  0x1a   : > { %s221_s9 = scalar_lea.vmem %s8244_s0, %s4221_s6  ;;  %v5262_v8 = vsub.s32 %v370_v4, %v5250_v3  ;;  %v340_v12 = vsub.s32 6, %v5250_v3  ;;  %v344_v15 = vsub.s32 7, %v5250_v3  ;;  %s215_s6 = sand.u32 1, %s5157_s19  }
  0x1b   : > { %v223_v5 = vld [vmem:[%s221_s9] sm:$0xff]  ;;  %v5272_v14 = vrot.slane %v5258_v6, %v324_v7  ;;  %v5276_v16 = vrot.slane %v5258_v6, %v328_v9  ;;  %v5279_v17 = vrot.slane %v5258_v6, %v332_v10  ;;  %v5282_v18 = vrot.slane %v5258_v6, %v336_v11  ;;  %s216_s8 = scalar_lea.vmem [#allocation2], %s215_s6  ;;  %s3979_s13 = scalar_lea.sflag [#allocation3], %s215_s6 }
  0x1c   : > { %227 = vxpose.xlu0.b32.start.end [1/1] (short) %v223_v5, 128  ;;  %v5285_v19 = vrot.slane %v5258_v6, %v340_v12  ;;  %v5288_v20 = vrot.slane %v5258_v6, %v344_v15  ;;  %v374_v21 = vrot.slane %v307_v13, %v5262_v8  ;;  %v391_v26 = vrot.slane %v5299_v25, %v5262_v8  ;;  %s3991_s9 = sshll.u32 %s216_s8, 4  ;;  %s5109_s16 = scalar_lea.vmem %s5108_s15, 32  ;;  %s8203_s9 = int_to_ptr.vmem [resolvable:$true] %s3991_s9 }
  0x1d   : > { %v225_v28 = vcombine.high %v223_v5, %v223_v5  ;;  %v5305_v30 = vrot.slane %v367_v29, %v5262_v8  ;;  %s5103_s14 = scalar_lea.vmem %s8203_s9, 16  ;;  %p5110_p0 = scmp.lt.s32.totalorder %s8203_s9, %s5108_s15 }
  0x1e   : > { %8257 = vst [vmem:[#allocation5_spill] sm:$0xff] %v5285_v19  ;;  %8258 = vst [vmem:[#allocation6_spill] sm:$0xff] %v5288_v20  ;;  %v382_v23 = vcombine.high %v374_v21, %v374_v21  ;;  %v460_v24 = vsel %vm458_vm0, %v374_v21, 0  ;;  %v399_v27 = vcombine.high %v391_v26, %v391_v26  ;;  %v472_v35 = vsel %vm458_vm0, %v391_v26, 0  ;;  %p5104_p11 = scmp.ne.s32.totalorder %s8203_s9, %s5103_s14  ;;  %p5111_p1 = scmp.lt.s32.totalorder %s5109_s16, %s5103_s14 }
  0x1f   : > { %v383_v31 = vcombine.high %v5305_v30, %v5305_v30  ;;  %v466_v29 = vsel %vm458_vm0, %v5305_v30, 0 }
  0x20   : > { %4053 = vmatprep.subr.msk.bf16.mxu0 %vm458_vm0, %v382_v23  ;;  %4332 = vmatprep.subr.msk.bf16.mxu1 %vm458_vm0, %v382_v23  ;;  %v384_v23 = vcombine.high %v5299_v25, %v5299_v25  ;;  %v484_v25 = vsel %vm458_vm0, %v5319_v37, 0  ;;  %p5105_p12 = pnand %p5104_p11, %p5238_p5  ;;  %p5112_p2 = por %p5111_p1, %p5110_p0 }
  0x21   : > { %490 = vmatpush1.bf16.msra.mxu0 %v460_v24  ;;  %4333 = vmatpush1.bf16.msra.mxu1 %v460_v24 }
  0x22   : > { %4087 = vmatprep.subr.msk.bf16.mxu0 %vm458_vm0, %v399_v27  ;;  %4070 = vmatprep.subr.msk.bf16.mxu1 %vm458_vm0, %v383_v31  ;;  %v398_v26 = vrot.slane %v384_v23, %v5262_v8  ;;  %p5106_p13 = pneg %p5105_p12 }
  0x24   : > { %v400_v31 = vcombine.high %v398_v26, %v398_v26  ;;  %p5113_p3 = pnand %p5112_p2, %p5106_p13 }
  0x59   : > { %259 = vxpose.xlu0.b32.start.end [1/1] (short) %v225_v28, 128 }
  0x9c   : > { %v243_v32 = vpop.trf.xlu0 }
  0xa0   : > { %v244_v33 = vpop.trf.xlu0 }
  0xa1   : > { %v5310_v34 = vpack.c.bf16 %v244_v33, %v243_v32  ;;  %v478_v33 = vsel %vm458_vm0, %v398_v26, 0 }
  0xa3   : > { %4054 = vmatmul.mubr.msk.bf16.vlgmr.msra.gmra.mrb[0].mxu0 %vm409_vm1, %v5310_v34 }
  0xa4   : > { %v245_v36 = vpop.trf.xlu0  ;;  %531 = vmatprep.mubr.bf16.mxu0 %v5168_v22  ;;  %876 = vmatpush1.bf16.msra.mxu0 %v472_v35  ;;  %v316_v35 = vsub.s32 0, %v5250_v3 }
  0xa5   : > { %4121 = vmatprep.subr.msk.bf16.mxu0 %vm458_vm0, %v408_v38 }
  0xa6   : > { %v5479_v37 = vrot.slane %v5258_v6, %v316_v35 }
  0xa8   : > { %v246_v39 = vpop.trf.xlu0 }
  0xa9   : > { %v5324_v40 = vpack.c.bf16 %v246_v39, %v245_v36  ;;  %v320_v36 = vsub.s32 1, %v5250_v3 }
  0xab   : > { %4055 = vmatmul.mubr.msk.bf16.gmra.mrb[4].mxu0 %vm409_vm1, %v5324_v40  ;;  %v5488_v38 = vrot.slane %v5258_v6, %v320_v36 }
  0xac   : > { %v247_v41 = vpop.trf.xlu0  ;;  %541 = vmatprep.mubr.bf16.mxu0 %v5168_v22 }
  0xb0   : > { %v248_v42 = vpop.trf.xlu0 }
  0xb1   : > { %v5329_v43 = vpack.c.bf16 %v248_v42, %v247_v41 }
  0xb3   : > { %4056 = vmatmul.mubr.msk.bf16.gmra.mrb[8].mxu0 %vm409_vm1, %v5329_v43 }
  0xb4   : > { %v249_v44 = vpop.trf.xlu0  ;;  %551 = vmatprep.mubr.bf16.mxu0 %v5168_v22 }
  0xb8   : > { %v250_v45 = vpop.trf.xlu0 }
  0xb9   : > { %v5334_v46 = vpack.c.bf16 %v250_v45, %v249_v44 }
  0xbb   : > { %4057 = vmatmul.mubr.msk.bf16.gmra.mrb[12].mxu0 %vm409_vm1, %v5334_v46 }
  0xbc   : > { %v251_v47 = vpop.trf.xlu0  ;;  %561 = vmatprep.mubr.bf16.mxu0 %v5168_v22 }
  0xc0   : > { %v252_v48 = vpop.trf.xlu0 }
  0xc1   : > { %v5339_v49 = vpack.c.bf16 %v252_v48, %v251_v47 }
  0xc3   : > { %4058 = vmatmul.mubr.msk.bf16.gmra.mrb[16].mxu0 %vm409_vm1, %v5339_v49 }
  0xc4   : > { %v253_v50 = vpop.trf.xlu0  ;;  %571 = vmatprep.mubr.bf16.mxu0 %v5168_v22 }
  0xc8   : > { %v254_v51 = vpop.trf.xlu0 }
  0xc9   : > { %v5344_v52 = vpack.c.bf16 %v254_v51, %v253_v50 }
  0xcb   : > { %4059 = vmatmul.mubr.msk.bf16.gmra.mrb[20].mxu0 %vm409_vm1, %v5344_v52 }
  0xcc   : > { %v255_v53 = vpop.trf.xlu0  ;;  %581 = vmatprep.mubr.bf16.mxu0 %v5168_v22 }
  0xd0   : > { %v256_v54 = vpop.trf.xlu0 }
  0xd1   : > { %v5349_v55 = vpack.c.bf16 %v256_v54, %v255_v53 }
  0xd3   : > { %4060 = vmatmul.mubr.msk.bf16.gmra.mrb[24].mxu0 %vm409_vm1, %v5349_v55 }
  0xd4   : > { %v257_v56 = vpop.trf.xlu0  ;;  %591 = vmatprep.mubr.bf16.mxu0 %v5168_v22 }
  0xd8   : > { %v258_v57 = vpop.trf.xlu0 }
  0xd9   : > { %v5354_v58 = vpack.c.bf16 %v258_v57, %v257_v56 }
  0xdb   : > { %4061 = vmatmul.mubr.msk.bf16.gmra.mrb[28].mxu0 %vm409_vm1, %v5354_v58 }
  0xdc   : > { %v275_v59 = vpop.trf.xlu0  ;;  %601 = vmatprep.mubr.bf16.mxu0 %v5168_v22 }
  0xe0   : > { %v276_v60 = vpop.trf.xlu0 }
  0xe1   : > { %v5359_v61 = vpack.c.bf16 %v276_v60, %v275_v59 }
  0xe3   : > { %4062 = vmatmul.mubr.msk.bf16.gmra.mrb[32].mxu0 %vm409_vm1, %v5359_v61 }
  0xe4   : > { %v277_v62 = vpop.trf.xlu0  ;;  %611 = vmatprep.mubr.bf16.mxu0 %v5168_v22 }
  0xe8   : > { %v278_v63 = vpop.trf.xlu0 }
  0xe9   : > { %v5364_v0 = vpack.c.bf16 %v278_v63, %v277_v62 }
  0xeb   : > { %4063 = vmatmul.mubr.msk.bf16.gmra.mrb[36].mxu0 %vm409_vm1, %v5364_v0 }
  0xec   : > { %v279_v1 = vpop.trf.xlu0  ;;  %621 = vmatprep.mubr.bf16.mxu0 %v5168_v22 }
  0xf0   : > { %v280_v2 = vpop.trf.xlu0 }
  0xf1   : > { %v5369_v4 = vpack.c.bf16 %v280_v2, %v279_v1 }
  0xf3   : > { %4064 = vmatmul.mubr.msk.bf16.gmra.mrb[40].mxu0 %vm409_vm1, %v5369_v4 }
  0xf4   : > { %v281_v5 = vpop.trf.xlu0  ;;  %631 = vmatprep.mubr.bf16.mxu0 %v5168_v22 }
  0xf8   : > { %v282_v7 = vpop.trf.xlu0 }
  0xf9   : > { %v5374_v9 = vpack.c.bf16 %v282_v7, %v281_v5 }
  0xfb   : > { %4065 = vmatmul.mubr.msk.bf16.gmra.mrb[44].mxu0 %vm409_vm1, %v5374_v9 }
  0xfc   : > { %v283_v10 = vpop.trf.xlu0  ;;  %641 = vmatprep.mubr.bf16.mxu0 %v5168_v22 }
 0x100   : > { %v284_v11 = vpop.trf.xlu0 }
 0x101   : > { %v5379_v12 = vpack.c.bf16 %v284_v11, %v283_v10 }
 0x103   : > { %4066 = vmatmul.mubr.msk.bf16.gmra.mrb[48].mxu0 %vm409_vm1, %v5379_v12 }
 0x104   : > { %v285_v13 = vpop.trf.xlu0  ;;  %651 = vmatprep.mubr.bf16.mxu0 %v5168_v22 }
 0x108   : > { %v286_v15 = vpop.trf.xlu0 }
 0x109   : > { %v5384_v21 = vpack.c.bf16 %v286_v15, %v285_v13 }
 0x10b   : > { %4067 = vmatmul.mubr.msk.bf16.gmra.mrb[52].mxu0 %vm409_vm1, %v5384_v21 }
 0x10c   : > { %v287_v24 = vpop.trf.xlu0  ;;  %907 = vmatprep.mubr.bf16.mxu0 %v5168_v22 }
 0x110   : > { %v288_v27 = vpop.trf.xlu0 }
 0x111   : > { %v5392_v28 = vpack.c.bf16 %v288_v27, %v287_v24 }
 0x113   : > { %4068 = vmatmul.mubr.msk.bf16.vlgmr.msra.gmra.mrb[0].mxu1 %vm409_vm1, %v5392_v28  ;;  %4088 = vmatmul.mubr.msk.bf16.vlgmr.msra.gmra.mrb[56].mxu0 %vm409_vm1, %v5310_v34 }
 0x114   : > { %683 = vmatpush1.bf16.msra.mxu1 %v466_v29  ;;  %v289_v32 = vpop.trf.xlu0  ;;  %671 = vmatprep.mubr.bf16.mxu1 %v5168_v22 }
 0x115   : > { %917 = vmatprep.mubr.bf16.mxu0 %v5168_v22  ;;  %4104 = vmatprep.subr.msk.bf16.mxu1 %vm458_vm0, %v400_v31 }
 0x116   : > { %1262 = vmatpush1.bf16.msra.mxu0 %v484_v25 }
 0x118   : > { %v290_v8 = vpop.trf.xlu0 }
 0x119   : > { %v5405_v30 = vpack.c.bf16 %v290_v8, %v289_v32 }
 0x11b   : > { %4069 = vmatmul.mubr.msk.bf16.gmra.mrb[4].mxu1 %vm409_vm1, %v5405_v30  ;;  %4089 = vmatmul.mubr.msk.bf16.gmra.mrb[60].mxu0 %vm409_vm1, %v5324_v40 }
 0x11c   : > { %714 = vmatprep.mubr.bf16.mxu1 %v5168_v22  ;;  %927 = vmatprep.mubr.bf16.mxu0 %v5168_v22 }
 0x123   : > { %4071 = vmatmul.mubr.msk.bf16.vlgmr.msra.gmra.mrb[8].mxu1 %vm409_vm1, %v5310_v34  ;;  %4090 = vmatmul.mubr.msk.bf16.gmra.mrb[64].mxu0 %vm409_vm1, %v5329_v43 }
 0x124   : > { %1069 = vmatpush1.bf16.msra.mxu1 %v478_v33  ;;  %724 = vmatprep.mubr.bf16.mxu1 %v5168_v22 }
 0x125   : > { %937 = vmatprep.mubr.bf16.mxu0 %v5168_v22 }
 0x12b   : > { %4072 = vmatmul.mubr.msk.bf16.gmra.mrb[12].mxu1 %vm409_vm1, %v5324_v40  ;;  %4091 = vmatmul.mubr.msk.bf16.gmra.mrb[68].mxu0 %vm409_vm1, %v5334_v46 }
 0x12c   : > { %734 = vmatprep.mubr.bf16.mxu1 %v5168_v22  ;;  %947 = vmatprep.mubr.bf16.mxu0 %v5168_v22 }
 0x133   : > { %4073 = vmatmul.mubr.msk.bf16.gmra.mrb[16].mxu1 %vm409_vm1, %v5329_v43  ;;  %4092 = vmatmul.mubr.msk.bf16.gmra.mrb[72].mxu0 %vm409_vm1, %v5339_v49 }
 0x134   : > { %744 = vmatprep.mubr.bf16.mxu1 %v5168_v22  ;;  %957 = vmatprep.mubr.bf16.mxu0 %v5168_v22 }
 0x13b   : > { %4074 = vmatmul.mubr.msk.bf16.gmra.mrb[20].mxu1 %vm409_vm1, %v5334_v46  ;;  %4093 = vmatmul.mubr.msk.bf16.gmra.mrb[76].mxu0 %vm409_vm1, %v5344_v52 }
 0x13c   : > { %754 = vmatprep.mubr.bf16.mxu1 %v5168_v22  ;;  %967 = vmatprep.mubr.bf16.mxu0 %v5168_v22 }
 0x143   : > { %4075 = vmatmul.mubr.msk.bf16.gmra.mrb[24].mxu1 %vm409_vm1, %v5339_v49  ;;  %4094 = vmatmul.mubr.msk.bf16.gmra.mrb[80].mxu0 %vm409_vm1, %v5349_v55 }
 0x144   : > { %764 = vmatprep.mubr.bf16.mxu1 %v5168_v22  ;;  %977 = vmatprep.mubr.bf16.mxu0 %v5168_v22 }
 0x14b   : > { %4076 = vmatmul.mubr.msk.bf16.gmra.mrb[28].mxu1 %vm409_vm1, %v5344_v52  ;;  %4095 = vmatmul.mubr.msk.bf16.gmra.mrb[84].mxu0 %vm409_vm1, %v5354_v58 }
 0x14c   : > { %774 = vmatprep.mubr.bf16.mxu1 %v5168_v22  ;;  %987 = vmatprep.mubr.bf16.mxu0 %v5168_v22 }
 0x153   : > { %4077 = vmatmul.mubr.msk.bf16.gmra.mrb[32].mxu1 %vm409_vm1, %v5349_v55  ;;  %4096 = vmatmul.mubr.msk.bf16.gmra.mrb[88].mxu0 %vm409_vm1, %v5359_v61 }
 0x154   : > { %784 = vmatprep.mubr.bf16.mxu1 %v5168_v22  ;;  %997 = vmatprep.mubr.bf16.mxu0 %v5168_v22 }
 0x15b   : > { %4078 = vmatmul.mubr.msk.bf16.gmra.mrb[36].mxu1 %vm409_vm1, %v5354_v58  ;;  %4097 = vmatmul.mubr.msk.bf16.gmra.mrb[92].mxu0 %vm409_vm1, %v5364_v0 }
 0x15c   : > { %794 = vmatprep.mubr.bf16.mxu1 %v5168_v22  ;;  %1007 = vmatprep.mubr.bf16.mxu0 %v5168_v22 }
 0x163   : > { %4079 = vmatmul.mubr.msk.bf16.gmra.mrb[40].mxu1 %vm409_vm1, %v5359_v61  ;;  %4098 = vmatmul.mubr.msk.bf16.gmra.mrb[96].mxu0 %vm409_vm1, %v5369_v4 }
 0x164   : > { %804 = vmatprep.mubr.bf16.mxu1 %v5168_v22  ;;  %1017 = vmatprep.mubr.bf16.mxu0 %v5168_v22 }
 0x16b   : > { %4080 = vmatmul.mubr.msk.bf16.gmra.mrb[44].mxu1 %vm409_vm1, %v5364_v0  ;;  %4099 = vmatmul.mubr.msk.bf16.gmra.mrb[100].mxu0 %vm409_vm1, %v5374_v9 }
 0x16c   : > { %814 = vmatprep.mubr.bf16.mxu1 %v5168_v22  ;;  %1027 = vmatprep.mubr.bf16.mxu0 %v5168_v22 }
 0x173   : > { %4081 = vmatmul.mubr.msk.bf16.gmra.mrb[48].mxu1 %vm409_vm1, %v5369_v4  ;;  %4100 = vmatmul.mubr.msk.bf16.gmra.mrb[104].mxu0 %vm409_vm1, %v5379_v12 }
 0x174   : > { %824 = vmatprep.mubr.bf16.mxu1 %v5168_v22  ;;  %1037 = vmatprep.mubr.bf16.mxu0 %v5168_v22 }
 0x176   : > { %v523_v39 = vpop.f32.mrb[0].mxu0 }
 0x177   : > { %v524_v41 = vadd.f32 %v523_v39, %v5479_v37  ;;  %v525_v42 = vpop.f32.mrb[1].mxu0 }
 0x178   : > { %v526_v44 = vadd.f32 %v525_v42, %v5488_v38  ;;  %v527_v45 = vpop.f32.mrb[2].mxu0 }
 0x179   : > { %v1454_v47 = vmul.f32 0.5, %v524_v41  ;;  %v528_v48 = vadd.f32 %v527_v45, %v5479_v37  ;;  %v529_v50 = vpop.f32.mrb[3].mxu0 }
 0x17a   : > { %v1455_v51 = vmul.f32 0.5, %v526_v44  ;;  %v530_v53 = vadd.f32 %v529_v50, %v5488_v38 }
 0x17b   : > { %4459 = vtanh.f32 %v1454_v47  ;;  %v1464_v6 = vmul.f32 0.5, %v528_v48  ;;  %4082 = vmatmul.mubr.msk.bf16.gmra.mrb[52].mxu1 %vm409_vm1, %v5374_v9  ;;  %4101 = vmatmul.mubr.msk.bf16.gmra.mrb[108].mxu0 %vm409_vm1, %v5384_v21 }
 0x17c   : > { %4461 = vtanh.f32 %v1455_v51  ;;  %v1465_v54 = vmul.f32 0.5, %v530_v53  ;;  %834 = vmatprep.mubr.bf16.mxu1 %v5168_v22  ;;  %1047 = vmatprep.mubr.bf16.mxu0 %v5168_v22 }
 0x17d   : > { %4463 = vtanh.f32 %v1464_v6 }
 0x17e   : > { %4465 = vtanh.f32 %v1465_v54  ;;  %v533_v56 = vpop.f32.mrb[4].mxu0 }
 0x17f   : > { %v534_v57 = vadd.f32 %v533_v56, %v5479_v37  ;;  %v535_v59 = vpop.f32.mrb[5].mxu0 }
 0x180   : > { %v536_v60 = vadd.f32 %v535_v59, %v5488_v38  ;;  %v537_v62 = vpop.f32.mrb[6].mxu0 }
 0x181   : > { %v1474_v63 = vmul.f32 0.5, %v534_v57  ;;  %v538_v1 = vadd.f32 %v537_v62, %v5479_v37  ;;  %v539_v2 = vpop.f32.mrb[7].mxu0 }
 0x182   : > { %v1475_v5 = vmul.f32 0.5, %v536_v60  ;;  %v540_v7 = vadd.f32 %v539_v2, %v5488_v38 }
 0x183   : > { %4467 = vtanh.f32 %v1474_v63  ;;  %v1484_v10 = vmul.f32 0.5, %v538_v1  ;;  %4083 = vmatmul.mubr.msk.bf16.gmra.mrb[56].mxu1 %vm409_vm1, %v5379_v12  ;;  %4102 = vmatmul.mubr.msk.bf16.gmra.mrb[112].mxu0 %vm409_vm1, %v5392_v28 }
 0x184   : > { %4469 = vtanh.f32 %v1475_v5  ;;  %v1485_v11 = vmul.f32 0.5, %v540_v7  ;;  %844 = vmatprep.mubr.bf16.mxu1 %v5168_v22  ;;  %1057 = vmatprep.mubr.bf16.mxu0 %v5168_v22 }
 0x185   : > { %v4460_v13 = vpop.eup %4459  ;;  %4471 = vtanh.f32 %v1484_v10 }
 0x186   : > { %v4462_v15 = vpop.eup %4461  ;;  %v2094_v23 = vadd.f32 1.0, %v4460_v13  ;;  %4473 = vtanh.f32 %v1485_v11  ;;  %v543_v24 = vpop.f32.mrb[8].mxu0 }
 0x187   : > { %v4464_v26 = vpop.eup %4463  ;;  %v2095_v27 = vadd.f32 1.0, %v4462_v15  ;;  %v544_v29 = vadd.f32 %v543_v24, %v5479_v37  ;;  %v545_v31 = vpop.f32.mrb[9].mxu0 }
 0x188   : > { %v4466_v25 = vpop.eup %4465  ;;  %v2104_v32 = vadd.f32 1.0, %v4464_v26  ;;  %v546_v8 = vadd.f32 %v545_v31, %v5488_v38  ;;  %v547_v33 = vpop.f32.mrb[10].mxu0  ;;  %v2414_v45 = vmul.f32 %v2094_v23, %v1454_v47 }
 0x189   : > { %v2105_v39 = vadd.f32 1.0, %v4466_v25  ;;  %v5514_v41 = vmul.f32 0.5, %v544_v29  ;;  %v548_v42 = vadd.f32 %v547_v33, %v5479_v37  ;;  %v549_v44 = vpop.f32.mrb[11].mxu0  ;;  %v2415_v56 = vmul.f32 %v2095_v27, %v1455_v51 }
 0x18a   : > { %v2424_v48 = vmul.f32 %v2104_v32, %v1464_v6  ;;  %v5517_v50 = vmul.f32 0.5, %v546_v8  ;;  %v550_v53 = vadd.f32 %v549_v44, %v5488_v38 }
 0x18b   : > { %v2425_v57 = vmul.f32 %v2105_v39, %v1465_v54  ;;  %4475 = vtanh.f32 %v5514_v41  ;;  %v5521_v59 = vmul.f32 0.5, %v548_v42  ;;  %4084 = vmatmul.mubr.msk.bf16.gmra.mrb[60].mxu1 %vm409_vm1, %v5384_v21  ;;  %4103 = vmatmul.mubr.msk.bf16.gmra.mrb[116].mxu0 %vm409_vm1, %v5405_v30 }
 0x18c   : > { %v2734_v60 = vadd.f32 %v2424_v48, %v2414_v45  ;;  %4477 = vtanh.f32 %v5517_v50  ;;  %v5528_v47 = vmul.f32 0.5, %v550_v53  ;;  %854 = vmatprep.mubr.bf16.mxu1 %v5168_v22  ;;  %1293 = vmatprep.mubr.bf16.mxu0 %v5168_v22 }
 0x18d   : > { %v4468_v51 = vpop.eup %4467  ;;  %v2771_v6 = vadd.f32 %v2425_v57, %v2415_v56  ;;  %4479 = vtanh.f32 %v5521_v59 }
 0x18e   : > { %v4470_v54 = vpop.eup %4469  ;;  %v2114_v62 = vadd.f32 1.0, %v4468_v51  ;;  %4481 = vtanh.f32 %v5528_v47  ;;  %v553_v1 = vpop.f32.mrb[12].mxu0 }
 0x18f   : > { %v4472_v2 = vpop.eup %4471  ;;  %v2115_v7 = vadd.f32 1.0, %v4470_v54  ;;  %v554_v13 = vadd.f32 %v553_v1, %v5479_v37  ;;  %v555_v15 = vpop.f32.mrb[13].mxu0 }
 0x190   : > { %v4474_v23 = vpop.eup %4473  ;;  %v2434_v24 = vmul.f32 %v2114_v62, %v1474_v63  ;;  %v2124_v26 = vadd.f32 1.0, %v4472_v2  ;;  %v556_v27 = vadd.f32 %v555_v15, %v5488_v38  ;;  %v557_v29 = vpop.f32.mrb[14].mxu0 }
 0x191   : > { %v2435_v31 = vmul.f32 %v2115_v7, %v1475_v5  ;;  %v2125_v25 = vadd.f32 1.0, %v4474_v23  ;;  %v5536_v32 = vmul.f32 0.5, %v554_v13  ;;  %v558_v8 = vadd.f32 %v557_v29, %v5479_v37  ;;  %v559_v33 = vpop.f32.mrb[15].mxu0 }
 0x192   : > { %v2735_v39 = vadd.f32 %v2734_v60, %v2434_v24  ;;  %v2444_v42 = vmul.f32 %v2124_v26, %v1484_v10  ;;  %v5539_v44 = vmul.f32 0.5, %v556_v27  ;;  %v560_v45 = vadd.f32 %v559_v33, %v5488_v38 }
 0x193   : > { %v2772_v48 = vadd.f32 %v2771_v6, %v2435_v31  ;;  %v2445_v53 = vmul.f32 %v2125_v25, %v1485_v11  ;;  %4483 = vtanh.f32 %v5536_v32  ;;  %v5543_v63 = vmul.f32 0.5, %v558_v8  ;;  %4085 = vmatmul.mubr.msk.bf16.gmra.mrb[64].mxu1 %vm409_vm1, %v5392_v28  ;;  %4122 = vmatmul.mubr.msk.bf16.vlgmr.msra.gmra.mrb[120].mxu0 %vm409_vm1, %v5310_v34  ;;  %v4379_v11 = vld [vmem:[%s8247_s3 + $0x40] sm:$0xff]  }
 0x194   : > { %v2736_v5 = vadd.f32 %v2735_v39, %v2444_v42  ;;  %4485 = vtanh.f32 %v5539_v44  ;;  %v5550_v10 = vmul.f32 0.5, %v560_v45  ;;  %864 = vmatprep.mubr.bf16.mxu1 %v5168_v22  ;;  %1303 = vmatprep.mubr.bf16.mxu0 %v5168_v22 }
 0x195   : > { %v4476_v56 = vpop.eup %4475  ;;  %v2773_v57 = vadd.f32 %v2772_v48, %v2445_v53  ;;  %4487 = vtanh.f32 %v5543_v63  ;;  %4222 = vmatprep.subr.bf16.mxu1 %v4379_v11 }
 0x196   : > { %v4478_v60 = vpop.eup %4477  ;;  %v2134_v51 = vadd.f32 1.0, %v4476_v56  ;;  %4489 = vtanh.f32 %v5550_v10  ;;  %v563_v6 = vpop.f32.mrb[16].mxu0 }
 0x197   : > { %v4480_v54 = vpop.eup %4479  ;;  %v2135_v62 = vadd.f32 1.0, %v4478_v60  ;;  %v564_v1 = vadd.f32 %v563_v6, %v5479_v37  ;;  %v565_v2 = vpop.f32.mrb[17].mxu0 }
 0x198   : > { %v4482_v7 = vpop.eup %4481  ;;  %v2454_v13 = vmul.f32 %v2134_v51, %v5514_v41  ;;  %v2144_v15 = vadd.f32 1.0, %v4480_v54  ;;  %v566_v23 = vadd.f32 %v565_v2, %v5488_v38  ;;  %v567_v24 = vpop.f32.mrb[18].mxu0 }
 0x199   : > { %v2455_v26 = vmul.f32 %v2135_v62, %v5517_v50  ;;  %v2145_v27 = vadd.f32 1.0, %v4482_v7  ;;  %v5563_v29 = vmul.f32 0.5, %v564_v1  ;;  %v568_v31 = vadd.f32 %v567_v24, %v5479_v37  ;;  %v569_v25 = vpop.f32.mrb[19].mxu0 }
 0x19a   : > { %v2737_v8 = vadd.f32 %v2736_v5, %v2454_v13  ;;  %v2464_v33 = vmul.f32 %v2144_v15, %v5521_v59  ;;  %v5567_v39 = vmul.f32 0.5, %v566_v23  ;;  %v570_v42 = vadd.f32 %v569_v25, %v5488_v38 }
 0x19b   : > { %v2774_v41 = vadd.f32 %v2773_v57, %v2455_v26  ;;  %v2465_v45 = vmul.f32 %v2145_v27, %v5528_v47  ;;  %4491 = vtanh.f32 %v5563_v29  ;;  %v5572_v48 = vmul.f32 0.5, %v568_v31  ;;  %4086 = vmatmul.mubr.msk.bf16.gmra.mrb[68].mxu1 %vm409_vm1, %v5405_v30  ;;  %4123 = vmatmul.mubr.msk.bf16.gmra.mrb[124].mxu0 %vm409_vm1, %v5324_v40  ;;  %v4380_v27 = vld [vmem:[%s8247_s3] sm:$0xff]  }
 0x19c   : > { %v2738_v50 = vadd.f32 %v2737_v8, %v2464_v33  ;;  %4493 = vtanh.f32 %v5567_v39  ;;  %v5579_v59 = vmul.f32 0.5, %v570_v42  ;;  %1100 = vmatprep.mubr.bf16.mxu1 %v5168_v22  ;;  %1313 = vmatprep.mubr.bf16.mxu0 %v5168_v22 }
 0x19d   : > { %v4484_v47 = vpop.eup %4483  ;;  %v2775_v53 = vadd.f32 %v2774_v41, %v2465_v45  ;;  %4495 = vtanh.f32 %v5572_v48 }
 0x19e   : > { %v4486_v5 = vpop.eup %4485  ;;  %v2154_v11 = vadd.f32 1.0, %v4484_v47  ;;  %4497 = vtanh.f32 %v5579_v59  ;;  %v573_v56 = vpop.f32.mrb[20].mxu0 }
 0x19f   : > { %v4488_v57 = vpop.eup %4487  ;;  %v2155_v60 = vadd.f32 1.0, %v4486_v5  ;;  %v574_v51 = vadd.f32 %v573_v56, %v5479_v37  ;;  %v575_v6 = vpop.f32.mrb[21].mxu0 }
 0x1a0   : > { %v4490_v54 = vpop.eup %4489  ;;  %v2474_v62 = vmul.f32 %v2154_v11, %v5536_v32  ;;  %v2164_v1 = vadd.f32 1.0, %v4488_v57  ;;  %v576_v2 = vadd.f32 %v575_v6, %v5488_v38  ;;  %v577_v7 = vpop.f32.mrb[22].mxu0  ;;  %v4383_v11 = vld [vmem:[%s8247_s3 + $0x50] sm:$0xff]  }
 0x1a1   : > { %v2475_v13 = vmul.f32 %v2155_v60, %v5539_v44  ;;  %v2165_v15 = vadd.f32 1.0, %v4490_v54  ;;  %v5589_v23 = vmul.f32 0.5, %v574_v51  ;;  %v578_v24 = vadd.f32 %v577_v7, %v5479_v37  ;;  %v579_v26 = vpop.f32.mrb[23].mxu0  ;;  %v4381_v44 = vld [vmem:[%s8247_s3 + $0x48] sm:$0xff]  }
 0x1a2   : > { %v2739_v31 = vadd.f32 %v2738_v50, %v2474_v62  ;;  %v2484_v25 = vmul.f32 %v2164_v1, %v5543_v63  ;;  %v5596_v32 = vmul.f32 0.5, %v576_v2  ;;  %v580_v8 = vadd.f32 %v579_v26, %v5488_v38 }
 0x1a3   : > { %v2776_v33 = vadd.f32 %v2775_v53, %v2475_v13  ;;  %v2485_v42 = vmul.f32 %v2165_v15, %v5550_v10  ;;  %4499 = vtanh.f32 %v5589_v23  ;;  %v5604_v41 = vmul.f32 0.5, %v578_v24  ;;  %4105 = vmatmul.mubr.msk.bf16.vlgmr.msra.gmra.mrb[72].mxu1 %vm409_vm1, %v5310_v34  ;;  %4124 = vmatmul.mubr.msk.bf16.gmra.mrb[128].mxu0 %vm409_vm1, %v5329_v43  ;;  %v4382_v34 = vld [vmem:[%s8247_s3 + $0x8] sm:$0xff]  }
 0x1a4   : > { %v2740_v63 = vadd.f32 %v2739_v31, %v2484_v25  ;;  %4501 = vtanh.f32 %v5596_v32  ;;  %v5611_v45 = vmul.f32 0.5, %v580_v8  ;;  %1110 = vmatprep.mubr.bf16.mxu1 %v5168_v22  ;;  %1323 = vmatprep.mubr.bf16.mxu0 %v5168_v22 }
 0x1a5   : > { %v4492_v10 = vpop.eup %4491  ;;  %v2777_v50 = vadd.f32 %v2776_v33, %v2485_v42  ;;  %4503 = vtanh.f32 %v5604_v41  ;;  %4223 = vmatpush3.bf16.msra.mxu1 %v4380_v27  ;;  %v4384_v27 = vld [vmem:[%s8247_s3 + $0x10] sm:$0xff]  }
 0x1a6   : > { %v4494_v47 = vpop.eup %4493  ;;  %v2174_v53 = vadd.f32 1.0, %v4492_v10  ;;  %4505 = vtanh.f32 %v5611_v45  ;;  %v583_v5 = vpop.f32.mrb[24].mxu0  ;;  %4224 = vmatprep.subr.bf16.mxu1 %v4381_v44 }
 0x1a7   : > { %v4496_v56 = vpop.eup %4495  ;;  %v2175_v57 = vadd.f32 1.0, %v4494_v47  ;;  %v584_v60 = vadd.f32 %v583_v5, %v5479_v37  ;;  %v585_v51 = vpop.f32.mrb[25].mxu0 }
 0x1a8   : > { %v4498_v6 = vpop.eup %4497  ;;  %v2494_v54 = vmul.f32 %v2174_v53, %v5563_v29  ;;  %v2184_v62 = vadd.f32 1.0, %v4496_v56  ;;  %v586_v1 = vadd.f32 %v585_v51, %v5488_v38  ;;  %v587_v2 = vpop.f32.mrb[26].mxu0  ;;  %v4387_v53 = vld [vmem:[%s8247_s3 + $0x60] sm:$0xff]  }
 0x1a9   : > { %v2495_v7 = vmul.f32 %v2175_v57, %v5567_v39  ;;  %v2185_v13 = vadd.f32 1.0, %v4498_v6  ;;  %v5627_v15 = vmul.f32 0.5, %v584_v60  ;;  %v588_v24 = vadd.f32 %v587_v2, %v5479_v37  ;;  %v589_v26 = vpop.f32.mrb[27].mxu0  ;;  %4225 = vmatpush3.bf16.msra.mxu1 %v4382_v34  ;;  %v4385_v39 = vld [vmem:[%s8247_s3 + $0x58] sm:$0xff]  }
 0x1aa   : > { %v2741_v31 = vadd.f32 %v2740_v63, %v2494_v54  ;;  %v2504_v29 = vmul.f32 %v2184_v62, %v5572_v48  ;;  %v5634_v25 = vmul.f32 0.5, %v586_v1  ;;  %v590_v8 = vadd.f32 %v589_v26, %v5488_v38  ;;  %4226 = vmatprep.subr.bf16.mxu1 %v4383_v11  ;;  %v4388_v26 = vld [vmem:[%s8247_s3 + $0x20] sm:$0xff]  }
 0x1ab   : > { %v2778_v44 = vadd.f32 %v2777_v50, %v2495_v7  ;;  %v2505_v33 = vmul.f32 %v2185_v13, %v5579_v59  ;;  %4507 = vtanh.f32 %v5627_v15  ;;  %v5642_v42 = vmul.f32 0.5, %v588_v24  ;;  %4106 = vmatmul.mubr.msk.bf16.gmra.mrb[76].mxu1 %vm409_vm1, %v5324_v40  ;;  %4125 = vmatmul.mubr.msk.bf16.gmra.mrb[132].mxu0 %vm409_vm1, %v5334_v46  ;;  %v4386_v40 = vld [vmem:[%s8247_s3 + $0x18] sm:$0xff]  }
 0x1ac   : > { %v2742_v48 = vadd.f32 %v2741_v31, %v2504_v29  ;;  %4509 = vtanh.f32 %v5634_v25  ;;  %v5649_v63 = vmul.f32 0.5, %v590_v8  ;;  %1120 = vmatprep.mubr.bf16.mxu1 %v5168_v22  ;;  %1333 = vmatprep.mubr.bf16.mxu0 %v5168_v22 }
 0x1ad   : > { %v4500_v59 = vpop.eup %4499  ;;  %v2779_v10 = vadd.f32 %v2778_v44, %v2505_v33  ;;  %4511 = vtanh.f32 %v5642_v42  ;;  %4227 = vmatpush3.bf16.msra.mxu1 %v4384_v27 }
 0x1ae   : > { %v4502_v50 = vpop.eup %4501  ;;  %v2194_v34 = vadd.f32 1.0, %v4500_v59  ;;  %4513 = vtanh.f32 %v5649_v63  ;;  %v593_v47 = vpop.f32.mrb[28].mxu0  ;;  %4228 = vmatprep.subr.bf16.mxu1 %v4385_v39 }
 0x1af   : > { %v4504_v5 = vpop.eup %4503  ;;  %v2195_v11 = vadd.f32 1.0, %v4502_v50  ;;  %v594_v56 = vadd.f32 %v593_v47, %v5479_v37  ;;  %v595_v57 = vpop.f32.mrb[29].mxu0  ;;  %v4391_v50 = vld [vmem:[%s8247_s3 + $0x70] sm:$0xff]  }
 0x1b0   : > { %v4506_v60 = vpop.eup %4505  ;;  %v2514_v51 = vmul.f32 %v2194_v34, %v5589_v23  ;;  %v2204_v6 = vadd.f32 1.0, %v4504_v5  ;;  %v596_v54 = vadd.f32 %v595_v57, %v5488_v38  ;;  %v597_v62 = vpop.f32.mrb[30].mxu0 }
 0x1b1   : > { %v2515_v1 = vmul.f32 %v2195_v11, %v5596_v32  ;;  %v2205_v2 = vadd.f32 1.0, %v4506_v60  ;;  %v5665_v7 = vmul.f32 0.5, %v594_v56  ;;  %v598_v13 = vadd.f32 %v597_v62, %v5479_v37  ;;  %v599_v24 = vpop.f32.mrb[31].mxu0  ;;  %4229 = vmatpush3.bf16.msra.mxu1 %v4386_v40  ;;  %v4389_v32 = vld [vmem:[%s8247_s3 + $0x68] sm:$0xff]  }
 0x1b2   : > { %v2743_v27 = vadd.f32 %v2742_v48, %v2514_v51  ;;  %v2524_v23 = vmul.f32 %v2204_v6, %v5604_v41  ;;  %v5672_v31 = vmul.f32 0.5, %v596_v54  ;;  %v600_v29 = vadd.f32 %v599_v24, %v5488_v38  ;;  %4230 = vmatprep.subr.bf16.mxu1 %v4387_v53 }
 0x1b3   : > { %v2780_v8 = vadd.f32 %v2779_v10, %v2515_v1  ;;  %v2525_v39 = vmul.f32 %v2205_v2, %v5611_v45  ;;  %4515 = vtanh.f32 %v5665_v7  ;;  %v5680_v44 = vmul.f32 0.5, %v598_v13  ;;  %4107 = vmatmul.mubr.msk.bf16.gmra.mrb[80].mxu1 %vm409_vm1, %v5329_v43  ;;  %4126 = vmatmul.mubr.msk.bf16.gmra.mrb[136].mxu0 %vm409_vm1, %v5339_v49  ;;  %v4390_v43 = vld [vmem:[%s8247_s3 + $0x28] sm:$0xff]   ;;  %v4392_v13 = vld [vmem:[%s8247_s3 + $0x30] sm:$0xff]  }
 0x1b4   : > { %v2744_v41 = vadd.f32 %v2743_v27, %v2524_v23  ;;  %4517 = vtanh.f32 %v5672_v31  ;;  %v5687_v33 = vmul.f32 0.5, %v600_v29  ;;  %1130 = vmatprep.mubr.bf16.mxu1 %v5168_v22  ;;  %1343 = vmatprep.mubr.bf16.mxu0 %v5168_v22 }
 0x1b5   : > { %v4508_v45 = vpop.eup %4507  ;;  %v2781_v48 = vadd.f32 %v2780_v8, %v2525_v39  ;;  %4519 = vtanh.f32 %v5680_v44  ;;  %4231 = vmatpush3.bf16.msra.mxu1 %v4388_v26 }
 0x1b6   : > { %v4510_v59 = vpop.eup %4509  ;;  %v2214_v10 = vadd.f32 1.0, %v4508_v45  ;;  %4521 = vtanh.f32 %v5687_v33  ;;  %v603_v40 = vpop.f32.mrb[32].mxu0  ;;  %4232 = vmatprep.subr.bf16.mxu1 %v4389_v32 }
 0x1b7   : > { %v4512_v34 = vpop.eup %4511  ;;  %v2215_v47 = vadd.f32 1.0, %v4510_v59  ;;  %v604_v53 = vadd.f32 %v603_v40, %v5479_v37  ;;  %v605_v5 = vpop.f32.mrb[33].mxu0 }
 0x1b8   : > { %v4514_v11 = vpop.eup %4513  ;;  %v2534_v56 = vmul.f32 %v2214_v10, %v5627_v15  ;;  %v2224_v57 = vadd.f32 1.0, %v4512_v34  ;;  %v606_v60 = vadd.f32 %v605_v5, %v5488_v38  ;;  %v607_v51 = vpop.f32.mrb[34].mxu0 }
 0x1b9   : > { %v2535_v6 = vmul.f32 %v2215_v47, %v5634_v25  ;;  %v2225_v54 = vadd.f32 1.0, %v4514_v11  ;;  %v5703_v62 = vmul.f32 0.5, %v604_v53  ;;  %v608_v1 = vadd.f32 %v607_v51, %v5479_v37  ;;  %v609_v2 = vpop.f32.mrb[35].mxu0  ;;  %4233 = vmatpush3.bf16.msra.mxu1 %v4390_v43 }
 0x1ba   : > { %v2745_v24 = vadd.f32 %v2744_v41, %v2534_v56  ;;  %v2544_v15 = vmul.f32 %v2224_v57, %v5642_v42  ;;  %v5710_v26 = vmul.f32 0.5, %v606_v60  ;;  %v610_v27 = vadd.f32 %v609_v2, %v5488_v38  ;;  %4234 = vmatprep.subr.bf16.mxu1 %v4391_v50 }
 0x1bb   : > { %v2782_v25 = vadd.f32 %v2781_v48, %v2535_v6  ;;  %v2545_v23 = vmul.f32 %v2225_v54, %v5649_v63  ;;  %4523 = vtanh.f32 %v5703_v62  ;;  %v5715_v29 = vmul.f32 0.5, %v608_v1  ;;  %4108 = vmatmul.mubr.msk.bf16.gmra.mrb[84].mxu1 %vm409_vm1, %v5334_v46  ;;  %4127 = vmatmul.mubr.msk.bf16.gmra.mrb[140].mxu0 %vm409_vm1, %v5344_v52 }
 0x1bc   : > { %v2746_v32 = vadd.f32 %v2745_v24, %v2544_v15  ;;  %4525 = vtanh.f32 %v5710_v26  ;;  %v5722_v42 = vmul.f32 0.5, %v610_v27  ;;  %1140 = vmatprep.mubr.bf16.mxu1 %v5168_v22  ;;  %1353 = vmatprep.mubr.bf16.mxu0 %v5168_v22 }
 0x1bd   : > { %v4516_v63 = vpop.eup %4515  ;;  %v2783_v8 = vadd.f32 %v2782_v25, %v2545_v23  ;;  %4527 = vtanh.f32 %v5715_v29  ;;  %4235 = vmatpush3.bf16.msra.mxu1 %v4392_v13 }
 0x1be   : > { %v4518_v39 = vpop.eup %4517  ;;  %v2234_v41 = vadd.f32 1.0, %v4516_v63  ;;  %4529 = vtanh.f32 %v5722_v42  ;;  %v613_v46 = vpop.f32.mrb[36].mxu0 }
 0x1bf   : > { %v4520_v45 = vpop.eup %4519  ;;  %v2235_v48 = vadd.f32 1.0, %v4518_v39  ;;  %v614_v43 = vadd.f32 %v613_v46, %v5479_v37  ;;  %v615_v59 = vpop.f32.mrb[37].mxu0 }
 0x1c0   : > { %v4522_v10 = vpop.eup %4521  ;;  %v2554_v40 = vmul.f32 %v2234_v41, %v5665_v7  ;;  %v2244_v50 = vadd.f32 1.0, %v4520_v45  ;;  %v616_v34 = vadd.f32 %v615_v59, %v5488_v38  ;;  %v617_v47 = vpop.f32.mrb[38].mxu0 }
 0x1c1   : > { %v2555_v53 = vmul.f32 %v2235_v48, %v5672_v31  ;;  %v2245_v5 = vadd.f32 1.0, %v4522_v10  ;;  %v5732_v11 = vmul.f32 0.5, %v614_v43  ;;  %v618_v56 = vadd.f32 %v617_v47, %v5479_v37  ;;  %v619_v57 = vpop.f32.mrb[39].mxu0 }
 0x1c2   : > { %v2747_v60 = vadd.f32 %v2746_v32, %v2554_v40  ;;  %v2564_v51 = vmul.f32 %v2244_v50, %v5680_v44  ;;  %v5736_v6 = vmul.f32 0.5, %v616_v34  ;;  %v620_v54 = vadd.f32 %v619_v57, %v5488_v38 }
 0x1c3   : > { %v2784_v7 = vadd.f32 %v2783_v8, %v2555_v53  ;;  %v2565_v1 = vmul.f32 %v2245_v5, %v5687_v33  ;;  %4531 = vtanh.f32 %v5732_v11  ;;  %v5741_v2 = vmul.f32 0.5, %v618_v56  ;;  %4109 = vmatmul.mubr.msk.bf16.gmra.mrb[88].mxu1 %vm409_vm1, %v5339_v49  ;;  %4128 = vmatmul.mubr.msk.bf16.gmra.mrb[144].mxu0 %vm409_vm1, %v5349_v55 }
 0x1c4   : > { %v2748_v31 = vadd.f32 %v2747_v60, %v2564_v51  ;;  %4533 = vtanh.f32 %v5736_v6  ;;  %v5748_v44 = vmul.f32 0.5, %v620_v54  ;;  %1150 = vmatprep.mubr.bf16.mxu1 %v5168_v22  ;;  %1363 = vmatprep.mubr.bf16.mxu0 %v5168_v22 }
 0x1c5   : > { %v4524_v33 = vpop.eup %4523  ;;  %v2785_v13 = vadd.f32 %v2784_v7, %v2565_v1  ;;  %4535 = vtanh.f32 %v5741_v2 }
 0x1c6   : > { %v4526_v24 = vpop.eup %4525  ;;  %v2254_v15 = vadd.f32 1.0, %v4524_v33  ;;  %4537 = vtanh.f32 %v5748_v44  ;;  %v623_v49 = vpop.f32.mrb[40].mxu0 }
 0x1c7   : > { %v4528_v27 = vpop.eup %4527  ;;  %v2255_v25 = vadd.f32 1.0, %v4526_v24  ;;  %v624_v23 = vadd.f32 %v623_v49, %v5479_v37  ;;  %v625_v32 = vpop.f32.mrb[41].mxu0 }
 0x1c8   : > { %v4530_v63 = vpop.eup %4529  ;;  %v2574_v8 = vmul.f32 %v2254_v15, %v5703_v62  ;;  %v2264_v39 = vadd.f32 1.0, %v4528_v27  ;;  %v626_v41 = vadd.f32 %v625_v32, %v5488_v38  ;;  %v627_v46 = vpop.f32.mrb[42].mxu0 }
 0x1c9   : > { %v2575_v45 = vmul.f32 %v2255_v25, %v5710_v26  ;;  %v2265_v48 = vadd.f32 1.0, %v4530_v63  ;;  %v5758_v43 = vmul.f32 0.5, %v624_v23  ;;  %v628_v59 = vadd.f32 %v627_v46, %v5479_v37  ;;  %v629_v10 = vpop.f32.mrb[43].mxu0  ;;  %v4393_v26 = vld [vmem:[%s8247_s3 + $0x78] sm:$0xff]  }
 0x1ca   : > { %v2749_v40 = vadd.f32 %v2748_v31, %v2574_v8  ;;  %v2584_v50 = vmul.f32 %v2264_v39, %v5715_v29  ;;  %v5762_v34 = vmul.f32 0.5, %v626_v41  ;;  %v630_v47 = vadd.f32 %v629_v10, %v5488_v38  ;;  %4236 = vmatprep.subr.bf16.mxu1 %v4393_v26 }
 0x1cb   : > { %v2786_v62 = vadd.f32 %v2785_v13, %v2575_v45  ;;  %v2585_v53 = vmul.f32 %v2265_v48, %v5722_v42  ;;  %4539 = vtanh.f32 %v5758_v43  ;;  %v5767_v5 = vmul.f32 0.5, %v628_v59  ;;  %4110 = vmatmul.mubr.msk.bf16.gmra.mrb[92].mxu1 %vm409_vm1, %v5344_v52  ;;  %4129 = vmatmul.mubr.msk.bf16.gmra.mrb[148].mxu0 %vm409_vm1, %v5354_v58  ;;  %v4394_v52 = vld [vmem:[%s8247_s3 + $0x38] sm:$0xff]  }
 0x1cc   : > { %v2750_v29 = vadd.f32 %v2749_v40, %v2584_v50  ;;  %4541 = vtanh.f32 %v5762_v34  ;;  %v5777_v56 = vmul.f32 0.5, %v630_v47  ;;  %1160 = vmatprep.mubr.bf16.mxu1 %v5168_v22  ;;  %1373 = vmatprep.mubr.bf16.mxu0 %v5168_v22 }
 0x1cd   : > { %v4532_v42 = vpop.eup %4531  ;;  %v2787_v57 = vadd.f32 %v2786_v62, %v2585_v53  ;;  %4543 = vtanh.f32 %v5767_v5  ;;  %4237 = vmatpush3.bf16.msra.mxu1 %v4394_v52 }
 0x1ce   : > { %v4534_v60 = vpop.eup %4533  ;;  %v2274_v51 = vadd.f32 1.0, %v4532_v42  ;;  %4545 = vtanh.f32 %v5777_v56  ;;  %v633_v54 = vpop.f32.mrb[44].mxu0 }
 0x1cf   : > { %v4536_v7 = vpop.eup %4535  ;;  %v2275_v1 = vadd.f32 1.0, %v4534_v60  ;;  %v634_v31 = vadd.f32 %v633_v54, %v5479_v37  ;;  %v635_v33 = vpop.f32.mrb[45].mxu0 }
 0x1d0   : > { %v4538_v13 = vpop.eup %4537  ;;  %v2594_v24 = vmul.f32 %v2274_v51, %v5732_v11  ;;  %v2284_v15 = vadd.f32 1.0, %v4536_v7  ;;  %v636_v49 = vadd.f32 %v635_v33, %v5488_v38  ;;  %v637_v27 = vpop.f32.mrb[46].mxu0 }
 0x1d1   : > { %v2595_v25 = vmul.f32 %v2275_v1, %v5736_v6  ;;  %v2285_v23 = vadd.f32 1.0, %v4538_v13  ;;  %v5790_v32 = vmul.f32 0.5, %v634_v31  ;;  %v638_v63 = vadd.f32 %v637_v27, %v5479_v37  ;;  %v639_v8 = vpop.f32.mrb[47].mxu0 }
 0x1d2   : > { %v2751_v39 = vadd.f32 %v2750_v29, %v2594_v24  ;;  %v2604_v41 = vmul.f32 %v2284_v15, %v5741_v2  ;;  %v5794_v46 = vmul.f32 0.5, %v636_v49  ;;  %v640_v45 = vadd.f32 %v639_v8, %v5488_v38 }
 0x1d3   : > { %v2788_v11 = vadd.f32 %v2787_v57, %v2595_v25  ;;  %v2605_v48 = vmul.f32 %v2285_v23, %v5748_v44  ;;  %4547 = vtanh.f32 %v5790_v32  ;;  %v5799_v59 = vmul.f32 0.5, %v638_v63  ;;  %4111 = vmatmul.mubr.msk.bf16.gmra.mrb[96].mxu1 %vm409_vm1, %v5349_v55  ;;  %4130 = vmatmul.mubr.msk.bf16.gmra.mrb[152].mxu0 %vm409_vm1, %v5359_v61 }
 0x1d4   : > { %v2752_v6 = vadd.f32 %v2751_v39, %v2604_v41  ;;  %4549 = vtanh.f32 %v5794_v46  ;;  %v5806_v2 = vmul.f32 0.5, %v640_v45  ;;  %1170 = vmatprep.mubr.bf16.mxu1 %v5168_v22  ;;  %1383 = vmatprep.mubr.bf16.mxu0 %v5168_v22 }
 0x1d5   : > { %v4540_v44 = vpop.eup %4539  ;;  %v2789_v10 = vadd.f32 %v2788_v11, %v2605_v48  ;;  %4551 = vtanh.f32 %v5799_v59 }
 0x1d6   : > { %v4542_v40 = vpop.eup %4541  ;;  %v2294_v50 = vadd.f32 1.0, %v4540_v44  ;;  %4553 = vtanh.f32 %v5806_v2  ;;  %v643_v55 = vpop.f32.mrb[48].mxu0 }
 0x1d7   : > { %v4544_v47 = vpop.eup %4543  ;;  %v2295_v62 = vadd.f32 1.0, %v4542_v40  ;;  %v644_v53 = vadd.f32 %v643_v55, %v5479_v37  ;;  %v645_v26 = vpop.f32.mrb[49].mxu0 }
 0x1d8   : > { %v4546_v29 = vpop.eup %4545  ;;  %v2614_v52 = vmul.f32 %v2294_v50, %v5758_v43  ;;  %v2304_v42 = vadd.f32 1.0, %v4544_v47  ;;  %v646_v57 = vadd.f32 %v645_v26, %v5488_v38  ;;  %v647_v60 = vpop.f32.mrb[50].mxu0 }
 0x1d9   : > { %v2615_v51 = vmul.f32 %v2295_v62, %v5762_v34  ;;  %v2305_v54 = vadd.f32 1.0, %v4546_v29  ;;  %v5816_v7 = vmul.f32 0.5, %v644_v53  ;;  %v648_v1 = vadd.f32 %v647_v60, %v5479_v37  ;;  %v649_v31 = vpop.f32.mrb[51].mxu0 }
 0x1da   : > { %v2753_v33 = vadd.f32 %v2752_v6, %v2614_v52  ;;  %v2624_v13 = vmul.f32 %v2304_v42, %v5767_v5  ;;  %v5820_v24 = vmul.f32 0.5, %v646_v57  ;;  %v650_v15 = vadd.f32 %v649_v31, %v5488_v38 }
 0x1db   : > { %v2790_v43 = vadd.f32 %v2789_v10, %v2615_v51  ;;  %v2625_v49 = vmul.f32 %v2305_v54, %v5777_v56  ;;  %4555 = vtanh.f32 %v5816_v7  ;;  %v5825_v27 = vmul.f32 0.5, %v648_v1  ;;  %4112 = vmatmul.mubr.msk.bf16.gmra.mrb[100].mxu1 %vm409_vm1, %v5354_v58  ;;  %4131 = vmatmul.mubr.msk.bf16.gmra.mrb[156].mxu0 %vm409_vm1, %v5364_v0 }
 0x1dc   : > { %v2754_v34 = vadd.f32 %v2753_v33, %v2624_v13  ;;  %4557 = vtanh.f32 %v5820_v24  ;;  %v5832_v5 = vmul.f32 0.5, %v650_v15  ;;  %1180 = vmatprep.mubr.bf16.mxu1 %v5168_v22  ;;  %1393 = vmatprep.mubr.bf16.mxu0 %v5168_v22 }
 0x1dd   : > { %v4548_v56 = vpop.eup %4547  ;;  %v2791_v25 = vadd.f32 %v2790_v43, %v2625_v49  ;;  %4559 = vtanh.f32 %v5825_v27 }
 0x1de   : > { %v4550_v23 = vpop.eup %4549  ;;  %v2314_v63 = vadd.f32 1.0, %v4548_v56  ;;  %4561 = vtanh.f32 %v5832_v5  ;;  %v653_v58 = vpop.f32.mrb[52].mxu0 }
 0x1df   : > { %v4552_v8 = vpop.eup %4551  ;;  %v2315_v39 = vadd.f32 1.0, %v4550_v23  ;;  %v654_v41 = vadd.f32 %v653_v58, %v5479_v37  ;;  %v655_v45 = vpop.f32.mrb[53].mxu0 }
 0x1e0   : > { %v4554_v11 = vpop.eup %4553  ;;  %v2634_v48 = vmul.f32 %v2314_v63, %v5790_v32  ;;  %v2324_v6 = vadd.f32 1.0, %v4552_v8  ;;  %v656_v44 = vadd.f32 %v655_v45, %v5488_v38  ;;  %v657_v10 = vpop.f32.mrb[54].mxu0  ;;  %v311_v32 = vld [vmem:[%s8246_s2 + $0x8] sm:$0x3] }
 0x1e1   : > { %v2635_v40 = vmul.f32 %v2315_v39, %v5794_v46  ;;  %v2325_v50 = vadd.f32 1.0, %v4554_v11  ;;  %v5842_v55 = vmul.f32 0.5, %v654_v41  ;;  %v658_v47 = vadd.f32 %v657_v10, %v5479_v37  ;;  %v659_v62 = vpop.f32.mrb[55].mxu0 }
 0x1e2   : > { %v2755_v53 = vadd.f32 %v2754_v34, %v2634_v48  ;;  %v2644_v26 = vmul.f32 %v2324_v6, %v5799_v59  ;;  %v5846_v29 = vmul.f32 0.5, %v656_v44  ;;  %v660_v52 = vadd.f32 %v659_v62, %v5488_v38 }
 0x1e3   : > { %v2792_v42 = vadd.f32 %v2791_v25, %v2635_v40  ;;  %v2645_v46 = vmul.f32 %v2325_v50, %v5806_v2  ;;  %4563 = vtanh.f32 %v5842_v55  ;;  %v5854_v57 = vmul.f32 0.5, %v658_v47  ;;  %4113 = vmatmul.mubr.msk.bf16.gmra.mrb[104].mxu1 %vm409_vm1, %v5359_v61  ;;  %4132 = vmatmul.mubr.msk.bf16.gmra.mrb[160].mxu0 %vm409_vm1, %v5369_v4 }
 0x1e4   : > { %v2756_v59 = vadd.f32 %v2755_v53, %v2644_v26  ;;  %4565 = vtanh.f32 %v5846_v29  ;;  %v5861_v60 = vmul.f32 0.5, %v660_v52  ;;  %1190 = vmatprep.mubr.bf16.mxu1 %v5168_v22  ;;  %1403 = vmatprep.mubr.bf16.mxu0 %v5168_v22  ;;  %v5868_v61 = vrot.slane %v311_v32, %v316_v35 }
 0x1e5   : > { %v4556_v2 = vpop.eup %4555  ;;  %v2793_v51 = vadd.f32 %v2792_v42, %v2645_v46  ;;  %4567 = vtanh.f32 %v5854_v57  ;;  %v5873_v15 = vrot.slane %v311_v32, %v320_v36 }
 0x1e6   : > { %v4558_v54 = vpop.eup %4557  ;;  %8259 = vst [vmem:[#allocation7_spill] sm:$0xff] %v5868_v61  ;;  %v2334_v1 = vadd.f32 1.0, %v4556_v2  ;;  %4569 = vtanh.f32 %v5861_v60  ;;  %v663_v31 = vpop.f32.mrb[0].mxu1 }
 0x1e7   : > { %v909_v33 = vpop.f32.mrb[56].mxu0  ;;  %v4560_v13 = vpop.eup %4559  ;;  %8260 = vst [vmem:[#allocation8_spill] sm:$0xff] %v5873_v15  ;;  %v2335_v43 = vadd.f32 1.0, %v4558_v54  ;;  %v664_v49 = vadd.f32 %v663_v31, %v5479_v37 }
 0x1e8   : > { %v910_v34 = vadd.f32 %v909_v33, %v5279_v17  ;;  %v665_v56 = vpop.f32.mrb[1].mxu1  ;;  %v911_v25 = vpop.f32.mrb[57].mxu0  ;;  %v2654_v35 = vmul.f32 %v2334_v1, %v5816_v7  ;;  %v2344_v63 = vadd.f32 1.0, %v4560_v13 }
 0x1e9   : > { %v4562_v23 = vpop.eup %4561  ;;  %v666_v58 = vadd.f32 %v665_v56, %v5488_v38  ;;  %v912_v8 = vadd.f32 %v911_v25, %v5282_v18  ;;  %v667_v39 = vpop.f32.mrb[2].mxu1  ;;  %v2655_v3 = vmul.f32 %v2335_v43, %v5820_v24  ;;  %v5881_v45 = vmul.f32 0.5, %v664_v49 }
 0x1ea   : > { %v913_v41 = vpop.f32.mrb[58].mxu0  ;;  %v2345_v36 = vadd.f32 1.0, %v4562_v23  ;;  %v5883_v11 = vmul.f32 0.5, %v910_v34  ;;  %v669_v48 = vpop.f32.mrb[3].mxu1  ;;  %v2757_v44 = vadd.f32 %v2756_v59, %v2654_v35  ;;  %v2664_v10 = vmul.f32 %v2344_v63, %v5825_v27 }
 0x1eb   : > { %v915_v6 = vpop.f32.mrb[59].mxu0  ;;  %v5886_v7 = vmul.f32 0.5, %v666_v58  ;;  %v5888_v40 = vmul.f32 0.5, %v912_v8  ;;  %v2794_v50 = vadd.f32 %v2793_v51, %v2655_v3  ;;  %4571 = vtanh.f32 %v5881_v45  ;;  %4114 = vmatmul.mubr.msk.bf16.gmra.mrb[108].mxu1 %vm409_vm1, %v5364_v0  ;;  %4133 = vmatmul.mubr.msk.bf16.gmra.mrb[164].mxu0 %vm409_vm1, %v5374_v9 }
 0x1ec   : > { %v2665_v47 = vmul.f32 %v2345_v36, %v5832_v5  ;;  %v668_v24 = vadd.f32 %v667_v39, %v5479_v37  ;;  %v2758_v62 = vadd.f32 %v2757_v44, %v2664_v10  ;;  %4573 = vtanh.f32 %v5883_v11  ;;  %1200 = vmatprep.mubr.bf16.mxu1 %v5168_v22  ;;  %1413 = vmatprep.mubr.bf16.mxu0 %v5168_v22 }
 0x1ed   : > { %v914_v27 = vadd.f32 %v913_v41, %v5279_v17  ;;  %v670_v53 = vadd.f32 %v669_v48, %v5488_v38  ;;  %v4564_v5 = vpop.eup %4563  ;;  %4575 = vtanh.f32 %v5886_v7  ;;  %v916_v0 = vadd.f32 %v915_v6, %v5282_v18 }
 0x1ee   : > { %v2795_v26 = vadd.f32 %v2794_v50, %v2665_v47  ;;  %v5903_v52 = vmul.f32 0.5, %v668_v24  ;;  %v4566_v32 = vpop.eup %4565  ;;  %v2354_v42 = vadd.f32 1.0, %v4564_v5  ;;  %4577 = vtanh.f32 %v5888_v40  ;;  %v673_v2 = vpop.f32.mrb[4].mxu1 }
 0x1ef   : > { %v5907_v46 = vmul.f32 0.5, %v914_v27  ;;  %v5909_v59 = vmul.f32 0.5, %v670_v53  ;;  %v919_v51 = vpop.f32.mrb[60].mxu0  ;;  %v4568_v54 = vpop.eup %4567  ;;  %v2355_v1 = vadd.f32 1.0, %v4566_v32  ;;  %v5912_v31 = vmul.f32 0.5, %v916_v0 }
 0x1f0   : > { %4579 = vtanh.f32 %v5903_v52  ;;  %v674_v33 = vadd.f32 %v673_v2, %v5479_v37  ;;  %v675_v13 = vpop.f32.mrb[5].mxu1  ;;  %v921_v43 = vpop.f32.mrb[61].mxu0  ;;  %v2674_v34 = vmul.f32 %v2354_v42, %v5842_v55  ;;  %v2364_v56 = vadd.f32 1.0, %v4568_v54 }
 0x1f1   : > { %v4570_v49 = vpop.eup %4569  ;;  %4581 = vtanh.f32 %v5907_v46  ;;  %v920_v25 = vadd.f32 %v919_v51, %v5279_v17  ;;  %v677_v23 = vpop.f32.mrb[6].mxu1  ;;  %v2675_v63 = vmul.f32 %v2355_v1, %v5846_v29  ;;  %v676_v29 = vadd.f32 %v675_v13, %v5488_v38 }
 0x1f2   : > { %v923_v35 = vpop.f32.mrb[62].mxu0  ;;  %v2365_v58 = vadd.f32 1.0, %v4570_v49  ;;  %4583 = vtanh.f32 %v5909_v59  ;;  %v5920_v8 = vmul.f32 0.5, %v674_v33  ;;  %v679_v39 = vpop.f32.mrb[7].mxu1  ;;  %v2759_v3 = vadd.f32 %v2758_v62, %v2674_v34 }
 0x1f3   : > { %v925_v41 = vpop.f32.mrb[63].mxu0  ;;  %v2684_v36 = vmul.f32 %v2364_v56, %v5854_v57  ;;  %4585 = vtanh.f32 %v5912_v31  ;;  %v5924_v55 = vmul.f32 0.5, %v920_v25  ;;  %v2796_v48 = vadd.f32 %v2795_v26, %v2675_v63  ;;  %4115 = vmatmul.mubr.msk.bf16.gmra.mrb[112].mxu1 %vm409_vm1, %v5369_v4  ;;  %4134 = vmatmul.mubr.msk.bf16.gmra.mrb[168].mxu0 %vm409_vm1, %v5379_v12 }
 0x1f4   : > { %v2685_v6 = vmul.f32 %v2365_v58, %v5861_v60  ;;  %4587 = vtanh.f32 %v5920_v8  ;;  %v922_v57 = vadd.f32 %v921_v43, %v5282_v18  ;;  %v678_v10 = vadd.f32 %v677_v23, %v5479_v37  ;;  %1210 = vmatprep.mubr.bf16.mxu1 %v5168_v22  ;;  %1423 = vmatprep.mubr.bf16.mxu0 %v5168_v22 }
 0x1f5   : > { %v2760_v44 = vadd.f32 %v2759_v3, %v2684_v36  ;;  %4589 = vtanh.f32 %v5924_v55  ;;  %v4572_v60 = vpop.eup %4571  ;;  %v5938_v47 = vmul.f32 0.5, %v676_v29  ;;  %v924_v4 = vadd.f32 %v923_v35, %v5279_v17 }
 0x1f6   : > { %v2797_v50 = vadd.f32 %v2796_v48, %v2685_v6  ;;  %v680_v24 = vadd.f32 %v679_v39, %v5488_v38  ;;  %v4574_v62 = vpop.eup %4573  ;;  %v2374_v27 = vadd.f32 1.0, %v4572_v60  ;;  %v5942_v53 = vmul.f32 0.5, %v922_v57  ;;  %v716_v26 = vpop.f32.mrb[8].mxu1 }
 0x1f7   : > { %v5944_v5 = vmul.f32 0.5, %v678_v10  ;;  %v926_v37 = vadd.f32 %v925_v41, %v5282_v18  ;;  %v929_v0 = vpop.f32.mrb[64].mxu0  ;;  %v4576_v32 = vpop.eup %4575  ;;  %v2098_v42 = vadd.f32 1.0, %v4574_v62  ;;  %4591 = vtanh.f32 %v5938_v47 }
 0x1f8   : > { %v5948_v2 = vmul.f32 0.5, %v924_v4  ;;  %v5950_v51 = vmul.f32 0.5, %v680_v24  ;;  %v718_v54 = vpop.f32.mrb[9].mxu1  ;;  %v931_v38 = vpop.f32.mrb[65].mxu0  ;;  %v2694_v33 = vmul.f32 %v2374_v27, %v5881_v45  ;;  %v2375_v13 = vadd.f32 1.0, %v4576_v32 }
 0x1f9   : > { %v4578_v1 = vpop.eup %4577  ;;  %4593 = vtanh.f32 %v5942_v53  ;;  %v5954_v43 = vmul.f32 0.5, %v926_v37  ;;  %v720_v49 = vpop.f32.mrb[10].mxu1  ;;  %v2418_v25 = vmul.f32 %v2098_v42, %v5883_v11  ;;  %v717_v35 = vadd.f32 %v716_v26, %v5272_v14 }
 0x1fa   : > { %v5956_v34 = vpop.f32.mrb[66].mxu0  ;;  %v4580_v56 = vpop.eup %4579  ;;  %v2099_v23 = vadd.f32 1.0, %v4578_v1  ;;  %4595 = vtanh.f32 %v5944_v5  ;;  %v2761_v39 = vadd.f32 %v2760_v44, %v2694_v33  ;;  %v2695_v41 = vmul.f32 %v2375_v13, %v5886_v7 }
 0x1fb   : > { %v5961_v63 = vpop.f32.mrb[11].mxu1  ;;  %v5963_v58 = vpop.f32.mrb[67].mxu0  ;;  %v2384_v3 = vadd.f32 1.0, %v4580_v56  ;;  %4597 = vtanh.f32 %v5948_v2  ;;  %v5969_v6 = vmul.f32 0.5, %v717_v35  ;;  %4116 = vmatmul.mubr.msk.bf16.gmra.mrb[116].mxu1 %vm409_vm1, %v5374_v9  ;;  %4135 = vmatmul.mubr.msk.bf16.gmra.mrb[172].mxu0 %vm409_vm1, %v5384_v21  ;;  %v930_v9 = vadd.f32 %v929_v0, %v5279_v17 }
 0x1fc   : > { %v4582_v45 = vpop.eup %4581  ;;  %v2419_v48 = vmul.f32 %v2099_v23, %v5888_v40  ;;  %4599 = vtanh.f32 %v5950_v51  ;;  %v2798_v44 = vadd.f32 %v2797_v50, %v2695_v41  ;;  %1220 = vmatprep.mubr.bf16.mxu1 %v5168_v22  ;;  %1433 = vmatprep.mubr.bf16.mxu0 %v5168_v22  ;;  %v719_v62 = vadd.f32 %v718_v54, %v5276_v16 }
 0x1fd   : > { %v4584_v36 = vpop.eup %4583  ;;  %v2108_v11 = vadd.f32 1.0, %v4582_v45  ;;  %v2704_v7 = vmul.f32 %v2384_v3, %v5903_v52  ;;  %4601 = vtanh.f32 %v5954_v43  ;;  %v5989_v42 = vmul.f32 0.5, %v930_v9 }
 0x1fe   : > { %v4586_v29 = vpop.eup %4585  ;;  %v2385_v57 = vadd.f32 1.0, %v4584_v36  ;;  %4603 = vtanh.f32 %v5969_v6  ;;  %v5984_v27 = vpop.f32.mrb[12].mxu1  ;;  %v5996_v13 = vmul.f32 0.5, %v719_v62  ;;  %v932_v54 = vadd.f32 %v931_v38, %v5282_v18 }
 0x1ff   : > { %v4588_v40 = vpop.eup %4587  ;;  %v2428_v10 = vmul.f32 %v2108_v11, %v5907_v46  ;;  %v2109_v60 = vadd.f32 1.0, %v4586_v29  ;;  %v2762_v24 = vadd.f32 %v2761_v39, %v2704_v7  ;;  %v5986_v37 = vpop.f32.mrb[68].mxu0  ;;  %4605 = vtanh.f32 %v5989_v42 }
 0x200   : > { %v4590_v4 = vpop.eup %4589  ;;  %v2705_v50 = vmul.f32 %v2385_v57, %v5909_v59  ;;  %v2394_v52 = vadd.f32 1.0, %v4588_v40  ;;  %v5991_v1 = vpop.f32.mrb[13].mxu1  ;;  %v721_v45 = vadd.f32 %v720_v49, %v5272_v14  ;;  %4607 = vtanh.f32 %v5996_v13 }
 0x201   : > { %v2882_v26 = vadd.f32 %v2428_v10, %v2418_v25  ;;  %v2429_v32 = vmul.f32 %v2109_v60, %v5912_v31  ;;  %v2118_v46 = vadd.f32 1.0, %v4590_v4  ;;  %v5993_v0 = vpop.f32.mrb[69].mxu0  ;;  %v5999_v56 = vpop.f32.mrb[14].mxu1  ;;  %v6011_v38 = vmul.f32 0.5, %v932_v54 }
 0x202   : > { %v2799_v33 = vadd.f32 %v2798_v44, %v2705_v50  ;;  %v2714_v59 = vmul.f32 %v2394_v52, %v5920_v8  ;;  %v6001_v23 = vpop.f32.mrb[70].mxu0  ;;  %v4592_v25 = vpop.eup %4591  ;;  %v6013_v44 = vmul.f32 0.5, %v721_v45  ;;  %v723_v40 = vadd.f32 %v5961_v63, %v5276_v16 }
 0x203   : > { %v2919_v31 = vadd.f32 %v2429_v32, %v2419_v48  ;;  %v2438_v35 = vmul.f32 %v2118_v46, %v5924_v55  ;;  %v6006_v39 = vpop.f32.mrb[15].mxu1  ;;  %v6008_v41 = vpop.f32.mrb[71].mxu0  ;;  %v2395_v36 = vadd.f32 1.0, %v4592_v25  ;;  %v934_v55 = vadd.f32 %v5956_v34, %v5279_v17  ;;  %4117 = vmatmul.mubr.msk.bf16.gmra.mrb[120].mxu1 %vm409_vm1, %v5379_v12  ;;  %4136 = vmatmul.mubr.msk.bf16.gmra.mrb[176].mxu0 %vm409_vm1, %v5392_v28 }
 0x204   : > { %v4594_v8 = vpop.eup %4593  ;;  %v2763_v3 = vadd.f32 %v2762_v24, %v2714_v59  ;;  %4609 = vtanh.f32 %v6011_v38  ;;  %1230 = vmatprep.mubr.bf16.mxu1 %v5168_v22  ;;  %1443 = vmatprep.mubr.bf16.mxu0 %v5168_v22  ;;  %v6032_v50 = vmul.f32 0.5, %v723_v40  ;;  %v936_v45 = vadd.f32 %v5963_v58, %v5282_v18 }
 0x205   : > { %v4596_v11 = vpop.eup %4595  ;;  %v2883_v29 = vadd.f32 %v2882_v26, %v2438_v35  ;;  %v2119_v48 = vadd.f32 1.0, %v4594_v8  ;;  %v2715_v7 = vmul.f32 %v2395_v36, %v5938_v47  ;;  %4611 = vtanh.f32 %v6013_v44 }
 0x206   : > { %v4598_v49 = vpop.eup %4597  ;;  %v2404_v57 = vadd.f32 1.0, %v4596_v11  ;;  %v6029_v60 = vmul.f32 0.5, %v934_v55  ;;  %v6034_v63 = vpop.f32.mrb[16].mxu1  ;;  %v727_v8 = vadd.f32 %v5984_v27, %v5272_v14  ;;  %v940_v55 = vadd.f32 %v5986_v37, %v5279_v17 }
 0x207   : > { %v4600_v34 = vpop.eup %4599  ;;  %v2439_v10 = vmul.f32 %v2119_v48, %v5942_v53  ;;  %v2128_v12 = vadd.f32 1.0, %v4598_v49  ;;  %v2800_v47 = vadd.f32 %v2799_v33, %v2715_v7  ;;  %v6036_v52 = vpop.f32.mrb[72].mxu0  ;;  %v729_v58 = vadd.f32 %v5991_v1, %v5276_v16 }
 0x208   : > { %v4602_v9 = vpop.eup %4601  ;;  %v2724_v4 = vmul.f32 %v2404_v57, %v5944_v5  ;;  %v2405_v24 = vadd.f32 1.0, %v4600_v34  ;;  %4613 = vtanh.f32 %v6029_v60  ;;  %v6040_v46 = vpop.f32.mrb[17].mxu1  ;;  %v6064_v7 = vmul.f32 0.5, %v727_v8 }
 0x209   : > { %v4604_v62 = vpop.eup %4603  ;;  %v2920_v26 = vadd.f32 %v2919_v31, %v2439_v10  ;;  %v2448_v53 = vmul.f32 %v2128_v12, %v5948_v2  ;;  %v2129_v32 = vadd.f32 1.0, %v4602_v9  ;;  %v6042_v59 = vpop.f32.mrb[73].mxu0  ;;  %4615 = vtanh.f32 %v6032_v50 }
 0x20a   : > { %v2764_v33 = vadd.f32 %v2763_v3, %v2724_v4  ;;  %v2725_v5 = vmul.f32 %v2405_v24, %v5950_v51  ;;  %v2096_v54 = vadd.f32 1.0, %v4604_v62  ;;  %v6046_v25 = vpop.f32.mrb[18].mxu1  ;;  %v6048_v35 = vpop.f32.mrb[74].mxu0  ;;  %v6072_v37 = vmul.f32 0.5, %v940_v55 }
 0x20b   : > { %v2884_v31 = vadd.f32 %v2883_v29, %v2448_v53  ;;  %v2449_v2 = vmul.f32 %v2129_v32, %v5954_v43  ;;  %v6055_v36 = vpop.f32.mrb[19].mxu1  ;;  %v6057_v3 = vpop.f32.mrb[75].mxu0  ;;  %v6062_v43 = vmul.f32 0.5, %v936_v45  ;;  %4118 = vmatmul.mubr.msk.bf16.gmra.mrb[124].mxu1 %vm409_vm1, %v5384_v21  ;;  %4137 = vmatmul.mubr.msk.bf16.gmra.mrb[180].mxu0 %vm409_vm1, %v5405_v30  ;;  %v6076_v10 = vmul.f32 0.5, %v729_v58 }
 0x20c   : > { %v2765_v51 = vrot.slane %v2764_v33, 4  ;;  %v2801_v11 = vadd.f32 %v2800_v47, %v2725_v5  ;;  %v2416_v48 = vmul.f32 %v2096_v54, %v5969_v6  ;;  %v4606_v29 = vpop.eup %4605  ;;  %1240 = vmatprep.mubr.bf16.mxu1 %v5168_v22  ;;  %v942_v1 = vadd.f32 %v5993_v0, %v5282_v18 }
 0x20d   : > { %v2921_v49 = vadd.f32 %v2920_v26, %v2449_v2  ;;  %v4608_v27 = vpop.eup %4607  ;;  %v2138_v40 = vadd.f32 1.0, %v4606_v29  ;;  %4617 = vtanh.f32 %v6062_v43 }
 0x20e   : > { %v2766_v6 = vadd.f32 %v2765_v51, %v2764_v33  ;;  %v2802_v57 = vrot.slane %v2801_v11, 4  ;;  %v2097_v34 = vadd.f32 1.0, %v4608_v27  ;;  %v4610_v21 = vpop.eup %4609  ;;  %4619 = vtanh.f32 %v6064_v7  ;;  %v6084_v4 = vpop.f32.mrb[20].mxu1 }
 0x20f   : > { %v2458_v47 = vmul.f32 %v2138_v40, %v5989_v42  ;;  %v6086_v24 = vpop.f32.mrb[76].mxu0  ;;  %v4612_v62 = vpop.eup %4611  ;;  %v2139_v53 = vadd.f32 1.0, %v4610_v21  ;;  %4621 = vtanh.f32 %v6072_v37  ;;  %v6090_v32 = vmul.f32 0.5, %v942_v1 }
 0x210   : > { %v2767_v12 = vrot.slane %v2766_v6, 2  ;;  %v6080_v9 = vadd.f32 %v2802_v57, %v2801_v11  ;;  %v2417_v26 = vmul.f32 %v2097_v34, %v5996_v13  ;;  %v6092_v0 = vpop.f32.mrb[21].mxu1  ;;  %v6094_v33 = vpop.f32.mrb[77].mxu0  ;;  %v2106_v54 = vadd.f32 1.0, %v4612_v62 }
 0x211   : > { %v2885_v42 = vadd.f32 %v2884_v31, %v2458_v47  ;;  %4623 = vtanh.f32 %v6076_v10  ;;  %v6097_v2 = vpop.f32.mrb[22].mxu1  ;;  %v6099_v45 = vpop.f32.mrb[78].mxu0  ;;  %v2459_v13 = vmul.f32 %v2139_v53, %v6011_v38  ;;  %v731_v51 = vadd.f32 %v5999_v56, %v5272_v14 }
 0x212   : > { %v2768_v5 = vadd.f32 %v2767_v12, %v2766_v6  ;;  %v4614_v8 = vpop.eup %4613  ;;  %4625 = vtanh.f32 %v6090_v32  ;;  %v944_v11 = vadd.f32 %v6001_v23, %v5279_v17  ;;  %v6107_v55 = vpop.f32.mrb[23].mxu1  ;;  %v2426_v27 = vmul.f32 %v2106_v54, %v6013_v44 }
 0x213   : > { %v6109_v31 = vpop.f32.mrb[79].mxu0  ;;  %v4616_v29 = vpop.eup %4615  ;;  %v2148_v6 = vadd.f32 1.0, %v4614_v8  ;;  %v733_v38 = vadd.f32 %v6006_v39, %v5276_v16  ;;  %v2922_v57 = vadd.f32 %v2921_v49, %v2459_v13  ;;  %v6114_v34 = vmul.f32 0.5, %v731_v51  ;;  %4119 = vmatmul.mubr.msk.bf16.gmra.mrb[128].mxu1 %vm409_vm1, %v5392_v28 }
 0x214   : > { %v2769_v58 = vrot.slane %v2768_v5, 1  ;;  %v2107_v40 = vadd.f32 1.0, %v4616_v29  ;;  %v6116_v56 = vmul.f32 0.5, %v944_v11  ;;  %v2808_v1 = vadd.f32 %v2426_v27, %v2416_v48  ;;  %1250 = vmatprep.mubr.bf16.mxu1 %v5168_v22 }
 0x215   : > { %v2468_v21 = vmul.f32 %v2148_v6, %v6029_v60  ;;  %v6121_v12 = vmul.f32 0.5, %v733_v38  ;;  %4627 = vtanh.f32 %v6114_v34  ;;  %v946_v39 = vadd.f32 %v6008_v41, %v5282_v18 }
 0x216   : > { %v2770_v23 = vadd.f32 %v2769_v58, %v2768_v5  ;;  %v2427_v44 = vmul.f32 %v2107_v40, %v6032_v50  ;;  %v737_v49 = vadd.f32 %v6034_v63, %v5272_v14  ;;  %4629 = vtanh.f32 %v6116_v56  ;;  %v6135_v48 = vpop.f32.mrb[24].mxu1  ;;  %v6137_v22 = vpop.f32.mrb[80].mxu0 }
 0x217   : > { %v2886_v28 = vadd.f32 %v2885_v42, %v2468_v21  ;;  %v950_v60 = vadd.f32 %v6036_v52, %v5279_v17  ;;  %v4618_v50 = vpop.eup %4617  ;;  %4631 = vtanh.f32 %v6121_v12  ;;  %v6140_v41 = vmul.f32 0.5, %v946_v39  ;;  %v6144_v63 = vpop.f32.mrb[25].mxu1 }
 0x218   : > { %v6130_v47 = vmul.f32 0.00390625, %v2770_v23  ;;  %v2845_v62 = vadd.f32 %v2427_v44, %v2417_v26  ;;  %v6142_v53 = vmul.f32 0.5, %v737_v49  ;;  %v6146_v5 = vpop.f32.mrb[81].mxu0  ;;  %v4620_v42 = vpop.eup %4619  ;;  %v2149_v54 = vadd.f32 1.0, %v4618_v50 }
 0x219   : > { %v6148_v8 = vmul.f32 0.5, %v950_v60  ;;  %v739_v52 = vadd.f32 %v6040_v46, %v5276_v16  ;;  %v952_v26 = vadd.f32 %v6042_v59, %v5282_v18  ;;  %v6154_v13 = vpop.f32.mrb[26].mxu1  ;;  %v6156_v51 = vpop.f32.mrb[82].mxu0  ;;  %v2116_v29 = vadd.f32 1.0, %v4620_v42 }
 0x21a   : > { %v4622_v11 = vpop.eup %4621  ;;  %4633 = vtanh.f32 %v6140_v41  ;;  %v741_v58 = vadd.f32 %v6046_v25, %v5272_v14  ;;  %v954_v27 = vadd.f32 %v6048_v35, %v5279_v17  ;;  %v6163_v6 = vpop.f32.mrb[27].mxu1  ;;  %v2469_v59 = vmul.f32 %v2149_v54, %v6062_v43 }
 0x21b   : > { %v6165_v46 = vpop.f32.mrb[83].mxu0  ;;  %v4624_v38 = vpop.eup %4623  ;;  %v2158_v40 = vadd.f32 1.0, %v4622_v11  ;;  %4635 = vtanh.f32 %v6142_v53  ;;  %v6169_v23 = vmul.f32 0.5, %v739_v52  ;;  %v2436_v44 = vmul.f32 %v2116_v29, %v6064_v7  ;;  %4120 = vmatmul.mubr.msk.bf16.gmra.mrb[132].mxu1 %vm409_vm1, %v5405_v30 }
 0x21c   : > { %v4626_v21 = vpop.eup %4625  ;;  %v2117_v39 = vadd.f32 1.0, %v4624_v38  ;;  %4637 = vtanh.f32 %v6148_v8  ;;  %v6173_v25 = vmul.f32 0.5, %v952_v26  ;;  %v2923_v35 = vadd.f32 %v2922_v57, %v2469_v59 }
 0x21d   : > { %v2478_v49 = vmul.f32 %v2158_v40, %v6072_v37  ;;  %v2159_v43 = vadd.f32 1.0, %v4626_v21  ;;  %4639 = vtanh.f32 %v6169_v23  ;;  %v2809_v60 = vadd.f32 %v2808_v1, %v2436_v44 }
 0x21e   : > { %v2437_v50 = vmul.f32 %v2117_v39, %v6076_v10  ;;  %4641 = vtanh.f32 %v6173_v25  ;;  %v6181_v7 = vmul.f32 0.5, %v741_v58  ;;  %v6184_v52 = vmul.f32 0.5, %v954_v27  ;;  %v6188_v57 = vpop.f32.mrb[28].mxu1  ;;  %v6190_v37 = vpop.f32.mrb[84].mxu0 }
 0x21f   : > { %v2887_v42 = vadd.f32 %v2886_v28, %v2478_v49  ;;  %v2479_v54 = vmul.f32 %v2159_v43, %v6090_v32  ;;  %v743_v30 = vadd.f32 %v6055_v36, %v5276_v16  ;;  %v4628_v26 = vpop.eup %4627  ;;  %v956_v10 = vadd.f32 %v6057_v3, %v5282_v18  ;;  %v6197_v32 = vpop.f32.mrb[29].mxu1 }
 0x220   : > { %v2846_v1 = vadd.f32 %v2845_v62, %v2437_v50  ;;  %4643 = vtanh.f32 %v6181_v7  ;;  %v747_v28 = vadd.f32 %v6084_v4, %v5272_v14  ;;  %v6199_v11 = vpop.f32.mrb[85].mxu0  ;;  %v4630_v29 = vpop.eup %4629  ;;  %v2126_v58 = vadd.f32 1.0, %v4628_v26 }
 0x221   : > { %v2924_v36 = vadd.f32 %v2923_v35, %v2479_v54  ;;  %4645 = vtanh.f32 %v6184_v52  ;;  %v6202_v27 = vmul.f32 0.5, %v743_v30  ;;  %v6204_v62 = vpop.f32.mrb[30].mxu1  ;;  %v6206_v38 = vpop.f32.mrb[86].mxu0  ;;  %v2168_v3 = vadd.f32 1.0, %v4630_v29 }
 0x222   : > { %v4632_v59 = vpop.eup %4631  ;;  %v6208_v40 = vmul.f32 0.5, %v956_v10  ;;  %v6210_v4 = vmul.f32 0.5, %v747_v28  ;;  %v960_v21 = vadd.f32 %v6086_v24, %v5279_v17  ;;  %v6214_v44 = vpop.f32.mrb[31].mxu1  ;;  %v2446_v35 = vmul.f32 %v2126_v58, %v6114_v34 }
 0x223   : > { %v6216_v39 = vpop.f32.mrb[87].mxu0  ;;  %v2127_v49 = vadd.f32 1.0, %v4632_v59  ;;  %4647 = vtanh.f32 %v6202_v27  ;;  %v749_v43 = vadd.f32 %v6092_v0, %v5276_v16  ;;  %v2488_v54 = vmul.f32 %v2168_v3, %v6116_v56 }
 0x224   : > { %v4634_v50 = vpop.eup %4633  ;;  %4649 = vtanh.f32 %v6208_v40  ;;  %v6224_v30 = vmul.f32 0.5, %v960_v21  ;;  %v962_v24 = vadd.f32 %v6094_v33, %v5282_v18  ;;  %v2810_v10 = vadd.f32 %v2809_v60, %v2446_v35 }
 0x225   : > { %v4636_v26 = vpop.eup %4635  ;;  %v2447_v34 = vmul.f32 %v2127_v49, %v6121_v12  ;;  %v2169_v28 = vadd.f32 1.0, %v4634_v50  ;;  %4651 = vtanh.f32 %v6210_v4  ;;  %v2888_v58 = vadd.f32 %v2887_v42, %v2488_v54 }
 0x226   : > { %v4638_v29 = vpop.eup %4637  ;;  %v2136_v0 = vadd.f32 1.0, %v4636_v26  ;;  %4653 = vtanh.f32 %v6224_v30  ;;  %v6231_v56 = vmul.f32 0.5, %v749_v43  ;;  %v6234_v33 = vmul.f32 0.5, %v962_v24  ;;  %v6236_v60 = vpop.f32.mrb[32].mxu1 }
 0x227   : > { %v4640_v59 = vpop.eup %4639  ;;  %v2847_v3 = vadd.f32 %v2846_v1, %v2447_v34  ;;  %v2489_v21 = vmul.f32 %v2169_v28, %v6140_v41  ;;  %v2178_v20 = vadd.f32 1.0, %v4638_v29  ;;  %v6238_v12 = vpop.f32.mrb[88].mxu0  ;;  %v751_v43 = vadd.f32 %v6097_v2, %v5272_v14 }
 0x228   : > { %v4642_v35 = vpop.eup %4641  ;;  %v2456_v49 = vmul.f32 %v2136_v0, %v6142_v53  ;;  %v2137_v42 = vadd.f32 1.0, %v4640_v59  ;;  %4655 = vtanh.f32 %v6231_v56  ;;  %v6244_v50 = vpop.f32.mrb[33].mxu1  ;;  %v964_v2 = vadd.f32 %v6099_v45, %v5279_v17 }
 0x229   : > { %v6246_v1 = vpop.f32.mrb[89].mxu0  ;;  %v2925_v41 = vadd.f32 %v2924_v36, %v2489_v21  ;;  %v2498_v54 = vmul.f32 %v2178_v20, %v6148_v8  ;;  %v2179_v24 = vadd.f32 1.0, %v4642_v35  ;;  %4657 = vtanh.f32 %v6234_v33  ;;  %v6250_v26 = vpop.f32.mrb[34].mxu1 }
 0x22a   : > { %v6252_v34 = vpop.f32.mrb[90].mxu0  ;;  %v4644_v53 = vpop.eup %4643  ;;  %v2811_v28 = vadd.f32 %v2810_v10, %v2456_v49  ;;  %v2457_v29 = vmul.f32 %v2137_v42, %v6169_v23  ;;  %v6255_v0 = vmul.f32 0.5, %v751_v43  ;;  %v753_v19 = vadd.f32 %v6107_v55, %v5276_v16 }
 0x22b   : > { %v6259_v59 = vpop.f32.mrb[35].mxu1  ;;  %v6261_v36 = vpop.f32.mrb[91].mxu0  ;;  %v2889_v8 = vadd.f32 %v2888_v58, %v2498_v54  ;;  %v2499_v21 = vmul.f32 %v2179_v24, %v6173_v25  ;;  %v2146_v35 = vadd.f32 1.0, %v4644_v53  ;;  %v6267_v23 = vmul.f32 0.5, %v964_v2 }
 0x22c   : > { %v4646_v20 = vpop.eup %4645  ;;  %v2848_v10 = vadd.f32 %v2847_v3, %v2457_v29  ;;  %4659 = vtanh.f32 %v6255_v0  ;;  %v6270_v15 = vmul.f32 0.5, %v753_v19  ;;  %v966_v58 = vadd.f32 %v6109_v31, %v5282_v18 }
 0x22d   : > { %v2188_v49 = vadd.f32 1.0, %v4646_v20  ;;  %v4648_v42 = vpop.eup %4647  ;;  %v2926_v45 = vadd.f32 %v2925_v41, %v2499_v21  ;;  %v2466_v43 = vmul.f32 %v2146_v35, %v6181_v7  ;;  %4661 = vtanh.f32 %v6267_v23 }
 0x22e   : > { %v4650_v25 = vpop.eup %4649  ;;  %v2147_v24 = vadd.f32 1.0, %v4648_v42  ;;  %v757_v55 = vadd.f32 %v6135_v48, %v5272_v14  ;;  %4663 = vtanh.f32 %v6270_v15  ;;  %v6279_v7 = vmul.f32 0.5, %v966_v58  ;;  %v6281_v19 = vpop.f32.mrb[36].mxu1 }
 0x22f   : > { %v2508_v54 = vmul.f32 %v2188_v49, %v6184_v52  ;;  %v4652_v3 = vpop.eup %4651  ;;  %v2812_v53 = vadd.f32 %v2811_v28, %v2466_v43  ;;  %v2189_v29 = vadd.f32 1.0, %v4650_v25  ;;  %v6283_v41 = vpop.f32.mrb[92].mxu0  ;;  %v970_v42 = vadd.f32 %v6137_v22, %v5279_v17 }
 0x230   : > { %v4654_v31 = vpop.eup %4653  ;;  %v2467_v52 = vmul.f32 %v2147_v24, %v6202_v27  ;;  %v2156_v20 = vadd.f32 1.0, %v4652_v3  ;;  %v6286_v21 = vmul.f32 0.5, %v757_v55  ;;  %v6288_v35 = vpop.f32.mrb[37].mxu1  ;;  %4665 = vtanh.f32 %v6279_v7 }
 0x231   : > { %v2890_v2 = vadd.f32 %v2889_v8, %v2508_v54  ;;  %v6290_v48 = vpop.f32.mrb[93].mxu0  ;;  %v2509_v28 = vmul.f32 %v2189_v29, %v6208_v40  ;;  %v2198_v49 = vadd.f32 1.0, %v4654_v31  ;;  %v6296_v43 = vpop.f32.mrb[38].mxu1  ;;  %v759_v54 = vadd.f32 %v6144_v63, %v5276_v16 }
 0x232   : > { %v6298_v8 = vpop.f32.mrb[94].mxu0  ;;  %v4656_v27 = vpop.eup %4655  ;;  %v2849_v58 = vadd.f32 %v2848_v10, %v2467_v52  ;;  %v2476_v25 = vmul.f32 %v2156_v20, %v6210_v4  ;;  %4667 = vtanh.f32 %v6286_v21  ;;  %v6309_v31 = vmul.f32 0.5, %v970_v42 }
 0x233   : > { %v6304_v40 = vpop.f32.mrb[39].mxu1  ;;  %v6306_v24 = vpop.f32.mrb[95].mxu0  ;;  %v2927_v3 = vadd.f32 %v2926_v45, %v2509_v28  ;;  %v2518_v22 = vmul.f32 %v2198_v49, %v6224_v30  ;;  %v2157_v29 = vadd.f32 1.0, %v4656_v27  ;;  %v6311_v52 = vmul.f32 0.5, %v759_v54 }
 0x234   : > { %v4658_v55 = vpop.eup %4657  ;;  %v2813_v61 = vadd.f32 %v2812_v53, %v2476_v25  ;;  %v972_v4 = vadd.f32 %v6146_v5, %v5282_v18  ;;  %4669 = vtanh.f32 %v6309_v31  ;;  %v761_v45 = vadd.f32 %v6154_v13, %v5272_v14 }
 0x235   : > { %v2199_v10 = vadd.f32 1.0, %v4658_v55  ;;  %v2891_v20 = vadd.f32 %v2890_v2, %v2518_v22  ;;  %v2477_v63 = vmul.f32 %v2157_v29, %v6231_v56  ;;  %4671 = vtanh.f32 %v6311_v52 }
 0x236   : > { %v4660_v28 = vpop.eup %4659  ;;  %v6321_v53 = vmul.f32 0.5, %v972_v4  ;;  %v974_v49 = vadd.f32 %v6156_v51, %v5279_v17  ;;  %v6325_v2 = vmul.f32 0.5, %v761_v45  ;;  %v763_v56 = vadd.f32 %v6163_v6, %v5276_v16  ;;  %v6329_v27 = vpop.f32.mrb[40].mxu1 }
 0x237   : > { %v2519_v30 = vmul.f32 %v2199_v10, %v6234_v33  ;;  %v2850_v42 = vadd.f32 %v2849_v58, %v2477_v63  ;;  %v2166_v5 = vadd.f32 1.0, %v4660_v28  ;;  %v6331_v13 = vpop.f32.mrb[96].mxu0  ;;  %v4662_v25 = vpop.eup %4661  ;;  %v976_v51 = vadd.f32 %v6165_v46, %v5282_v18 }
 0x238   : > { %4673 = vtanh.f32 %v6321_v53  ;;  %v6334_v54 = vmul.f32 0.5, %v974_v49  ;;  %v6338_v58 = vpop.f32.mrb[41].mxu1  ;;  %v6340_v55 = vpop.f32.mrb[97].mxu0  ;;  %v2208_v29 = vadd.f32 1.0, %v4662_v25  ;;  %v6344_v10 = vmul.f32 0.5, %v763_v56 }
 0x239   : > { %v2928_v33 = vadd.f32 %v2927_v3, %v2519_v30  ;;  %v4664_v22 = vpop.eup %4663  ;;  %v2486_v6 = vmul.f32 %v2166_v5, %v6255_v0  ;;  %4675 = vtanh.f32 %v6325_v2  ;;  %v6346_v3 = vpop.f32.mrb[42].mxu1  ;;  %v6351_v46 = vmul.f32 0.5, %v976_v51 }
 0x23a   : > { %8261 = vst [vmem:[#allocation9_spill] sm:$0xff] %v6346_v3  ;;  %v6348_v4 = vpop.f32.mrb[98].mxu0  ;;  %v2167_v63 = vadd.f32 1.0, %v4664_v22  ;;  %4677 = vtanh.f32 %v6334_v54  ;;  %v2804_v45 = vrot.slane %v6080_v9, 2  ;;  %v6354_v28 = vpop.f32.mrb[43].mxu1  ;;  %v2528_v5 = vmul.f32 %v2208_v29, %v6267_v23 }
 0x23b   : > { %8262 = vst [vmem:[#allocation10_spill] sm:$0xff] %v6348_v4  ;;  %8263 = vst [vmem:[#allocation11_spill] sm:$0xff] %v6354_v28  ;;  %v6356_v30 = vpop.f32.mrb[99].mxu0  ;;  %v4666_v0 = vpop.eup %4665  ;;  %v2814_v49 = vadd.f32 %v2813_v61, %v2486_v6  ;;  %4679 = vtanh.f32 %v6344_v10  ;;  %v767_v56 = vadd.f32 %v6188_v57, %v5272_v14  ;;  %v980_v61 = vadd.f32 %v6190_v37, %v5279_v17 }
 0x23c   : > { %8264 = vst [vmem:[#allocation12_spill] sm:$0xff] %v6356_v30  ;;  %v4668_v25 = vpop.eup %4667  ;;  %v2487_v22 = vmul.f32 %v2167_v63, %v6270_v15  ;;  %v2209_v51 = vadd.f32 1.0, %v4666_v0  ;;  %4681 = vtanh.f32 %v6351_v46  ;;  %v2805_v4 = vadd.f32 %v2804_v45, %v6080_v9 }
 0x23d   : > { %v2892_v28 = vadd.f32 %v2891_v20, %v2528_v5  ;;  %v2176_v3 = vadd.f32 1.0, %v4668_v25  ;;  %v6365_v30 = vmul.f32 0.5, %v767_v56  ;;  %v769_v57 = vadd.f32 %v6197_v32, %v5276_v16 }
 0x23e   : > { %v2851_v23 = vadd.f32 %v2850_v42, %v2487_v22  ;;  %v2529_v6 = vmul.f32 %v2209_v51, %v6279_v7  ;;  %v2806_v29 = vrot.slane %v2805_v4, 1  ;;  %v4670_v15 = vpop.eup %4669  ;;  %v6374_v9 = vmul.f32 0.5, %v980_v61  ;;  %v6378_v45 = vpop.f32.mrb[44].mxu1 }
 0x23f   : > { %v2496_v63 = vmul.f32 %v2176_v3, %v6286_v21  ;;  %4683 = vtanh.f32 %v6365_v30  ;;  %v982_v20 = vadd.f32 %v6199_v11, %v5282_v18  ;;  %v6380_v37 = vpop.f32.mrb[100].mxu0  ;;  %v4672_v42 = vpop.eup %4671  ;;  %v2218_v0 = vadd.f32 1.0, %v4670_v15 }
 0x240   : > { %v2929_v7 = vadd.f32 %v2928_v33, %v2529_v6  ;;  %v2807_v5 = vadd.f32 %v2806_v29, %v2805_v4  ;;  %v6382_v56 = vmul.f32 0.5, %v769_v57  ;;  %v6384_v32 = vpop.f32.mrb[45].mxu1  ;;  %v6386_v21 = vpop.f32.mrb[101].mxu0  ;;  %v2177_v25 = vadd.f32 1.0, %v4672_v42 }
 0x241   : > { %8265 = vst [vmem:[#allocation13_spill] sm:$0xff] %v6386_v21  ;;  %v2815_v3 = vadd.f32 %v2814_v49, %v2496_v63  ;;  %4685 = vtanh.f32 %v6374_v9  ;;  %v6389_v22 = vmul.f32 0.5, %v982_v20  ;;  %v6391_v11 = vpop.f32.mrb[46].mxu1  ;;  %v6393_v51 = vpop.f32.mrb[102].mxu0  ;;  %v2538_v33 = vmul.f32 %v2218_v0, %v6309_v31 }
 0x242   : > { %8266 = vst [vmem:[#allocation14_spill] sm:$0xff] %v6391_v11  ;;  %8267 = vst [vmem:[#allocation15_spill] sm:$0xff] %v6393_v51  ;;  %v4674_v61 = vpop.eup %4673  ;;  %v3105_v4 = vmul.f32 0.00390625, %v2807_v5  ;;  %4687 = vtanh.f32 %v6382_v56  ;;  %v771_v6 = vadd.f32 %v6204_v62, %v5272_v14  ;;  %v6399_v29 = vpop.f32.mrb[47].mxu1  ;;  %v2497_v15 = vmul.f32 %v2177_v25, %v6311_v52  ;;  %v4395_v62 = vld [vmem:[%s8247_s3 + $0xc0] sm:$0xff]  }
 0x243   : > { %8268 = vst [vmem:[#allocation16_spill] sm:$0xff] %v6399_v29  ;;  %v6401_v49 = vpop.f32.mrb[103].mxu0  ;;  %v4676_v57 = vpop.eup %4675  ;;  %v2219_v63 = vadd.f32 1.0, %v4674_v61  ;;  %4689 = vtanh.f32 %v6389_v22  ;;  %v984_v20 = vadd.f32 %v6206_v38, %v5279_v17  ;;  %v2893_v42 = vadd.f32 %v2892_v28, %v2538_v33  ;;  %4244 = vmatprep.subr.bf16.mxu1 %v4395_v62 }
 0x244   : > { %8269 = vst [vmem:[#allocation17_spill] sm:$0xff] %v6401_v49  ;;  %v4678_v31 = vpop.eup %4677  ;;  %v2186_v0 = vadd.f32 1.0, %v4676_v57  ;;  %v3115_v5 = vpack.c.bf16 %v3105_v4, %v3105_v4  ;;  %v6407_v51 = vmul.f32 0.5, %v771_v6  ;;  %v2852_v29 = vadd.f32 %v2851_v23, %v2497_v15 }
 0x245   : > { %v4680_v49 = vpop.eup %4679  ;;  %v2539_v52 = vmul.f32 %v2219_v63, %v6321_v53  ;;  %v2228_v25 = vadd.f32 1.0, %v4678_v31  ;;  %v6413_v61 = vmul.f32 0.5, %v984_v20  ;;  %v773_v28 = vadd.f32 %v6214_v44, %v5276_v16 }
 0x246   : > { %v4682_v11 = vpop.eup %4681  ;;  %v2506_v38 = vmul.f32 %v2186_v0, %v6325_v2  ;;  %v2187_v21 = vadd.f32 1.0, %v4680_v49  ;;  %3797 = vmatprep.mubr.bf16.mxu1 %v3115_v5  ;;  %4691 = vtanh.f32 %v6407_v51  ;;  %v6421_v53 = vpop.f32.mrb[48].mxu1  ;;  %v986_v15 = vadd.f32 %v6216_v39, %v5282_v18 }
 0x247   : > { %v2930_v33 = vadd.f32 %v2929_v7, %v2539_v52  ;;  %v2548_v4 = vmul.f32 %v2228_v25, %v6334_v54  ;;  %v2229_v23 = vadd.f32 1.0, %v4682_v11  ;;  %4693 = vtanh.f32 %v6413_v61  ;;  %v6423_v6 = vpop.f32.mrb[104].mxu0  ;;  %v6430_v44 = vpop.f32.mrb[49].mxu1  ;;  %v4396_v54 = vld [vmem:[%s8247_s3 + $0x80] sm:$0xff]  }
 0x248   : > { %v2816_v57 = vadd.f32 %v2815_v3, %v2506_v38  ;;  %v2507_v2 = vmul.f32 %v2187_v21, %v6344_v10  ;;  %v6426_v49 = vmul.f32 0.5, %v773_v28  ;;  %v6432_v7 = vpop.f32.mrb[105].mxu0  ;;  %v3114_v10 = vpack.c.bf16 %v6130_v47, %v6130_v47  ;;  %v6442_v3 = vpop.f32.mrb[50].mxu1 }
 0x249   : > { %v4684_v11 = vpop.eup %4683  ;;  %v2894_v63 = vadd.f32 %v2893_v42, %v2548_v4  ;;  %v2549_v20 = vmul.f32 %v2229_v23, %v6351_v46  ;;  %v777_v21 = vadd.f32 %v6236_v60, %v5272_v14  ;;  %v6444_v39 = vpop.f32.mrb[106].mxu0  ;;  %v6447_v5 = vmul.f32 0.5, %v986_v15 }
 0x24a   : > { %v2853_v31 = vadd.f32 %v2852_v29, %v2507_v2  ;;  %v2196_v0 = vadd.f32 1.0, %v4684_v11  ;;  %4695 = vtanh.f32 %v6426_v49  ;;  %v6449_v62 = vpop.f32.mrb[51].mxu1  ;;  %v6451_v42 = vpop.f32.mrb[107].mxu0  ;;  %3798 = vmatmul.mubr.bf16.vlgmr.msra.gmra.mrb[136].mxu1 %v3114_v10  ;;  %v990_v60 = vadd.f32 %v6238_v12, %v5279_v17 }
 0x24b   : > { %v4686_v46 = vpop.eup %4685  ;;  %v2931_v52 = vadd.f32 %v2930_v33, %v2549_v20  ;;  %v6453_v47 = vmul.f32 0.5, %v777_v21  ;;  %v779_v29 = vadd.f32 %v6244_v50, %v5276_v16  ;;  %4697 = vtanh.f32 %v6447_v5  ;;  %4245 = vmatpush3.bf16.msra.mxu1 %v4396_v54  ;;  %v4397_v33 = vld [vmem:[%s8247_s3 + $0xc8] sm:$0xff]  }
 0x24c   : > { %v4688_v25 = vpop.eup %4687  ;;  %v2516_v38 = vmul.f32 %v2196_v0, %v6365_v30  ;;  %v2238_v28 = vadd.f32 1.0, %v4686_v46  ;;  %v992_v4 = vadd.f32 %v6246_v1, %v5282_v18  ;;  %v6467_v12 = vmul.f32 0.5, %v990_v60  ;;  %v4398_v30 = vld [vmem:[%s8247_s3 + $0x88] sm:$0xff]   ;;  %4246 = vmatprep.subr.bf16.mxu1 %v4397_v33 }
 0x24d   : > { %v4690_v23 = vpop.eup %4689  ;;  %v2197_v2 = vadd.f32 1.0, %v4688_v25  ;;  %4699 = vtanh.f32 %v6453_v47  ;;  %v6469_v50 = vmul.f32 0.5, %v779_v29  ;;  %v781_v10 = vadd.f32 %v6250_v26, %v5272_v14  ;;  %v4399_v26 = vld [vmem:[%s8247_s3 + $0xd0] sm:$0xff]  }
 0x24e   : > { %v2817_v15 = vadd.f32 %v2816_v57, %v2516_v38  ;;  %v2558_v1 = vmul.f32 %v2238_v28, %v6374_v9  ;;  %v2239_v54 = vadd.f32 1.0, %v4690_v23  ;;  %v6475_v11 = vmul.f32 0.5, %v992_v4  ;;  %v6483_v0 = vpop.f32.mrb[52].mxu1  ;;  %v6485_v46 = vpop.f32.mrb[108].mxu0 }
 0x24f   : > { %v2517_v20 = vmul.f32 %v2197_v2, %v6382_v56  ;;  %4701 = vtanh.f32 %v6467_v12  ;;  %v994_v21 = vadd.f32 %v6252_v34, %v5279_v17  ;;  %v783_v56 = vadd.f32 %v6259_v59, %v5276_v16  ;;  %v6491_v29 = vpop.f32.mrb[53].mxu1  ;;  %v6493_v25 = vpop.f32.mrb[109].mxu0  ;;  %4247 = vmatpush3.bf16.msra.mxu1 %v4398_v30 }
 0x250   : > { %v4692_v57 = vpop.eup %4691  ;;  %v2895_v9 = vadd.f32 %v2894_v63, %v2558_v1  ;;  %v2559_v60 = vmul.f32 %v2239_v54, %v6389_v22  ;;  %4703 = vtanh.f32 %v6469_v50  ;;  %v6499_v22 = vmul.f32 0.5, %v781_v10  ;;  %v6501_v63 = vpop.f32.mrb[54].mxu1  ;;  %4248 = vmatprep.subr.bf16.mxu1 %v4399_v26 }
 0x251   : > { %v4694_v34 = vpop.eup %4693  ;;  %v2854_v38 = vadd.f32 %v2853_v31, %v2517_v20  ;;  %v2206_v28 = vadd.f32 1.0, %v4692_v57  ;;  %4705 = vtanh.f32 %v6475_v11  ;;  %v6503_v4 = vpop.f32.mrb[110].mxu0  ;;  %v6505_v23 = vmul.f32 0.5, %v994_v21  ;;  %v4400_v20 = vld [vmem:[%s8247_s3 + $0x90] sm:$0xff]  }
 0x252   : > { %v2932_v59 = vadd.f32 %v2931_v52, %v2559_v60  ;;  %v2248_v33 = vadd.f32 1.0, %v4694_v34  ;;  %v6507_v2 = vmul.f32 0.5, %v783_v56  ;;  %v6509_v30 = vpop.f32.mrb[55].mxu1  ;;  %v6511_v1 = vpop.f32.mrb[111].mxu0  ;;  %4707 = vtanh.f32 %v6499_v22 }
 0x253   : > { %8270 = vst [vmem:[#allocation18_spill] sm:$0xff] %v6511_v1  ;;  %v2526_v31 = vmul.f32 %v2206_v28, %v6407_v51  ;;  %v996_v54 = vadd.f32 %v6261_v36, %v5282_v18  ;;  %v787_v52 = vadd.f32 %v6281_v19, %v5272_v14  ;;  %4709 = vtanh.f32 %v6505_v23  ;;  %4249 = vmatpush3.bf16.msra.mxu1 %v4400_v20 }
 0x254   : > { %v4696_v10 = vpop.eup %4695  ;;  %v2568_v21 = vmul.f32 %v2248_v33, %v6413_v61  ;;  %v1000_v51 = vadd.f32 %v6283_v41, %v5279_v17  ;;  %v789_v57 = vadd.f32 %v6288_v35, %v5276_v16  ;;  %4711 = vtanh.f32 %v6507_v2 }
 0x255   : > { %v2818_v60 = vadd.f32 %v2817_v15, %v2526_v31  ;;  %v2207_v36 = vadd.f32 1.0, %v4696_v10  ;;  %v6529_v19 = vmul.f32 0.5, %v996_v54  ;;  %v4698_v56 = vpop.eup %4697  ;;  %v6531_v34 = vmul.f32 0.5, %v787_v52  ;;  %v4402_v10 = vld [vmem:[%s8247_s3 + $0x98] sm:$0xff]  }
 0x256   : > { %v2896_v26 = vadd.f32 %v2895_v9, %v2568_v21  ;;  %v6533_v61 = vmul.f32 0.5, %v1000_v51  ;;  %v6535_v28 = vmul.f32 0.5, %v789_v57  ;;  %v2249_v1 = vadd.f32 1.0, %v4698_v56  ;;  %v6541_v15 = vpop.f32.mrb[56].mxu1  ;;  %v6543_v31 = vpop.f32.mrb[112].mxu0  ;;  %v4401_v9 = vld [vmem:[%s8247_s3 + $0xd8] sm:$0xff]  }
 0x257   : > { %v4700_v33 = vpop.eup %4699  ;;  %v2527_v41 = vmul.f32 %v2207_v36, %v6426_v49  ;;  %4713 = vtanh.f32 %v6529_v19  ;;  %v1002_v35 = vadd.f32 %v6290_v48, %v5282_v18  ;;  %v791_v49 = vadd.f32 %v6296_v43, %v5272_v14  ;;  %v6553_v20 = vpop.f32.mrb[57].mxu1  ;;  %4250 = vmatprep.subr.bf16.mxu1 %v4401_v9 }
 0x258   : > { %v2216_v54 = vadd.f32 1.0, %v4700_v33  ;;  %4715 = vtanh.f32 %v6531_v34  ;;  %v1004_v52 = vadd.f32 %v6298_v8, %v5279_v17  ;;  %8271 = vst [vmem:[#allocation19_spill] sm:$0xff] %v6553_v20  ;;  %v6555_v48 = vpop.f32.mrb[113].mxu0  ;;  %v2569_v57 = vmul.f32 %v2249_v1, %v6447_v5  ;;  %v6564_v43 = vpop.f32.mrb[58].mxu1  ;;  %4251 = vmatpush3.bf16.msra.mxu1 %v4402_v10 }
 0x259   : > { %8272 = vst [vmem:[#allocation20_spill] sm:$0xff] %v6555_v48  ;;  %v4702_v21 = vpop.eup %4701  ;;  %v2855_v51 = vadd.f32 %v2854_v38, %v2527_v41  ;;  %4717 = vtanh.f32 %v6533_v61  ;;  %v6562_v36 = vmul.f32 0.5, %v1002_v35  ;;  %v6566_v56 = vpop.f32.mrb[114].mxu0  ;;  %v6570_v20 = vmul.f32 0.5, %v791_v49 }
 0x25a   : > { %8273 = vst [vmem:[#allocation21_spill] sm:$0xff] %v6566_v56  ;;  %v4704_v8 = vpop.eup %4703  ;;  %v2536_v33 = vmul.f32 %v2216_v54, %v6453_v47  ;;  %v2258_v48 = vadd.f32 1.0, %v4702_v21  ;;  %4719 = vtanh.f32 %v6535_v28  ;;  %v6572_v38 = vpop.f32.mrb[59].mxu1  ;;  %v2933_v41 = vadd.f32 %v2932_v59, %v2569_v57  ;;  %v4403_v47 = vld [vmem:[%s8247_s3 + $0xe0] sm:$0xff]  }
 0x25b   : > { %8274 = vst [vmem:[#allocation22_spill] sm:$0xff] %v6572_v38  ;;  %v6574_v5 = vpop.f32.mrb[115].mxu0  ;;  %v4706_v1 = vpop.eup %4705  ;;  %v2217_v35 = vadd.f32 1.0, %v4704_v8  ;;  %4721 = vtanh.f32 %v6562_v36  ;;  %v6577_v56 = vmul.f32 0.5, %v1004_v52  ;;  %v793_v59 = vadd.f32 %v6304_v40, %v5276_v16  ;;  %4252 = vmatprep.subr.bf16.mxu1 %v4403_v47 }
 0x25c   : > { %8275 = vst [vmem:[#allocation23_spill] sm:$0xff] %v6574_v5  ;;  %v2819_v9 = vadd.f32 %v2818_v60, %v2536_v33  ;;  %v2578_v54 = vmul.f32 %v2258_v48, %v6467_v12  ;;  %v2259_v49 = vadd.f32 1.0, %v4706_v1  ;;  %4723 = vtanh.f32 %v6570_v20  ;;  %v4708_v21 = vpop.eup %4707 }
 0x25d   : > { %v2537_v10 = vmul.f32 %v2217_v35, %v6469_v50  ;;  %4725 = vtanh.f32 %v6577_v56  ;;  %v1006_v52 = vadd.f32 %v6306_v24, %v5282_v18  ;;  %v4710_v57 = vpop.eup %4709  ;;  %v2226_v12 = vadd.f32 1.0, %v4708_v21 }
 0x25e   : > { %v2897_v8 = vadd.f32 %v2896_v26, %v2578_v54  ;;  %v2579_v60 = vmul.f32 %v2259_v49, %v6475_v11  ;;  %v797_v48 = vadd.f32 %v6329_v27, %v5272_v14  ;;  %v4712_v33 = vpop.eup %4711  ;;  %v2268_v50 = vadd.f32 1.0, %v4710_v57  ;;  %v6597_v40 = vpop.f32.mrb[60].mxu1 }
 0x25f   : > { %v2856_v1 = vadd.f32 %v2855_v51, %v2537_v10  ;;  %v6593_v35 = vmul.f32 0.5, %v793_v59  ;;  %v6595_v5 = vmul.f32 0.5, %v1006_v52  ;;  %v6599_v38 = vpop.f32.mrb[116].mxu0  ;;  %v2546_v26 = vmul.f32 %v2226_v12, %v6499_v22  ;;  %v6604_v54 = vpop.f32.mrb[61].mxu1  ;;  %v4404_v51 = vld [vmem:[%s8247_s3 + $0xa0] sm:$0xff]  }
 0x260   : > { %v2934_v24 = vadd.f32 %v2933_v41, %v2579_v60  ;;  %v2227_v47 = vadd.f32 1.0, %v4712_v33  ;;  %v6602_v11 = vmul.f32 0.5, %v797_v48  ;;  %v6606_v27 = vpop.f32.mrb[117].mxu0  ;;  %v2588_v21 = vmul.f32 %v2268_v50, %v6505_v23  ;;  %v6617_v10 = vpop.f32.mrb[62].mxu1  ;;  %4253 = vmatpush3.bf16.msra.mxu1 %v4404_v51 }
 0x261   : > { %v4714_v49 = vpop.eup %4713  ;;  %4727 = vtanh.f32 %v6593_v35  ;;  %v1010_v41 = vadd.f32 %v6331_v13, %v5279_v17  ;;  %v799_v22 = vadd.f32 %v6338_v58, %v5276_v16  ;;  %8276 = vst [vmem:[#allocation24_spill] sm:$0xff] %v6617_v10  ;;  %v6619_v59 = vpop.f32.mrb[118].mxu0  ;;  %v2820_v57 = vadd.f32 %v2819_v9, %v2546_v26 }
 0x262   : > { %8277 = vst [vmem:[#allocation25_spill] sm:$0xff] %v6619_v59  ;;  %v4716_v52 = vpop.eup %4715  ;;  %v2547_v60 = vmul.f32 %v2227_v47, %v6507_v2  ;;  %v2269_v12 = vadd.f32 1.0, %v4714_v49  ;;  %4729 = vtanh.f32 %v6595_v5  ;;  %v6623_v23 = vpop.f32.mrb[63].mxu1  ;;  %v2898_v33 = vadd.f32 %v2897_v8, %v2588_v21  ;;  %v4405_v47 = vld [vmem:[%s8247_s3 + $0xe8] sm:$0xff]  }
 0x263   : > { %v6625_v48 = vpop.f32.mrb[119].mxu0  ;;  %v4718_v13 = vpop.eup %4717  ;;  %v2236_v50 = vadd.f32 1.0, %v4716_v52  ;;  %4731 = vtanh.f32 %v6602_v11  ;;  %v6628_v58 = vmul.f32 0.5, %v1010_v41  ;;  %v6631_v26 = vmul.f32 0.5, %v799_v22  ;;  %4254 = vmatprep.subr.bf16.mxu1 %v4405_v47 }
 0x264   : > { %8278 = vst [vmem:[#allocation26_spill] sm:$0xff] %v6625_v48  ;;  %v4720_v59 = vpop.eup %4719  ;;  %v2857_v10 = vadd.f32 %v2856_v1, %v2547_v60  ;;  %v2589_v9 = vmul.f32 %v2269_v12, %v6529_v19  ;;  %v2278_v2 = vadd.f32 1.0, %v4718_v13  ;;  %v1012_v21 = vadd.f32 %v6340_v55, %v5282_v18  ;;  %v4406_v19 = vld [vmem:[%s8247_s3 + $0xa8] sm:$0xff]  }
 0x265   : > { %v4722_v49 = vpop.eup %4721  ;;  %v2556_v51 = vmul.f32 %v2236_v50, %v6531_v34  ;;  %v2237_v8 = vadd.f32 1.0, %v4720_v59  ;;  %4733 = vtanh.f32 %v6628_v58  ;;  %4255 = vmatpush3.bf16.msra.mxu1 %v4406_v19 }
 0x266   : > { %v4724_v1 = vpop.eup %4723  ;;  %v2935_v41 = vadd.f32 %v2934_v24, %v2589_v9  ;;  %v2598_v22 = vmul.f32 %v2278_v2, %v6533_v61  ;;  %v2279_v52 = vadd.f32 1.0, %v4722_v49  ;;  %4735 = vtanh.f32 %v6631_v26  ;;  %v6648_v55 = vpop.f32.mrb[64].mxu1  ;;  %v8279_v9 = vld [vmem:[#allocation9_spill] sm:$0xff] }
 0x267   : > { %v4726_v60 = vpop.eup %4725  ;;  %v2821_v34 = vadd.f32 %v2820_v57, %v2556_v51  ;;  %v2557_v59 = vmul.f32 %v2237_v8, %v6535_v28  ;;  %v2246_v12 = vadd.f32 1.0, %v4724_v1  ;;  %v6646_v13 = vmul.f32 0.5, %v1012_v21  ;;  %v6650_v50 = vpop.f32.mrb[120].mxu0  ;;  %v4407_v28 = vld [vmem:[%s8247_s3 + $0xf0] sm:$0xff]  }
 0x268   : > { %v2899_v48 = vadd.f32 %v2898_v33, %v2598_v22  ;;  %v2599_v24 = vmul.f32 %v2279_v52, %v6562_v36  ;;  %v2288_v61 = vadd.f32 1.0, %v4726_v60  ;;  %v801_v2 = vadd.f32 %v8279_v9, %v5272_v14  ;;  %v6655_v47 = vpop.f32.mrb[65].mxu1  ;;  %v6657_v57 = vpop.f32.mrb[121].mxu0  ;;  %v8280_v33 = vld [vmem:[#allocation10_spill] sm:$0xff]  ;;  %v8283_v52 = vld [vmem:[#allocation11_spill] sm:$0xff]  ;;  %4256 = vmatprep.subr.bf16.mxu1 %v4407_v28 }
 0x269   : > { %v2858_v49 = vadd.f32 %v2857_v10, %v2557_v59  ;;  %v2566_v51 = vmul.f32 %v2246_v12, %v6570_v20  ;;  %4737 = vtanh.f32 %v6646_v13  ;;  %v1014_v36 = vadd.f32 %v8280_v33, %v5279_v17  ;;  %v6666_v8 = vpop.f32.mrb[66].mxu1  ;;  %v6668_v21 = vpop.f32.mrb[122].mxu0  ;;  %v8286_v33 = vld [vmem:[#allocation12_spill] sm:$0xff] }
 0x26a   : > { %8281 = vst [vmem:[#allocation9_spill] sm:$0xff] %v6666_v8  ;;  %8282 = vst [vmem:[#allocation10_spill] sm:$0xff] %v6668_v21  ;;  %v2936_v19 = vadd.f32 %v2935_v41, %v2599_v24  ;;  %v2608_v1 = vmul.f32 %v2288_v61, %v6577_v56  ;;  %v6671_v22 = vmul.f32 0.5, %v801_v2  ;;  %v803_v60 = vadd.f32 %v8283_v52, %v5276_v16  ;;  %v6675_v10 = vpop.f32.mrb[67].mxu1  ;;  %v6677_v20 = vpop.f32.mrb[123].mxu0  ;;  %v4408_v41 = vld [vmem:[%s8247_s3 + $0xb0] sm:$0xff]  }
 0x26b   : > { %8284 = vst [vmem:[#allocation11_spill] sm:$0xff] %v6675_v10  ;;  %8285 = vst [vmem:[#allocation27_spill] sm:$0xff] %v6677_v20  ;;  %v4728_v59 = vpop.eup %4727  ;;  %v2822_v12 = vadd.f32 %v2821_v34, %v2566_v51  ;;  %v6679_v9 = vmul.f32 0.5, %v1014_v36  ;;  %v1016_v21 = vadd.f32 %v8286_v33, %v5282_v18  ;;  %v807_v56 = vadd.f32 %v6378_v45, %v5272_v14 }
 0x26c   : > { %v4730_v24 = vpop.eup %4729  ;;  %v2900_v61 = vadd.f32 %v2899_v48, %v2608_v1  ;;  %v2247_v2 = vadd.f32 1.0, %v4728_v59  ;;  %4739 = vtanh.f32 %v6671_v22  ;;  %v6689_v28 = vmul.f32 0.5, %v803_v60  ;;  %4257 = vmatpush3.bf16.msra.mxu1 %v4408_v41  ;;  %v8287_v59 = vld [vmem:[#allocation13_spill] sm:$0xff] }
 0x26d   : > { %v4732_v34 = vpop.eup %4731  ;;  %v2289_v51 = vadd.f32 1.0, %v4730_v24  ;;  %4741 = vtanh.f32 %v6679_v9  ;;  %v6692_v36 = vmul.f32 0.5, %v1016_v21  ;;  %v6694_v52 = vmul.f32 0.5, %v807_v56  ;;  %v4409_v24 = vld [vmem:[%s8247_s3 + $0xf8] sm:$0xff]  }
 0x26e   : > { %v2567_v45 = vmul.f32 %v2247_v2, %v6593_v35  ;;  %v2256_v33 = vadd.f32 1.0, %v4732_v34  ;;  %4743 = vtanh.f32 %v6689_v28  ;;  %v1020_v48 = vadd.f32 %v6380_v37, %v5279_v17  ;;  %v6706_v41 = vpop.f32.mrb[68].mxu1  ;;  %v6708_v35 = vpop.f32.mrb[124].mxu0  ;;  %4258 = vmatprep.subr.bf16.mxu1 %v4409_v24 }
 0x26f   : > { %v4734_v1 = vpop.eup %4733  ;;  %v2609_v60 = vmul.f32 %v2289_v51, %v6595_v5  ;;  %4745 = vtanh.f32 %v6692_v36  ;;  %v809_v21 = vadd.f32 %v6384_v32, %v5276_v16  ;;  %v1022_v56 = vadd.f32 %v8287_v59, %v5282_v18  ;;  %8288 = vst [vmem:[#allocation12_spill] sm:$0xff] %v6706_v41  ;;  %8289 = vst [vmem:[#allocation13_spill] sm:$0xff] %v6708_v35  ;;  %v6715_v51 = vpop.f32.mrb[69].mxu1  ;;  %v4410_v59 = vld [vmem:[%s8247_s3 + $0xb8] sm:$0xff]  }
 0x270   : > { %v4736_v37 = vpop.eup %4735  ;;  %v2859_v2 = vadd.f32 %v2858_v49, %v2567_v45  ;;  %v2576_v5 = vmul.f32 %v2256_v33, %v6602_v11  ;;  %v2298_v34 = vadd.f32 1.0, %v4734_v1  ;;  %4747 = vtanh.f32 %v6694_v52  ;;  %8290 = vst [vmem:[#allocation28_spill] sm:$0xff] %v6715_v51  ;;  %v6717_v32 = vpop.f32.mrb[125].mxu0  ;;  %4259 = vmatpush3.bf16.msra.mxu1 %v4410_v59 }
 0x271   : > { %8291 = vst [vmem:[#allocation29_spill] sm:$0xff] %v6717_v32  ;;  %v2937_v35 = vadd.f32 %v2936_v19, %v2609_v60  ;;  %v2257_v41 = vadd.f32 1.0, %v4736_v37  ;;  %v6722_v20 = vmul.f32 0.5, %v1020_v48  ;;  %v6724_v10 = vmul.f32 0.5, %v809_v21  ;;  %v6726_v49 = vpop.f32.mrb[70].mxu1  ;;  %v6728_v11 = vpop.f32.mrb[126].mxu0 }
 0x272   : > { %v2823_v45 = vadd.f32 %v2822_v12, %v2576_v5  ;;  %v2618_v33 = vmul.f32 %v2298_v34, %v6628_v58  ;;  %v6731_v1 = vmul.f32 0.5, %v1022_v56  ;;  %v8292_v32 = vld [vmem:[#allocation14_spill] sm:$0xff]  ;;  %v6735_v8 = vpop.f32.mrb[71].mxu1  ;;  %v6737_v19 = vpop.f32.mrb[127].mxu0  ;;  %v8295_v21 = vld [vmem:[#allocation15_spill] sm:$0xff]  ;;  %v8296_v58 = vld [vmem:[#allocation16_spill] sm:$0xff] }
 0x273   : > { %v811_v51 = vadd.f32 %v8292_v32, %v5272_v14  ;;  %8293 = vst [vmem:[#allocation14_spill] sm:$0xff] %v6735_v8  ;;  %8294 = vst [vmem:[#allocation30_spill] sm:$0xff] %v6737_v19  ;;  %v4738_v48 = vpop.eup %4737  ;;  %v2577_v60 = vmul.f32 %v2257_v41, %v6631_v26  ;;  %4749 = vtanh.f32 %v6722_v20  ;;  %v1024_v12 = vadd.f32 %v8295_v21, %v5279_v17  ;;  %v8297_v21 = vld [vmem:[#allocation17_spill] sm:$0xff] }
 0x274   : > { %v813_v56 = vadd.f32 %v8296_v58, %v5276_v16  ;;  %v2901_v24 = vadd.f32 %v2900_v61, %v2618_v33  ;;  %v2299_v37 = vadd.f32 1.0, %v4738_v48  ;;  %4751 = vtanh.f32 %v6724_v10 }
 0x275   : > { %v6746_v5 = vmul.f32 0.5, %v811_v51  ;;  %v2860_v34 = vadd.f32 %v2859_v2, %v2577_v60  ;;  %4753 = vtanh.f32 %v6731_v1  ;;  %v6749_v32 = vmul.f32 0.5, %v1024_v12 }
 0x276   : > { %v6751_v26 = vmul.f32 0.5, %v813_v56  ;;  %v4740_v41 = vpop.eup %4739  ;;  %v2619_v59 = vmul.f32 %v2299_v37, %v6646_v13  ;;  %v1026_v61 = vadd.f32 %v8297_v21, %v5282_v18  ;;  %v817_v33 = vadd.f32 %v6421_v53, %v5272_v14  ;;  %v6764_v12 = vpop.f32.mrb[72].mxu1 }
 0x277   : > { %4755 = vtanh.f32 %v6746_v5  ;;  %v4742_v51 = vpop.eup %4741  ;;  %v2266_v48 = vadd.f32 1.0, %v4740_v41  ;;  %v1030_v2 = vadd.f32 %v6423_v6, %v5279_v17  ;;  %v819_v60 = vadd.f32 %v6430_v44, %v5276_v16  ;;  %8298 = vst [vmem:[#allocation15_spill] sm:$0xff] %v6764_v12  ;;  %v6766_v13 = vpop.f32.mrb[128].mxu0 }
 0x278   : > { %4757 = vtanh.f32 %v6749_v32  ;;  %8299 = vst [vmem:[#allocation16_spill] sm:$0xff] %v6766_v13  ;;  %v4744_v58 = vpop.eup %4743  ;;  %v2938_v56 = vadd.f32 %v2937_v35, %v2619_v59  ;;  %v2308_v37 = vadd.f32 1.0, %v4742_v51  ;;  %v6769_v53 = vmul.f32 0.5, %v1026_v61  ;;  %v6771_v41 = vpop.f32.mrb[73].mxu1 }
 0x279   : > { %4759 = vtanh.f32 %v6751_v26  ;;  %8300 = vst [vmem:[#allocation17_spill] sm:$0xff] %v6771_v41  ;;  %v6773_v21 = vpop.f32.mrb[129].mxu0  ;;  %v4746_v19 = vpop.eup %4745  ;;  %v2586_v6 = vmul.f32 %v2266_v48, %v6671_v22  ;;  %v2267_v8 = vadd.f32 1.0, %v4744_v58  ;;  %v6776_v44 = vmul.f32 0.5, %v817_v33 }
 0x27a   : > { %8301 = vst [vmem:[#allocation31_spill] sm:$0xff] %v6773_v21  ;;  %v6778_v12 = vmul.f32 0.5, %v1030_v2  ;;  %v6780_v13 = vpop.f32.mrb[74].mxu1  ;;  %v6782_v35 = vpop.f32.mrb[130].mxu0  ;;  %v2628_v61 = vmul.f32 %v2308_v37, %v6679_v9  ;;  %v2309_v51 = vadd.f32 1.0, %v4746_v19  ;;  %4761 = vtanh.f32 %v6769_v53 }
 0x27b   : > { %8302 = vst [vmem:[#allocation32_spill] sm:$0xff] %v6782_v35  ;;  %v4748_v59 = vpop.eup %4747  ;;  %v6786_v41 = vmul.f32 0.5, %v819_v60  ;;  %v6788_v21 = vpop.f32.mrb[75].mxu1  ;;  %v2824_v33 = vadd.f32 %v2823_v45, %v2586_v6  ;;  %v2587_v48 = vmul.f32 %v2267_v8, %v6689_v28  ;;  %4763 = vtanh.f32 %v6776_v44 }
 0x27c   : > { %v6790_v22 = vpop.f32.mrb[131].mxu0  ;;  %v2276_v2 = vadd.f32 1.0, %v4748_v59  ;;  %v2902_v58 = vadd.f32 %v2901_v24, %v2628_v61  ;;  %v2629_v35 = vmul.f32 %v2309_v51, %v6692_v36  ;;  %4765 = vtanh.f32 %v6778_v12 }
 0x27d   : > { %v1032_v9 = vadd.f32 %v6432_v7, %v5282_v18  ;;  %v4750_v19 = vpop.eup %4749  ;;  %v2861_v60 = vadd.f32 %v2860_v34, %v2587_v48  ;;  %4767 = vtanh.f32 %v6786_v41  ;;  %v821_v8 = vadd.f32 %v6442_v3, %v5272_v14 }
 0x27e   : > { %v2596_v37 = vmul.f32 %v2276_v2, %v6694_v52  ;;  %v4752_v28 = vpop.eup %4751  ;;  %v2939_v45 = vadd.f32 %v2938_v56, %v2629_v35  ;;  %v2318_v6 = vadd.f32 1.0, %v4750_v19  ;;  %v1034_v36 = vadd.f32 %v6444_v39, %v5279_v17  ;;  %v6810_v34 = vpop.f32.mrb[76].mxu1 }
 0x27f   : > { %v6802_v24 = vmul.f32 0.5, %v1032_v9  ;;  %v4754_v59 = vpop.eup %4753  ;;  %v2277_v7 = vadd.f32 1.0, %v4752_v28  ;;  %v6806_v51 = vmul.f32 0.5, %v821_v8  ;;  %v823_v52 = vadd.f32 %v6449_v62, %v5276_v16  ;;  %v6812_v48 = vpop.f32.mrb[132].mxu0 }
 0x280   : > { %v2825_v61 = vadd.f32 %v2824_v33, %v2596_v37  ;;  %v2638_v56 = vmul.f32 %v2318_v6, %v6722_v20  ;;  %v2319_v35 = vadd.f32 1.0, %v4754_v59  ;;  %v6816_v2 = vmul.f32 0.5, %v1034_v36  ;;  %v6818_v39 = vpop.f32.mrb[77].mxu1  ;;  %v6820_v33 = vpop.f32.mrb[133].mxu0 }
 0x281   : > { %v4756_v3 = vpop.eup %4755  ;;  %4769 = vtanh.f32 %v6802_v24  ;;  %8303 = vst [vmem:[#allocation33_spill] sm:$0xff] %v6818_v39  ;;  %8304 = vst [vmem:[#allocation34_spill] sm:$0xff] %v6820_v33  ;;  %v2597_v19 = vmul.f32 %v2277_v7, %v6724_v10  ;;  %v6824_v37 = vmul.f32 0.5, %v823_v52  ;;  %v6826_v8 = vpop.f32.mrb[78].mxu1  ;;  %v4411_v10 = vld [vmem:[%s8247_s3 + $0x140] sm:$0xff]  }
 0x282   : > { %v4758_v9 = vpop.eup %4757  ;;  %v2286_v62 = vadd.f32 1.0, %v4756_v3  ;;  %4771 = vtanh.f32 %v6806_v51  ;;  %v6828_v20 = vpop.f32.mrb[134].mxu0  ;;  %v2903_v6 = vadd.f32 %v2902_v58, %v2638_v56  ;;  %v2639_v36 = vmul.f32 %v2319_v35, %v6731_v1  ;;  %4266 = vmatprep.subr.bf16.mxu1 %v4411_v10 }
 0x283   : > { %8305 = vst [vmem:[#allocation35_spill] sm:$0xff] %v6828_v20  ;;  %v4760_v28 = vpop.eup %4759  ;;  %v2328_v59 = vadd.f32 1.0, %v4758_v9  ;;  %4773 = vtanh.f32 %v6816_v2  ;;  %v6832_v33 = vpop.f32.mrb[79].mxu1  ;;  %v2862_v7 = vadd.f32 %v2861_v60, %v2597_v19  ;;  %v1036_v35 = vadd.f32 %v6451_v42, %v5282_v18 }
 0x284   : > { %8306 = vst [vmem:[#allocation36_spill] sm:$0xff] %v6832_v33  ;;  %v6834_v39 = vpop.f32.mrb[135].mxu0  ;;  %v2606_v52 = vmul.f32 %v2286_v62, %v6746_v5  ;;  %v2287_v3 = vadd.f32 1.0, %v4760_v28  ;;  %4775 = vtanh.f32 %v6824_v37  ;;  %v4762_v58 = vpop.eup %4761  ;;  %v2940_v56 = vadd.f32 %v2939_v45, %v2639_v36 }
 0x285   : > { %8307 = vst [vmem:[#allocation37_spill] sm:$0xff] %v6834_v39  ;;  %v2648_v1 = vmul.f32 %v2328_v59, %v6749_v32  ;;  %v827_v9 = vadd.f32 %v6483_v0, %v5272_v14  ;;  %v4764_v39 = vpop.eup %4763  ;;  %v2329_v19 = vadd.f32 1.0, %v4762_v58  ;;  %v1040_v5 = vadd.f32 %v6485_v46, %v5279_v17 }
 0x286   : > { %v2826_v33 = vadd.f32 %v2825_v61, %v2606_v52  ;;  %v2607_v60 = vmul.f32 %v2287_v3, %v6751_v26  ;;  %v4766_v62 = vpop.eup %4765  ;;  %v2296_v45 = vadd.f32 1.0, %v4764_v39  ;;  %v6849_v36 = vmul.f32 0.5, %v1036_v35  ;;  %v6856_v61 = vpop.f32.mrb[80].mxu1 }
 0x287   : > { %v2904_v28 = vadd.f32 %v2903_v6, %v2648_v1  ;;  %v6851_v32 = vmul.f32 0.5, %v827_v9  ;;  %v4768_v42 = vpop.eup %4767  ;;  %v2649_v0 = vmul.f32 %v2329_v19, %v6769_v53  ;;  %v2338_v10 = vadd.f32 1.0, %v4766_v62  ;;  %v6858_v26 = vpop.f32.mrb[136].mxu0 }
 0x288   : > { %v2863_v59 = vadd.f32 %v2862_v7, %v2607_v60  ;;  %v6854_v20 = vmul.f32 0.5, %v1040_v5  ;;  %v2616_v46 = vmul.f32 %v2296_v45, %v6776_v44  ;;  %v2297_v52 = vadd.f32 1.0, %v4768_v42  ;;  %v6864_v6 = vpop.f32.mrb[81].mxu1  ;;  %v6866_v7 = vpop.f32.mrb[137].mxu0 }
 0x289   : > { %4777 = vtanh.f32 %v6849_v36  ;;  %v829_v39 = vadd.f32 %v6491_v29, %v5276_v16  ;;  %v2941_v53 = vadd.f32 %v2940_v56, %v2649_v0  ;;  %v2658_v3 = vmul.f32 %v2338_v10, %v6778_v12  ;;  %v6872_v1 = vpop.f32.mrb[82].mxu1  ;;  %v6874_v44 = vpop.f32.mrb[138].mxu0 }
 0x28a   : > { %4779 = vtanh.f32 %v6851_v32  ;;  %v1042_v58 = vadd.f32 %v6493_v25, %v5282_v18  ;;  %v2827_v9 = vadd.f32 %v2826_v33, %v2616_v46  ;;  %v2617_v29 = vmul.f32 %v2297_v52, %v6786_v41  ;;  %v6880_v56 = vpop.f32.mrb[83].mxu1  ;;  %v6882_v12 = vpop.f32.mrb[139].mxu0 }
 0x28b   : > { %v4770_v35 = vpop.eup %4769  ;;  %4781 = vtanh.f32 %v6854_v20  ;;  %v6878_v60 = vmul.f32 0.5, %v829_v39  ;;  %v2905_v5 = vadd.f32 %v2904_v28, %v2658_v3  ;;  %v831_v45 = vadd.f32 %v6501_v63, %v5272_v14 }
 0x28c   : > { %v4772_v19 = vpop.eup %4771  ;;  %v2339_v62 = vadd.f32 1.0, %v4770_v35  ;;  %v6884_v25 = vmul.f32 0.5, %v1042_v58  ;;  %v2864_v33 = vadd.f32 %v2863_v59, %v2617_v29  ;;  %v1044_v41 = vadd.f32 %v6503_v4, %v5279_v17  ;;  %v8308_v4 = vld [vmem:[#allocation18_spill] sm:$0xff] }
 0x28d   : > { %v4774_v42 = vpop.eup %4773  ;;  %v2306_v0 = vadd.f32 1.0, %v4772_v19  ;;  %4783 = vtanh.f32 %v6878_v60  ;;  %v6893_v28 = vmul.f32 0.5, %v831_v45  ;;  %v833_v59 = vadd.f32 %v6509_v30, %v5276_v16 }
 0x28e   : > { %v4776_v10 = vpop.eup %4775  ;;  %v2659_v46 = vmul.f32 %v2339_v62, %v6802_v24  ;;  %v2348_v52 = vadd.f32 1.0, %v4774_v42  ;;  %4785 = vtanh.f32 %v6884_v25  ;;  %v6896_v63 = vmul.f32 0.5, %v1044_v41  ;;  %v6904_v29 = vpop.f32.mrb[84].mxu1 }
 0x28f   : > { %v2626_v39 = vmul.f32 %v2306_v0, %v6806_v51  ;;  %v2307_v3 = vadd.f32 1.0, %v4776_v10  ;;  %4787 = vtanh.f32 %v6893_v28  ;;  %v1046_v24 = vadd.f32 %v8308_v4, %v5282_v18  ;;  %8309 = vst [vmem:[#allocation18_spill] sm:$0xff] %v6904_v29  ;;  %v6906_v19 = vpop.f32.mrb[140].mxu0  ;;  %v6912_v30 = vpop.f32.mrb[85].mxu1 }
 0x290   : > { %v2942_v58 = vadd.f32 %v2941_v53, %v2659_v46  ;;  %v2668_v35 = vmul.f32 %v2348_v52, %v6816_v2  ;;  %8310 = vst [vmem:[#allocation38_spill] sm:$0xff] %v6906_v19  ;;  %4789 = vtanh.f32 %v6896_v63  ;;  %v6910_v45 = vmul.f32 0.5, %v833_v59  ;;  %8311 = vst [vmem:[#allocation39_spill] sm:$0xff] %v6912_v30  ;;  %v6914_v53 = vpop.f32.mrb[141].mxu0  ;;  %v8315_v52 = vld [vmem:[#allocation19_spill] sm:$0xff] }
 0x291   : > { %v2828_v62 = vadd.f32 %v2827_v9, %v2626_v39  ;;  %v2627_v51 = vmul.f32 %v2307_v3, %v6824_v37  ;;  %8312 = vst [vmem:[#allocation40_spill] sm:$0xff] %v6914_v53  ;;  %v6916_v42 = vmul.f32 0.5, %v1046_v24  ;;  %v837_v0 = vadd.f32 %v6541_v15, %v5272_v14  ;;  %v6922_v9 = vpop.f32.mrb[86].mxu1  ;;  %v6924_v37 = vpop.f32.mrb[142].mxu0 }
 0x292   : > { %v2906_v2 = vadd.f32 %v2905_v5, %v2668_v35  ;;  %v1050_v41 = vadd.f32 %v6543_v31, %v5279_v17  ;;  %8313 = vst [vmem:[#allocation41_spill] sm:$0xff] %v6922_v9  ;;  %8314 = vst [vmem:[#allocation42_spill] sm:$0xff] %v6924_v37  ;;  %4791 = vtanh.f32 %v6910_v45  ;;  %v839_v39 = vadd.f32 %v8315_v52, %v5276_v16  ;;  %v8316_v5 = vld [vmem:[#allocation20_spill] sm:$0xff]  ;;  %v6931_v59 = vpop.f32.mrb[87].mxu1  ;;  %v6933_v15 = vpop.f32.mrb[143].mxu0 }
 0x293   : > { %v4778_v10 = vpop.eup %4777  ;;  %v2865_v46 = vadd.f32 %v2864_v33, %v2627_v51  ;;  %v1052_v3 = vadd.f32 %v8316_v5, %v5282_v18  ;;  %8317 = vst [vmem:[#allocation19_spill] sm:$0xff] %v6931_v59  ;;  %8318 = vst [vmem:[#allocation20_spill] sm:$0xff] %v6933_v15  ;;  %4793 = vtanh.f32 %v6916_v42  ;;  %v6936_v4 = vmul.f32 0.5, %v837_v0 }
 0x294   : > { %v4780_v35 = vpop.eup %4779  ;;  %v2349_v31 = vadd.f32 1.0, %v4778_v10  ;;  %v6938_v24 = vmul.f32 0.5, %v1050_v41  ;;  %v6940_v37 = vmul.f32 0.5, %v839_v39  ;;  %v841_v5 = vadd.f32 %v6564_v43, %v5272_v14  ;;  %v8319_v10 = vld [vmem:[#allocation21_spill] sm:$0xff] }
 0x295   : > { %v4782_v33 = vpop.eup %4781  ;;  %v2316_v51 = vadd.f32 1.0, %v4780_v35  ;;  %v6942_v52 = vmul.f32 0.5, %v1052_v3  ;;  %4795 = vtanh.f32 %v6936_v4  ;;  %v1054_v0 = vadd.f32 %v8319_v10, %v5279_v17  ;;  %v8320_v3 = vld [vmem:[#allocation22_spill] sm:$0xff]  ;;  %v4413_v43 = vld [vmem:[%s8247_s3 + $0x240] sm:$0xff]  }
 0x296   : > { %v2669_v59 = vmul.f32 %v2349_v31, %v6849_v36  ;;  %v2358_v15 = vadd.f32 1.0, %v4782_v33  ;;  %4797 = vtanh.f32 %v6938_v24  ;;  %v6952_v39 = vmul.f32 0.5, %v841_v5  ;;  %v4414_v36 = vld [vmem:[%s8247_s3 + $0x200] sm:$0xff]   ;;  %v6966_v5 = vpop.f32.mrb[144].mxu0  ;;  %4310 = vmatprep.subr.bf16.mxu0 %v4413_v43  ;;  %v8323_v43 = vld [vmem:[#allocation23_spill] sm:$0xff] }
 0x297   : > { %v4784_v9 = vpop.eup %4783  ;;  %v2636_v41 = vmul.f32 %v2316_v51, %v6851_v32  ;;  %v843_v35 = vadd.f32 %v8320_v3, %v5276_v16  ;;  %4799 = vtanh.f32 %v6940_v37  ;;  %v6964_v51 = vpop.f32.mrb[88].mxu1  ;;  %v6969_v30 = vmul.f32 0.5, %v1054_v0  ;;  %4311 = vmatpush3.bf16.msra.mxu0 %v4414_v36 }
 0x298   : > { %v4786_v31 = vpop.eup %4785  ;;  %v2943_v33 = vadd.f32 %v2942_v58, %v2669_v59  ;;  %v2678_v10 = vmul.f32 %v2358_v15, %v6854_v20  ;;  %v2317_v32 = vadd.f32 1.0, %v4784_v9  ;;  %4801 = vtanh.f32 %v6942_v52  ;;  %v6971_v19 = vpop.f32.mrb[89].mxu1 }
 0x299   : > { %v2829_v3 = vadd.f32 %v2828_v62, %v2636_v41  ;;  %v2359_v53 = vadd.f32 1.0, %v4786_v31  ;;  %v6973_v29 = vpop.f32.mrb[145].mxu0  ;;  %v4788_v58 = vpop.eup %4787  ;;  %4803 = vtanh.f32 %v6952_v39  ;;  %v6977_v59 = vmul.f32 0.5, %v843_v35 }
 0x29a   : > { %v2907_v20 = vadd.f32 %v2906_v2, %v2678_v10  ;;  %v2637_v9 = vmul.f32 %v2317_v32, %v6878_v60  ;;  %v6979_v15 = vpop.f32.mrb[90].mxu1  ;;  %v6981_v62 = vpop.f32.mrb[146].mxu0  ;;  %v2326_v31 = vadd.f32 1.0, %v4788_v58  ;;  %4805 = vtanh.f32 %v6969_v30 }
 0x29b   : > { %8321 = vst [vmem:[#allocation21_spill] sm:$0xff] %v6979_v15  ;;  %8322 = vst [vmem:[#allocation22_spill] sm:$0xff] %v6981_v62  ;;  %v4790_v0 = vpop.eup %4789  ;;  %v2679_v41 = vmul.f32 %v2359_v53, %v6884_v25  ;;  %v1056_v2 = vadd.f32 %v8323_v43, %v5282_v18  ;;  %v6987_v10 = vpop.f32.mrb[91].mxu1  ;;  %4807 = vtanh.f32 %v6977_v59  ;;  %v847_v36 = vadd.f32 %v6597_v40, %v5272_v14 }
 0x29c   : > { %8324 = vst [vmem:[#allocation23_spill] sm:$0xff] %v6987_v10  ;;  %v6989_v60 = vpop.f32.mrb[147].mxu0  ;;  %v2866_v35 = vadd.f32 %v2865_v46, %v2637_v9  ;;  %v2368_v32 = vadd.f32 1.0, %v4790_v0  ;;  %v4792_v62 = vpop.eup %4791  ;;  %v2646_v25 = vmul.f32 %v2326_v31, %v6893_v28  ;;  %v1060_v58 = vadd.f32 %v6599_v38, %v5279_v17 }
 0x29d   : > { %8325 = vst [vmem:[#allocation43_spill] sm:$0xff] %v6989_v60  ;;  %v2944_v15 = vadd.f32 %v2943_v33, %v2679_v41  ;;  %v6995_v53 = vmul.f32 0.5, %v1056_v2  ;;  %v4794_v43 = vpop.eup %4793  ;;  %v2327_v60 = vadd.f32 1.0, %v4792_v62  ;;  %v7000_v46 = vmul.f32 0.5, %v847_v36 }
 0x29e   : > { %v2688_v10 = vmul.f32 %v2368_v32, %v6896_v63  ;;  %v849_v9 = vadd.f32 %v6604_v54, %v5276_v16  ;;  %v2830_v0 = vadd.f32 %v2829_v3, %v2646_v25  ;;  %v2369_v40 = vadd.f32 1.0, %v4794_v43  ;;  %v7011_v63 = vpop.f32.mrb[92].mxu1  ;;  %v7013_v62 = vpop.f32.mrb[148].mxu0  ;;  %v8330_v25 = vld [vmem:[#allocation24_spill] sm:$0xff] }
 0x29f   : > { %4809 = vtanh.f32 %v6995_v53  ;;  %v7005_v33 = vmul.f32 0.5, %v1060_v58  ;;  %v4796_v28 = vpop.eup %4795  ;;  %v2647_v31 = vmul.f32 %v2327_v60, %v6910_v45  ;;  %8326 = vst [vmem:[#allocation44_spill] sm:$0xff] %v7011_v63  ;;  %8327 = vst [vmem:[#allocation45_spill] sm:$0xff] %v7013_v62  ;;  %v1062_v32 = vadd.f32 %v6606_v27, %v5282_v18  ;;  %v7021_v45 = vpop.f32.mrb[149].mxu0 }
 0x2a0   : > { %v2908_v41 = vadd.f32 %v2907_v20, %v2688_v10  ;;  %4811 = vtanh.f32 %v7000_v46  ;;  %v7009_v38 = vmul.f32 0.5, %v849_v9  ;;  %v4798_v2 = vpop.eup %4797  ;;  %v2689_v54 = vmul.f32 %v2369_v40, %v6916_v42  ;;  %v7019_v20 = vpop.f32.mrb[93].mxu1  ;;  %8329 = vst [vmem:[#allocation47_spill] sm:$0xff] %v7021_v45 }
 0x2a1   : > { %v2336_v3 = vadd.f32 1.0, %v4796_v28  ;;  %4813 = vtanh.f32 %v7005_v33  ;;  %8328 = vst [vmem:[#allocation46_spill] sm:$0xff] %v7019_v20  ;;  %v4800_v10 = vpop.eup %4799  ;;  %v2867_v60 = vadd.f32 %v2866_v35, %v2647_v31  ;;  %v2378_v36 = vadd.f32 1.0, %v4798_v2  ;;  %v7026_v43 = vpop.f32.mrb[94].mxu1 }
 0x2a2   : > { %4815 = vtanh.f32 %v7009_v38  ;;  %v851_v58 = vadd.f32 %v8330_v25, %v5272_v14  ;;  %8331 = vst [vmem:[#allocation24_spill] sm:$0xff] %v7026_v43  ;;  %v7028_v42 = vpop.f32.mrb[150].mxu0  ;;  %v4802_v9 = vpop.eup %4801  ;;  %v2945_v40 = vadd.f32 %v2944_v15, %v2689_v54  ;;  %v2337_v28 = vadd.f32 1.0, %v4800_v10  ;;  %v8334_v43 = vld [vmem:[#allocation25_spill] sm:$0xff] }
 0x2a3   : > { %8332 = vst [vmem:[#allocation48_spill] sm:$0xff] %v7028_v42  ;;  %v2656_v27 = vmul.f32 %v2336_v3, %v6936_v4  ;;  %v7031_v20 = vmul.f32 0.5, %v1062_v32  ;;  %v7033_v45 = vpop.f32.mrb[95].mxu1  ;;  %v7035_v35 = vpop.f32.mrb[151].mxu0  ;;  %v2698_v2 = vmul.f32 %v2378_v36, %v6938_v24  ;;  %v2379_v62 = vadd.f32 1.0, %v4802_v9 }
 0x2a4   : > { %8333 = vst [vmem:[#allocation49_spill] sm:$0xff] %v7035_v35  ;;  %v4804_v31 = vpop.eup %4803  ;;  %v7038_v25 = vmul.f32 0.5, %v851_v58  ;;  %v1064_v42 = vadd.f32 %v8334_v43, %v5279_v17  ;;  %v2657_v4 = vmul.f32 %v2337_v28, %v6940_v37  ;;  %v853_v37 = vadd.f32 %v6623_v23, %v5276_v16  ;;  %v8335_v43 = vld [vmem:[#allocation26_spill] sm:$0xff] }
 0x2a5   : > { %v4806_v63 = vpop.eup %4805  ;;  %v2831_v15 = vadd.f32 %v2830_v0, %v2656_v27  ;;  %v2346_v54 = vadd.f32 1.0, %v4804_v31  ;;  %4817 = vtanh.f32 %v7031_v20  ;;  %v2909_v32 = vadd.f32 %v2908_v41, %v2698_v2  ;;  %v4424_v23 = vld [vmem:[%s8247_s3 + $0x208] sm:$0xff]  }
 0x2a6   : > { %v4808_v3 = vpop.eup %4807  ;;  %v2699_v10 = vmul.f32 %v2379_v62, %v6942_v52  ;;  %v2388_v35 = vadd.f32 1.0, %v4806_v63  ;;  %4819 = vtanh.f32 %v7038_v25  ;;  %v2868_v24 = vadd.f32 %v2867_v60, %v2657_v4  ;;  %v7054_v27 = vpop.f32.mrb[96].mxu1 }
 0x2a7   : > { %v2666_v36 = vmul.f32 %v2346_v54, %v6952_v39  ;;  %v2347_v58 = vadd.f32 1.0, %v4808_v3  ;;  %v7047_v9 = vmul.f32 0.5, %v1064_v42  ;;  %v1066_v41 = vadd.f32 %v8335_v43, %v5282_v18  ;;  %v7056_v52 = vpop.f32.mrb[152].mxu0  ;;  %v4423_v18 = vld [vmem:[%s8247_s3 + $0x248] sm:$0xff]  }
 0x2a8   : > { %v2946_v17 = vadd.f32 %v2945_v40, %v2699_v10  ;;  %v2708_v0 = vmul.f32 %v2388_v35, %v6969_v30  ;;  %v857_v60 = vadd.f32 %v6648_v55, %v5272_v14  ;;  %v7062_v30 = vpop.f32.mrb[97].mxu1  ;;  %v7064_v42 = vpop.f32.mrb[153].mxu0  ;;  %v7072_v35 = vmul.f32 0.5, %v853_v37  ;;  %v8337_v10 = vld [vmem:[#allocation7_spill] sm:$0xff]  ;;  %4312 = vmatprep.subr.bf16.mxu0 %v4423_v18 }
 0x2a9   : > { %v4810_v63 = vpop.eup %4809  ;;  %v2832_v62 = vadd.f32 %v2831_v15, %v2666_v36  ;;  %v2667_v39 = vmul.f32 %v2347_v58, %v6977_v59  ;;  %4821 = vtanh.f32 %v7047_v9  ;;  %v7074_v31 = vmul.f32 0.5, %v1066_v41  ;;  %v7076_v55 = vpop.f32.mrb[98].mxu1  ;;  %4313 = vmatpush3.bf16.msra.mxu0 %v4424_v23 }
 0x2aa   : > { %v4812_v40 = vpop.eup %4811  ;;  %v2910_v28 = vadd.f32 %v2909_v32, %v2708_v0  ;;  %v2389_v59 = vadd.f32 1.0, %v4810_v63  ;;  %v7078_v2 = vpop.f32.mrb[154].mxu0  ;;  %v7080_v3 = vmul.f32 0.5, %v857_v60  ;;  %v1296_v36 = vadd.f32 %v6650_v50, %v8337_v10 }
 0x2ab   : > { %8336 = vst [vmem:[#allocation25_spill] sm:$0xff] %v7078_v2  ;;  %v4814_v15 = vpop.eup %4813  ;;  %v2869_v4 = vadd.f32 %v2868_v24, %v2667_v39  ;;  %v2356_v54 = vadd.f32 1.0, %v4812_v40  ;;  %v7084_v58 = vpop.f32.mrb[99].mxu1  ;;  %4823 = vtanh.f32 %v7072_v35  ;;  %v859_v24 = vadd.f32 %v6655_v47, %v5276_v16  ;;  %v8340_v47 = vld [vmem:[#allocation8_spill] sm:$0xff] }
 0x2ac   : > { %8338 = vst [vmem:[#allocation26_spill] sm:$0xff] %v7084_v58  ;;  %v7086_v32 = vpop.f32.mrb[155].mxu0  ;;  %v4816_v0 = vpop.eup %4815  ;;  %v2709_v37 = vmul.f32 %v2389_v59, %v6995_v53  ;;  %v2398_v43 = vadd.f32 1.0, %v4814_v15  ;;  %4825 = vtanh.f32 %v7074_v31  ;;  %v7094_v50 = vmul.f32 0.5, %v1296_v36 }
 0x2ad   : > { %8339 = vst [vmem:[#allocation7_spill] sm:$0xff] %v7086_v32  ;;  %v2676_v41 = vmul.f32 %v2356_v54, %v7000_v46  ;;  %v2357_v63 = vadd.f32 1.0, %v4816_v0  ;;  %4827 = vtanh.f32 %v7080_v3  ;;  %v7098_v53 = vmul.f32 0.5, %v859_v24 }
 0x2ae   : > { %v2947_v39 = vadd.f32 %v2946_v17, %v2709_v37  ;;  %v2718_v60 = vmul.f32 %v2398_v43, %v7005_v33  ;;  %4829 = vtanh.f32 %v7094_v50  ;;  %v1298_v46 = vadd.f32 %v6657_v57, %v8340_v47  ;;  %v8341_v33 = vld [vmem:[#allocation9_spill] sm:$0xff]  ;;  %v7107_v36 = vpop.f32.mrb[100].mxu1  ;;  %v7109_v0 = vpop.f32.mrb[156].mxu0  ;;  %v8344_v43 = vld [vmem:[#allocation10_spill] sm:$0xff] }
 0x2af   : > { %v4818_v18 = vpop.eup %4817  ;;  %v2833_v40 = vadd.f32 %v2832_v62, %v2676_v41  ;;  %v2677_v59 = vmul.f32 %v2357_v63, %v7009_v38  ;;  %4831 = vtanh.f32 %v7098_v53  ;;  %v861_v17 = vadd.f32 %v8341_v33, %v5272_v14  ;;  %8342 = vst [vmem:[#allocation8_spill] sm:$0xff] %v7107_v36  ;;  %8343 = vst [vmem:[#allocation9_spill] sm:$0xff] %v7109_v0  ;;  %v7115_v57 = vpop.f32.mrb[101].mxu1  ;;  %v8348_v33 = vld [vmem:[#allocation27_spill] sm:$0xff] }
 0x2b0   : > { %v4820_v23 = vpop.eup %4819  ;;  %v2911_v15 = vadd.f32 %v2910_v28, %v2718_v60  ;;  %v2399_v54 = vadd.f32 1.0, %v4818_v18  ;;  %v7111_v38 = vmul.f32 0.5, %v1298_v46  ;;  %v1300_v24 = vadd.f32 %v8344_v43, %v8337_v10  ;;  %8345 = vst [vmem:[#allocation10_spill] sm:$0xff] %v7115_v57  ;;  %v7117_v28 = vpop.f32.mrb[157].mxu0  ;;  %v8347_v60 = vld [vmem:[#allocation11_spill] sm:$0xff]  ;;  %v8349_v43 = vld [vmem:[#allocation12_spill] sm:$0xff] }
 0x2b1   : > { %v2870_v62 = vadd.f32 %v2869_v4, %v2677_v59  ;;  %v2366_v37 = vadd.f32 1.0, %v4820_v23  ;;  %8346 = vst [vmem:[#allocation50_spill] sm:$0xff] %v7117_v28  ;;  %v7120_v63 = vmul.f32 0.5, %v861_v17  ;;  %v863_v18 = vadd.f32 %v8347_v60, %v5276_v16  ;;  %v7135_v17 = vpop.f32.mrb[102].mxu1 }
 0x2b2   : > { %v2719_v41 = vmul.f32 %v2399_v54, %v7031_v20  ;;  %v1302_v4 = vadd.f32 %v8348_v33, %v8340_v47  ;;  %4833 = vtanh.f32 %v7111_v38  ;;  %v7128_v23 = vmul.f32 0.5, %v1300_v24  ;;  %8350 = vst [vmem:[#allocation11_spill] sm:$0xff] %v7135_v17  ;;  %v7163_v58 = vpop.f32.mrb[103].mxu1 }
 0x2b3   : > { %v4822_v59 = vpop.eup %4821  ;;  %v2686_v46 = vmul.f32 %v2366_v37, %v7038_v25  ;;  %v867_v28 = vadd.f32 %v8349_v43, %v5272_v14  ;;  %4835 = vtanh.f32 %v7120_v63  ;;  %v7133_v54 = vmul.f32 0.5, %v863_v18  ;;  %v7142_v37 = vpop.f32.mrb[158].mxu0  ;;  %v8353_v18 = vld [vmem:[#allocation28_spill] sm:$0xff] }
 0x2b4   : > { %v2948_v57 = vadd.f32 %v2947_v39, %v2719_v41  ;;  %v2408_v20 = vadd.f32 1.0, %v4822_v59  ;;  %4837 = vtanh.f32 %v7128_v23  ;;  %v7138_v33 = vmul.f32 0.5, %v1302_v4  ;;  %8351 = vst [vmem:[#allocation27_spill] sm:$0xff] %v7142_v37  ;;  %v8352_v39 = vld [vmem:[#allocation13_spill] sm:$0xff] }
 0x2b5   : > { %v2834_v60 = vadd.f32 %v2833_v40, %v2686_v46  ;;  %v7140_v25 = vmul.f32 0.5, %v867_v28  ;;  %v4824_v24 = vpop.eup %4823  ;;  %4839 = vtanh.f32 %v7133_v54  ;;  %v1306_v41 = vadd.f32 %v8352_v39, %v8337_v10  ;;  %v8354_v28 = vld [vmem:[#allocation29_spill] sm:$0xff] }
 0x2b6   : > { %v2728_v43 = vmul.f32 %v2408_v20, %v7047_v9  ;;  %v869_v59 = vadd.f32 %v8353_v18, %v5276_v16  ;;  %v4826_v40 = vpop.eup %4825  ;;  %v2367_v46 = vadd.f32 1.0, %v4824_v24  ;;  %4841 = vtanh.f32 %v7138_v33 }
 0x2b7   : > { %v1308_v4 = vadd.f32 %v8354_v28, %v8340_v47  ;;  %v871_v37 = vadd.f32 %v6726_v49, %v5272_v14  ;;  %v4828_v17 = vpop.eup %4827  ;;  %v2409_v20 = vadd.f32 1.0, %v4826_v40  ;;  %4843 = vtanh.f32 %v7140_v25 }
 0x2b8   : > { %v2912_v9 = vadd.f32 %v2911_v15, %v2728_v43  ;;  %v7156_v0 = vmul.f32 0.5, %v1306_v41  ;;  %v4830_v39 = vpop.eup %4829  ;;  %v2687_v18 = vmul.f32 %v2367_v46, %v7072_v35  ;;  %v2376_v36 = vadd.f32 1.0, %v4828_v17  ;;  %v7167_v15 = vpop.f32.mrb[159].mxu0 }
 0x2b9   : > { %v7159_v24 = vmul.f32 0.5, %v869_v59  ;;  %v7161_v32 = vmul.f32 0.5, %v1308_v4  ;;  %v4832_v28 = vpop.eup %4831  ;;  %v2729_v14 = vmul.f32 %v2409_v20, %v7074_v31  ;;  %v2102_v49 = vadd.f32 1.0, %v4830_v39  ;;  %v7171_v17 = vpop.f32.mrb[104].mxu1 }
 0x2ba   : > { %v2913_v2 = vrot.slane %v2912_v9, 4  ;;  %4845 = vtanh.f32 %v7156_v0  ;;  %v2871_v43 = vadd.f32 %v2870_v62, %v2687_v18  ;;  %v2696_v41 = vmul.f32 %v2376_v36, %v7080_v3  ;;  %v7175_v31 = vpop.f32.mrb[160].mxu0  ;;  %v7182_v36 = vpop.f32.mrb[105].mxu1 }
 0x2bb   : > { %v2377_v35 = vadd.f32 1.0, %v4832_v28  ;;  %4847 = vtanh.f32 %v7159_v24  ;;  %v2949_v40 = vadd.f32 %v2948_v57, %v2729_v14  ;;  %v2422_v46 = vmul.f32 %v2102_v49, %v7094_v50  ;;  %8355 = vst [vmem:[#allocation12_spill] sm:$0xff] %v7175_v31  ;;  %8356 = vst [vmem:[#allocation13_spill] sm:$0xff] %v7182_v36  ;;  %v8357_v50 = vld [vmem:[#allocation14_spill] sm:$0xff]  ;;  %v7186_v14 = vpop.f32.mrb[161].mxu0 }
 0x2bc   : > { %v2914_v59 = vadd.f32 %v2913_v2, %v2912_v9  ;;  %4849 = vtanh.f32 %v7161_v32  ;;  %v4834_v4 = vpop.eup %4833  ;;  %v2835_v20 = vadd.f32 %v2834_v60, %v2696_v41  ;;  %v7178_v62 = vmul.f32 0.5, %v871_v37  ;;  %8358 = vst [vmem:[#allocation28_spill] sm:$0xff] %v7186_v14  ;;  %v7191_v37 = vpop.f32.mrb[106].mxu1 }
 0x2bd   : > { %v2697_v39 = vmul.f32 %v2377_v35, %v7098_v53  ;;  %v1310_v3 = vadd.f32 %v6728_v11, %v8337_v10  ;;  %v4836_v18 = vpop.eup %4835  ;;  %v2950_v57 = vrot.slane %v2949_v40, 4  ;;  %v2103_v9 = vadd.f32 1.0, %v4834_v4  ;;  %8359 = vst [vmem:[#allocation29_spill] sm:$0xff] %v7191_v37 }
 0x2be   : > { %v2915_v2 = vrot.slane %v2914_v59, 2  ;;  %v873_v28 = vadd.f32 %v8357_v50, %v5276_v16  ;;  %v4838_v49 = vpop.eup %4837  ;;  %v2386_v41 = vadd.f32 1.0, %v4836_v18  ;;  %4851 = vtanh.f32 %v7178_v62 }
 0x2bf   : > { %v2872_v60 = vadd.f32 %v2871_v43, %v2697_v39  ;;  %v7189_v53 = vmul.f32 0.5, %v1310_v3  ;;  %v4840_v11 = vpop.eup %4839  ;;  %v7195_v36 = vadd.f32 %v2950_v57, %v2949_v40  ;;  %v2423_v4 = vmul.f32 %v2103_v9, %v7111_v38  ;;  %v7202_v39 = vpop.f32.mrb[162].mxu0  ;;  %v8362_v40 = vld [vmem:[#allocation30_spill] sm:$0xff]  ;;  %v8363_v57 = vld [vmem:[#allocation5_spill] sm:$0xff]  ;;  %v8364_v38 = vld [vmem:[#allocation15_spill] sm:$0xff] }
 0x2c0   : > { %v7193_v35 = vadd.f32 %v2915_v2, %v2914_v59  ;;  %v2112_v31 = vadd.f32 1.0, %v4838_v49  ;;  %v4842_v16 = vpop.eup %4841  ;;  %v2706_v50 = vmul.f32 %v2386_v41, %v7120_v63  ;;  %v2387_v14 = vadd.f32 1.0, %v4840_v11  ;;  %8361 = vst [vmem:[#allocation51_spill] sm:$0xff] %v7202_v39  ;;  %v7209_v49 = vpop.f32.mrb[107].mxu1 }
 0x2c1   : > { %4853 = vtanh.f32 %v7189_v53  ;;  %v7200_v43 = vmul.f32 0.5, %v873_v28  ;;  %v4844_v3 = vpop.eup %4843  ;;  %v2113_v59 = vadd.f32 1.0, %v4842_v16  ;;  %v1312_v2 = vadd.f32 %v8362_v40, %v8340_v47  ;;  %8365 = vst [vmem:[#allocation30_spill] sm:$0xff] %v7209_v49  ;;  %v7213_v28 = vpop.f32.mrb[163].mxu0  ;;  %v4431_v40 = vld [vmem:[%s8247_s3 + $0x250] sm:$0xff]   ;;  %v8370_v49 = vld [vmem:[#allocation17_spill] sm:$0xff] }
 0x2c2   : > { %8360 = vst [vmem:[#allocation14_spill] sm:$0xff] %v7193_v35  ;;  %v2432_v18 = vmul.f32 %v2112_v31, %v7128_v23  ;;  %v1103_v9 = vadd.f32 %v8364_v38, %v8363_v57  ;;  %v2836_v63 = vadd.f32 %v2835_v20, %v2706_v50  ;;  %v2707_v41 = vmul.f32 %v2387_v14, %v7133_v54  ;;  %v4432_v54 = vld [vmem:[%s8247_s3 + $0x210] sm:$0xff]   ;;  %v7226_v20 = vpop.f32.mrb[108].mxu1 }
 0x2c3   : > { %v2396_v11 = vadd.f32 1.0, %v4844_v3  ;;  %4855 = vtanh.f32 %v7200_v43  ;;  %8366 = vst [vmem:[#allocation5_spill] sm:$0xff] %v7213_v28  ;;  %v2433_v23 = vmul.f32 %v2113_v59, %v7138_v33  ;;  %v7216_v31 = vmul.f32 0.5, %v1312_v2  ;;  %8367 = vst [vmem:[#allocation15_spill] sm:$0xff] %v7226_v20  ;;  %v8368_v33 = vld [vmem:[#allocation16_spill] sm:$0xff]  ;;  %v7231_v59 = vpop.f32.mrb[164].mxu0  ;;  %4314 = vmatprep.subr.bf16.mxu0 %v4431_v40 }
 0x2c4   : > { %v4846_v39 = vpop.eup %4845  ;;  %v3030_v37 = vadd.f32 %v2432_v18, %v2422_v46  ;;  %v7218_v16 = vmul.f32 0.5, %v1103_v9  ;;  %v2873_v50 = vadd.f32 %v2872_v60, %v2707_v41  ;;  %v1316_v18 = vadd.f32 %v8368_v33, %v8337_v10  ;;  %v8369_v28 = vld [vmem:[#allocation6_spill] sm:$0xff]  ;;  %4315 = vmatpush3.bf16.msra.mxu0 %v4432_v54 }
 0x2c5   : > { %v4848_v14 = vpop.eup %4847  ;;  %v2716_v46 = vmul.f32 %v2396_v11, %v7140_v25  ;;  %v2122_v3 = vadd.f32 1.0, %v4846_v39  ;;  %v3067_v38 = vadd.f32 %v2433_v23, %v2423_v4  ;;  %4857 = vtanh.f32 %v7216_v31  ;;  %v7238_v25 = vpop.f32.mrb[109].mxu1  ;;  %v8371_v23 = vld [vmem:[#allocation31_spill] sm:$0xff] }
 0x2c6   : > { %v4850_v2 = vpop.eup %4849  ;;  %v2397_v9 = vadd.f32 1.0, %v4848_v14  ;;  %v1105_v35 = vadd.f32 %v8370_v49, %v8369_v28  ;;  %4859 = vtanh.f32 %v7218_v16  ;;  %v7241_v11 = vmul.f32 0.5, %v1316_v18  ;;  %v7247_v49 = vpop.f32.mrb[165].mxu0 }
 0x2c7   : > { %v2837_v20 = vadd.f32 %v2836_v63, %v2716_v46  ;;  %v2442_v60 = vmul.f32 %v2122_v3, %v7156_v0  ;;  %v2123_v41 = vadd.f32 1.0, %v4850_v2  ;;  %v1318_v14 = vadd.f32 %v8371_v23, %v8340_v47  ;;  %v8372_v46 = vld [vmem:[#allocation32_spill] sm:$0xff] }
 0x2c8   : > { %v2717_v39 = vmul.f32 %v2397_v9, %v7159_v24  ;;  %v7243_v4 = vmul.f32 0.5, %v1105_v35  ;;  %v4852_v63 = vpop.eup %4851  ;;  %v1107_v54 = vadd.f32 %v6780_v13, %v8363_v57  ;;  %v1320_v3 = vadd.f32 %v8372_v46, %v8337_v10  ;;  %v7254_v24 = vpop.f32.mrb[110].mxu1 }
 0x2c9   : > { %v3031_v40 = vadd.f32 %v3030_v37, %v2442_v60  ;;  %v2443_v0 = vmul.f32 %v2123_v41, %v7161_v32  ;;  %8373 = vst [vmem:[#allocation16_spill] sm:$0xff] %v7254_v24  ;;  %v2406_v35 = vadd.f32 1.0, %v4852_v63  ;;  %4861 = vtanh.f32 %v7241_v11  ;;  %v7268_v41 = vpop.f32.mrb[166].mxu0 }
 0x2ca   : > { %v2874_v33 = vadd.f32 %v2873_v50, %v2717_v39  ;;  %v7257_v18 = vmul.f32 0.5, %v1318_v14  ;;  %4863 = vtanh.f32 %v7243_v4  ;;  %v7260_v37 = vmul.f32 0.5, %v1107_v54  ;;  %8374 = vst [vmem:[#allocation6_spill] sm:$0xff] %v7268_v41 }
 0x2cb   : > { %v4854_v2 = vpop.eup %4853  ;;  %v3068_v9 = vadd.f32 %v3067_v38, %v2443_v0  ;;  %v7262_v32 = vmul.f32 0.5, %v1320_v3  ;;  %v2726_v13 = vmul.f32 %v2406_v35, %v7178_v62  ;;  %v1109_v50 = vadd.f32 %v6788_v21, %v8369_v28 }
 0x2cc   : > { %v2132_v60 = vadd.f32 1.0, %v4854_v2  ;;  %4865 = vtanh.f32 %v7257_v18  ;;  %v1322_v38 = vadd.f32 %v6790_v22, %v8340_v47  ;;  %v1113_v23 = vadd.f32 %v6810_v34, %v8363_v57  ;;  %v7287_v22 = vpop.f32.mrb[111].mxu1 }
 0x2cd   : > { %v4856_v39 = vpop.eup %4855  ;;  %4867 = vtanh.f32 %v7260_v37  ;;  %v1326_v62 = vadd.f32 %v6812_v48, %v8337_v10  ;;  %v2838_v14 = vadd.f32 %v2837_v20, %v2726_v13  ;;  %v7279_v21 = vmul.f32 0.5, %v1109_v50  ;;  %8375 = vst [vmem:[#allocation17_spill] sm:$0xff] %v7287_v22  ;;  %v7292_v13 = vpop.f32.mrb[167].mxu0 }
 0x2ce   : > { %v2452_v63 = vmul.f32 %v2132_v60, %v7189_v53  ;;  %v2407_v0 = vadd.f32 1.0, %v4856_v39  ;;  %4869 = vtanh.f32 %v7262_v32  ;;  %v7281_v54 = vmul.f32 0.5, %v1322_v38  ;;  %v8376_v53 = vld [vmem:[#allocation33_spill] sm:$0xff]  ;;  %8377 = vst [vmem:[#allocation31_spill] sm:$0xff] %v7292_v13  ;;  %v8378_v39 = vld [vmem:[#allocation34_spill] sm:$0xff] }
 0x2cf   : > { %v7283_v46 = vmul.f32 0.5, %v1113_v23  ;;  %v7285_v3 = vmul.f32 0.5, %v1326_v62  ;;  %v4858_v34 = vpop.eup %4857  ;;  %v2839_v35 = vrot.slane %v2838_v14, 4  ;;  %v1115_v20 = vadd.f32 %v8376_v53, %v8369_v28 }
 0x2d0   : > { %v3032_v2 = vadd.f32 %v3031_v40, %v2452_v63  ;;  %v2727_v48 = vmul.f32 %v2407_v0, %v7200_v43  ;;  %v4860_v60 = vpop.eup %4859  ;;  %v2133_v50 = vadd.f32 1.0, %v4858_v34  ;;  %4871 = vtanh.f32 %v7279_v21  ;;  %v7306_v34 = vpop.f32.mrb[112].mxu1 }
 0x2d1   : > { %v1328_v38 = vadd.f32 %v8378_v39, %v8340_v47  ;;  %v1117_v23 = vadd.f32 %v6826_v8, %v8363_v57  ;;  %v2840_v62 = vadd.f32 %v2839_v35, %v2838_v14  ;;  %v2100_v40 = vadd.f32 1.0, %v4860_v60  ;;  %8379 = vst [vmem:[#allocation32_spill] sm:$0xff] %v7306_v34 }
 0x2d2   : > { %v2875_v22 = vadd.f32 %v2874_v33, %v2727_v48  ;;  %4873 = vtanh.f32 %v7281_v54  ;;  %v2453_v43 = vmul.f32 %v2133_v50, %v7216_v31  ;;  %v7302_v63 = vmul.f32 0.5, %v1115_v20  ;;  %v7310_v33 = vpop.f32.mrb[168].mxu0 }
 0x2d3   : > { %4875 = vtanh.f32 %v7283_v46  ;;  %v7304_v0 = vmul.f32 0.5, %v1328_v38  ;;  %v4862_v53 = vpop.eup %4861  ;;  %v2841_v39 = vrot.slane %v2840_v62, 2  ;;  %v2420_v8 = vmul.f32 %v2100_v40, %v7218_v16  ;;  %8380 = vst [vmem:[#allocation33_spill] sm:$0xff] %v7310_v33  ;;  %v7331_v41 = vpop.f32.mrb[169].mxu0 }
 0x2d4   : > { %v2876_v13 = vrot.slane %v2875_v22, 4  ;;  %4877 = vtanh.f32 %v7285_v3  ;;  %v4864_v14 = vpop.eup %4863  ;;  %v3069_v35 = vadd.f32 %v3068_v9, %v2453_v43  ;;  %v2142_v31 = vadd.f32 1.0, %v4862_v53  ;;  %v8381_v9 = vld [vmem:[#allocation35_spill] sm:$0xff]  ;;  %v7324_v53 = vpop.f32.mrb[113].mxu1 }
 0x2d5   : > { %4879 = vtanh.f32 %v7302_v63  ;;  %v7313_v48 = vmul.f32 0.5, %v1117_v23  ;;  %v7315_v60 = vadd.f32 %v2841_v39, %v2840_v62  ;;  %v2101_v38 = vadd.f32 1.0, %v4864_v14  ;;  %8382 = vst [vmem:[#allocation34_spill] sm:$0xff] %v7324_v53  ;;  %v8384_v14 = vld [vmem:[#allocation37_spill] sm:$0xff] }
 0x2d6   : > { %v4866_v20 = vpop.eup %4865  ;;  %v7317_v50 = vadd.f32 %v2876_v13, %v2875_v22  ;;  %4881 = vtanh.f32 %v7304_v0  ;;  %v2462_v40 = vmul.f32 %v2142_v31, %v7241_v11  ;;  %v1330_v43 = vadd.f32 %v8381_v9, %v8337_v10  ;;  %v8383_v22 = vld [vmem:[#allocation36_spill] sm:$0xff]  ;;  %v7336_v9 = vpop.f32.mrb[114].mxu1 }
 0x2d7   : > { %v4868_v16 = vpop.eup %4867  ;;  %v2143_v34 = vadd.f32 1.0, %v4866_v20  ;;  %4883 = vtanh.f32 %v7313_v48  ;;  %v2421_v62 = vmul.f32 %v2101_v38, %v7243_v4  ;;  %v1119_v13 = vadd.f32 %v8383_v22, %v8369_v28  ;;  %8385 = vst [vmem:[#allocation35_spill] sm:$0xff] %v7336_v9  ;;  %v7345_v22 = vpop.f32.mrb[170].mxu0 }
 0x2d8   : > { %v4870_v23 = vpop.eup %4869  ;;  %v2110_v39 = vadd.f32 1.0, %v4868_v16  ;;  %v1332_v33 = vadd.f32 %v8384_v14, %v8340_v47  ;;  %v3033_v11 = vadd.f32 %v3032_v2, %v2462_v40  ;;  %v7334_v24 = vmul.f32 0.5, %v1330_v43  ;;  %8386 = vst [vmem:[#allocation36_spill] sm:$0xff] %v7345_v22  ;;  %v7351_v40 = vpop.f32.mrb[115].mxu1 }
 0x2d9   : > { %v2463_v31 = vmul.f32 %v2143_v34, %v7257_v18  ;;  %v2152_v20 = vadd.f32 1.0, %v4870_v23  ;;  %v7339_v4 = vmul.f32 0.5, %v1119_v13  ;;  %v1123_v16 = vadd.f32 %v6856_v61, %v8363_v57  ;;  %8387 = vst [vmem:[#allocation37_spill] sm:$0xff] %v7351_v40 }
 0x2da   : > { %v2430_v53 = vmul.f32 %v2110_v39, %v7260_v37  ;;  %v7341_v38 = vmul.f32 0.5, %v1332_v33  ;;  %v4872_v14 = vpop.eup %4871  ;;  %4885 = vtanh.f32 %v7334_v24  ;;  %v1336_v34 = vadd.f32 %v6858_v26, %v8337_v10 }
 0x2db   : > { %v3070_v2 = vadd.f32 %v3069_v35, %v2463_v31  ;;  %v2472_v18 = vmul.f32 %v2152_v20, %v7262_v32  ;;  %v2111_v33 = vadd.f32 1.0, %v4872_v14  ;;  %4887 = vtanh.f32 %v7339_v4  ;;  %v7359_v35 = vpop.f32.mrb[171].mxu0 }
 0x2dc   : > { %v4874_v37 = vpop.eup %4873  ;;  %v2956_v43 = vadd.f32 %v2430_v53, %v2420_v8  ;;  %v7354_v23 = vmul.f32 0.5, %v1123_v16  ;;  %4889 = vtanh.f32 %v7341_v38  ;;  %v7357_v32 = vmul.f32 0.5, %v1336_v34  ;;  %8388 = vst [vmem:[#allocation52_spill] sm:$0xff] %v7359_v35  ;;  %v4433_v53 = vld [vmem:[%s8247_s3 + $0x258] sm:$0xff]   ;;  %v7371_v16 = vpop.f32.mrb[116].mxu1 }
 0x2dd   : > { %v4876_v61 = vpop.eup %4875  ;;  %v3034_v39 = vadd.f32 %v3033_v11, %v2472_v18  ;;  %v2153_v13 = vadd.f32 1.0, %v4874_v37  ;;  %v2431_v26 = vmul.f32 %v2111_v33, %v7279_v21  ;;  %v1125_v8 = vadd.f32 %v6864_v6, %v8369_v28  ;;  %v4434_v11 = vld [vmem:[%s8247_s3 + $0x218] sm:$0xff]   ;;  %8389 = vst [vmem:[#allocation53_spill] sm:$0xff] %v7371_v16  ;;  %v7377_v6 = vpop.f32.mrb[172].mxu0  ;;  %4316 = vmatprep.subr.bf16.mxu0 %v4433_v53 }
 0x2de   : > { %v4878_v31 = vpop.eup %4877  ;;  %v2120_v20 = vadd.f32 1.0, %v4876_v61  ;;  %4891 = vtanh.f32 %v7354_v23  ;;  %v1338_v34 = vadd.f32 %v6866_v7, %v8340_v47  ;;  %8390 = vst [vmem:[#allocation54_spill] sm:$0xff] %v7377_v6  ;;  %v7382_v16 = vpop.f32.mrb[117].mxu1  ;;  %4317 = vmatpush3.bf16.msra.mxu0 %v4434_v11 }
 0x2df   : > { %v4880_v14 = vpop.eup %4879  ;;  %v2473_v18 = vmul.f32 %v2153_v13, %v7281_v54  ;;  %v2162_v21 = vadd.f32 1.0, %v4878_v31  ;;  %4893 = vtanh.f32 %v7357_v32  ;;  %v2993_v33 = vadd.f32 %v2431_v26, %v2421_v62  ;;  %v7387_v7 = vpop.f32.mrb[173].mxu0 }
 0x2e0   : > { %v4882_v37 = vpop.eup %4881  ;;  %v2440_v61 = vmul.f32 %v2120_v20, %v7283_v46  ;;  %v2121_v35 = vadd.f32 1.0, %v4880_v14  ;;  %v7380_v40 = vmul.f32 0.5, %v1125_v8  ;;  %v7385_v9 = vmul.f32 0.5, %v1338_v34  ;;  %v7391_v26 = vpop.f32.mrb[118].mxu1 }
 0x2e1   : > { %v4884_v22 = vpop.eup %4883  ;;  %v3071_v54 = vadd.f32 %v3070_v2, %v2473_v18  ;;  %v2482_v13 = vmul.f32 %v2162_v21, %v7285_v3  ;;  %v2163_v31 = vadd.f32 1.0, %v4882_v37  ;;  %v1127_v3 = vadd.f32 %v6872_v1, %v8363_v57  ;;  %v7397_v2 = vpop.f32.mrb[174].mxu0  ;;  %v8391_v1 = vld [vmem:[#allocation18_spill] sm:$0xff] }
 0x2e2   : > { %v2957_v6 = vadd.f32 %v2956_v43, %v2440_v61  ;;  %v2441_v62 = vmul.f32 %v2121_v35, %v7302_v63  ;;  %v2130_v46 = vadd.f32 1.0, %v4884_v22  ;;  %4895 = vtanh.f32 %v7380_v40  ;;  %v7410_v18 = vpop.f32.mrb[119].mxu1 }
 0x2e3   : > { %v3035_v20 = vadd.f32 %v3034_v39, %v2482_v13  ;;  %v2483_v8 = vmul.f32 %v2163_v31, %v7304_v0  ;;  %4897 = vtanh.f32 %v7385_v9  ;;  %v1340_v63 = vadd.f32 %v6874_v44, %v8337_v10  ;;  %v7423_v13 = vpop.f32.mrb[120].mxu1 }
 0x2e4   : > { %v2994_v53 = vadd.f32 %v2993_v33, %v2441_v62  ;;  %v2450_v43 = vmul.f32 %v2130_v46, %v7313_v48  ;;  %v1129_v22 = vadd.f32 %v6880_v56, %v8369_v28  ;;  %v4886_v35 = vpop.eup %4885  ;;  %v7404_v11 = vmul.f32 0.5, %v1127_v3  ;;  %v7416_v56 = vpop.f32.mrb[175].mxu0  ;;  %v8392_v46 = vld [vmem:[#allocation38_spill] sm:$0xff] }
 0x2e5   : > { %v3072_v39 = vadd.f32 %v3071_v54, %v2483_v8  ;;  %v1342_v0 = vadd.f32 %v6882_v12, %v8340_v47  ;;  %v1133_v14 = vadd.f32 %v8391_v1, %v8363_v57  ;;  %v4888_v21 = vpop.eup %4887  ;;  %v2172_v34 = vadd.f32 1.0, %v4886_v35 }
 0x2e6   : > { %v2958_v48 = vadd.f32 %v2957_v6, %v2450_v43  ;;  %v7412_v37 = vmul.f32 0.5, %v1340_v63  ;;  %v7414_v44 = vmul.f32 0.5, %v1129_v22  ;;  %v4890_v33 = vpop.eup %4889  ;;  %v2131_v61 = vadd.f32 1.0, %v4888_v21  ;;  %v8393_v22 = vld [vmem:[#allocation39_spill] sm:$0xff] }
 0x2e7   : > { %4899 = vtanh.f32 %v7404_v11  ;;  %v7419_v54 = vmul.f32 0.5, %v1342_v0  ;;  %v7421_v12 = vmul.f32 0.5, %v1133_v14  ;;  %v2492_v6 = vmul.f32 %v2172_v34, %v7334_v24  ;;  %v7433_v0 = vpop.f32.mrb[176].mxu0 }
 0x2e8   : > { %v4892_v31 = vpop.eup %4891  ;;  %v2173_v62 = vadd.f32 1.0, %v4890_v33  ;;  %4901 = vtanh.f32 %v7412_v37  ;;  %v1346_v8 = vadd.f32 %v8392_v46, %v8337_v10  ;;  %v2451_v43 = vmul.f32 %v2131_v61, %v7339_v4 }
 0x2e9   : > { %v4894_v3 = vpop.eup %4893  ;;  %v2140_v63 = vadd.f32 1.0, %v4892_v31  ;;  %4903 = vtanh.f32 %v7414_v44  ;;  %v1135_v35 = vadd.f32 %v8393_v22, %v8369_v28  ;;  %v3036_v1 = vadd.f32 %v3035_v20, %v2492_v6  ;;  %v8394_v20 = vld [vmem:[#allocation40_spill] sm:$0xff] }
 0x2ea   : > { %v2493_v24 = vmul.f32 %v2173_v62, %v7341_v38  ;;  %v2182_v14 = vadd.f32 1.0, %v4894_v3  ;;  %4905 = vtanh.f32 %v7419_v54  ;;  %v2995_v21 = vadd.f32 %v2994_v53, %v2451_v43  ;;  %v7446_v38 = vpop.f32.mrb[121].mxu1  ;;  %v7451_v43 = vpop.f32.mrb[177].mxu0 }
 0x2eb   : > { %v2460_v34 = vmul.f32 %v2140_v63, %v7354_v23  ;;  %4907 = vtanh.f32 %v7421_v12  ;;  %v7439_v4 = vmul.f32 0.5, %v1346_v8  ;;  %v7442_v46 = vmul.f32 0.5, %v1135_v35  ;;  %v8395_v23 = vld [vmem:[#allocation41_spill] sm:$0xff]  ;;  %8396 = vst [vmem:[#allocation18_spill] sm:$0xff] %v7451_v43 }
 0x2ec   : > { %v4896_v33 = vpop.eup %4895  ;;  %v3073_v61 = vadd.f32 %v3072_v39, %v2493_v24  ;;  %v2502_v31 = vmul.f32 %v2182_v14, %v7357_v32  ;;  %v1348_v6 = vadd.f32 %v8394_v20, %v8340_v47  ;;  %v1137_v8 = vadd.f32 %v8395_v23, %v8363_v57  ;;  %v8398_v14 = vld [vmem:[#allocation19_spill] sm:$0xff] }
 0x2ed   : > { %v4898_v62 = vpop.eup %4897  ;;  %v2959_v3 = vadd.f32 %v2958_v48, %v2460_v34  ;;  %v2141_v53 = vadd.f32 1.0, %v4896_v33  ;;  %4909 = vtanh.f32 %v7439_v4  ;;  %v8397_v48 = vld [vmem:[#allocation42_spill] sm:$0xff]  ;;  %v1139_v34 = vadd.f32 %v8398_v14, %v8369_v28 }
 0x2ee   : > { %v3037_v39 = vadd.f32 %v3036_v1, %v2502_v31  ;;  %v2183_v63 = vadd.f32 1.0, %v4898_v62  ;;  %4911 = vtanh.f32 %v7442_v46  ;;  %v7454_v32 = vmul.f32 0.5, %v1348_v6  ;;  %v8399_v1 = vld [vmem:[#allocation20_spill] sm:$0xff]  ;;  %v7469_v6 = vpop.f32.mrb[122].mxu1 }
 0x2ef   : > { %v2461_v22 = vmul.f32 %v2141_v53, %v7380_v40  ;;  %v7457_v35 = vmul.f32 0.5, %v1137_v8  ;;  %v1350_v24 = vadd.f32 %v8397_v48, %v8337_v10  ;;  %v1352_v31 = vadd.f32 %v8399_v1, %v8340_v47 }
 0x2f0   : > { %v2503_v33 = vmul.f32 %v2183_v63, %v7385_v9  ;;  %4913 = vtanh.f32 %v7454_v32  ;;  %v1143_v20 = vadd.f32 %v6964_v51, %v8363_v57  ;;  %v7474_v23 = vmul.f32 0.5, %v1139_v34 }
 0x2f1   : > { %v4900_v40 = vpop.eup %4899  ;;  %v2996_v62 = vadd.f32 %v2995_v21, %v2461_v22  ;;  %4915 = vtanh.f32 %v7457_v35  ;;  %v7472_v53 = vmul.f32 0.5, %v1350_v24  ;;  %v7476_v48 = vmul.f32 0.5, %v1352_v31  ;;  %v7485_v22 = vpop.f32.mrb[178].mxu0 }
 0x2f2   : > { %v4902_v8 = vpop.eup %4901  ;;  %v3074_v9 = vadd.f32 %v3073_v61, %v2503_v33  ;;  %v2150_v63 = vadd.f32 1.0, %v4900_v40  ;;  %v7478_v14 = vmul.f32 0.5, %v1143_v20  ;;  %v1356_v51 = vadd.f32 %v6966_v5, %v8337_v10  ;;  %8400 = vst [vmem:[#allocation38_spill] sm:$0xff] %v7485_v22  ;;  %v7491_v31 = vpop.f32.mrb[123].mxu1 }
 0x2f3   : > { %v4904_v1 = vpop.eup %4903  ;;  %v2192_v43 = vadd.f32 1.0, %v4902_v8  ;;  %4917 = vtanh.f32 %v7472_v53  ;;  %v1145_v21 = vadd.f32 %v6971_v19, %v8369_v28  ;;  %v1358_v33 = vadd.f32 %v6973_v29, %v8340_v47  ;;  %8401 = vst [vmem:[#allocation39_spill] sm:$0xff] %v7491_v31 }
 0x2f4   : > { %v4906_v24 = vpop.eup %4905  ;;  %v2470_v61 = vmul.f32 %v2150_v63, %v7404_v11  ;;  %v2151_v34 = vadd.f32 1.0, %v4904_v1  ;;  %4919 = vtanh.f32 %v7474_v23  ;;  %v7495_v19 = vmul.f32 0.5, %v1356_v51 }
 0x2f5   : > { %v4908_v20 = vpop.eup %4907  ;;  %v2512_v40 = vmul.f32 %v2192_v43, %v7412_v37  ;;  %v2193_v5 = vadd.f32 1.0, %v4906_v24  ;;  %4921 = vtanh.f32 %v7476_v48  ;;  %v7501_v31 = vmul.f32 0.5, %v1145_v21  ;;  %v7503_v37 = vpop.f32.mrb[179].mxu0 }
 0x2f6   : > { %v2960_v8 = vadd.f32 %v2959_v3, %v2470_v61  ;;  %v2471_v22 = vmul.f32 %v2151_v34, %v7414_v44  ;;  %v2160_v11 = vadd.f32 1.0, %v4908_v20  ;;  %4923 = vtanh.f32 %v7478_v14  ;;  %8402 = vst [vmem:[#allocation40_spill] sm:$0xff] %v7503_v37  ;;  %v4435_v44 = vld [vmem:[%s8247_s3 + $0x260] sm:$0xff]  }
 0x2f7   : > { %v4910_v63 = vpop.eup %4909  ;;  %v3038_v1 = vadd.f32 %v3037_v39, %v2512_v40  ;;  %v2513_v29 = vmul.f32 %v2193_v5, %v7419_v54  ;;  %4925 = vtanh.f32 %v7495_v19  ;;  %v7506_v61 = vmul.f32 0.5, %v1358_v33  ;;  %v4436_v54 = vld [vmem:[%s8247_s3 + $0x220] sm:$0xff]   ;;  %v7514_v39 = vpop.f32.mrb[124].mxu1  ;;  %4318 = vmatprep.subr.bf16.mxu0 %v4435_v44 }
 0x2f8   : > { %v4912_v43 = vpop.eup %4911  ;;  %v2997_v24 = vadd.f32 %v2996_v62, %v2471_v22  ;;  %v2480_v51 = vmul.f32 %v2160_v11, %v7421_v12  ;;  %v2202_v3 = vadd.f32 1.0, %v4910_v63  ;;  %8403 = vst [vmem:[#allocation41_spill] sm:$0xff] %v7514_v39  ;;  %4927 = vtanh.f32 %v7501_v31  ;;  %v7518_v12 = vpop.f32.mrb[180].mxu0  ;;  %v8405_v40 = vld [vmem:[#allocation21_spill] sm:$0xff]  ;;  %4319 = vmatpush3.bf16.msra.mxu0 %v4436_v54 }
 0x2f9   : > { %v3075_v21 = vadd.f32 %v3074_v9, %v2513_v29  ;;  %v2161_v34 = vadd.f32 1.0, %v4912_v43  ;;  %v2878_v62 = vrot.slane %v7317_v50, 2  ;;  %8404 = vst [vmem:[#allocation42_spill] sm:$0xff] %v7518_v12  ;;  %4929 = vtanh.f32 %v7506_v61  ;;  %v7524_v11 = vpop.f32.mrb[125].mxu1  ;;  %v8407_v12 = vld [vmem:[#allocation22_spill] sm:$0xff] }
 0x2fa   : > { %v4914_v22 = vpop.eup %4913  ;;  %v2961_v33 = vadd.f32 %v2960_v8, %v2480_v51  ;;  %v2522_v20 = vmul.f32 %v2202_v3, %v7439_v4  ;;  %v1147_v5 = vadd.f32 %v8405_v40, %v8363_v57  ;;  %8406 = vst [vmem:[#allocation19_spill] sm:$0xff] %v7524_v11  ;;  %v1360_v39 = vadd.f32 %v8407_v12, %v8337_v10  ;;  %v7530_v8 = vpop.f32.mrb[181].mxu0 }
 0x2fb   : > { %v4916_v9 = vpop.eup %4915  ;;  %v2481_v63 = vmul.f32 %v2161_v34, %v7442_v46  ;;  %v2203_v29 = vadd.f32 1.0, %v4914_v22  ;;  %v2879_v43 = vadd.f32 %v2878_v62, %v7317_v50  ;;  %8408 = vst [vmem:[#allocation20_spill] sm:$0xff] %v7530_v8  ;;  %v2843_v44 = vrot.slane %v7315_v60, 1  ;;  %v7535_v40 = vpop.f32.mrb[126].mxu1  ;;  %v8411_v8 = vld [vmem:[#allocation23_spill] sm:$0xff] }
 0x2fc   : > { %v3039_v4 = vadd.f32 %v3038_v1, %v2522_v20  ;;  %v2170_v51 = vadd.f32 1.0, %v4916_v9  ;;  %v7532_v3 = vmul.f32 0.5, %v1147_v5  ;;  %8409 = vst [vmem:[#allocation21_spill] sm:$0xff] %v7535_v40  ;;  %v7538_v50 = vmul.f32 0.5, %v1360_v39  ;;  %v7540_v62 = vpop.f32.mrb[182].mxu0 }
 0x2fd   : > { %v4918_v11 = vpop.eup %4917  ;;  %v2998_v37 = vadd.f32 %v2997_v24, %v2481_v63  ;;  %v2523_v46 = vmul.f32 %v2203_v29, %v7454_v32  ;;  %v2880_v34 = vrot.slane %v2879_v43, 1  ;;  %8410 = vst [vmem:[#allocation22_spill] sm:$0xff] %v7540_v62  ;;  %v2844_v22 = vadd.f32 %v2843_v44, %v7315_v60 }
 0x2fe   : > { %v4920_v54 = vpop.eup %4919  ;;  %v2490_v12 = vmul.f32 %v2170_v51, %v7457_v35  ;;  %v2212_v1 = vadd.f32 1.0, %v4918_v11  ;;  %4931 = vtanh.f32 %v7532_v3  ;;  %v1149_v60 = vadd.f32 %v8411_v8, %v8369_v28 }
 0x2ff   : > { %v4922_v20 = vpop.eup %4921  ;;  %v3076_v5 = vadd.f32 %v3075_v21, %v2523_v46  ;;  %v2171_v9 = vadd.f32 1.0, %v4920_v54  ;;  %v2881_v40 = vadd.f32 %v2880_v34, %v2879_v43  ;;  %4933 = vtanh.f32 %v7538_v50 }
 0x300   : > { %v4924_v32 = vpop.eup %4923  ;;  %v2962_v24 = vadd.f32 %v2961_v33, %v2490_v12  ;;  %v2532_v39 = vmul.f32 %v2212_v1, %v7472_v53  ;;  %v2213_v63 = vadd.f32 1.0, %v4922_v20  ;;  %v3106_v29 = vmul.f32 0.00390625, %v2844_v22  ;;  %v4412_v12 = vld [vmem:[%s8247_s3 + $0x100] sm:$0xff]  }
 0x301   : > { %v4926_v62 = vpop.eup %4925  ;;  %v2491_v35 = vmul.f32 %v2171_v9, %v7474_v23  ;;  %v2180_v11 = vadd.f32 1.0, %v4924_v32  ;;  %v3107_v51 = vmul.f32 0.00390625, %v2881_v40  ;;  %v7555_v23 = vmul.f32 0.5, %v1149_v60  ;;  %v8413_v32 = vld [vmem:[#allocation44_spill] sm:$0xff] }
 0x302   : > { %v3040_v44 = vadd.f32 %v3039_v4, %v2532_v39  ;;  %v2533_v21 = vmul.f32 %v2213_v63, %v7476_v48  ;;  %v2222_v43 = vadd.f32 1.0, %v4926_v62  ;;  %v3116_v46 = vpack.c.bf16 %v3106_v29, %v3106_v29  ;;  %v4928_v34 = vpop.eup %4927  ;;  %v8412_v48 = vld [vmem:[#allocation43_spill] sm:$0xff]  ;;  %v4416_v29 = vld [vmem:[%s8247_s3 + $0x108] sm:$0xff]  }
 0x303   : > { %v2999_v54 = vadd.f32 %v2998_v37, %v2491_v35  ;;  %v2500_v33 = vmul.f32 %v2180_v11, %v7478_v14  ;;  %v3117_v53 = vpack.c.bf16 %v3107_v51, %v3107_v51  ;;  %v4930_v40 = vpop.eup %4929  ;;  %v2181_v4 = vadd.f32 1.0, %v4928_v34  ;;  %v4415_v37 = vld [vmem:[%s8247_s3 + $0x148] sm:$0xff]  }
 0x304   : > { %v3077_v1 = vadd.f32 %v3076_v5, %v2533_v21  ;;  %v2542_v8 = vmul.f32 %v2222_v43, %v7495_v19  ;;  %v1362_v62 = vadd.f32 %v8412_v48, %v8340_v47  ;;  %v2223_v22 = vadd.f32 1.0, %v4930_v40  ;;  %v8414_v35 = vld [vmem:[#allocation45_spill] sm:$0xff]  ;;  %v4417_v43 = vld [vmem:[%s8247_s3 + $0x150] sm:$0xff]  }
 0x305   : > { %v2963_v14 = vadd.f32 %v2962_v24, %v2500_v33  ;;  %3837 = vmatprep.mubr.bf16.mxu1 %v3117_v53  ;;  %4935 = vtanh.f32 %v7555_v23  ;;  %v2952_v20 = vrot.slane %v7195_v36, 2  ;;  %v2501_v5 = vmul.f32 %v2181_v4, %v7501_v31  ;;  %v8415_v31 = vld [vmem:[#allocation46_spill] sm:$0xff] }
 0x306   : > { %v3041_v9 = vadd.f32 %v3040_v44, %v2542_v8  ;;  %3838 = vmatmul.mubr.bf16.vlgmr.msra.gmra.mrb[140].mxu1 %v3116_v46  ;;  %v7566_v19 = vmul.f32 0.5, %v1362_v62  ;;  %v1153_v39 = vadd.f32 %v8413_v32, %v8363_v57  ;;  %v2543_v63 = vmul.f32 %v2223_v22, %v7506_v61  ;;  %v4419_v32 = vld [vmem:[%s8247_s3 + $0x158] sm:$0xff]  }
 0x307   : > { %4267 = vmatpush3.bf16.msra.mxu1 %v4412_v12  ;;  %v2953_v24 = vadd.f32 %v2952_v20, %v7195_v36  ;;  %v1366_v11 = vadd.f32 %v8414_v35, %v8337_v10  ;;  %v1155_v51 = vadd.f32 %v8415_v31, %v8369_v28  ;;  %v7579_v44 = vadd.f32 %v2999_v54, %v2501_v5  ;;  %v8416_v36 = vld [vmem:[#allocation47_spill] sm:$0xff]  ;;  %v8418_v20 = vld [vmem:[#allocation48_spill] sm:$0xff] }
 0x308   : > { %v4932_v60 = vpop.eup %4931  ;;  %4937 = vtanh.f32 %v7566_v19  ;;  %4268 = vmatprep.subr.bf16.mxu1 %v4415_v37  ;;  %v7582_v61 = vmul.f32 0.5, %v1153_v39  ;;  %v1368_v21 = vadd.f32 %v8416_v36, %v8340_v47  ;;  %v7589_v34 = vadd.f32 %v3077_v1, %v2543_v63  ;;  %v8417_v1 = vld [vmem:[#allocation24_spill] sm:$0xff]  ;;  %v4418_v37 = vld [vmem:[%s8247_s3 + $0x110] sm:$0xff]   ;;  %v7614_v39 = vpop.f32.mrb[127].mxu1  ;;  %v8419_v36 = vld [vmem:[#allocation49_spill] sm:$0xff] }
 0x309   : > { %v4934_v46 = vpop.eup %4933  ;;  %v2190_v33 = vadd.f32 1.0, %v4932_v60  ;;  %v2954_v53 = vrot.slane %v2953_v24, 1  ;;  %v7591_v12 = vmul.f32 0.5, %v1366_v11  ;;  %v7594_v40 = vmul.f32 0.5, %v1155_v51  ;;  %v7616_v63 = vpop.f32.mrb[183].mxu0 }
 0x30a   : > { %v2232_v54 = vadd.f32 1.0, %v4934_v46  ;;  %4939 = vtanh.f32 %v7582_v61  ;;  %v7596_v8 = vmul.f32 0.5, %v1368_v21  ;;  %v1157_v62 = vadd.f32 %v8417_v1, %v8363_v57  ;;  %v7629_v11 = vpop.f32.mrb[128].mxu1 }
 0x30b   : > { %v2510_v4 = vmul.f32 %v2190_v33, %v7532_v3  ;;  %v2955_v48 = vadd.f32 %v2954_v53, %v2953_v24  ;;  %4269 = vmatpush3.bf16.msra.mxu1 %v4416_v29  ;;  %4941 = vtanh.f32 %v7591_v12  ;;  %v1370_v5 = vadd.f32 %v8418_v20, %v8337_v10  ;;  %v4438_v24 = vld [vmem:[%s8247_s3 + $0x228] sm:$0xff]  }
 0x30c   : > { %v2552_v22 = vmul.f32 %v2232_v54, %v7538_v50  ;;  %4943 = vtanh.f32 %v7594_v40  ;;  %4270 = vmatprep.subr.bf16.mxu1 %v4417_v43  ;;  %v1159_v3 = vadd.f32 %v7033_v45, %v8369_v28  ;;  %v4437_v50 = vld [vmem:[%s8247_s3 + $0x268] sm:$0xff]   ;;  %v7627_v45 = vmul.f32 0.5, %v1157_v62  ;;  %v7639_v43 = vpop.f32.mrb[129].mxu1  ;;  %v4421_v62 = vld [vmem:[%s8247_s3 + $0x160] sm:$0xff]  }
 0x30d   : > { %v7624_v29 = vadd.f32 %v2963_v14, %v2510_v4  ;;  %v3109_v35 = vmul.f32 0.00390625, %v2955_v48  ;;  %4945 = vtanh.f32 %v7596_v8  ;;  %v7633_v51 = vmul.f32 0.5, %v1370_v5  ;;  %4320 = vmatprep.subr.bf16.mxu0 %v4437_v50  ;;  %v7649_v54 = vpop.f32.mrb[130].mxu1 }
 0x30e   : > { %v7631_v31 = vadd.f32 %v3041_v9, %v2552_v22  ;;  %v7635_v60 = vmul.f32 0.5, %v1159_v3  ;;  %v1372_v21 = vadd.f32 %v8419_v36, %v8340_v47  ;;  %4947 = vtanh.f32 %v7627_v45  ;;  %v4420_v9 = vld [vmem:[%s8247_s3 + $0x118] sm:$0xff]   ;;  %4321 = vmatpush3.bf16.msra.mxu0 %v4438_v24 }
 0x30f   : > { %v4936_v14 = vpop.eup %4935  ;;  %v3119_v46 = vpack.c.bf16 %v3109_v35, %v3109_v35  ;;  %4271 = vmatpush3.bf16.msra.mxu1 %v4418_v37  ;;  %v1163_v33 = vadd.f32 %v7054_v27, %v8363_v57  ;;  %v1376_v53 = vadd.f32 %v7056_v52, %v8337_v10  ;;  %4949 = vtanh.f32 %v7633_v51  ;;  %v7659_v27 = vpop.f32.mrb[131].mxu1 }
 0x310   : > { %v2191_v4 = vadd.f32 1.0, %v4936_v14  ;;  %v7652_v48 = vmul.f32 0.5, %v1372_v21  ;;  %4272 = vmatprep.subr.bf16.mxu1 %v4419_v32  ;;  %v1165_v1 = vadd.f32 %v7062_v30, %v8369_v28  ;;  %8420 = vst [vmem:[#allocation23_spill] sm:$0xff] %v7659_v27  ;;  %4951 = vtanh.f32 %v7635_v60  ;;  %v7668_v20 = vpop.f32.mrb[132].mxu1 }
 0x311   : > { %3877 = vmatprep.mubr.bf16.mxu1 %v3119_v46  ;;  %v7662_v52 = vmul.f32 0.5, %v1163_v33  ;;  %v7664_v37 = vmul.f32 0.5, %v1376_v53  ;;  %v1378_v22 = vadd.f32 %v7064_v42, %v8340_v47  ;;  %8421 = vst [vmem:[#allocation43_spill] sm:$0xff] %v7668_v20  ;;  %v1167_v32 = vadd.f32 %v7076_v55, %v8363_v57  ;;  %v7676_v50 = vpop.f32.mrb[133].mxu1  ;;  %v8423_v42 = vld [vmem:[#allocation25_spill] sm:$0xff] }
 0x312   : > { %v4938_v5 = vpop.eup %4937  ;;  %v2511_v30 = vmul.f32 %v2191_v4, %v7555_v23  ;;  %4953 = vtanh.f32 %v7652_v48  ;;  %v7672_v3 = vmul.f32 0.5, %v1165_v1  ;;  %8422 = vst [vmem:[#allocation44_spill] sm:$0xff] %v7676_v50  ;;  %v1380_v36 = vadd.f32 %v8423_v42, %v8337_v10  ;;  %v4422_v23 = vld [vmem:[%s8247_s3 + $0x120] sm:$0xff]   ;;  %v7686_v21 = vpop.f32.mrb[134].mxu1  ;;  %v4425_v53 = vld [vmem:[%s8247_s3 + $0x168] sm:$0xff]  }
 0x313   : > { %v2233_v24 = vadd.f32 1.0, %v4938_v5  ;;  %4273 = vmatpush3.bf16.msra.mxu1 %v4420_v9  ;;  %4955 = vtanh.f32 %v7662_v52  ;;  %v7679_v35 = vmul.f32 0.5, %v1378_v22  ;;  %8424 = vst [vmem:[#allocation45_spill] sm:$0xff] %v7686_v21  ;;  %v7690_v46 = vmul.f32 0.5, %v1167_v32  ;;  %v8425_v9 = vld [vmem:[#allocation26_spill] sm:$0xff]  ;;  %v7697_v4 = vpop.f32.mrb[135].mxu1 }
 0x314   : > { %v4940_v14 = vpop.eup %4939  ;;  %v3001_v55 = vadd.f32 %v7579_v44, %v2511_v30  ;;  %4957 = vtanh.f32 %v7664_v37  ;;  %4274 = vmatprep.subr.bf16.mxu1 %v4421_v62  ;;  %v1169_v33 = vadd.f32 %v8425_v9, %v8369_v28  ;;  %8426 = vst [vmem:[#allocation46_spill] sm:$0xff] %v7697_v4  ;;  %v7701_v44 = vmul.f32 0.5, %v1380_v36  ;;  %v4441_v62 = vld [vmem:[%s8247_s3 + $0x270] sm:$0xff]  }
 0x315   : > { %v4942_v1 = vpop.eup %4941  ;;  %v2553_v22 = vmul.f32 %v2233_v24, %v7566_v19  ;;  %v2200_v5 = vadd.f32 1.0, %v4940_v14  ;;  %4959 = vtanh.f32 %v7672_v3  ;;  %v4442_v30 = vld [vmem:[%s8247_s3 + $0x230] sm:$0xff]   ;;  %4322 = vmatprep.subr.bf16.mxu0 %v4441_v62  ;;  %v8428_v62 = vld [vmem:[#allocation8_spill] sm:$0xff] }
 0x316   : > { %v4944_v32 = vpop.eup %4943  ;;  %v2242_v42 = vadd.f32 1.0, %v4942_v1  ;;  %4961 = vtanh.f32 %v7679_v35  ;;  %v7710_v9 = vmul.f32 0.5, %v1169_v33  ;;  %v8427_v19 = vld [vmem:[#allocation7_spill] sm:$0xff]  ;;  %v4426_v1 = vld [vmem:[%s8247_s3 + $0x128] sm:$0xff]   ;;  %4323 = vmatpush3.bf16.msra.mxu0 %v4442_v30 }
 0x317   : > { %v1382_v24 = vadd.f32 %v8427_v19, %v8340_v47  ;;  %v4946_v14 = vpop.eup %4945  ;;  %v3079_v36 = vadd.f32 %v7589_v34, %v2553_v22  ;;  %v2520_v4 = vmul.f32 %v2200_v5, %v7582_v61  ;;  %v2201_v21 = vadd.f32 1.0, %v4944_v32  ;;  %4275 = vmatpush3.bf16.msra.mxu1 %v4422_v23  ;;  %v4448_v33 = vld [vmem:[%s8247_s3 + $0x278] sm:$0xff]   ;;  %v4427_v61 = vld [vmem:[%s8247_s3 + $0x170] sm:$0xff]  }
 0x318   : > { %4963 = vtanh.f32 %v7690_v46  ;;  %v2562_v19 = vmul.f32 %v2242_v42, %v7591_v12  ;;  %v2243_v50 = vadd.f32 1.0, %v4946_v14  ;;  %4276 = vmatprep.subr.bf16.mxu1 %v4425_v53  ;;  %v4450_v23 = vld [vmem:[%s8247_s3 + $0x238] sm:$0xff]   ;;  %v4948_v22 = vpop.eup %4947  ;;  %v1173_v32 = vadd.f32 %v8428_v62, %v8363_v57  ;;  %4324 = vmatprep.subr.bf16.mxu0 %v4448_v33 }
 0x319   : > { %4965 = vtanh.f32 %v7701_v44  ;;  %v7725_v34 = vmul.f32 0.5, %v1382_v24  ;;  %v2965_v5 = vadd.f32 %v7624_v29, %v2520_v4  ;;  %v2521_v12 = vmul.f32 %v2201_v21, %v7594_v40  ;;  %v4950_v53 = vpop.eup %4949  ;;  %v8429_v40 = vld [vmem:[#allocation9_spill] sm:$0xff]  ;;  %v4428_v4 = vld [vmem:[%s8247_s3 + $0x130] sm:$0xff]  }
 0x31a   : > { %4967 = vtanh.f32 %v7710_v9  ;;  %v3043_v42 = vadd.f32 %v7631_v31, %v2562_v19  ;;  %v2563_v30 = vmul.f32 %v2243_v50, %v7596_v8  ;;  %v2210_v24 = vadd.f32 1.0, %v4948_v22  ;;  %v4952_v14 = vpop.eup %4951  ;;  %v8430_v19 = vld [vmem:[#allocation10_spill] sm:$0xff]  ;;  %4325 = vmatpush3.bf16.msra.mxu0 %v4450_v23 }
 0x31b   : > { %4969 = vtanh.f32 %v7725_v34  ;;  %v3002_v20 = vadd.f32 %v3001_v55, %v2521_v12  ;;  %v2252_v27 = vadd.f32 1.0, %v4950_v53  ;;  %4277 = vmatpush3.bf16.msra.mxu1 %v4426_v1  ;;  %v7741_v29 = vmul.f32 0.5, %v1173_v32  ;;  %v4429_v55 = vld [vmem:[%s8247_s3 + $0x178] sm:$0xff]  }
 0x31c   : > { %v1386_v21 = vadd.f32 %v8429_v40, %v8337_v10  ;;  %v4954_v33 = vpop.eup %4953  ;;  %v3080_v31 = vadd.f32 %v3079_v36, %v2563_v30  ;;  %v2530_v8 = vmul.f32 %v2210_v24, %v7627_v45  ;;  %v2211_v50 = vadd.f32 1.0, %v4952_v14  ;;  %4278 = vmatprep.subr.bf16.mxu1 %v4427_v61 }
 0x31d   : > { %v1175_v22 = vadd.f32 %v8430_v19, %v8369_v28  ;;  %v4956_v1 = vpop.eup %4955  ;;  %v2572_v12 = vmul.f32 %v2252_v27, %v7633_v51  ;;  %v2253_v62 = vadd.f32 1.0, %v4954_v33  ;;  %4971 = vtanh.f32 %v7741_v29  ;;  %v4430_v51 = vld [vmem:[%s8247_s3 + $0x138] sm:$0xff]   ;;  %v7766_v27 = vpop.f32.mrb[136].mxu1 }
 0x31e   : > { %v7756_v32 = vmul.f32 0.5, %v1386_v21  ;;  %v4958_v36 = vpop.eup %4957  ;;  %v2966_v45 = vadd.f32 %v2965_v5, %v2530_v8  ;;  %v2531_v53 = vmul.f32 %v2211_v50, %v7635_v60  ;;  %v2220_v30 = vadd.f32 1.0, %v4956_v1 }
 0x31f   : > { %v7759_v24 = vmul.f32 0.5, %v1175_v22  ;;  %v4960_v61 = vpop.eup %4959  ;;  %v3044_v14 = vadd.f32 %v3043_v42, %v2572_v12  ;;  %v2573_v40 = vmul.f32 %v2253_v62, %v7652_v48  ;;  %v2262_v23 = vadd.f32 1.0, %v4958_v36  ;;  %4279 = vmatpush3.bf16.msra.mxu1 %v4428_v4  ;;  %v7770_v42 = vpop.f32.mrb[137].mxu1  ;;  %v4439_v48 = vld [vmem:[%s8247_s3 + $0x1c0] sm:$0xff]   ;;  %v8432_v22 = vld [vmem:[#allocation50_spill] sm:$0xff]  ;;  %v8433_v36 = vld [vmem:[#allocation11_spill] sm:$0xff] }
 0x320   : > { %4973 = vtanh.f32 %v7756_v32  ;;  %v4962_v5 = vpop.eup %4961  ;;  %v3003_v21 = vadd.f32 %v3002_v20, %v2531_v53  ;;  %v2540_v60 = vmul.f32 %v2220_v30, %v7662_v52  ;;  %v2221_v33 = vadd.f32 1.0, %v4960_v61  ;;  %4280 = vmatprep.subr.bf16.mxu1 %v4429_v55  ;;  %8431 = vst [vmem:[#allocation47_spill] sm:$0xff] %v7770_v42  ;;  %v4241_v1 = vpop.f32.mrb[138].mxu1 }
 0x321   : > { %4975 = vtanh.f32 %v7759_v24  ;;  %v3081_v8 = vadd.f32 %v3080_v31, %v2573_v40  ;;  %v2582_v50 = vmul.f32 %v2262_v23, %v7664_v37  ;;  %v2263_v19 = vadd.f32 1.0, %v4962_v5  ;;  %v4242_v30 = vpop.f32.mrb[139].mxu1 }
 0x322   : > { %v4964_v4 = vpop.eup %4963  ;;  %v1388_v20 = vadd.f32 %v8432_v22, %v8340_v47  ;;  %v2967_v12 = vadd.f32 %v2966_v45, %v2540_v60  ;;  %v2541_v62 = vmul.f32 %v2221_v33, %v7672_v3  ;;  %v1177_v53 = vadd.f32 %v8433_v36, %v8363_v57 }
 0x323   : > { %v4966_v52 = vpop.eup %4965  ;;  %v2230_v55 = vadd.f32 1.0, %v4964_v4  ;;  %v3045_v42 = vadd.f32 %v3044_v14, %v2582_v50  ;;  %v2583_v31 = vmul.f32 %v2263_v19, %v7679_v35  ;;  %4281 = vmatpush3.bf16.msra.mxu1 %v4430_v51  ;;  %v8434_v51 = vld [vmem:[#allocation27_spill] sm:$0xff] }
 0x324   : > { %v4968_v61 = vpop.eup %4967  ;;  %v2272_v40 = vadd.f32 1.0, %v4966_v52  ;;  %v7782_v37 = vmul.f32 0.5, %v1388_v20  ;;  %v3004_v5 = vadd.f32 %v3003_v21, %v2541_v62  ;;  %v7785_v60 = vmul.f32 0.5, %v1177_v53  ;;  %4288 = vmatprep.subr.bf16.mxu1 %v4439_v48 }
 0x325   : > { %v4970_v23 = vpop.eup %4969  ;;  %v2550_v22 = vmul.f32 %v2230_v55, %v7690_v46  ;;  %v2231_v45 = vadd.f32 1.0, %v4968_v61  ;;  %v3082_v3 = vadd.f32 %v3081_v8, %v2583_v31  ;;  %v1390_v21 = vadd.f32 %v8434_v51, %v8337_v10  ;;  %v8436_v61 = vld [vmem:[#allocation13_spill] sm:$0xff] }
 0x326   : > { %v2592_v33 = vmul.f32 %v2272_v40, %v7701_v44  ;;  %v2273_v4 = vadd.f32 1.0, %v4970_v23  ;;  %4977 = vtanh.f32 %v7782_v37  ;;  %v1179_v48 = vadd.f32 %v7163_v58, %v8369_v28 }
 0x327   : > { %v2968_v14 = vadd.f32 %v2967_v12, %v2550_v22  ;;  %v2551_v35 = vmul.f32 %v2231_v45, %v7710_v9  ;;  %4979 = vtanh.f32 %v7785_v60  ;;  %v4972_v50 = vpop.eup %4971  ;;  %v1392_v44 = vadd.f32 %v7167_v15, %v8340_v47 }
 0x328   : > { %v3046_v46 = vadd.f32 %v3045_v42, %v2592_v33  ;;  %v2593_v19 = vmul.f32 %v2273_v4, %v7725_v34  ;;  %v2240_v20 = vadd.f32 1.0, %v4972_v50  ;;  %v7798_v1 = vmul.f32 0.5, %v1390_v21  ;;  %v8435_v34 = vld [vmem:[#allocation12_spill] sm:$0xff]  ;;  %v8440_v50 = vld [vmem:[#allocation51_spill] sm:$0xff] }
 0x329   : > { %v3005_v8 = vadd.f32 %v3004_v5, %v2551_v35  ;;  %v1183_v9 = vadd.f32 %v7171_v17, %v8363_v57  ;;  %v7802_v62 = vmul.f32 0.5, %v1179_v48  ;;  %v7804_v42 = vmul.f32 0.5, %v1392_v44 }
 0x32a   : > { %v4974_v52 = vpop.eup %4973  ;;  %v3083_v12 = vadd.f32 %v3082_v3, %v2593_v19  ;;  %v1396_v55 = vadd.f32 %v8435_v34, %v8337_v10  ;;  %v2560_v36 = vmul.f32 %v2240_v20, %v7741_v29  ;;  %4981 = vtanh.f32 %v7798_v1  ;;  %v8437_v29 = vld [vmem:[#allocation28_spill] sm:$0xff]  ;;  %v8438_v3 = vld [vmem:[#allocation14_spill] sm:$0xff] }
 0x32b   : > { %v4976_v58 = vpop.eup %4975  ;;  %v2282_v15 = vadd.f32 1.0, %v4974_v52  ;;  %v7810_v53 = vmul.f32 0.5, %v1183_v9  ;;  %4983 = vtanh.f32 %v7802_v62  ;;  %v1185_v31 = vadd.f32 %v8436_v61, %v8369_v28  ;;  %v8441_v20 = vld [vmem:[#allocation30_spill] sm:$0xff] }
 0x32c   : > { %v2241_v30 = vadd.f32 1.0, %v4976_v58  ;;  %v7813_v17 = vmul.f32 0.5, %v1396_v55  ;;  %v2969_v40 = vadd.f32 %v2968_v14, %v2560_v36  ;;  %4985 = vtanh.f32 %v7804_v42 }
 0x32d   : > { %v2602_v23 = vmul.f32 %v2282_v15, %v7756_v32  ;;  %v1398_v5 = vadd.f32 %v8437_v29, %v8340_v47  ;;  %4987 = vtanh.f32 %v7810_v53  ;;  %v7823_v45 = vmul.f32 0.5, %v1185_v31  ;;  %v8439_v32 = vld [vmem:[#allocation29_spill] sm:$0xff] }
 0x32e   : > { %v2561_v22 = vmul.f32 %v2241_v30, %v7759_v24  ;;  %v2917_v33 = vrot.slane %v8438_v3, 1  ;;  %4989 = vtanh.f32 %v7813_v17  ;;  %v1187_v14 = vadd.f32 %v8439_v32, %v8363_v57  ;;  %v8443_v30 = vld [vmem:[#allocation15_spill] sm:$0xff]  ;;  %v4440_v31 = vld [vmem:[%s8247_s3 + $0x180] sm:$0xff]  }
 0x32f   : > { %v3047_v4 = vadd.f32 %v3046_v46, %v2602_v23  ;;  %v7827_v35 = vmul.f32 0.5, %v1398_v5  ;;  %4991 = vtanh.f32 %v7823_v45  ;;  %v1400_v19 = vadd.f32 %v8440_v50, %v8337_v10 }
 0x330   : > { %v4978_v51 = vpop.eup %4977  ;;  %v3006_v21 = vadd.f32 %v3005_v8, %v2561_v22  ;;  %v2918_v24 = vadd.f32 %v2917_v33, %v8438_v3  ;;  %v7836_v46 = vmul.f32 0.5, %v1187_v14  ;;  %v1189_v9 = vadd.f32 %v8441_v20, %v8369_v28  ;;  %v8442_v8 = vld [vmem:[#allocation5_spill] sm:$0xff] }
 0x331   : > { %v4980_v48 = vpop.eup %4979  ;;  %v2283_v44 = vadd.f32 1.0, %v4978_v51  ;;  %4993 = vtanh.f32 %v7827_v35  ;;  %v7840_v55 = vmul.f32 0.5, %v1400_v19  ;;  %v1402_v58 = vadd.f32 %v8442_v8, %v8340_v47 }
 0x332   : > { %v2250_v52 = vadd.f32 1.0, %v4980_v48  ;;  %v3108_v34 = vmul.f32 0.00390625, %v2918_v24  ;;  %4995 = vtanh.f32 %v7836_v46  ;;  %v7846_v15 = vmul.f32 0.5, %v1189_v9 }
 0x333   : > { %v2603_v36 = vmul.f32 %v2283_v44, %v7782_v37  ;;  %v1193_v61 = vadd.f32 %v8443_v30, %v8363_v57  ;;  %4997 = vtanh.f32 %v7840_v55  ;;  %v7855_v5 = vmul.f32 0.5, %v1402_v58  ;;  %v4443_v37 = vld [vmem:[%s8247_s3 + $0x1c8] sm:$0xff]  }
 0x334   : > { %v2570_v23 = vmul.f32 %v2250_v52, %v7785_v60  ;;  %v3118_v29 = vpack.c.bf16 %v3108_v34, %v3108_v34  ;;  %v4982_v22 = vpop.eup %4981  ;;  %4999 = vtanh.f32 %v7846_v15  ;;  %v1406_v32 = vadd.f32 %v7231_v59, %v8337_v10  ;;  %v4444_v59 = vld [vmem:[%s8247_s3 + $0x188] sm:$0xff]   ;;  %v4445_v34 = vld [vmem:[%s8247_s3 + $0x1d0] sm:$0xff]  }
 0x335   : > { %v3084_v3 = vadd.f32 %v3083_v12, %v2603_v36  ;;  %v7861_v33 = vmul.f32 0.5, %v1193_v61  ;;  %v4984_v14 = vpop.eup %4983  ;;  %v2292_v51 = vadd.f32 1.0, %v4982_v22  ;;  %5001 = vtanh.f32 %v7855_v5 }
 0x336   : > { %v2970_v60 = vadd.f32 %v2969_v40, %v2570_v23  ;;  %3878 = vmatmul.mubr.bf16.vlgmr.msra.gmra.mrb[144].mxu1 %v3118_v29  ;;  %v1195_v24 = vadd.f32 %v7238_v25, %v8369_v28  ;;  %v4986_v50 = vpop.eup %4985  ;;  %v2251_v19 = vadd.f32 1.0, %v4984_v14  ;;  %v7869_v12 = vmul.f32 0.5, %v1406_v32  ;;  %v8444_v25 = vld [vmem:[#allocation16_spill] sm:$0xff] }
 0x337   : > { %5003 = vtanh.f32 %v7861_v33  ;;  %v1408_v48 = vadd.f32 %v7247_v49, %v8340_v47  ;;  %4289 = vmatpush3.bf16.msra.mxu1 %v4440_v31  ;;  %v4988_v40 = vpop.eup %4987  ;;  %v2612_v44 = vmul.f32 %v2292_v51, %v7798_v1  ;;  %v2293_v20 = vadd.f32 1.0, %v4986_v50  ;;  %v8445_v50 = vld [vmem:[#allocation6_spill] sm:$0xff] }
 0x338   : > { %v7877_v9 = vmul.f32 0.5, %v1195_v24  ;;  %v1197_v52 = vadd.f32 %v8444_v25, %v8363_v57  ;;  %4290 = vmatprep.subr.bf16.mxu1 %v4443_v37  ;;  %v4990_v49 = vpop.eup %4989  ;;  %v2571_v8 = vmul.f32 %v2251_v19, %v7802_v62  ;;  %v2260_v58 = vadd.f32 1.0, %v4988_v40  ;;  %v4446_v62 = vld [vmem:[%s8247_s3 + $0x190] sm:$0xff]  }
 0x339   : > { %5005 = vtanh.f32 %v7869_v12  ;;  %v7886_v36 = vmul.f32 0.5, %v1408_v48  ;;  %v4992_v1 = vpop.eup %4991  ;;  %v3048_v30 = vadd.f32 %v3047_v4, %v2612_v44  ;;  %v2613_v61 = vmul.f32 %v2293_v20, %v7804_v42  ;;  %v8446_v48 = vld [vmem:[#allocation17_spill] sm:$0xff] }
 0x33a   : > { %v2302_v31 = vadd.f32 1.0, %v4990_v49  ;;  %5007 = vtanh.f32 %v7877_v9  ;;  %v3007_v29 = vadd.f32 %v3006_v21, %v2571_v8  ;;  %v2580_v37 = vmul.f32 %v2260_v58, %v7810_v53  ;;  %v4447_v21 = vld [vmem:[%s8247_s3 + $0x1d8] sm:$0xff]  }
 0x33b   : > { %v4994_v23 = vpop.eup %4993  ;;  %v2261_v22 = vadd.f32 1.0, %v4992_v1  ;;  %5009 = vtanh.f32 %v7886_v36  ;;  %4291 = vmatpush3.bf16.msra.mxu1 %v4444_v59  ;;  %v3085_v32 = vadd.f32 %v3084_v3, %v2613_v61  ;;  %v7896_v42 = vmul.f32 0.5, %v1197_v52  ;;  %v8447_v1 = vld [vmem:[#allocation31_spill] sm:$0xff]  ;;  %v4451_v61 = vld [vmem:[%s8247_s3 + $0x1e0] sm:$0xff]  }
 0x33c   : > { %v2622_v4 = vmul.f32 %v2302_v31, %v7813_v17  ;;  %v2303_v14 = vadd.f32 1.0, %v4994_v23  ;;  %4292 = vmatprep.subr.bf16.mxu1 %v4445_v34  ;;  %v4996_v53 = vpop.eup %4995  ;;  %v2971_v51 = vadd.f32 %v2970_v60, %v2580_v37  ;;  %v1410_v19 = vadd.f32 %v8445_v50, %v8337_v10  ;;  %v8448_v37 = vld [vmem:[#allocation32_spill] sm:$0xff] }
 0x33d   : > { %v2581_v24 = vmul.f32 %v2261_v22, %v7823_v45  ;;  %v1199_v3 = vadd.f32 %v8446_v48, %v8369_v28  ;;  %v4998_v59 = vpop.eup %4997  ;;  %v2270_v44 = vadd.f32 1.0, %v4996_v53  ;;  %5011 = vtanh.f32 %v7896_v42  ;;  %v4449_v45 = vld [vmem:[%s8247_s3 + $0x198] sm:$0xff]   ;;  %v8449_v48 = vld [vmem:[#allocation33_spill] sm:$0xff] }
 0x33e   : > { %v3049_v17 = vadd.f32 %v3048_v30, %v2622_v4  ;;  %v2623_v40 = vmul.f32 %v2303_v14, %v7827_v35  ;;  %v5000_v20 = vpop.eup %4999  ;;  %v2312_v52 = vadd.f32 1.0, %v4998_v59  ;;  %v7908_v34 = vmul.f32 0.5, %v1410_v19 }
 0x33f   : > { %v3008_v25 = vadd.f32 %v3007_v29, %v2581_v24  ;;  %v7910_v60 = vmul.f32 0.5, %v1199_v3  ;;  %4293 = vmatpush3.bf16.msra.mxu1 %v4446_v62  ;;  %v5002_v49 = vpop.eup %5001  ;;  %v2590_v58 = vmul.f32 %v2270_v44, %v7836_v46  ;;  %v2271_v35 = vadd.f32 1.0, %v5000_v20  ;;  %v8450_v44 = vld [vmem:[#allocation34_spill] sm:$0xff] }
 0x340   : > { %v3086_v8 = vadd.f32 %v3085_v32, %v2623_v40  ;;  %v1412_v30 = vadd.f32 %v8447_v1, %v8340_v47  ;;  %4294 = vmatprep.subr.bf16.mxu1 %v4447_v21  ;;  %v2632_v23 = vmul.f32 %v2312_v52, %v7840_v55  ;;  %v2313_v29 = vadd.f32 1.0, %v5002_v49  ;;  %v4452_v55 = vld [vmem:[%s8247_s3 + $0x1a0] sm:$0xff]  }
 0x341   : > { %v5004_v31 = vpop.eup %5003  ;;  %5013 = vtanh.f32 %v7908_v34  ;;  %v1203_v22 = vadd.f32 %v8448_v37, %v8363_v57  ;;  %v2972_v62 = vadd.f32 %v2971_v51, %v2590_v58  ;;  %v2591_v46 = vmul.f32 %v2271_v35, %v7846_v15  ;;  %v4454_v35 = vld [vmem:[%s8247_s3 + $0x1a8] sm:$0xff]  }
 0x342   : > { %v2280_v32 = vadd.f32 1.0, %v5004_v31  ;;  %5015 = vtanh.f32 %v7910_v60  ;;  %v3050_v14 = vadd.f32 %v3049_v17, %v2632_v23  ;;  %v2633_v21 = vmul.f32 %v2313_v29, %v7855_v5  ;;  %v4453_v5 = vld [vmem:[%s8247_s3 + $0x1e8] sm:$0xff]  }
 0x343   : > { %v5006_v4 = vpop.eup %5005  ;;  %v7928_v53 = vmul.f32 0.5, %v1412_v30  ;;  %v7930_v24 = vmul.f32 0.5, %v1203_v22  ;;  %4295 = vmatpush3.bf16.msra.mxu1 %v4449_v45  ;;  %v3009_v51 = vadd.f32 %v3008_v25, %v2591_v46  ;;  %v1416_v3 = vadd.f32 %v8449_v48, %v8337_v10  ;;  %v8455_v48 = vld [vmem:[#allocation53_spill] sm:$0xff] }
 0x344   : > { %v5008_v50 = vpop.eup %5007  ;;  %v2600_v15 = vmul.f32 %v2280_v32, %v7861_v33  ;;  %v2322_v19 = vadd.f32 1.0, %v5006_v4  ;;  %4296 = vmatprep.subr.bf16.mxu1 %v4451_v61  ;;  %v3087_v17 = vadd.f32 %v3086_v8, %v2633_v21  ;;  %v1205_v20 = vadd.f32 %v8450_v44, %v8369_v28  ;;  %v8451_v61 = vld [vmem:[#allocation35_spill] sm:$0xff] }
 0x345   : > { %v5010_v59 = vpop.eup %5009  ;;  %v2281_v40 = vadd.f32 1.0, %v5008_v50  ;;  %5017 = vtanh.f32 %v7928_v53  ;;  %v7947_v49 = vmul.f32 0.5, %v1416_v3  ;;  %v1418_v8 = vadd.f32 %v7331_v41, %v8340_v47  ;;  %v4455_v41 = vld [vmem:[%s8247_s3 + $0x1f0] sm:$0xff]  }
 0x346   : > { %v2973_v25 = vadd.f32 %v2972_v62, %v2600_v15  ;;  %v2642_v33 = vmul.f32 %v2322_v19, %v7869_v12  ;;  %v2323_v52 = vadd.f32 1.0, %v5010_v59  ;;  %5019 = vtanh.f32 %v7930_v24  ;;  %v8456_v3 = vld [vmem:[#allocation54_spill] sm:$0xff]  ;;  %v4457_v59 = vld [vmem:[%s8247_s3 + $0x1f8] sm:$0xff]  }
 0x347   : > { %v2601_v45 = vmul.f32 %v2281_v40, %v7877_v9  ;;  %v7949_v58 = vmul.f32 0.5, %v1205_v20  ;;  %4297 = vmatpush3.bf16.msra.mxu1 %v4452_v55  ;;  %v5012_v1 = vpop.eup %5011  ;;  %v1207_v31 = vadd.f32 %v8451_v61, %v8363_v57  ;;  %v8452_v9 = vld [vmem:[#allocation36_spill] sm:$0xff]  ;;  %5021 = vtanh.f32 %v7947_v49 }
 0x348   : > { %v3051_v30 = vadd.f32 %v3050_v14, %v2642_v33  ;;  %v2643_v12 = vmul.f32 %v2323_v52, %v7886_v36  ;;  %v1420_v23 = vadd.f32 %v8452_v9, %v8337_v10  ;;  %4298 = vmatprep.subr.bf16.mxu1 %v4453_v5  ;;  %v2290_v37 = vadd.f32 1.0, %v5012_v1  ;;  %v8453_v14 = vld [vmem:[#allocation37_spill] sm:$0xff]  ;;  %v8454_v55 = vld [vmem:[#allocation52_spill] sm:$0xff] }
 0x349   : > { %v3010_v29 = vadd.f32 %v3009_v51, %v2601_v45  ;;  %v7965_v22 = vmul.f32 0.5, %v1418_v8  ;;  %5023 = vtanh.f32 %v7949_v58  ;;  %v7968_v36 = vmul.f32 0.5, %v1207_v31  ;;  %v4456_v51 = vld [vmem:[%s8247_s3 + $0x1b0] sm:$0xff]  }
 0x34a   : > { %v3088_v62 = vadd.f32 %v3087_v17, %v2643_v12  ;;  %v7970_v46 = vmul.f32 0.5, %v1420_v23  ;;  %v2610_v4 = vmul.f32 %v2290_v37, %v7896_v42  ;;  %v1209_v21 = vadd.f32 %v8453_v14, %v8369_v28 }
 0x34b   : > { %v5014_v32 = vpop.eup %5013  ;;  %5025 = vtanh.f32 %v7965_v22  ;;  %v1422_v50 = vadd.f32 %v8454_v55, %v8340_v47  ;;  %4299 = vmatpush3.bf16.msra.mxu1 %v4454_v35  ;;  %v1213_v42 = vadd.f32 %v8455_v48, %v8363_v57  ;;  %v1426_v5 = vadd.f32 %v8456_v3, %v8337_v10 }
 0x34c   : > { %v5016_v15 = vpop.eup %5015  ;;  %v2332_v19 = vadd.f32 1.0, %v5014_v32  ;;  %5027 = vtanh.f32 %v7968_v36  ;;  %4300 = vmatprep.subr.bf16.mxu1 %v4455_v41  ;;  %v2974_v17 = vadd.f32 %v2973_v25, %v2610_v4  ;;  %v7990_v44 = vmul.f32 0.5, %v1209_v21 }
 0x34d   : > { %v2291_v40 = vadd.f32 1.0, %v5016_v15  ;;  %5029 = vtanh.f32 %v7970_v46  ;;  %v7993_v33 = vmul.f32 0.5, %v1422_v50  ;;  %v7995_v52 = vmul.f32 0.5, %v1213_v42 }
 0x34e   : > { %v2652_v20 = vmul.f32 %v2332_v19, %v7908_v34  ;;  %v7997_v45 = vmul.f32 0.5, %v1426_v5  ;;  %5031 = vtanh.f32 %v7990_v44  ;;  %v1215_v25 = vadd.f32 %v7382_v16, %v8369_v28  ;;  %v4458_v34 = vld [vmem:[%s8247_s3 + $0x1b8] sm:$0xff]  }
 0x34f   : > { %v5018_v8 = vpop.eup %5017  ;;  %v2611_v35 = vmul.f32 %v2291_v40, %v7910_v60  ;;  %v1428_v1 = vadd.f32 %v7387_v7, %v8340_v47  ;;  %4301 = vmatpush3.bf16.msra.mxu1 %v4456_v51  ;;  %5033 = vtanh.f32 %v7993_v33  ;;  %v1217_v60 = vadd.f32 %v7391_v26, %v8363_v57 }
 0x350   : > { %v5020_v12 = vpop.eup %5019  ;;  %v3052_v61 = vadd.f32 %v3051_v30, %v2652_v20  ;;  %v2333_v31 = vadd.f32 1.0, %v5018_v8  ;;  %4302 = vmatprep.subr.bf16.mxu1 %v4457_v59  ;;  %5035 = vtanh.f32 %v7995_v52  ;;  %v8012_v16 = vmul.f32 0.5, %v1215_v25 }
 0x351   : > { %v3011_v9 = vadd.f32 %v3010_v29, %v2611_v35  ;;  %v2300_v23 = vadd.f32 1.0, %v5020_v12  ;;  %5037 = vtanh.f32 %v7997_v45  ;;  %v8016_v41 = vmul.f32 0.5, %v1428_v1  ;;  %v5022_v37 = vpop.eup %5021 }
 0x352   : > { %v2653_v7 = vmul.f32 %v2333_v31, %v7928_v53  ;;  %v8018_v30 = vmul.f32 0.5, %v1217_v60  ;;  %5039 = vtanh.f32 %v8012_v16  ;;  %v1430_v26 = vadd.f32 %v7397_v2, %v8337_v10 }
 0x353   : > { %v2620_v32 = vmul.f32 %v2300_v23, %v7930_v24  ;;  %v1219_v29 = vadd.f32 %v7410_v18, %v8369_v28  ;;  %4303 = vmatpush3.bf16.msra.mxu1 %v4458_v34  ;;  %v5024_v4 = vpop.eup %5023  ;;  %v2342_v14 = vadd.f32 1.0, %v5022_v37  ;;  %5041 = vtanh.f32 %v8016_v41 }
 0x354   : > { %v3089_v53 = vadd.f32 %v3088_v62, %v2653_v7  ;;  %v1432_v21 = vadd.f32 %v7416_v56, %v8340_v47  ;;  %v2301_v24 = vadd.f32 1.0, %v5024_v4  ;;  %5043 = vtanh.f32 %v8018_v30 }
 0x355   : > { %v5026_v55 = vpop.eup %5025  ;;  %v2975_v50 = vadd.f32 %v2974_v17, %v2620_v32  ;;  %v8030_v51 = vmul.f32 0.5, %v1430_v26  ;;  %v2662_v15 = vmul.f32 %v2342_v14, %v7947_v49  ;;  %v8033_v19 = vmul.f32 0.5, %v1219_v29  ;;  %v8457_v32 = vld [vmem:[#allocation18_spill] sm:$0xff] }
 0x356   : > { %v5028_v2 = vpop.eup %5027  ;;  %v2343_v18 = vadd.f32 1.0, %v5026_v55  ;;  %v8035_v62 = vmul.f32 0.5, %v1432_v21  ;;  %v2621_v42 = vmul.f32 %v2301_v24, %v7949_v58  ;;  %v1223_v56 = vadd.f32 %v7423_v13, %v8363_v57 }
 0x357   : > { %v5030_v48 = vpop.eup %5029  ;;  %v2310_v3 = vadd.f32 1.0, %v5028_v2  ;;  %5045 = vtanh.f32 %v8030_v51  ;;  %v3053_v5 = vadd.f32 %v3052_v61, %v2662_v15  ;;  %v1436_v13 = vadd.f32 %v7433_v0, %v8337_v10 }
 0x358   : > { %v2663_v59 = vmul.f32 %v2343_v18, %v7965_v22  ;;  %v2352_v17 = vadd.f32 1.0, %v5030_v48  ;;  %5047 = vtanh.f32 %v8033_v19  ;;  %v5032_v49 = vpop.eup %5031  ;;  %v3012_v40 = vadd.f32 %v3011_v9, %v2621_v42  ;;  %v8458_v42 = vld [vmem:[#allocation38_spill] sm:$0xff] }
 0x359   : > { %v2630_v20 = vmul.f32 %v2310_v3, %v7968_v36  ;;  %5049 = vtanh.f32 %v8035_v62  ;;  %v8045_v8 = vmul.f32 0.5, %v1223_v56  ;;  %v5034_v58 = vpop.eup %5033  ;;  %v2311_v1 = vadd.f32 1.0, %v5032_v49 }
 0x35a   : > { %v3090_v35 = vadd.f32 %v3089_v53, %v2663_v59  ;;  %v2672_v25 = vmul.f32 %v2352_v17, %v7970_v46  ;;  %v5036_v22 = vpop.eup %5035  ;;  %v2353_v12 = vadd.f32 1.0, %v5034_v58  ;;  %v1225_v36 = vadd.f32 %v7446_v38, %v8369_v28 }
 0x35b   : > { %v2976_v34 = vadd.f32 %v2975_v50, %v2630_v20  ;;  %5051 = vtanh.f32 %v8045_v8  ;;  %v5038_v61 = vpop.eup %5037  ;;  %v2631_v60 = vmul.f32 %v2311_v1, %v7990_v44  ;;  %v2320_v9 = vadd.f32 1.0, %v5036_v22 }
 0x35c   : > { %v3054_v31 = vadd.f32 %v3053_v5, %v2672_v25  ;;  %v8054_v23 = vmul.f32 0.5, %v1436_v13  ;;  %v5040_v46 = vpop.eup %5039  ;;  %v2673_v7 = vmul.f32 %v2353_v12, %v7993_v33  ;;  %v2362_v37 = vadd.f32 1.0, %v5038_v61  ;;  %v8460_v13 = vld [vmem:[#allocation40_spill] sm:$0xff] }
 0x35d   : > { %v8057_v0 = vmul.f32 0.5, %v1225_v36  ;;  %v1438_v26 = vadd.f32 %v8457_v32, %v8340_v47  ;;  %v5042_v29 = vpop.eup %5041  ;;  %v3013_v4 = vadd.f32 %v3012_v40, %v2631_v60  ;;  %v2640_v38 = vmul.f32 %v2320_v9, %v7995_v52  ;;  %v8462_v32 = vld [vmem:[#allocation42_spill] sm:$0xff] }
 0x35e   : > { %v2321_v53 = vadd.f32 1.0, %v5040_v46  ;;  %5053 = vtanh.f32 %v8054_v23  ;;  %v5044_v44 = vpop.eup %5043  ;;  %v3091_v14 = vadd.f32 %v3090_v35, %v2673_v7  ;;  %v2682_v21 = vmul.f32 %v2362_v37, %v7997_v45  ;;  %v8459_v35 = vld [vmem:[#allocation39_spill] sm:$0xff] }
 0x35f   : > { %v2363_v55 = vadd.f32 1.0, %v5042_v29  ;;  %5055 = vtanh.f32 %v8057_v0  ;;  %v2977_v33 = vadd.f32 %v2976_v34, %v2640_v38  ;;  %v2330_v24 = vadd.f32 1.0, %v5044_v44  ;;  %v8461_v34 = vld [vmem:[#allocation41_spill] sm:$0xff]  ;;  %v8463_v29 = vld [vmem:[#allocation19_spill] sm:$0xff] }
 0x360   : > { %v2641_v50 = vmul.f32 %v2321_v53, %v8012_v16  ;;  %v8066_v2 = vmul.f32 0.5, %v1438_v26  ;;  %v3055_v18 = vadd.f32 %v3054_v31, %v2682_v21  ;;  %v1227_v48 = vadd.f32 %v7469_v6, %v8363_v57  ;;  %v8464_v53 = vld [vmem:[#allocation20_spill] sm:$0xff] }
 0x361   : > { %v5046_v15 = vpop.eup %5045  ;;  %v2683_v52 = vmul.f32 %v2363_v55, %v8016_v41  ;;  %v1440_v3 = vadd.f32 %v8458_v42, %v8337_v10  ;;  %v2650_v5 = vmul.f32 %v2330_v24, %v8018_v30  ;;  %v1229_v25 = vadd.f32 %v8459_v35, %v8369_v28  ;;  %v8466_v42 = vld [vmem:[#allocation22_spill] sm:$0xff] }
 0x362   : > { %v5048_v45 = vpop.eup %5047  ;;  %v3014_v56 = vadd.f32 %v3013_v4, %v2641_v50  ;;  %v2372_v59 = vadd.f32 1.0, %v5046_v15  ;;  %5057 = vtanh.f32 %v8066_v2  ;;  %v8075_v40 = vmul.f32 0.5, %v1227_v48 }
 0x363   : > { %v5050_v16 = vpop.eup %5049  ;;  %v3092_v17 = vadd.f32 %v3091_v14, %v2683_v52  ;;  %v2331_v49 = vadd.f32 1.0, %v5048_v45  ;;  %v8077_v20 = vmul.f32 0.5, %v1440_v3  ;;  %v2978_v41 = vadd.f32 %v2977_v33, %v2650_v5  ;;  %v8465_v14 = vld [vmem:[#allocation21_spill] sm:$0xff] }
 0x364   : > { %v2692_v6 = vmul.f32 %v2372_v59, %v8030_v51  ;;  %v2373_v58 = vadd.f32 1.0, %v5050_v16  ;;  %5059 = vtanh.f32 %v8075_v40  ;;  %v1442_v22 = vadd.f32 %v8460_v13, %v8340_v47 }
 0x365   : > { %v5052_v1 = vpop.eup %5051  ;;  %v2651_v30 = vmul.f32 %v2331_v49, %v8033_v19  ;;  %v1233_v12 = vadd.f32 %v8461_v34, %v8363_v57  ;;  %5061 = vtanh.f32 %v8077_v20  ;;  %v8090_v60 = vmul.f32 0.5, %v1229_v25 }
 0x366   : > { %v3056_v36 = vadd.f32 %v3055_v18, %v2692_v6  ;;  %v2693_v61 = vmul.f32 %v2373_v58, %v8035_v62  ;;  %v2340_v31 = vadd.f32 1.0, %v5052_v1  ;;  %v8092_v9 = vmul.f32 0.5, %v1442_v22  ;;  %v8468_v22 = vld [vmem:[#allocation43_spill] sm:$0xff] }
 0x367   : > { %v3015_v51 = vadd.f32 %v3014_v56, %v2651_v30  ;;  %v8094_v19 = vmul.f32 0.5, %v1233_v12  ;;  %v1446_v26 = vadd.f32 %v8462_v32, %v8337_v10  ;;  %v1235_v62 = vadd.f32 %v8463_v29, %v8369_v28 }
 0x368   : > { %v5054_v46 = vpop.eup %5053  ;;  %v3093_v7 = vadd.f32 %v3092_v17, %v2693_v61  ;;  %v2660_v37 = vmul.f32 %v2340_v31, %v8045_v8  ;;  %5063 = vtanh.f32 %v8090_v60  ;;  %v1448_v44 = vadd.f32 %v8464_v53, %v8340_v47  ;;  %v8470_v53 = vld [vmem:[#allocation45_spill] sm:$0xff] }
 0x369   : > { %v5056_v4 = vpop.eup %5055  ;;  %v2382_v38 = vadd.f32 1.0, %v5054_v46  ;;  %v1237_v21 = vadd.f32 %v8465_v14, %v8363_v57  ;;  %5065 = vtanh.f32 %v8092_v9  ;;  %v8107_v8 = vmul.f32 0.5, %v1446_v26  ;;  %v8469_v26 = vld [vmem:[#allocation44_spill] sm:$0xff] }
 0x36a   : > { %v2979_v55 = vadd.f32 %v2978_v41, %v2660_v37  ;;  %v2341_v33 = vadd.f32 1.0, %v5056_v4  ;;  %5067 = vtanh.f32 %v8094_v19  ;;  %v8111_v24 = vmul.f32 0.5, %v1235_v62 }
 0x36b   : > { %v2702_v50 = vmul.f32 %v2382_v38, %v8054_v23  ;;  %v8113_v15 = vmul.f32 0.5, %v1448_v44  ;;  %5069 = vtanh.f32 %v8107_v8  ;;  %v8117_v48 = vmul.f32 0.5, %v1237_v21 }
 0x36c   : > { %v5058_v18 = vpop.eup %5057  ;;  %v2661_v52 = vmul.f32 %v2341_v33, %v8057_v0  ;;  %v1450_v3 = vadd.f32 %v8466_v42, %v8337_v10  ;;  %5071 = vtanh.f32 %v8111_v24  ;;  %v1239_v23 = vadd.f32 %v7614_v39, %v8369_v28 }
 0x36d   : > { %v3057_v45 = vadd.f32 %v3056_v36, %v2702_v50  ;;  %v2383_v56 = vadd.f32 1.0, %v5058_v18  ;;  %5073 = vtanh.f32 %v8113_v15  ;;  %v1452_v0 = vadd.f32 %v7616_v63, %v8340_v47 }
 0x36e   : > { %v3016_v5 = vadd.f32 %v3015_v51, %v2661_v52  ;;  %v8125_v59 = vmul.f32 0.5, %v1450_v3  ;;  %v5060_v16 = vpop.eup %5059  ;;  %5075 = vtanh.f32 %v8117_v48  ;;  %v8131_v10 = vmul.f32 0.5, %v1239_v23 }
 0x36f   : > { %v2703_v17 = vmul.f32 %v2383_v56, %v8066_v2  ;;  %v1243_v49 = vadd.f32 %v7629_v11, %v8363_v57  ;;  %v5062_v41 = vpop.eup %5061  ;;  %v2350_v39 = vadd.f32 1.0, %v5060_v16  ;;  %v8136_v6 = vmul.f32 0.5, %v1452_v0 }
 0x370   : > { %5077 = vtanh.f32 %v8125_v59  ;;  %v1245_v58 = vadd.f32 %v7639_v43, %v8369_v28  ;;  %v2392_v63 = vadd.f32 1.0, %v5062_v41  ;;  %v1247_v25 = vadd.f32 %v7649_v54, %v8363_v57  ;;  %v8467_v43 = vld [vmem:[#allocation23_spill] sm:$0xff] }
 0x371   : > { %v3094_v47 = vadd.f32 %v3093_v7, %v2703_v17  ;;  %5079 = vtanh.f32 %v8131_v10  ;;  %v8141_v2 = vmul.f32 0.5, %v1243_v49  ;;  %v2670_v35 = vmul.f32 %v2350_v39, %v8075_v40 }
 0x372   : > { %5081 = vtanh.f32 %v8136_v6  ;;  %v8145_v11 = vmul.f32 0.5, %v1245_v58  ;;  %v5064_v1 = vpop.eup %5063  ;;  %v2712_v30 = vmul.f32 %v2392_v63, %v8077_v20  ;;  %v1249_v13 = vadd.f32 %v8467_v43, %v8369_v28 }
 0x373   : > { %5083 = vtanh.f32 %v8141_v2  ;;  %v1253_v34 = vadd.f32 %v8468_v22, %v8363_v57  ;;  %v5066_v12 = vpop.eup %5065  ;;  %v2980_v40 = vadd.f32 %v2979_v55, %v2670_v35  ;;  %v2351_v36 = vadd.f32 1.0, %v5064_v1 }
 0x374   : > { %5085 = vtanh.f32 %v8145_v11  ;;  %v8156_v61 = vmul.f32 0.5, %v1247_v25  ;;  %v5068_v31 = vpop.eup %5067  ;;  %v3058_v54 = vadd.f32 %v3057_v45, %v2712_v30  ;;  %v2393_v51 = vadd.f32 1.0, %v5066_v12  ;;  %v8472_v30 = vld [vmem:[#allocation47_spill] sm:$0xff] }
 0x375   : > { %v8158_v46 = vmul.f32 0.5, %v1249_v13  ;;  %v8160_v20 = vmul.f32 0.5, %v1253_v34  ;;  %v5070_v7 = vpop.eup %5069  ;;  %v2671_v37 = vmul.f32 %v2351_v36, %v8090_v60  ;;  %v2360_v32 = vadd.f32 1.0, %v5068_v31 }
 0x376   : > { %5087 = vtanh.f32 %v8156_v61  ;;  %v1255_v29 = vadd.f32 %v8469_v26, %v8369_v28  ;;  %v5072_v62 = vpop.eup %5071  ;;  %v2713_v4 = vmul.f32 %v2393_v51, %v8092_v9  ;;  %v2402_v38 = vadd.f32 1.0, %v5070_v7 }
 0x377   : > { %5089 = vtanh.f32 %v8158_v46  ;;  %v1257_v44 = vadd.f32 %v8470_v53, %v8363_v57  ;;  %v5074_v14 = vpop.eup %5073  ;;  %v3017_v21 = vadd.f32 %v3016_v5, %v2671_v37  ;;  %v2680_v55 = vmul.f32 %v2360_v32, %v8094_v19 }
 0x378   : > { %v2361_v60 = vadd.f32 1.0, %v5072_v62  ;;  %5091 = vtanh.f32 %v8160_v20  ;;  %v5076_v33 = vpop.eup %5075  ;;  %v3095_v50 = vadd.f32 %v3094_v47, %v2713_v4  ;;  %v2722_v18 = vmul.f32 %v2402_v38, %v8107_v8 }
 0x379   : > { %v2403_v52 = vadd.f32 1.0, %v5074_v14  ;;  %v1761_v42 = vmul.f32 0.5, %v1255_v29  ;;  %v2981_v3 = vadd.f32 %v2980_v40, %v2680_v55  ;;  %v2370_v56 = vadd.f32 1.0, %v5076_v33 }
 0x37a   : > { %v5078_v9 = vpop.eup %5077  ;;  %v2681_v45 = vmul.f32 %v2361_v60, %v8111_v24  ;;  %v1770_v23 = vmul.f32 0.5, %v1257_v44  ;;  %v3059_v0 = vadd.f32 %v3058_v54, %v2722_v18  ;;  %v8471_v24 = vld [vmem:[#allocation46_spill] sm:$0xff]  ;;  %v8182_v43 = vadd.f32 %v8472_v30, %v7766_v27 }
 0x37b   : > { %v5080_v57 = vpop.eup %5079  ;;  %v2723_v5 = vmul.f32 %v2403_v52, %v8113_v15  ;;  %v2412_v19 = vadd.f32 1.0, %v5078_v9  ;;  %5093 = vtanh.f32 %v1761_v42  ;;  %v2690_v49 = vmul.f32 %v2370_v56, %v8117_v48 }
 0x37c   : > { %v5082_v16 = vpop.eup %5081  ;;  %v3018_v17 = vadd.f32 %v3017_v21, %v2681_v45  ;;  %v2371_v41 = vadd.f32 1.0, %v5080_v57  ;;  %5095 = vtanh.f32 %v1770_v23  ;;  %v1259_v63 = vadd.f32 %v8471_v24, %v8369_v28 }
 0x37d   : > { %v5084_v8 = vpop.eup %5083  ;;  %v3096_v39 = vadd.f32 %v3095_v50, %v2723_v5  ;;  %v2732_v58 = vmul.f32 %v2412_v19, %v8125_v59  ;;  %v2413_v47 = vadd.f32 1.0, %v5082_v16  ;;  %v2982_v25 = vadd.f32 %v2981_v3, %v2690_v49 }
 0x37e   : > { %v5086_v35 = vpop.eup %5085  ;;  %v2691_v15 = vmul.f32 %v2371_v41, %v8131_v10  ;;  %v2380_v1 = vadd.f32 1.0, %v5084_v8  ;;  %v1771_v34 = vmul.f32 0.5, %v1259_v63 }
 0x37f   : > { %v3060_v48 = vadd.f32 %v3059_v0, %v2732_v58  ;;  %v2733_v13 = vmul.f32 %v2413_v47, %v8136_v6  ;;  %v2381_v22 = vadd.f32 1.0, %v5086_v35 }
 0x380   : > { %v5088_v12 = vpop.eup %5087  ;;  %v3019_v59 = vadd.f32 %v3018_v17, %v2691_v15  ;;  %v2700_v40 = vmul.f32 %v2380_v1, %v8141_v2  ;;  %5097 = vtanh.f32 %v1771_v34 }
 0x381   : > { %v5090_v36 = vpop.eup %5089  ;;  %v3061_v28 = vrot.slane %v3060_v48, 4  ;;  %v3097_v31 = vadd.f32 %v3096_v39, %v2733_v13  ;;  %v2701_v54 = vmul.f32 %v2381_v22, %v8145_v11  ;;  %v2390_v10 = vadd.f32 1.0, %v5088_v12 }
 0x382   : > { %v5092_v51 = vpop.eup %5091  ;;  %v2983_v7 = vadd.f32 %v2982_v25, %v2700_v40  ;;  %v2391_v37 = vadd.f32 1.0, %v5090_v36 }
 0x383   : > { %v3062_v27 = vadd.f32 %v3061_v28, %v3060_v48  ;;  %v3098_v32 = vrot.slane %v3097_v31, 4  ;;  %v3020_v26 = vadd.f32 %v3019_v59, %v2701_v54  ;;  %v2710_v6 = vmul.f32 %v2390_v10, %v8156_v61 }
 0x384   : > { %v2711_v29 = vmul.f32 %v2391_v37, %v8158_v46  ;;  %v2400_v62 = vadd.f32 1.0, %v5092_v51 }
 0x385   : > { %v5094_v4 = vpop.eup %5093  ;;  %v3063_v2 = vrot.slane %v3062_v27, 2  ;;  %v3099_v38 = vadd.f32 %v3098_v32, %v3097_v31  ;;  %v2984_v53 = vadd.f32 %v2983_v7, %v2710_v6 }
 0x386   : > { %v5096_v44 = vpop.eup %5095  ;;  %v3021_v14 = vadd.f32 %v3020_v26, %v2711_v29  ;;  %v2720_v11 = vmul.f32 %v2400_v62, %v8160_v20  ;;  %v2401_v21 = vadd.f32 1.0, %v5094_v4 }
 0x387   : > { %v3064_v55 = vadd.f32 %v3063_v2, %v3062_v27  ;;  %v2410_v60 = vadd.f32 1.0, %v5096_v44  ;;  %v3100_v33 = vrot.slane %v3099_v38, 2 }
 0x388   : > { %v2985_v50 = vadd.f32 %v2984_v53, %v2720_v11  ;;  %v2721_v18 = vmul.f32 %v2401_v21, %v1761_v42 }
 0x389   : > { %v3065_v52 = vrot.slane %v3064_v55, 1  ;;  %v2730_v9 = vmul.f32 %v2410_v60, %v1770_v23  ;;  %v3101_v61 = vadd.f32 %v3100_v33, %v3099_v38 }
 0x38a   : > { %v3022_v3 = vadd.f32 %v3021_v14, %v2721_v18  ;;  %v5098_v57 = vpop.eup %5097 }
 0x38b   : > { %v3066_v46 = vadd.f32 %v3065_v52, %v3064_v55  ;;  %v2986_v45 = vadd.f32 %v2985_v50, %v2730_v9  ;;  %v3102_v56 = vrot.slane %v3101_v61, 1  ;;  %v2411_v5 = vadd.f32 1.0, %v5098_v57 }
 0x38d   : > { %v2987_v0 = vrot.slane %v2986_v45, 4  ;;  %v3103_v19 = vadd.f32 %v3102_v56, %v3101_v61  ;;  %v3112_v16 = vmul.f32 0.00390625, %v3066_v46  ;;  %v2731_v20 = vmul.f32 %v2411_v5, %v1771_v34  ;;  %v3284_v34 = vld [vmem:[%s8248_s4] sm:$0x1] }
 0x38e   : > { %v3800_v40 = vadd.f32 %v8182_v43, %v3284_v34 }
 0x38f   : > { %v2988_v17 = vadd.f32 %v2987_v0, %v2986_v45  ;;  %v3113_v49 = vmul.f32 0.00390625, %v3103_v19  ;;  %v3023_v8 = vadd.f32 %v3022_v3, %v2731_v20  ;;  %v3122_v58 = vpack.c.bf16 %v3112_v16, %v3112_v16 }
 0x391   : > { %v2989_v41 = vrot.slane %v2988_v17, 2  ;;  %v3123_v39 = vpack.c.bf16 %v3113_v49, %v3113_v49  ;;  %v3024_v47 = vrot.slane %v3023_v8, 4 }
 0x393   : > { %v2990_v42 = vadd.f32 %v2989_v41, %v2988_v17  ;;  %3957 = vmatprep.mubr.bf16.mxu0 %v3123_v39  ;;  %v3025_v23 = vadd.f32 %v3024_v47, %v3023_v8 }
 0x394   : > { %3958 = vmatmul.mubr.bf16.vlgmr.msra.gmra.mrb[184].mxu0 %v3122_v58 }
 0x395   : > { %v2991_v24 = vrot.slane %v2990_v42, 1  ;;  %v3026_v63 = vrot.slane %v3025_v23, 2 }
 0x397   : > { %v3027_v35 = vadd.f32 %v3026_v63, %v3025_v23  ;;  %v2992_v25 = vadd.f32 %v2991_v24, %v2990_v42 }
 0x399   : > { %v3028_v15 = vrot.slane %v3027_v35, 1  ;;  %v3110_v30 = vmul.f32 0.00390625, %v2992_v25 }
 0x39b   : > { %v3029_v1 = vadd.f32 %v3028_v15, %v3027_v35  ;;  %v3120_v22 = vpack.c.bf16 %v3110_v30, %v3110_v30 }
 0x39d   : > { %v3111_v48 = vmul.f32 0.00390625, %v3029_v1 }
 0x39f   : > { %v3121_v13 = vpack.c.bf16 %v3111_v48, %v3111_v48 }
 0x3a1   : > { %3917 = vmatprep.mubr.bf16.mxu1 %v3121_v13 }
 0x3a2   : > { %3918 = vmatmul.mubr.bf16.vlgmr.msra.gmra.mrb[148].mxu1 %v3120_v22 }
 0x3d9   : > { %v4260_v12 = vpop.f32.mrb[140].mxu1 }
 0x3da   : > { %v4261_v59 = vpop.f32.mrb[141].mxu1 }
 0x3db   : > { %v4262_v36 = vadd.f32 %v4261_v59, %v4260_v12  ;;  %v4263_v28 = vpop.f32.mrb[142].mxu1 }
 0x3dc   : > { %v4264_v31 = vpop.f32.mrb[143].mxu1 }
 0x3dd   : > { %v3840_v54 = vadd.f32 %v4262_v36, %v3800_v40 }
 0x409   : > { %v4282_v10 = vpop.f32.mrb[144].mxu1 }
 0x40a   : > { %v4283_v51 = vpop.f32.mrb[145].mxu1 }
 0x40b   : > { %v4284_v7 = vadd.f32 %v4283_v51, %v4282_v10  ;;  %v4285_v37 = vpop.f32.mrb[146].mxu1 }
 0x40c   : > { %v4286_v27 = vpop.f32.mrb[147].mxu1 }
 0x40d   : > { %v3880_v32 = vadd.f32 %v4284_v7, %v3840_v54 }
 0x467   : > { %v4326_v26 = vpop.f32.mrb[184].mxu0 }
 0x468   : > { %v4327_v6 = vpop.f32.mrb[185].mxu0 }
 0x469   : > { %v4328_v29 = vadd.f32 %v4327_v6, %v4326_v26  ;;  %v4329_v62 = vpop.f32.mrb[186].mxu0 }
 0x46a   : > { %v4330_v4 = vpop.f32.mrb[187].mxu0 }
 0x475   : > { %v4304_v2 = vpop.f32.mrb[148].mxu1 }
 0x476   : > { %v4305_v38 = vpop.f32.mrb[149].mxu1 }
 0x477   : > { %v4306_v53 = vadd.f32 %v4305_v38, %v4304_v2  ;;  %v4307_v44 = vpop.f32.mrb[150].mxu1 }
 0x478   : > { %v4308_v43 = vpop.f32.mrb[151].mxu1 }
 0x479   : > { %v3920_v14 = vadd.f32 %v4306_v53, %v3880_v32 }
 0x47b   : > { %v3960_v11 = vadd.f32 %v4328_v29, %v3920_v14 }
 0x47d   : > { %v3966_v21 = vsel %vm3965_vm2, %v3960_v11, -inf }
 0x47e   : > { %3967 = vmax.xlane.f32.xlu1 %v3966_v21 }
 0x50b   : > { %v3968_v55 = vpop.xlane.xlu1 %3967 }
 0x50c   : > { %v3969_v60 = vsub.f32 %v3960_v11, %v3968_v55 }
 0x50e   : > { %v3970_v33 = vmul.f32 1.442695, %v3969_v60 }
 0x510   : > { %5099 = vpow2.f32 %v3970_v33 }
 0x51a   : > { %v5100_v50 = vpop.eup %5099 }
 0x51b   : > { %v3972_v18 = vsel %vm3965_vm2, %v5100_v50, 0.0 }
 0x51c   : > { %3973 = vadd.xlane.f32.xlu1 %v3972_v18 }
 0x5a9   : > { %v3974_v52 = vpop.xlane.xlu1 %3973 }
 0x5aa   : > { %5101 = vrcp.f32 %v3974_v52 }
 0x5b4   : > { %v5102_v9 = vpop.eup %5101 }
 0x5b5   : > { %v3976_v61 = vmul.f32 %v5102_v9, %v5100_v50 }
 0x5b7   : > { %3977 = vst.msk [vmem:[%s216_s8] sm:$0x1] %vm3965_vm2, %v3976_v61 }
 0x5b8   : > { %5116 = shalt.err (!%p5113_p3)
}
 0x5b9   : > { %s5117_s17 = scalar_lea.hbm %s8201_s12, 16  ;;  %s5121_s26 = scalar_lea.hbm %s8249_s5, 32 }
 0x5ba   : > { %p5118_p4 = scmp.ne.s32.totalorder %s8201_s12, %s5117_s17  ;;  %p5122_p9 = scmp.lt.u32.totalorder %s8201_s12, %s8249_s5 }
 0x5bb   : > { %p5123_p10 = scmp.lt.u32.totalorder %s5121_s26, %s5117_s17  ;;  %p5125_p12 = scmp.lt.u32.totalorder %s5117_s17, %s8201_s12 }
 0x5bc   : > { %p5119_p7 = pnand %p5118_p4, %p5238_p5 }
 0x5bd   : > { %p5124_p11 = por %p5123_p10, %p5122_p9 }
 0x5be   : > { %p5120_p8 = pneg %p5119_p7 }
 0x5bf   : > { %p5126_p13 = por %p5125_p12, %p5124_p11 }
 0x5c1   : > { %p5127_p0 = pnand %p5126_p13, %p5120_p8 }
 0x5c3   : > { %5130 = shalt.err (!%p5127_p0)
}
 0x5c4   : > { %4334 = dma.vmem_to_hbm [thread:$0]  (%p5238_p5), %s8203_s9, 16, %s8201_s12, %s3979_s13  }
 0x5c5 PF: > { %p4340_p1 = scmp.ge.s32.totalorder %s5165_s21, 2  ;;  %s4003_s7 = sand.u32 1, %s5153_s18  }
 0x5c6   : > { %s4004_s8 = scalar_lea.sflag [#allocation3], %s4003_s7 }
 0x5c7   : > { %p4337_p2 = pnand %p4340_p1, %p5242_p6 }
 0x5c9   : > { %5148 = dma.done.wait (!%p4337_p2), %s4004_s8, 16  }
 0x5ca   : > { %5150 = vsyncadd (!%p4337_p2), %s4004_s8, 4294967280  ;;  %p15_p3 = scmp.ge.s32.totalorder %s5225_s24, 4   ;;  %s8473_s18 = smov %s5157_s19 }
 0x5cb   : > { %s8474_s19 = smov %s5161_s20  ;;  %s8475_s20 = smov %s5236_s27 }
 0x5cc   : > { %s8476_s21 = smov %s5225_s24  ;;  %17 = sbr.rel (!%p15_p3) target bundleno = 3 (0x3), region = 75 }
 0x5d3   :  { %4008 = vsyncpa [#allocation3], 1 }
 0x5d4   :  { %4010 = vsyncpa [#allocation3 + $0x1], 1 }

</bundles_post_ra>
